<compile_context>
chip_gen: v5e
topology: v5e:2x2
jax: 0.10.0
libtpu: 0.0.40
codegen_flags: <defaults>
</compile_context>

<pallas_src>
import jax
import jax.numpy as jnp
import numpy as np
from jax.experimental import pallas as pl
from jax.experimental.pallas import tpu as pltpu


def _round_up(x, m):
    return (x + m - 1) // m * m


# ----------------------------- Pallas kernel ------------------------------

def basic_block_kernel(x_ref, w1_ref, w2_ref, s1_ref, b1_ref, s2_ref, b2_ref,
                       o_ref, xp_scr, midp_scr, acc_scr):
    """out = relu(bn2(conv2(relu(bn1(conv1(x))))) + x) for a block of B images."""
    B, H, W, Cin = x_ref.shape
    Cout = o_ref.shape[-1]
    cdt = xp_scr.dtype

    # Zero ONLY the 1-pixel halo ring of the padded scratches (the interior is
    # fully overwritten below).  Re-done every step for megacore safety — see
    # header comment.  Cost is O((H+W)*C), a small fraction of the interior
    # store traffic, vs. the old full (H+2)*(W+2)*C zeroing.
    def zero_halo(scr):
        Bh, _, Wh, Ch = scr.shape
        scr[:, 0:1, :, :] = jnp.zeros((Bh, 1, Wh, Ch), cdt)
        scr[:, H + 1:H + 2, :, :] = jnp.zeros((Bh, 1, Wh, Ch), cdt)
        scr[:, 1:H + 1, 0:1, :] = jnp.zeros((Bh, H, 1, Ch), cdt)
        scr[:, 1:H + 1, W + 1:W + 2, :] = jnp.zeros((Bh, H, 1, Ch), cdt)

    zero_halo(xp_scr)
    zero_halo(midp_scr)

    # Padded input interior lives in VMEM scratch (no jnp.pad / HBM pass).
    xp_scr[:, 1:H + 1, 1:W + 1, :] = x_ref[...]

    def conv3x3(src_scr, w_ref, cin):
        # Nine shifted accumulating matmuls into the f32 accumulator scratch
        # instead of a materialized (M, 9*Cin) im2col patch matrix.
        for k in range(9):
            dy, dx = divmod(k, 3)
            win = src_scr[:, dy:dy + H, dx:dx + W, :].reshape(B * H * W, cin)
            contrib = jnp.dot(win, w_ref[k * cin:(k + 1) * cin, :],
                              preferred_element_type=jnp.float32)
            if k == 0:
                acc_scr[...] = contrib
            else:
                acc_scr[...] += contrib

    # conv1 -> bn1 -> relu (f32 epilogue); result stays in the padded VMEM
    # scratch — no HBM round trip between the two convolutions.
    conv3x3(xp_scr, w1_ref, Cin)
    y1 = jnp.maximum(acc_scr[...] * s1_ref[0] + b1_ref[0], 0.0)
    midp_scr[:, 1:H + 1, 1:W + 1, :] = y1.reshape(B, H, W, Cout).astype(cdt)

    # conv2 -> bn2 -> (+ identity residual) -> relu, single f32 epilogue pass.
    conv3x3(midp_scr, w2_ref, Cout)
    y2 = acc_scr[...] * s2_ref[0] + b2_ref[0]
    res = x_ref[...].reshape(B * H * W, Cin).astype(jnp.float32)
    out = jnp.maximum(y2 + res, 0.0)
    o_ref[...] = out.reshape(B, H, W, Cout).astype(o_ref.dtype)


# ------------------------------ JAX wrapper -------------------------------

def _fold_bn(gamma, beta, mean, var, eps=1e-5):
    scale = gamma / jnp.sqrt(var + eps)
    bias = beta - mean * scale
    # (1, C) rows so they live as 2-D tiles in VMEM; kept f32 (epilogue dtype).
    return (scale.reshape(1, -1).astype(jnp.float32),
            bias.reshape(1, -1).astype(jnp.float32))


def _oihw_to_flat(w_oihw):
    # (Cout, Cin, 3, 3) -> (3, 3, Cin, Cout) -> (9*Cin, Cout); row k*Cin..(k+1)*Cin
    # holds tap k = kh*3 + kw.
    cout, cin, _, _ = w_oihw.shape
    return jnp.transpose(w_oihw, (2, 3, 1, 0)).reshape(9 * cin, cout)


def _choose_images_per_step(N, per_image_bytes, hw, budget_bytes=24 << 20):
    """Divisor of N: fill the 256-row MXU, stay in VMEM budget, keep >=2 steps."""
    max_b = max(1, int(budget_bytes // max(per_image_bytes, 1)))
    divisors = [b for b in range(1, N + 1) if N % b == 0 and b <= max_b] or [1]
    cand = next((b for b in divisors if b * hw >= 256), divisors[-1])
    if N // cand < 2:                       # keep both v7x TensorCores busy
        with_two = [b for b in divisors if N // b >= 2]
        if with_two:
            cand = with_two[-1]
    return cand


def basic_block_forward(x_nchw, params, compute_dtype=jnp.float32,
                        images_per_step=None):
    """BasicBlock forward (stride=1, downsample=None). Input/output NCHW.

    compute_dtype=jnp.bfloat16 halves HBM/VMEM traffic and feeds the bf16 MXU
    path on v5e/v6e/v7x; the matmul accumulator and BN/ReLU/residual epilogue
    stay f32 on every generation.  Note: with bf16 the residual add uses the
    bf16-rounded input and a bf16 inter-conv activation (slight deviation from
    the f32 PyTorch reference).  Output dtype follows compute_dtype.
    """
    w1 = _oihw_to_flat(params["conv1_w"]).astype(compute_dtype)
    w2 = _oihw_to_flat(params["conv2_w"]).astype(compute_dtype)
    s1, b1 = _fold_bn(params["bn1_gamma"], params["bn1_beta"],
                      params["bn1_mean"], params["bn1_var"])
    s2, b2 = _fold_bn(params["bn2_gamma"], params["bn2_beta"],
                      params["bn2_mean"], params["bn2_var"])

    x = jnp.transpose(x_nchw, (0, 2, 3, 1)).astype(compute_dtype)  # NHWC
    N, H, W, Cin = x.shape
    Cout = w1.shape[-1]
    # Identity residual path only (stride=1, no downsample).
    assert Cin == Cout, "BasicBlock identity path requires inplanes == planes"

    isz = jnp.dtype(compute_dtype).itemsize
    Hp = H + 2
    Wp = _round_up(W + 2, 8)            # sublane-aligned padded width

    # Rough per-image VMEM footprint: double-buffered in/out blocks, the two
    # padded scratches, the f32 accumulator, plus window/matmul temporaries.
    per_img = (2 * H * W * Cin * isz + 2 * H * W * Cout * isz
               + Hp * Wp * (Cin + Cout) * isz
               + H * W * Cout * 4
               + 2 * H * W * max(Cin, Cout) * 4)
    B = (_choose_images_per_step(N, per_img, H * W)
         if images_per_step is None else images_per_step)
    assert N % B == 0, (N, B)

    weight_bytes = 2 * (9 * Cin * Cout + 9 * Cout * Cout) * isz + 8 * Cout * 4
    est = B * per_img + weight_bytes + (1 << 20)
    vmem_limit = int(min(48 << 20, max(32 << 20, 2 * est)))  # v7x: 64 MiB phys

    out = pl.pallas_call(
        basic_block_kernel,
        out_shape=jax.ShapeDtypeStruct((N, H, W, Cout), compute_dtype),
        grid=(N // B,),
        in_specs=[
            pl.BlockSpec((B, H, W, Cin), lambda n: (n, 0, 0, 0)),     # x
            pl.BlockSpec((9 * Cin, Cout), lambda n: (0, 0)),          # w1
            pl.BlockSpec((9 * Cout, Cout), lambda n: (0, 0)),         # w2
            pl.BlockSpec((1, Cout), lambda n: (0, 0)),                # s1
            pl.BlockSpec((1, Cout), lambda n: (0, 0)),                # b1
            pl.BlockSpec((1, Cout), lambda n: (0, 0)),                # s2
            pl.BlockSpec((1, Cout), lambda n: (0, 0)),                # b2
        ],
        out_specs=pl.BlockSpec((B, H, W, Cout), lambda n: (n, 0, 0, 0)),
        scratch_shapes=[
            pltpu.VMEM((B, Hp, Wp, Cin), compute_dtype),    # padded x tile
            pltpu.VMEM((B, Hp, Wp, Cout), compute_dtype),   # padded mid tile
            pltpu.VMEM((B * H * W, Cout), jnp.float32),     # conv accumulator
        ],
        compiler_params=pltpu.CompilerParams(
            dimension_semantics=("parallel",),   # shard batch across TCs (v7x)
            vmem_limit_bytes=vmem_limit),
    )(x, w1, w2, s1, b1, s2, b2)

    return jnp.transpose(out, (0, 3, 1, 2))  # back to NCHW


# --------------------------- pure-JAX reference ----------------------------

def _ref_conv3x3(x_nhwc, w_oihw):
    w_hwio = jnp.transpose(w_oihw, (2, 3, 1, 0))  # OIHW -> HWIO
    return jax.lax.conv_general_dilated(
        x_nhwc, w_hwio, window_strides=(1, 1), padding="SAME",
        dimension_numbers=("NHWC", "HWIO", "NHWC"))


def basic_block_reference(x_nchw, params, eps=1e-5):
    x = jnp.transpose(x_nchw, (0, 2, 3, 1)).astype(jnp.float32)

    def bn(y, g, b, m, v):
        return (y - m) / jnp.sqrt(v + eps) * g + b

    out = _ref_conv3x3(x, params["conv1_w"])
    out = bn(out, params["bn1_gamma"], params["bn1_beta"],
             params["bn1_mean"], params["bn1_var"])
    out = jnp.maximum(out, 0.0)
    out = _ref_conv3x3(out, params["conv2_w"])
    out = bn(out, params["bn2_gamma"], params["bn2_beta"],
             params["bn2_mean"], params["bn2_var"])
    out = jnp.maximum(out + x, 0.0)
    return jnp.transpose(out, (0, 3, 1, 2))


# ----------------------------------- main ----------------------------------

if __name__ == "__main__":
    N, C, H, W = 2, 4, 16, 16   # inplanes == planes, stride=1, downsample=None
    key = jax.random.PRNGKey(0)
    k = jax.random.split(key, 8)

    params = {
        "conv1_w":  jax.random.normal(k[0], (C, C, 3, 3), jnp.float32) * 0.2,
        "conv2_w":  jax.random.normal(k[1], (C, C, 3, 3), jnp.float32) * 0.2,
        "bn1_gamma": 1.0 + 0.1 * jax.random.normal(k[2], (C,), jnp.float32),
        "bn1_beta":  0.1 * jax.random.normal(k[3], (C,), jnp.float32),
        "bn1_mean":  0.1 * jax.random.normal(k[4], (C,), jnp.float32),
        "bn1_var":   jnp.abs(jax.random.normal(k[5], (C,), jnp.float32)) + 0.5,
        "bn2_gamma": 1.0 + 0.1 * jax.random.normal(k[6], (C,), jnp.float32),
        "bn2_beta":  0.1 * jax.random.normal(k[7], (C,), jnp.float32),
        "bn2_mean":  jnp.zeros((C,), jnp.float32),
        "bn2_var":   jnp.ones((C,), jnp.float32),
    }

    x = jax.random.normal(jax.random.PRNGKey(42), (N, C, H, W), jnp.float32)

    out = jax.block_until_ready(basic_block_forward(x, params))
    ref = jax.block_until_ready(basic_block_reference(x, params))

    assert out.shape == (N, C, H, W), out.shape
    np.testing.assert_allclose(np.asarray(out), np.asarray(ref),
                               rtol=1e-4, atol=1e-4)

    print("KERNEL_OK")
</pallas_src>

<mosaic_0001>
module attributes {stable_mosaic.version = 11 : i64} {
  func.func @basic_block_kernel(%arg0: i32, %arg1: memref<1x16x16x4xf32, #tpu.memory_space<vmem>>, %arg2: memref<36x4xf32, #tpu.memory_space<vmem>>, %arg3: memref<36x4xf32, #tpu.memory_space<vmem>>, %arg4: memref<1x4xf32, #tpu.memory_space<vmem>>, %arg5: memref<1x4xf32, #tpu.memory_space<vmem>>, %arg6: memref<1x4xf32, #tpu.memory_space<vmem>>, %arg7: memref<1x4xf32, #tpu.memory_space<vmem>>, %arg8: memref<1x16x16x4xf32, #tpu.memory_space<vmem>>, %arg9: memref<1x18x24x4xf32, #tpu.memory_space<vmem>>, %arg10: memref<1x18x24x4xf32, #tpu.memory_space<vmem>>, %arg11: memref<256x4xf32, #tpu.memory_space<vmem>>) attributes {dimension_semantics = [#tpu.dimension_semantics<parallel>], iteration_bounds = array<i64: 2>, scalar_prefetch = 0 : i64, scratch_operands = 3 : i64, tpu.core_type = #tpu.core_type<tc>, window_params = [{transform_indices = @transform_0, window_bounds = array<i64: 1, 16, 16, 4>}, {pipeline_mode = #tpu.pipeline_mode<synchronous>, transform_indices = @transform_1, window_bounds = array<i64: 36, 4>}, {pipeline_mode = #tpu.pipeline_mode<synchronous>, transform_indices = @transform_2, window_bounds = array<i64: 36, 4>}, {pipeline_mode = #tpu.pipeline_mode<synchronous>, transform_indices = @transform_3, window_bounds = array<i64: 1, 4>}, {pipeline_mode = #tpu.pipeline_mode<synchronous>, transform_indices = @transform_4, window_bounds = array<i64: 1, 4>}, {pipeline_mode = #tpu.pipeline_mode<synchronous>, transform_indices = @transform_5, window_bounds = array<i64: 1, 4>}, {pipeline_mode = #tpu.pipeline_mode<synchronous>, transform_indices = @transform_6, window_bounds = array<i64: 1, 4>}, {transform_indices = @transform_7, window_bounds = array<i64: 1, 16, 16, 4>}]} {
    %cst = arith.constant 0.000000e+00 : f32
    %0 = vector.broadcast %cst : f32 to vector<1x1x24x4xf32>
    %c0 = arith.constant 0 : index
    %c0_0 = arith.constant 0 : index
    %c0_1 = arith.constant 0 : index
    %c0_2 = arith.constant 0 : index
    %1 = vector.load %arg9[%c0, %c0_0, %c0_1, %c0_2] : memref<1x18x24x4xf32, #tpu.memory_space<vmem>>, vector<1x1x24x4xf32>
    tpu.vector_store %arg9[%c0, %c0_0, %c0_1, %c0_2], %0 {strides = array<i32>} : memref<1x18x24x4xf32, #tpu.memory_space<vmem>>, vector<1x1x24x4xf32>,
    %cst_3 = arith.constant 0.000000e+00 : f32
    %2 = vector.broadcast %cst_3 : f32 to vector<1x1x24x4xf32>
    %c0_4 = arith.constant 0 : index
    %c17 = arith.constant 17 : index
    %c0_5 = arith.constant 0 : index
    %c0_6 = arith.constant 0 : index
    %3 = vector.load %arg9[%c0_4, %c17, %c0_5, %c0_6] : memref<1x18x24x4xf32, #tpu.memory_space<vmem>>, vector<1x1x24x4xf32>
    tpu.vector_store %arg9[%c0_4, %c17, %c0_5, %c0_6], %2 {strides = array<i32>} : memref<1x18x24x4xf32, #tpu.memory_space<vmem>>, vector<1x1x24x4xf32>,
    %cst_7 = arith.constant 0.000000e+00 : f32
    %4 = vector.broadcast %cst_7 : f32 to vector<1x16x1x4xf32>
    %c0_8 = arith.constant 0 : index
    %c1 = arith.constant 1 : index
    %c0_9 = arith.constant 0 : index
    %c0_10 = arith.constant 0 : index
    %5 = vector.load %arg9[%c0_8, %c1, %c0_9, %c0_10] : memref<1x18x24x4xf32, #tpu.memory_space<vmem>>, vector<1x16x1x4xf32>
    tpu.vector_store %arg9[%c0_8, %c1, %c0_9, %c0_10], %4 {strides = array<i32>} : memref<1x18x24x4xf32, #tpu.memory_space<vmem>>, vector<1x16x1x4xf32>,
    %cst_11 = arith.constant 0.000000e+00 : f32
    %6 = vector.broadcast %cst_11 : f32 to vector<1x16x1x4xf32>
    %c0_12 = arith.constant 0 : index
    %c1_13 = arith.constant 1 : index
    %c17_14 = arith.constant 17 : index
    %c0_15 = arith.constant 0 : index
    %7 = vector.load %arg9[%c0_12, %c1_13, %c17_14, %c0_15] : memref<1x18x24x4xf32, #tpu.memory_space<vmem>>, vector<1x16x1x4xf32>
    tpu.vector_store %arg9[%c0_12, %c1_13, %c17_14, %c0_15], %6 {strides = array<i32>} : memref<1x18x24x4xf32, #tpu.memory_space<vmem>>, vector<1x16x1x4xf32>,
    %cst_16 = arith.constant 0.000000e+00 : f32
    %8 = vector.broadcast %cst_16 : f32 to vector<1x1x24x4xf32>
    %c0_17 = arith.constant 0 : index
    %c0_18 = arith.constant 0 : index
    %c0_19 = arith.constant 0 : index
    %c0_20 = arith.constant 0 : index
    %9 = vector.load %arg10[%c0_17, %c0_18, %c0_19, %c0_20] : memref<1x18x24x4xf32, #tpu.memory_space<vmem>>, vector<1x1x24x4xf32>
    tpu.vector_store %arg10[%c0_17, %c0_18, %c0_19, %c0_20], %8 {strides = array<i32>} : memref<1x18x24x4xf32, #tpu.memory_space<vmem>>, vector<1x1x24x4xf32>,
    %cst_21 = arith.constant 0.000000e+00 : f32
    %10 = vector.broadcast %cst_21 : f32 to vector<1x1x24x4xf32>
    %c0_22 = arith.constant 0 : index
    %c17_23 = arith.constant 17 : index
    %c0_24 = arith.constant 0 : index
    %c0_25 = arith.constant 0 : index
    %11 = vector.load %arg10[%c0_22, %c17_23, %c0_24, %c0_25] : memref<1x18x24x4xf32, #tpu.memory_space<vmem>>, vector<1x1x24x4xf32>
    tpu.vector_store %arg10[%c0_22, %c17_23, %c0_24, %c0_25], %10 {strides = array<i32>} : memref<1x18x24x4xf32, #tpu.memory_space<vmem>>, vector<1x1x24x4xf32>,
    %cst_26 = arith.constant 0.000000e+00 : f32
    %12 = vector.broadcast %cst_26 : f32 to vector<1x16x1x4xf32>
    %c0_27 = arith.constant 0 : index
    %c1_28 = arith.constant 1 : index
    %c0_29 = arith.constant 0 : index
    %c0_30 = arith.constant 0 : index
    %13 = vector.load %arg10[%c0_27, %c1_28, %c0_29, %c0_30] : memref<1x18x24x4xf32, #tpu.memory_space<vmem>>, vector<1x16x1x4xf32>
    tpu.vector_store %arg10[%c0_27, %c1_28, %c0_29, %c0_30], %12 {strides = array<i32>} : memref<1x18x24x4xf32, #tpu.memory_space<vmem>>, vector<1x16x1x4xf32>,
    %cst_31 = arith.constant 0.000000e+00 : f32
    %14 = vector.broadcast %cst_31 : f32 to vector<1x16x1x4xf32>
    %c0_32 = arith.constant 0 : index
    %c1_33 = arith.constant 1 : index
    %c17_34 = arith.constant 17 : index
    %c0_35 = arith.constant 0 : index
    %15 = vector.load %arg10[%c0_32, %c1_33, %c17_34, %c0_35] : memref<1x18x24x4xf32, #tpu.memory_space<vmem>>, vector<1x16x1x4xf32>
    tpu.vector_store %arg10[%c0_32, %c1_33, %c17_34, %c0_35], %14 {strides = array<i32>} : memref<1x18x24x4xf32, #tpu.memory_space<vmem>>, vector<1x16x1x4xf32>,
    %c0_36 = arith.constant 0 : index
    %c0_37 = arith.constant 0 : index
    %c0_38 = arith.constant 0 : index
    %c0_39 = arith.constant 0 : index
    %16 = vector.load %arg1[%c0_36, %c0_37, %c0_38, %c0_39] : memref<1x16x16x4xf32, #tpu.memory_space<vmem>>, vector<1x16x16x4xf32>
    %c0_40 = arith.constant 0 : index
    %c1_41 = arith.constant 1 : index
    %c1_42 = arith.constant 1 : index
    %c0_43 = arith.constant 0 : index
    %17 = vector.load %arg9[%c0_40, %c1_41, %c1_42, %c0_43] : memref<1x18x24x4xf32, #tpu.memory_space<vmem>>, vector<1x16x16x4xf32>
    tpu.vector_store %arg9[%c0_40, %c1_41, %c1_42, %c0_43], %16 {strides = array<i32>} : memref<1x18x24x4xf32, #tpu.memory_space<vmem>>, vector<1x16x16x4xf32>,
    %c0_44 = arith.constant 0 : index
    %c0_45 = arith.constant 0 : index
    %c0_46 = arith.constant 0 : index
    %c0_47 = arith.constant 0 : index
    %18 = vector.load %arg9[%c0_44, %c0_45, %c0_46, %c0_47] : memref<1x18x24x4xf32, #tpu.memory_space<vmem>>, vector<1x16x16x4xf32>
    %19 = vector.shape_cast %18 : vector<1x16x16x4xf32> to vector<256x4xf32>
    %c0_48 = arith.constant 0 : index
    %c0_49 = arith.constant 0 : index
    %20 = vector.load %arg2[%c0_48, %c0_49] : memref<36x4xf32, #tpu.memory_space<vmem>>, vector<4x4xf32>
    %cst_50 = arith.constant dense<0.000000e+00> : vector<256x4xf32>
    %21 = tpu.matmul %19, %20, %cst_50 {dimension_numbers = #tpu.dot_dimension_numbers<[1], [0], [0], [1], [0, 0, 1, 1], [], []>} : vector<256x4xf32>, vector<4x4xf32>, vector<256x4xf32> -> vector<256x4xf32>
    %c0_51 = arith.constant 0 : index
    %c0_52 = arith.constant 0 : index
    %22 = vector.load %arg11[%c0_51, %c0_52] : memref<256x4xf32, #tpu.memory_space<vmem>>, vector<256x4xf32>
    tpu.vector_store %arg11[%c0_51, %c0_52], %21 {strides = array<i32>} : memref<256x4xf32, #tpu.memory_space<vmem>>, vector<256x4xf32>,
    %c0_53 = arith.constant 0 : index
    %c0_54 = arith.constant 0 : index
    %c1_55 = arith.constant 1 : index
    %c0_56 = arith.constant 0 : index
    %23 = vector.load %arg9[%c0_53, %c0_54, %c1_55, %c0_56] : memref<1x18x24x4xf32, #tpu.memory_space<vmem>>, vector<1x16x16x4xf32>
    %24 = vector.shape_cast %23 : vector<1x16x16x4xf32> to vector<256x4xf32>
    %c4 = arith.constant 4 : index
    %c0_57 = arith.constant 0 : index
    %25 = vector.load %arg2[%c4, %c0_57] : memref<36x4xf32, #tpu.memory_space<vmem>>, vector<4x4xf32>
    %cst_58 = arith.constant dense<0.000000e+00> : vector<256x4xf32>
    %26 = tpu.matmul %24, %25, %cst_58 {dimension_numbers = #tpu.dot_dimension_numbers<[1], [0], [0], [1], [0, 0, 1, 1], [], []>} : vector<256x4xf32>, vector<4x4xf32>, vector<256x4xf32> -> vector<256x4xf32>
    %c0_59 = arith.constant 0 : index
    %c0_60 = arith.constant 0 : index
    %27 = vector.load %arg11[%c0_59, %c0_60] : memref<256x4xf32, #tpu.memory_space<vmem>>, vector<256x4xf32>
    %28 = arith.addf %27, %26 : vector<256x4xf32>
    %c0_61 = arith.constant 0 : index
    %c0_62 = arith.constant 0 : index
    %29 = vector.load %arg11[%c0_61, %c0_62] : memref<256x4xf32, #tpu.memory_space<vmem>>, vector<256x4xf32>
    tpu.vector_store %arg11[%c0_61, %c0_62], %28 {strides = array<i32>} : memref<256x4xf32, #tpu.memory_space<vmem>>, vector<256x4xf32>,
    %c0_63 = arith.constant 0 : index
    %c0_64 = arith.constant 0 : index
    %c2 = arith.constant 2 : index
    %c0_65 = arith.constant 0 : index
    %30 = vector.load %arg9[%c0_63, %c0_64, %c2, %c0_65] : memref<1x18x24x4xf32, #tpu.memory_space<vmem>>, vector<1x16x16x4xf32>
    %31 = vector.shape_cast %30 : vector<1x16x16x4xf32> to vector<256x4xf32>
    %c8 = arith.constant 8 : index
    %c0_66 = arith.constant 0 : index
    %32 = vector.load %arg2[%c8, %c0_66] : memref<36x4xf32, #tpu.memory_space<vmem>>, vector<4x4xf32>
    %cst_67 = arith.constant dense<0.000000e+00> : vector<256x4xf32>
    %33 = tpu.matmul %31, %32, %cst_67 {dimension_numbers = #tpu.dot_dimension_numbers<[1], [0], [0], [1], [0, 0, 1, 1], [], []>} : vector<256x4xf32>, vector<4x4xf32>, vector<256x4xf32> -> vector<256x4xf32>
    %c0_68 = arith.constant 0 : index
    %c0_69 = arith.constant 0 : index
    %34 = vector.load %arg11[%c0_68, %c0_69] : memref<256x4xf32, #tpu.memory_space<vmem>>, vector<256x4xf32>
    %35 = arith.addf %34, %33 : vector<256x4xf32>
    %c0_70 = arith.constant 0 : index
    %c0_71 = arith.constant 0 : index
    %36 = vector.load %arg11[%c0_70, %c0_71] : memref<256x4xf32, #tpu.memory_space<vmem>>, vector<256x4xf32>
    tpu.vector_store %arg11[%c0_70, %c0_71], %35 {strides = array<i32>} : memref<256x4xf32, #tpu.memory_space<vmem>>, vector<256x4xf32>,
    %c0_72 = arith.constant 0 : index
    %c1_73 = arith.constant 1 : index
    %c0_74 = arith.constant 0 : index
    %c0_75 = arith.constant 0 : index
    %37 = vector.load %arg9[%c0_72, %c1_73, %c0_74, %c0_75] : memref<1x18x24x4xf32, #tpu.memory_space<vmem>>, vector<1x16x16x4xf32>
    %38 = vector.shape_cast %37 : vector<1x16x16x4xf32> to vector<256x4xf32>
    %c12 = arith.constant 12 : index
    %c0_76 = arith.constant 0 : index
    %39 = vector.load %arg2[%c12, %c0_76] : memref<36x4xf32, #tpu.memory_space<vmem>>, vector<4x4xf32>
    %cst_77 = arith.constant dense<0.000000e+00> : vector<256x4xf32>
    %40 = tpu.matmul %38, %39, %cst_77 {dimension_numbers = #tpu.dot_dimension_numbers<[1], [0], [0], [1], [0, 0, 1, 1], [], []>} : vector<256x4xf32>, vector<4x4xf32>, vector<256x4xf32> -> vector<256x4xf32>
    %c0_78 = arith.constant 0 : index
    %c0_79 = arith.constant 0 : index
    %41 = vector.load %arg11[%c0_78, %c0_79] : memref<256x4xf32, #tpu.memory_space<vmem>>, vector<256x4xf32>
    %42 = arith.addf %41, %40 : vector<256x4xf32>
    %c0_80 = arith.constant 0 : index
    %c0_81 = arith.constant 0 : index
    %43 = vector.load %arg11[%c0_80, %c0_81] : memref<256x4xf32, #tpu.memory_space<vmem>>, vector<256x4xf32>
    tpu.vector_store %arg11[%c0_80, %c0_81], %42 {strides = array<i32>} : memref<256x4xf32, #tpu.memory_space<vmem>>, vector<256x4xf32>,
    %c0_82 = arith.constant 0 : index
    %c1_83 = arith.constant 1 : index
    %c1_84 = arith.constant 1 : index
    %c0_85 = arith.constant 0 : index
    %44 = vector.load %arg9[%c0_82, %c1_83, %c1_84, %c0_85] : memref<1x18x24x4xf32, #tpu.memory_space<vmem>>, vector<1x16x16x4xf32>
    %45 = vector.shape_cast %44 : vector<1x16x16x4xf32> to vector<256x4xf32>
    %c16 = arith.constant 16 : index
    %c0_86 = arith.constant 0 : index
    %46 = vector.load %arg2[%c16, %c0_86] : memref<36x4xf32, #tpu.memory_space<vmem>>, vector<4x4xf32>
    %cst_87 = arith.constant dense<0.000000e+00> : vector<256x4xf32>
    %47 = tpu.matmul %45, %46, %cst_87 {dimension_numbers = #tpu.dot_dimension_numbers<[1], [0], [0], [1], [0, 0, 1, 1], [], []>} : vector<256x4xf32>, vector<4x4xf32>, vector<256x4xf32> -> vector<256x4xf32>
    %c0_88 = arith.constant 0 : index
    %c0_89 = arith.constant 0 : index
    %48 = vector.load %arg11[%c0_88, %c0_89] : memref<256x4xf32, #tpu.memory_space<vmem>>, vector<256x4xf32>
    %49 = arith.addf %48, %47 : vector<256x4xf32>
    %c0_90 = arith.constant 0 : index
    %c0_91 = arith.constant 0 : index
    %50 = vector.load %arg11[%c0_90, %c0_91] : memref<256x4xf32, #tpu.memory_space<vmem>>, vector<256x4xf32>
    tpu.vector_store %arg11[%c0_90, %c0_91], %49 {strides = array<i32>} : memref<256x4xf32, #tpu.memory_space<vmem>>, vector<256x4xf32>,
    %c0_92 = arith.constant 0 : index
    %c1_93 = arith.constant 1 : index
    %c2_94 = arith.constant 2 : index
    %c0_95 = arith.constant 0 : index
    %51 = vector.load %arg9[%c0_92, %c1_93, %c2_94, %c0_95] : memref<1x18x24x4xf32, #tpu.memory_space<vmem>>, vector<1x16x16x4xf32>
    %52 = vector.shape_cast %51 : vector<1x16x16x4xf32> to vector<256x4xf32>
    %c20 = arith.constant 20 : index
    %c0_96 = arith.constant 0 : index
    %53 = vector.load %arg2[%c20, %c0_96] : memref<36x4xf32, #tpu.memory_space<vmem>>, vector<4x4xf32>
    %cst_97 = arith.constant dense<0.000000e+00> : vector<256x4xf32>
    %54 = tpu.matmul %52, %53, %cst_97 {dimension_numbers = #tpu.dot_dimension_numbers<[1], [0], [0], [1], [0, 0, 1, 1], [], []>} : vector<256x4xf32>, vector<4x4xf32>, vector<256x4xf32> -> vector<256x4xf32>
    %c0_98 = arith.constant 0 : index
    %c0_99 = arith.constant 0 : index
    %55 = vector.load %arg11[%c0_98, %c0_99] : memref<256x4xf32, #tpu.memory_space<vmem>>, vector<256x4xf32>
    %56 = arith.addf %55, %54 : vector<256x4xf32>
    %c0_100 = arith.constant 0 : index
    %c0_101 = arith.constant 0 : index
    %57 = vector.load %arg11[%c0_100, %c0_101] : memref<256x4xf32, #tpu.memory_space<vmem>>, vector<256x4xf32>
    tpu.vector_store %arg11[%c0_100, %c0_101], %56 {strides = array<i32>} : memref<256x4xf32, #tpu.memory_space<vmem>>, vector<256x4xf32>,
    %c0_102 = arith.constant 0 : index
    %c2_103 = arith.constant 2 : index
    %c0_104 = arith.constant 0 : index
    %c0_105 = arith.constant 0 : index
    %58 = vector.load %arg9[%c0_102, %c2_103, %c0_104, %c0_105] : memref<1x18x24x4xf32, #tpu.memory_space<vmem>>, vector<1x16x16x4xf32>
    %59 = vector.shape_cast %58 : vector<1x16x16x4xf32> to vector<256x4xf32>
    %c24 = arith.constant 24 : index
    %c0_106 = arith.constant 0 : index
    %60 = vector.load %arg2[%c24, %c0_106] : memref<36x4xf32, #tpu.memory_space<vmem>>, vector<4x4xf32>
    %cst_107 = arith.constant dense<0.000000e+00> : vector<256x4xf32>
    %61 = tpu.matmul %59, %60, %cst_107 {dimension_numbers = #tpu.dot_dimension_numbers<[1], [0], [0], [1], [0, 0, 1, 1], [], []>} : vector<256x4xf32>, vector<4x4xf32>, vector<256x4xf32> -> vector<256x4xf32>
    %c0_108 = arith.constant 0 : index
    %c0_109 = arith.constant 0 : index
    %62 = vector.load %arg11[%c0_108, %c0_109] : memref<256x4xf32, #tpu.memory_space<vmem>>, vector<256x4xf32>
    %63 = arith.addf %62, %61 : vector<256x4xf32>
    %c0_110 = arith.constant 0 : index
    %c0_111 = arith.constant 0 : index
    %64 = vector.load %arg11[%c0_110, %c0_111] : memref<256x4xf32, #tpu.memory_space<vmem>>, vector<256x4xf32>
    tpu.vector_store %arg11[%c0_110, %c0_111], %63 {strides = array<i32>} : memref<256x4xf32, #tpu.memory_space<vmem>>, vector<256x4xf32>,
    %c0_112 = arith.constant 0 : index
    %c2_113 = arith.constant 2 : index
    %c1_114 = arith.constant 1 : index
    %c0_115 = arith.constant 0 : index
    %65 = vector.load %arg9[%c0_112, %c2_113, %c1_114, %c0_115] : memref<1x18x24x4xf32, #tpu.memory_space<vmem>>, vector<1x16x16x4xf32>
    %66 = vector.shape_cast %65 : vector<1x16x16x4xf32> to vector<256x4xf32>
    %c28 = arith.constant 28 : index
    %c0_116 = arith.constant 0 : index
    %67 = vector.load %arg2[%c28, %c0_116] : memref<36x4xf32, #tpu.memory_space<vmem>>, vector<4x4xf32>
    %cst_117 = arith.constant dense<0.000000e+00> : vector<256x4xf32>
    %68 = tpu.matmul %66, %67, %cst_117 {dimension_numbers = #tpu.dot_dimension_numbers<[1], [0], [0], [1], [0, 0, 1, 1], [], []>} : vector<256x4xf32>, vector<4x4xf32>, vector<256x4xf32> -> vector<256x4xf32>
    %c0_118 = arith.constant 0 : index
    %c0_119 = arith.constant 0 : index
    %69 = vector.load %arg11[%c0_118, %c0_119] : memref<256x4xf32, #tpu.memory_space<vmem>>, vector<256x4xf32>
    %70 = arith.addf %69, %68 : vector<256x4xf32>
    %c0_120 = arith.constant 0 : index
    %c0_121 = arith.constant 0 : index
    %71 = vector.load %arg11[%c0_120, %c0_121] : memref<256x4xf32, #tpu.memory_space<vmem>>, vector<256x4xf32>
    tpu.vector_store %arg11[%c0_120, %c0_121], %70 {strides = array<i32>} : memref<256x4xf32, #tpu.memory_space<vmem>>, vector<256x4xf32>,
    %c0_122 = arith.constant 0 : index
    %c2_123 = arith.constant 2 : index
    %c2_124 = arith.constant 2 : index
    %c0_125 = arith.constant 0 : index
    %72 = vector.load %arg9[%c0_122, %c2_123, %c2_124, %c0_125] : memref<1x18x24x4xf32, #tpu.memory_space<vmem>>, vector<1x16x16x4xf32>
    %73 = vector.shape_cast %72 : vector<1x16x16x4xf32> to vector<256x4xf32>
    %c32 = arith.constant 32 : index
    %c0_126 = arith.constant 0 : index
    %74 = vector.load %arg2[%c32, %c0_126] : memref<36x4xf32, #tpu.memory_space<vmem>>, vector<4x4xf32>
    %cst_127 = arith.constant dense<0.000000e+00> : vector<256x4xf32>
    %75 = tpu.matmul %73, %74, %cst_127 {dimension_numbers = #tpu.dot_dimension_numbers<[1], [0], [0], [1], [0, 0, 1, 1], [], []>} : vector<256x4xf32>, vector<4x4xf32>, vector<256x4xf32> -> vector<256x4xf32>
    %c0_128 = arith.constant 0 : index
    %c0_129 = arith.constant 0 : index
    %76 = vector.load %arg11[%c0_128, %c0_129] : memref<256x4xf32, #tpu.memory_space<vmem>>, vector<256x4xf32>
    %77 = arith.addf %76, %75 : vector<256x4xf32>
    %c0_130 = arith.constant 0 : index
    %c0_131 = arith.constant 0 : index
    %78 = vector.load %arg11[%c0_130, %c0_131] : memref<256x4xf32, #tpu.memory_space<vmem>>, vector<256x4xf32>
    tpu.vector_store %arg11[%c0_130, %c0_131], %77 {strides = array<i32>} : memref<256x4xf32, #tpu.memory_space<vmem>>, vector<256x4xf32>,
    %c0_132 = arith.constant 0 : index
    %c0_133 = arith.constant 0 : index
    %79 = vector.load %arg11[%c0_132, %c0_133] : memref<256x4xf32, #tpu.memory_space<vmem>>, vector<256x4xf32>
    %c0_134 = arith.constant 0 : index
    %c0_135 = arith.constant 0 : index
    %80 = vector.load %arg4[%c0_134, %c0_135] : memref<1x4xf32, #tpu.memory_space<vmem>>, vector<1x4xf32>
    %81 = vector.shape_cast %80 : vector<1x4xf32> to vector<4xf32>
    %82 = vector.shape_cast %81 : vector<4xf32> to vector<1x4xf32>
    %83 = vector.broadcast %82 : vector<1x4xf32> to vector<256x4xf32>
    %84 = arith.mulf %79, %83 : vector<256x4xf32>
    %c0_136 = arith.constant 0 : index
    %c0_137 = arith.constant 0 : index
    %85 = vector.load %arg5[%c0_136, %c0_137] : memref<1x4xf32, #tpu.memory_space<vmem>>, vector<1x4xf32>
    %86 = vector.shape_cast %85 : vector<1x4xf32> to vector<4xf32>
    %87 = vector.shape_cast %86 : vector<4xf32> to vector<1x4xf32>
    %88 = vector.broadcast %87 : vector<1x4xf32> to vector<256x4xf32>
    %89 = arith.addf %84, %88 : vector<256x4xf32>
    %cst_138 = arith.constant 0.000000e+00 : f32
    %90 = vector.broadcast %cst_138 : f32 to vector<256x4xf32>
    %91 = arith.maximumf %89, %90 : vector<256x4xf32>
    %92 = vector.shape_cast %91 : vector<256x4xf32> to vector<1x16x16x4xf32>
    %c0_139 = arith.constant 0 : index
    %c1_140 = arith.constant 1 : index
    %c1_141 = arith.constant 1 : index
    %c0_142 = arith.constant 0 : index
    %93 = vector.load %arg10[%c0_139, %c1_140, %c1_141, %c0_142] : memref<1x18x24x4xf32, #tpu.memory_space<vmem>>, vector<1x16x16x4xf32>
    tpu.vector_store %arg10[%c0_139, %c1_140, %c1_141, %c0_142], %92 {strides = array<i32>} : memref<1x18x24x4xf32, #tpu.memory_space<vmem>>, vector<1x16x16x4xf32>,
    %c0_143 = arith.constant 0 : index
    %c0_144 = arith.constant 0 : index
    %c0_145 = arith.constant 0 : index
    %c0_146 = arith.constant 0 : index
    %94 = vector.load %arg10[%c0_143, %c0_144, %c0_145, %c0_146] : memref<1x18x24x4xf32, #tpu.memory_space<vmem>>, vector<1x16x16x4xf32>
    %95 = vector.shape_cast %94 : vector<1x16x16x4xf32> to vector<256x4xf32>
    %c0_147 = arith.constant 0 : index
    %c0_148 = arith.constant 0 : index
    %96 = vector.load %arg3[%c0_147, %c0_148] : memref<36x4xf32, #tpu.memory_space<vmem>>, vector<4x4xf32>
    %cst_149 = arith.constant dense<0.000000e+00> : vector<256x4xf32>
    %97 = tpu.matmul %95, %96, %cst_149 {dimension_numbers = #tpu.dot_dimension_numbers<[1], [0], [0], [1], [0, 0, 1, 1], [], []>} : vector<256x4xf32>, vector<4x4xf32>, vector<256x4xf32> -> vector<256x4xf32>
    %c0_150 = arith.constant 0 : index
    %c0_151 = arith.constant 0 : index
    %98 = vector.load %arg11[%c0_150, %c0_151] : memref<256x4xf32, #tpu.memory_space<vmem>>, vector<256x4xf32>
    tpu.vector_store %arg11[%c0_150, %c0_151], %97 {strides = array<i32>} : memref<256x4xf32, #tpu.memory_space<vmem>>, vector<256x4xf32>,
    %c0_152 = arith.constant 0 : index
    %c0_153 = arith.constant 0 : index
    %c1_154 = arith.constant 1 : index
    %c0_155 = arith.constant 0 : index
    %99 = vector.load %arg10[%c0_152, %c0_153, %c1_154, %c0_155] : memref<1x18x24x4xf32, #tpu.memory_space<vmem>>, vector<1x16x16x4xf32>
    %100 = vector.shape_cast %99 : vector<1x16x16x4xf32> to vector<256x4xf32>
    %c4_156 = arith.constant 4 : index
    %c0_157 = arith.constant 0 : index
    %101 = vector.load %arg3[%c4_156, %c0_157] : memref<36x4xf32, #tpu.memory_space<vmem>>, vector<4x4xf32>
    %cst_158 = arith.constant dense<0.000000e+00> : vector<256x4xf32>
    %102 = tpu.matmul %100, %101, %cst_158 {dimension_numbers = #tpu.dot_dimension_numbers<[1], [0], [0], [1], [0, 0, 1, 1], [], []>} : vector<256x4xf32>, vector<4x4xf32>, vector<256x4xf32> -> vector<256x4xf32>
    %c0_159 = arith.constant 0 : index
    %c0_160 = arith.constant 0 : index
    %103 = vector.load %arg11[%c0_159, %c0_160] : memref<256x4xf32, #tpu.memory_space<vmem>>, vector<256x4xf32>
    %104 = arith.addf %103, %102 : vector<256x4xf32>
    %c0_161 = arith.constant 0 : index
    %c0_162 = arith.constant 0 : index
    %105 = vector.load %arg11[%c0_161, %c0_162] : memref<256x4xf32, #tpu.memory_space<vmem>>, vector<256x4xf32>
    tpu.vector_store %arg11[%c0_161, %c0_162], %104 {strides = array<i32>} : memref<256x4xf32, #tpu.memory_space<vmem>>, vector<256x4xf32>,
    %c0_163 = arith.constant 0 : index
    %c0_164 = arith.constant 0 : index
    %c2_165 = arith.constant 2 : index
    %c0_166 = arith.constant 0 : index
    %106 = vector.load %arg10[%c0_163, %c0_164, %c2_165, %c0_166] : memref<1x18x24x4xf32, #tpu.memory_space<vmem>>, vector<1x16x16x4xf32>
    %107 = vector.shape_cast %106 : vector<1x16x16x4xf32> to vector<256x4xf32>
    %c8_167 = arith.constant 8 : index
    %c0_168 = arith.constant 0 : index
    %108 = vector.load %arg3[%c8_167, %c0_168] : memref<36x4xf32, #tpu.memory_space<vmem>>, vector<4x4xf32>
    %cst_169 = arith.constant dense<0.000000e+00> : vector<256x4xf32>
    %109 = tpu.matmul %107, %108, %cst_169 {dimension_numbers = #tpu.dot_dimension_numbers<[1], [0], [0], [1], [0, 0, 1, 1], [], []>} : vector<256x4xf32>, vector<4x4xf32>, vector<256x4xf32> -> vector<256x4xf32>
    %c0_170 = arith.constant 0 : index
    %c0_171 = arith.constant 0 : index
    %110 = vector.load %arg11[%c0_170, %c0_171] : memref<256x4xf32, #tpu.memory_space<vmem>>, vector<256x4xf32>
    %111 = arith.addf %110, %109 : vector<256x4xf32>
    %c0_172 = arith.constant 0 : index
    %c0_173 = arith.constant 0 : index
    %112 = vector.load %arg11[%c0_172, %c0_173] : memref<256x4xf32, #tpu.memory_space<vmem>>, vector<256x4xf32>
    tpu.vector_store %arg11[%c0_172, %c0_173], %111 {strides = array<i32>} : memref<256x4xf32, #tpu.memory_space<vmem>>, vector<256x4xf32>,
    %c0_174 = arith.constant 0 : index
    %c1_175 = arith.constant 1 : index
    %c0_176 = arith.constant 0 : index
    %c0_177 = arith.constant 0 : index
    %113 = vector.load %arg10[%c0_174, %c1_175, %c0_176, %c0_177] : memref<1x18x24x4xf32, #tpu.memory_space<vmem>>, vector<1x16x16x4xf32>
    %114 = vector.shape_cast %113 : vector<1x16x16x4xf32> to vector<256x4xf32>
    %c12_178 = arith.constant 12 : index
    %c0_179 = arith.constant 0 : index
    %115 = vector.load %arg3[%c12_178, %c0_179] : memref<36x4xf32, #tpu.memory_space<vmem>>, vector<4x4xf32>
    %cst_180 = arith.constant dense<0.000000e+00> : vector<256x4xf32>
    %116 = tpu.matmul %114, %115, %cst_180 {dimension_numbers = #tpu.dot_dimension_numbers<[1], [0], [0], [1], [0, 0, 1, 1], [], []>} : vector<256x4xf32>, vector<4x4xf32>, vector<256x4xf32> -> vector<256x4xf32>
    %c0_181 = arith.constant 0 : index
    %c0_182 = arith.constant 0 : index
    %117 = vector.load %arg11[%c0_181, %c0_182] : memref<256x4xf32, #tpu.memory_space<vmem>>, vector<256x4xf32>
    %118 = arith.addf %117, %116 : vector<256x4xf32>
    %c0_183 = arith.constant 0 : index
    %c0_184 = arith.constant 0 : index
    %119 = vector.load %arg11[%c0_183, %c0_184] : memref<256x4xf32, #tpu.memory_space<vmem>>, vector<256x4xf32>
    tpu.vector_store %arg11[%c0_183, %c0_184], %118 {strides = array<i32>} : memref<256x4xf32, #tpu.memory_space<vmem>>, vector<256x4xf32>,
    %c0_185 = arith.constant 0 : index
    %c1_186 = arith.constant 1 : index
    %c1_187 = arith.constant 1 : index
    %c0_188 = arith.constant 0 : index
    %120 = vector.load %arg10[%c0_185, %c1_186, %c1_187, %c0_188] : memref<1x18x24x4xf32, #tpu.memory_space<vmem>>, vector<1x16x16x4xf32>
    %121 = vector.shape_cast %120 : vector<1x16x16x4xf32> to vector<256x4xf32>
    %c16_189 = arith.constant 16 : index
    %c0_190 = arith.constant 0 : index
    %122 = vector.load %arg3[%c16_189, %c0_190] : memref<36x4xf32, #tpu.memory_space<vmem>>, vector<4x4xf32>
    %cst_191 = arith.constant dense<0.000000e+00> : vector<256x4xf32>
    %123 = tpu.matmul %121, %122, %cst_191 {dimension_numbers = #tpu.dot_dimension_numbers<[1], [0], [0], [1], [0, 0, 1, 1], [], []>} : vector<256x4xf32>, vector<4x4xf32>, vector<256x4xf32> -> vector<256x4xf32>
    %c0_192 = arith.constant 0 : index
    %c0_193 = arith.constant 0 : index
    %124 = vector.load %arg11[%c0_192, %c0_193] : memref<256x4xf32, #tpu.memory_space<vmem>>, vector<256x4xf32>
    %125 = arith.addf %124, %123 : vector<256x4xf32>
    %c0_194 = arith.constant 0 : index
    %c0_195 = arith.constant 0 : index
    %126 = vector.load %arg11[%c0_194, %c0_195] : memref<256x4xf32, #tpu.memory_space<vmem>>, vector<256x4xf32>
    tpu.vector_store %arg11[%c0_194, %c0_195], %125 {strides = array<i32>} : memref<256x4xf32, #tpu.memory_space<vmem>>, vector<256x4xf32>,
    %c0_196 = arith.constant 0 : index
    %c1_197 = arith.constant 1 : index
    %c2_198 = arith.constant 2 : index
    %c0_199 = arith.constant 0 : index
    %127 = vector.load %arg10[%c0_196, %c1_197, %c2_198, %c0_199] : memref<1x18x24x4xf32, #tpu.memory_space<vmem>>, vector<1x16x16x4xf32>
    %128 = vector.shape_cast %127 : vector<1x16x16x4xf32> to vector<256x4xf32>
    %c20_200 = arith.constant 20 : index
    %c0_201 = arith.constant 0 : index
    %129 = vector.load %arg3[%c20_200, %c0_201] : memref<36x4xf32, #tpu.memory_space<vmem>>, vector<4x4xf32>
    %cst_202 = arith.constant dense<0.000000e+00> : vector<256x4xf32>
    %130 = tpu.matmul %128, %129, %cst_202 {dimension_numbers = #tpu.dot_dimension_numbers<[1], [0], [0], [1], [0, 0, 1, 1], [], []>} : vector<256x4xf32>, vector<4x4xf32>, vector<256x4xf32> -> vector<256x4xf32>
    %c0_203 = arith.constant 0 : index
    %c0_204 = arith.constant 0 : index
    %131 = vector.load %arg11[%c0_203, %c0_204] : memref<256x4xf32, #tpu.memory_space<vmem>>, vector<256x4xf32>
    %132 = arith.addf %131, %130 : vector<256x4xf32>
    %c0_205 = arith.constant 0 : index
    %c0_206 = arith.constant 0 : index
    %133 = vector.load %arg11[%c0_205, %c0_206] : memref<256x4xf32, #tpu.memory_space<vmem>>, vector<256x4xf32>
    tpu.vector_store %arg11[%c0_205, %c0_206], %132 {strides = array<i32>} : memref<256x4xf32, #tpu.memory_space<vmem>>, vector<256x4xf32>,
    %c0_207 = arith.constant 0 : index
    %c2_208 = arith.constant 2 : index
    %c0_209 = arith.constant 0 : index
    %c0_210 = arith.constant 0 : index
    %134 = vector.load %arg10[%c0_207, %c2_208, %c0_209, %c0_210] : memref<1x18x24x4xf32, #tpu.memory_space<vmem>>, vector<1x16x16x4xf32>
    %135 = vector.shape_cast %134 : vector<1x16x16x4xf32> to vector<256x4xf32>
    %c24_211 = arith.constant 24 : index
    %c0_212 = arith.constant 0 : index
    %136 = vector.load %arg3[%c24_211, %c0_212] : memref<36x4xf32, #tpu.memory_space<vmem>>, vector<4x4xf32>
    %cst_213 = arith.constant dense<0.000000e+00> : vector<256x4xf32>
    %137 = tpu.matmul %135, %136, %cst_213 {dimension_numbers = #tpu.dot_dimension_numbers<[1], [0], [0], [1], [0, 0, 1, 1], [], []>} : vector<256x4xf32>, vector<4x4xf32>, vector<256x4xf32> -> vector<256x4xf32>
    %c0_214 = arith.constant 0 : index
    %c0_215 = arith.constant 0 : index
    %138 = vector.load %arg11[%c0_214, %c0_215] : memref<256x4xf32, #tpu.memory_space<vmem>>, vector<256x4xf32>
    %139 = arith.addf %138, %137 : vector<256x4xf32>
    %c0_216 = arith.constant 0 : index
    %c0_217 = arith.constant 0 : index
    %140 = vector.load %arg11[%c0_216, %c0_217] : memref<256x4xf32, #tpu.memory_space<vmem>>, vector<256x4xf32>
    tpu.vector_store %arg11[%c0_216, %c0_217], %139 {strides = array<i32>} : memref<256x4xf32, #tpu.memory_space<vmem>>, vector<256x4xf32>,
    %c0_218 = arith.constant 0 : index
    %c2_219 = arith.constant 2 : index
    %c1_220 = arith.constant 1 : index
    %c0_221 = arith.constant 0 : index
    %141 = vector.load %arg10[%c0_218, %c2_219, %c1_220, %c0_221] : memref<1x18x24x4xf32, #tpu.memory_space<vmem>>, vector<1x16x16x4xf32>
    %142 = vector.shape_cast %141 : vector<1x16x16x4xf32> to vector<256x4xf32>
    %c28_222 = arith.constant 28 : index
    %c0_223 = arith.constant 0 : index
    %143 = vector.load %arg3[%c28_222, %c0_223] : memref<36x4xf32, #tpu.memory_space<vmem>>, vector<4x4xf32>
    %cst_224 = arith.constant dense<0.000000e+00> : vector<256x4xf32>
    %144 = tpu.matmul %142, %143, %cst_224 {dimension_numbers = #tpu.dot_dimension_numbers<[1], [0], [0], [1], [0, 0, 1, 1], [], []>} : vector<256x4xf32>, vector<4x4xf32>, vector<256x4xf32> -> vector<256x4xf32>
    %c0_225 = arith.constant 0 : index
    %c0_226 = arith.constant 0 : index
    %145 = vector.load %arg11[%c0_225, %c0_226] : memref<256x4xf32, #tpu.memory_space<vmem>>, vector<256x4xf32>
    %146 = arith.addf %145, %144 : vector<256x4xf32>
    %c0_227 = arith.constant 0 : index
    %c0_228 = arith.constant 0 : index
    %147 = vector.load %arg11[%c0_227, %c0_228] : memref<256x4xf32, #tpu.memory_space<vmem>>, vector<256x4xf32>
    tpu.vector_store %arg11[%c0_227, %c0_228], %146 {strides = array<i32>} : memref<256x4xf32, #tpu.memory_space<vmem>>, vector<256x4xf32>,
    %c0_229 = arith.constant 0 : index
    %c2_230 = arith.constant 2 : index
    %c2_231 = arith.constant 2 : index
    %c0_232 = arith.constant 0 : index
    %148 = vector.load %arg10[%c0_229, %c2_230, %c2_231, %c0_232] : memref<1x18x24x4xf32, #tpu.memory_space<vmem>>, vector<1x16x16x4xf32>
    %149 = vector.shape_cast %148 : vector<1x16x16x4xf32> to vector<256x4xf32>
    %c32_233 = arith.constant 32 : index
    %c0_234 = arith.constant 0 : index
    %150 = vector.load %arg3[%c32_233, %c0_234] : memref<36x4xf32, #tpu.memory_space<vmem>>, vector<4x4xf32>
    %cst_235 = arith.constant dense<0.000000e+00> : vector<256x4xf32>
    %151 = tpu.matmul %149, %150, %cst_235 {dimension_numbers = #tpu.dot_dimension_numbers<[1], [0], [0], [1], [0, 0, 1, 1], [], []>} : vector<256x4xf32>, vector<4x4xf32>, vector<256x4xf32> -> vector<256x4xf32>
    %c0_236 = arith.constant 0 : index
    %c0_237 = arith.constant 0 : index
    %152 = vector.load %arg11[%c0_236, %c0_237] : memref<256x4xf32, #tpu.memory_space<vmem>>, vector<256x4xf32>
    %153 = arith.addf %152, %151 : vector<256x4xf32>
    %c0_238 = arith.constant 0 : index
    %c0_239 = arith.constant 0 : index
    %154 = vector.load %arg11[%c0_238, %c0_239] : memref<256x4xf32, #tpu.memory_space<vmem>>, vector<256x4xf32>
    tpu.vector_store %arg11[%c0_238, %c0_239], %153 {strides = array<i32>} : memref<256x4xf32, #tpu.memory_space<vmem>>, vector<256x4xf32>,
    %c0_240 = arith.constant 0 : index
    %c0_241 = arith.constant 0 : index
    %155 = vector.load %arg11[%c0_240, %c0_241] : memref<256x4xf32, #tpu.memory_space<vmem>>, vector<256x4xf32>
    %c0_242 = arith.constant 0 : index
    %c0_243 = arith.constant 0 : index
    %156 = vector.load %arg6[%c0_242, %c0_243] : memref<1x4xf32, #tpu.memory_space<vmem>>, vector<1x4xf32>
    %157 = vector.shape_cast %156 : vector<1x4xf32> to vector<4xf32>
    %158 = vector.shape_cast %157 : vector<4xf32> to vector<1x4xf32>
    %159 = vector.broadcast %158 : vector<1x4xf32> to vector<256x4xf32>
    %160 = arith.mulf %155, %159 : vector<256x4xf32>
    %c0_244 = arith.constant 0 : index
    %c0_245 = arith.constant 0 : index
    %161 = vector.load %arg7[%c0_244, %c0_245] : memref<1x4xf32, #tpu.memory_space<vmem>>, vector<1x4xf32>
    %162 = vector.shape_cast %161 : vector<1x4xf32> to vector<4xf32>
    %163 = vector.shape_cast %162 : vector<4xf32> to vector<1x4xf32>
    %164 = vector.broadcast %163 : vector<1x4xf32> to vector<256x4xf32>
    %165 = arith.addf %160, %164 : vector<256x4xf32>
    %c0_246 = arith.constant 0 : index
    %c0_247 = arith.constant 0 : index
    %c0_248 = arith.constant 0 : index
    %c0_249 = arith.constant 0 : index
    %166 = vector.load %arg1[%c0_246, %c0_247, %c0_248, %c0_249] : memref<1x16x16x4xf32, #tpu.memory_space<vmem>>, vector<1x16x16x4xf32>
    %167 = vector.shape_cast %166 : vector<1x16x16x4xf32> to vector<256x4xf32>
    %168 = arith.addf %165, %167 : vector<256x4xf32>
    %cst_250 = arith.constant 0.000000e+00 : f32
    %169 = vector.broadcast %cst_250 : f32 to vector<256x4xf32>
    %170 = arith.maximumf %168, %169 : vector<256x4xf32>
    %171 = vector.shape_cast %170 : vector<256x4xf32> to vector<1x16x16x4xf32>
    %c0_251 = arith.constant 0 : index
    %c0_252 = arith.constant 0 : index
    %c0_253 = arith.constant 0 : index
    %c0_254 = arith.constant 0 : index
    %172 = vector.load %arg8[%c0_251, %c0_252, %c0_253, %c0_254] : memref<1x16x16x4xf32, #tpu.memory_space<vmem>>, vector<1x16x16x4xf32>
    tpu.vector_store %arg8[%c0_251, %c0_252, %c0_253, %c0_254], %171 {strides = array<i32>} : memref<1x16x16x4xf32, #tpu.memory_space<vmem>>, vector<1x16x16x4xf32>,
    return
  }
  func.func @transform_0(%arg0: i32) -> (i32, i32, i32, i32) {
    %c0_i32 = arith.constant 0 : i32
    %c0_i32_0 = arith.constant 0 : i32
    %c0_i32_1 = arith.constant 0 : i32
    %c0_i32_2 = arith.constant 0 : i32
    return %arg0, %c0_i32, %c0_i32_0, %c0_i32_1 : i32, i32, i32, i32
  }
  func.func @transform_1(%arg0: i32) -> (i32, i32) {
    %c0_i32 = arith.constant 0 : i32
    %c0_i32_0 = arith.constant 0 : i32
    %c0_i32_1 = arith.constant 0 : i32
    return %c0_i32, %c0_i32_0 : i32, i32
  }
  func.func @transform_2(%arg0: i32) -> (i32, i32) {
    %c0_i32 = arith.constant 0 : i32
    %c0_i32_0 = arith.constant 0 : i32
    %c0_i32_1 = arith.constant 0 : i32
    return %c0_i32, %c0_i32_0 : i32, i32
  }
  func.func @transform_3(%arg0: i32) -> (i32, i32) {
    %c0_i32 = arith.constant 0 : i32
    %c0_i32_0 = arith.constant 0 : i32
    %c0_i32_1 = arith.constant 0 : i32
    return %c0_i32, %c0_i32_0 : i32, i32
  }
  func.func @transform_4(%arg0: i32) -> (i32, i32) {
    %c0_i32 = arith.constant 0 : i32
    %c0_i32_0 = arith.constant 0 : i32
    %c0_i32_1 = arith.constant 0 : i32
    return %c0_i32, %c0_i32_0 : i32, i32
  }
  func.func @transform_5(%arg0: i32) -> (i32, i32) {
    %c0_i32 = arith.constant 0 : i32
    %c0_i32_0 = arith.constant 0 : i32
    %c0_i32_1 = arith.constant 0 : i32
    return %c0_i32, %c0_i32_0 : i32, i32
  }
  func.func @transform_6(%arg0: i32) -> (i32, i32) {
    %c0_i32 = arith.constant 0 : i32
    %c0_i32_0 = arith.constant 0 : i32
    %c0_i32_1 = arith.constant 0 : i32
    return %c0_i32, %c0_i32_0 : i32, i32
  }
  func.func @transform_7(%arg0: i32) -> (i32, i32, i32, i32) {
    %c0_i32 = arith.constant 0 : i32
    %c0_i32_0 = arith.constant 0 : i32
    %c0_i32_1 = arith.constant 0 : i32
    %c0_i32_2 = arith.constant 0 : i32
    return %arg0, %c0_i32, %c0_i32_0, %c0_i32_1 : i32, i32, i32, i32
  }
}

</mosaic_0001>

<bundles_post_ra>
// kernel: tpu_custom_call.1
= control target key start
LH: loop header
LB: loop body
LE: loop exit
PB: predicated region body
PF: predicated region fallthrough
CT: control target
= control target key end

     0   :  { %s7566_s24 = smov 0   ;;  %s10270_s0 = inlined_call_operand.vmem [shape: f32[2,16,16,4], index: 0, kind: input, shape index: {}]   ;;  %s10271_s1 = inlined_call_operand.vmem [shape: f32[36,4], index: 1, kind: input, shape index: {}]   ;;  %s10272_s2 = inlined_call_operand.vmem [shape: f32[36,4], index: 2, kind: input, shape index: {}]   ;;  %s10273_s3 = inlined_call_operand.vmem [shape: f32[1,4], index: 3, kind: input, shape index: {}]   ;;  %s10274_s4 = inlined_call_operand.vmem [shape: f32[1,4], index: 4, kind: input, shape index: {}]   ;;  %s10275_s5 = inlined_call_operand.vmem [shape: f32[1,4], index: 5, kind: input, shape index: {}]   ;;  %s10276_s6 = inlined_call_operand.vmem [shape: f32[1,4], index: 6, kind: input, shape index: {}]   ;;  %s10277_s7 = inlined_call_operand.vmem [shape: f32[2,16,16,4], index: 7, kind: output, shape index: {}]  }
   0x1 LB: > { %s6893_s25 = sadd.s32 4294967295, %s7523_s24   ;;  %p6897_p0 = scmp.ge.s32.totalorder %s7523_s24, 1  ;;  %s7523_s24 = sphi %s7566_s24, %s17_s24  }
   0x2   : > { %p237_p1 = scmp.lt.s32.totalorder %s7523_s24, 3 }
   0x4   : > { %p238_p2 = pnand %p6897_p0, %p237_p1 }
   0x5   : > { %p269_p3 = scmp.lt.s32.totalorder (!%p238_p2), %s6893_s25, 1 }
   0x6   : > { %241 = sbr.rel (%p238_p2) target bundleno = 1540 (0x604), region = 48 }
   0xb   : > { %v457_v0 = vld [vmem:[%s10271_s1] sm:$0xf]  ;;  %vm554_vm0 = vcmask 1043456   ;;  %vm279_vm1 = vcmask 31744   ;;  %v7525_v1 = vmov 0.0   ;;  %s10279_s25 = smov (!%p269_p3, %s6893_s25), 1 }
   0xc   : > { %6902 = vmatpush.msk.msra.mxu0 %vm554_vm0, %v457_v0  ;;  %280 = vst.msk [vmem:[#allocation2] sm:$0xff] %vm279_vm1, %v7525_v1  ;;  %7500 = vmatpush.msk.msra.mxu2 %vm554_vm0, %v457_v0  ;;  %v735_v2 = vld [vmem:[%s10271_s1 + $0x4] sm:$0xf]  ;;  %s7498_s30 = sshll.u32 %s10279_s25, 8  ;;  %vm288_vm2 = vcmask 24576  }
   0xd   : > { %281 = vst.msk [vmem:[#allocation2 + $0x8] sm:$0xff] %vm279_vm1, %v7525_v1  ;;  %7501 = vmatpush.msk.msra.mxu3 %vm554_vm0, %v735_v2  ;;  %6935 = vmatpush.msk.msra.mxu1 %vm554_vm0, %v735_v2  ;;  %s7608_s10 = scalar_lea.vmem %s10270_s0, %s7498_s30  ;;  %v1076_v8 = vld [vmem:[%s10271_s1 + $0x8] sm:$0xf]  ;;  %v1417_v9 = vld [vmem:[%s10271_s1 + $0xc] sm:$0xf]  ;;  %s10013_s19 = scalar_lea.vmem %s10277_s7, %s7498_s30 }
   0xe   : > { %282 = vst.msk [vmem:[#allocation2 + $0x10] sm:$0xff] %vm279_vm1, %v7525_v1  ;;  %v375_v4 = vld [vmem:[%s7608_s10 + $0x70] sm:$0xff]  ;;  %6968 = vmatpush.msk.msrb.mxu2 %vm554_vm0, %v1076_v8  ;;  %v376_v11 = vld [vmem:[%s7608_s10 + $0x78] sm:$0xff]  ;;  %v361_v12 = vld [vmem:[%s7608_s10] sm:$0xff] }
   0xf   : > { %284 = vst.msk [vmem:[#allocation2 + $0x198] sm:$0xff] %vm279_vm1, %v7525_v1  ;;  %7001 = vmatpush.msk.msrb.mxu3 %vm554_vm0, %v1417_v9  ;;  %v1758_v10 = vld [vmem:[%s10271_s1 + $0x10] sm:$0xf]  ;;  %v377_v13 = vld [vmem:[%s7608_s10 + $0x80] sm:$0xff]  ;;  %v362_v14 = vld [vmem:[%s7608_s10 + $0x8] sm:$0xff] }
  0x10   : > { %285 = vst.msk [vmem:[#allocation2 + $0x1a0] sm:$0xff] %vm279_vm1, %v7525_v1  ;;  %7034 = vmatpush.msk.msrb.mxu0 %vm554_vm0, %v1758_v10  ;;  %v378_v15 = vld [vmem:[%s7608_s10 + $0x88] sm:$0xff]  ;;  %v363_v17 = vld [vmem:[%s7608_s10 + $0x10] sm:$0xff]  ;;  %v364_v19 = vld [vmem:[%s7608_s10 + $0x18] sm:$0xff] }
  0x11   : > { %286 = vst.msk [vmem:[#allocation2 + $0x1a8] sm:$0xff] %vm279_vm1, %v7525_v1  ;;  %v379_v18 = vld [vmem:[%s7608_s10 + $0x90] sm:$0xff]  ;;  %v380_v20 = vld [vmem:[%s7608_s10 + $0x98] sm:$0xff]  ;;  %v365_v21 = vld [vmem:[%s7608_s10 + $0x20] sm:$0xff] }
  0x12   : > { %321 = vst.msk [vmem:[#allocation3] sm:$0xff] %vm279_vm1, %v7525_v1  ;;  %v381_v24 = vld [vmem:[%s7608_s10 + $0xa0] sm:$0xff]  ;;  %v366_v27 = vld [vmem:[%s7608_s10 + $0x28] sm:$0xff]  ;;  %v367_v33 = vld [vmem:[%s7608_s10 + $0x30] sm:$0xff] }
  0x13   : > { %v425_v3 = vld [vmem:[#allocation2] sm:$0xff]  ;;  %322 = vst.msk [vmem:[#allocation3 + $0x8] sm:$0xff] %vm279_vm1, %v7525_v1  ;;  %v382_v31 = vld [vmem:[%s7608_s10 + $0xa8] sm:$0xff]  ;;  %v383_v37 = vld [vmem:[%s7608_s10 + $0xb0] sm:$0xff] }
  0x14   : > { %6903 = vmatmul.msk.f32.vlgmr.msra.gmra.mxu0 %vm279_vm1, %v425_v3  ;;  %323 = vst.msk [vmem:[#allocation3 + $0x10] sm:$0xff] %vm279_vm1, %v7525_v1  ;;  %v426_v5 = vld [vmem:[#allocation2 + $0x8] sm:$0xff]  ;;  %v368_v39 = vld [vmem:[%s7608_s10 + $0x38] sm:$0xff]  ;;  %v369_v45 = vld [vmem:[%s7608_s10 + $0x40] sm:$0xff] }
  0x15   : > { %325 = vst.msk [vmem:[#allocation3 + $0x198] sm:$0xff] %vm279_vm1, %v7525_v1  ;;  %v703_v16 = vld [vmem:[#allocation2 + $0x1] sm:$0xff]  ;;  %v704_v26 = vld [vmem:[#allocation2 + $0x9] sm:$0xff]  ;;  %v384_v43 = vld [vmem:[%s7608_s10 + $0xb8] sm:$0xff] }
  0x16   : > { %326 = vst.msk [vmem:[#allocation3 + $0x1a0] sm:$0xff] %vm279_vm1, %v7525_v1  ;;  %6936 = vmatmul.msk.f32.vlgmr.msra.gmra.mxu1 %vm279_vm1, %v703_v16  ;;  %v385_v49 = vld [vmem:[%s7608_s10 + $0xc0] sm:$0xff]  ;;  %v370_v51 = vld [vmem:[%s7608_s10 + $0x48] sm:$0xff]  ;;  %v371_v57 = vld [vmem:[%s7608_s10 + $0x50] sm:$0xff] }
  0x17   : > { %327 = vst.msk [vmem:[#allocation3 + $0x1a8] sm:$0xff] %vm279_vm1, %v7525_v1  ;;  %v386_v55 = vld [vmem:[%s7608_s10 + $0xc8] sm:$0xff]  ;;  %v387_v61 = vld [vmem:[%s7608_s10 + $0xd0] sm:$0xff]  ;;  %v372_v63 = vld [vmem:[%s7608_s10 + $0x58] sm:$0xff] }
  0x18   : > { %296 = vst.msk [vmem:[#allocation2 + $0xc0] sm:$0x1] %vm288_vm2, %v7525_v1  ;;  %v388_v3 = vld [vmem:[%s7608_s10 + $0xd8] sm:$0xff]  ;;  %v389_v10 = vld [vmem:[%s7608_s10 + $0xe0] sm:$0xff]  ;;  %v390_v16 = vld [vmem:[%s7608_s10 + $0xe8] sm:$0xff] }
  0x19   : > { %407 = vst.msk [vmem:[#allocation2 + $0xc1] sm:$0xff] %vm279_vm1, %v375_v4 }
  0x1a   : > { %289 = vst.msk [vmem:[#allocation2 + $0x18] sm:$0x1] %vm288_vm2, %v7525_v1 }
  0x1b   : > { %290 = vst.msk [vmem:[#allocation2 + $0x30] sm:$0x1] %vm288_vm2, %v7525_v1 }
  0x1c   : > { %291 = vst.msk [vmem:[#allocation2 + $0x48] sm:$0x1] %vm288_vm2, %v7525_v1  ;;  %6904 = vmatmul.msk.f32.gmra.mxu0 %vm279_vm1, %v426_v5  ;;  %v373_v5 = vld [vmem:[%s7608_s10 + $0x60] sm:$0xff] }
  0x1d   : > { %292 = vst.msk [vmem:[#allocation2 + $0x60] sm:$0x1] %vm288_vm2, %v7525_v1 }
  0x1e   : > { %293 = vst.msk [vmem:[#allocation2 + $0x78] sm:$0x1] %vm288_vm2, %v7525_v1  ;;  %6937 = vmatmul.msk.f32.gmra.mxu1 %vm279_vm1, %v704_v26 }
  0x1f   : > { %294 = vst.msk [vmem:[#allocation2 + $0x90] sm:$0x1] %vm288_vm2, %v7525_v1 }
  0x20   : > { %v441_v6 = vld [vmem:[#allocation2 + $0xc0] sm:$0xff]  ;;  %295 = vst.msk [vmem:[#allocation2 + $0xa8] sm:$0x1] %vm288_vm2, %v7525_v1 }
  0x21   : > { %v7638_v7 = vld [vmem:[#allocation2 + $0xc1] sm:$0xff]  ;;  %6919 = vmatmul.msk.f32.vlgmr.msra.gmra.mxu2 %vm279_vm1, %v441_v6  ;;  %297 = vst.msk [vmem:[#allocation2 + $0xd8] sm:$0x1] %vm288_vm2, %v7525_v1 }
  0x22   : > { %6952 = vmatmul.msk.f32.vlgmr.msra.gmra.mxu3 %vm279_vm1, %v7638_v7  ;;  %298 = vst.msk [vmem:[#allocation2 + $0xf0] sm:$0x1] %vm288_vm2, %v7525_v1 }
  0x23   : > { %299 = vst.msk [vmem:[#allocation2 + $0x108] sm:$0x1] %vm288_vm2, %v7525_v1 }
  0x24   : > { %300 = vst.msk [vmem:[#allocation2 + $0x120] sm:$0x1] %vm288_vm2, %v7525_v1 }
  0x25   : > { %301 = vst.msk [vmem:[#allocation2 + $0x138] sm:$0x1] %vm288_vm2, %v7525_v1 }
  0x26   : > { %302 = vst.msk [vmem:[#allocation2 + $0x150] sm:$0x1] %vm288_vm2, %v7525_v1 }
  0x27   : > { %303 = vst.msk [vmem:[#allocation2 + $0x168] sm:$0x1] %vm288_vm2, %v7525_v1 }
  0x28   : > { %304 = vst.msk [vmem:[#allocation2 + $0x180] sm:$0x1] %vm288_vm2, %v7525_v1 }
  0x29   : > { %305 = vst.msk [vmem:[#allocation2 + $0x29] sm:$0x1] %vm288_vm2, %v7525_v1 }
  0x2a   : > { %306 = vst.msk [vmem:[#allocation2 + $0x41] sm:$0x1] %vm288_vm2, %v7525_v1 }
  0x2b   : > { %307 = vst.msk [vmem:[#allocation2 + $0x59] sm:$0x1] %vm288_vm2, %v7525_v1 }
  0x2c   : > { %308 = vst.msk [vmem:[#allocation2 + $0x71] sm:$0x1] %vm288_vm2, %v7525_v1 }
  0x2d   : > { %309 = vst.msk [vmem:[#allocation2 + $0x89] sm:$0x1] %vm288_vm2, %v7525_v1 }
  0x2e   : > { %310 = vst.msk [vmem:[#allocation2 + $0xa1] sm:$0x1] %vm288_vm2, %v7525_v1 }
  0x2f   : > { %311 = vst.msk [vmem:[#allocation2 + $0xb9] sm:$0x1] %vm288_vm2, %v7525_v1 }
  0x30   : > { %312 = vst.msk [vmem:[#allocation2 + $0xd1] sm:$0x1] %vm288_vm2, %v7525_v1 }
  0x31   : > { %313 = vst.msk [vmem:[#allocation2 + $0xe9] sm:$0x1] %vm288_vm2, %v7525_v1 }
  0x32   : > { %314 = vst.msk [vmem:[#allocation2 + $0x101] sm:$0x1] %vm288_vm2, %v7525_v1 }
  0x33   : > { %315 = vst.msk [vmem:[#allocation2 + $0x119] sm:$0x1] %vm288_vm2, %v7525_v1 }
  0x34   : > { %316 = vst.msk [vmem:[#allocation2 + $0x131] sm:$0x1] %vm288_vm2, %v7525_v1 }
  0x35   : > { %317 = vst.msk [vmem:[#allocation2 + $0x149] sm:$0x1] %vm288_vm2, %v7525_v1 }
  0x36   : > { %318 = vst.msk [vmem:[#allocation2 + $0x161] sm:$0x1] %vm288_vm2, %v7525_v1 }
  0x37   : > { %319 = vst.msk [vmem:[#allocation2 + $0x179] sm:$0x1] %vm288_vm2, %v7525_v1 }
  0x38   : > { %320 = vst.msk [vmem:[#allocation2 + $0x191] sm:$0x1] %vm288_vm2, %v7525_v1 }
  0x39   : > { %329 = vst.msk [vmem:[#allocation3 + $0x18] sm:$0x1] %vm288_vm2, %v7525_v1 }
  0x3a   : > { %330 = vst.msk [vmem:[#allocation3 + $0x30] sm:$0x1] %vm288_vm2, %v7525_v1 }
  0x3b   : > { %331 = vst.msk [vmem:[#allocation3 + $0x48] sm:$0x1] %vm288_vm2, %v7525_v1 }
  0x3c   : > { %332 = vst.msk [vmem:[#allocation3 + $0x60] sm:$0x1] %vm288_vm2, %v7525_v1 }
  0x3d   : > { %333 = vst.msk [vmem:[#allocation3 + $0x78] sm:$0x1] %vm288_vm2, %v7525_v1 }
  0x3e   : > { %334 = vst.msk [vmem:[#allocation3 + $0x90] sm:$0x1] %vm288_vm2, %v7525_v1 }
  0x3f   : > { %335 = vst.msk [vmem:[#allocation3 + $0xa8] sm:$0x1] %vm288_vm2, %v7525_v1 }
  0x40   : > { %336 = vst.msk [vmem:[#allocation3 + $0xc0] sm:$0x1] %vm288_vm2, %v7525_v1 }
  0x41   : > { %337 = vst.msk [vmem:[#allocation3 + $0xd8] sm:$0x1] %vm288_vm2, %v7525_v1 }
  0x42   : > { %338 = vst.msk [vmem:[#allocation3 + $0xf0] sm:$0x1] %vm288_vm2, %v7525_v1 }
  0x43   : > { %339 = vst.msk [vmem:[#allocation3 + $0x108] sm:$0x1] %vm288_vm2, %v7525_v1 }
  0x44   : > { %340 = vst.msk [vmem:[#allocation3 + $0x120] sm:$0x1] %vm288_vm2, %v7525_v1 }
  0x45   : > { %341 = vst.msk [vmem:[#allocation3 + $0x138] sm:$0x1] %vm288_vm2, %v7525_v1 }
  0x46   : > { %342 = vst.msk [vmem:[#allocation3 + $0x150] sm:$0x1] %vm288_vm2, %v7525_v1 }
  0x47   : > { %343 = vst.msk [vmem:[#allocation3 + $0x168] sm:$0x1] %vm288_vm2, %v7525_v1 }
  0x48   : > { %344 = vst.msk [vmem:[#allocation3 + $0x180] sm:$0x1] %vm288_vm2, %v7525_v1 }
  0x49   : > { %345 = vst.msk [vmem:[#allocation3 + $0x29] sm:$0x1] %vm288_vm2, %v7525_v1 }
  0x4a   : > { %346 = vst.msk [vmem:[#allocation3 + $0x41] sm:$0x1] %vm288_vm2, %v7525_v1 }
  0x4b   : > { %347 = vst.msk [vmem:[#allocation3 + $0x59] sm:$0x1] %vm288_vm2, %v7525_v1 }
  0x4c   : > { %348 = vst.msk [vmem:[#allocation3 + $0x71] sm:$0x1] %vm288_vm2, %v7525_v1 }
  0x4d   : > { %349 = vst.msk [vmem:[#allocation3 + $0x89] sm:$0x1] %vm288_vm2, %v7525_v1 }
  0x4e   : > { %350 = vst.msk [vmem:[#allocation3 + $0xa1] sm:$0x1] %vm288_vm2, %v7525_v1 }
  0x4f   : > { %351 = vst.msk [vmem:[#allocation3 + $0xb9] sm:$0x1] %vm288_vm2, %v7525_v1 }
  0x50   : > { %352 = vst.msk [vmem:[#allocation3 + $0xd1] sm:$0x1] %vm288_vm2, %v7525_v1 }
  0x51   : > { %353 = vst.msk [vmem:[#allocation3 + $0xe9] sm:$0x1] %vm288_vm2, %v7525_v1 }
  0x52   : > { %354 = vst.msk [vmem:[#allocation3 + $0x101] sm:$0x1] %vm288_vm2, %v7525_v1 }
  0x53   : > { %355 = vst.msk [vmem:[#allocation3 + $0x119] sm:$0x1] %vm288_vm2, %v7525_v1 }
  0x54   : > { %356 = vst.msk [vmem:[#allocation3 + $0x131] sm:$0x1] %vm288_vm2, %v7525_v1 }
  0x55   : > { %357 = vst.msk [vmem:[#allocation3 + $0x149] sm:$0x1] %vm288_vm2, %v7525_v1 }
  0x56   : > { %358 = vst.msk [vmem:[#allocation3 + $0x161] sm:$0x1] %vm288_vm2, %v7525_v1 }
  0x57   : > { %359 = vst.msk [vmem:[#allocation3 + $0x179] sm:$0x1] %vm288_vm2, %v7525_v1 }
  0x58   : > { %360 = vst.msk [vmem:[#allocation3 + $0x191] sm:$0x1] %vm288_vm2, %v7525_v1 }
  0x59   : > { %408 = vst.msk [vmem:[#allocation2 + $0xc9] sm:$0xff] %vm279_vm1, %v376_v11 }
  0x5a   : > { %393 = vst.msk [vmem:[#allocation2 + $0x19] sm:$0xff] %vm279_vm1, %v361_v12  ;;  %v374_v12 = vld [vmem:[%s7608_s10 + $0x68] sm:$0xff] }
  0x5b   : > { %409 = vst.msk [vmem:[#allocation2 + $0xd9] sm:$0xff] %vm279_vm1, %v377_v13 }
  0x5c   : > { %394 = vst.msk [vmem:[#allocation2 + $0x21] sm:$0xff] %vm279_vm1, %v362_v14 }
  0x5d   : > { %410 = vst.msk [vmem:[#allocation2 + $0xe1] sm:$0xff] %vm279_vm1, %v378_v15 }
  0x5e   : > { %395 = vst.msk [vmem:[#allocation2 + $0x31] sm:$0xff] %vm279_vm1, %v363_v17 }
  0x5f   : > { %411 = vst.msk [vmem:[#allocation2 + $0xf1] sm:$0xff] %vm279_vm1, %v379_v18 }
  0x60   : > { %v7785_v22 = vld [vmem:[#allocation2 + $0xc8] sm:$0xff]  ;;  %396 = vst.msk [vmem:[#allocation2 + $0x39] sm:$0xff] %vm279_vm1, %v364_v19 }
  0x61   : > { %v7787_v23 = vld [vmem:[#allocation2 + $0xc9] sm:$0xff]  ;;  %6920 = vmatmul.msk.f32.gmra.mxu2 %vm279_vm1, %v7785_v22  ;;  %v7795_v25 = vld [vmem:[#allocation2 + $0x18] sm:$0xff]  ;;  %412 = vst.msk [vmem:[#allocation2 + $0xf9] sm:$0xff] %vm279_vm1, %v380_v20 }
  0x62   : > { %6953 = vmatmul.msk.f32.gmra.mxu3 %vm279_vm1, %v7787_v23  ;;  %6905 = vmatmul.msk.f32.gmra.mxu0 %vm279_vm1, %v7795_v25  ;;  %397 = vst.msk [vmem:[#allocation2 + $0x49] sm:$0xff] %vm279_vm1, %v365_v21  ;;  %v7805_v28 = vld [vmem:[#allocation2 + $0xd8] sm:$0xff] }
  0x63   : > { %413 = vst.msk [vmem:[#allocation2 + $0x109] sm:$0xff] %vm279_vm1, %v381_v24  ;;  %v7807_v29 = vld [vmem:[#allocation2 + $0xd9] sm:$0xff]  ;;  %v7839_v38 = vld [vmem:[#allocation2 + $0x21] sm:$0xff] }
  0x64   : > { %398 = vst.msk [vmem:[#allocation2 + $0x51] sm:$0xff] %vm279_vm1, %v366_v27  ;;  %v7809_v30 = vld [vmem:[#allocation2 + $0x20] sm:$0xff] }
  0x65   : > { %414 = vst.msk [vmem:[#allocation2 + $0x111] sm:$0xff] %vm279_vm1, %v382_v31  ;;  %v7819_v32 = vld [vmem:[#allocation2 + $0x19] sm:$0xff]  ;;  %v7827_v35 = vld [vmem:[#allocation2 + $0xe1] sm:$0xff]  ;;  %v7829_v36 = vld [vmem:[#allocation2 + $0x30] sm:$0xff] }
  0x66   : > { %6938 = vmatmul.msk.f32.gmra.mxu1 %vm279_vm1, %v7819_v32  ;;  %399 = vst.msk [vmem:[#allocation2 + $0x61] sm:$0xff] %vm279_vm1, %v367_v33  ;;  %v7825_v34 = vld [vmem:[#allocation2 + $0xe0] sm:$0xff]  ;;  %v7845_v40 = vld [vmem:[#allocation2 + $0xf0] sm:$0xff] }
  0x67   : > { %415 = vst.msk [vmem:[#allocation2 + $0x121] sm:$0xff] %vm279_vm1, %v383_v37  ;;  %v7847_v41 = vld [vmem:[#allocation2 + $0xf1] sm:$0xff]  ;;  %v7879_v50 = vld [vmem:[#allocation2 + $0x39] sm:$0xff] }
  0x68   : > { %400 = vst.msk [vmem:[#allocation2 + $0x69] sm:$0xff] %vm279_vm1, %v368_v39  ;;  %v7849_v42 = vld [vmem:[#allocation2 + $0x38] sm:$0xff] }
  0x69   : > { %6921 = vmatmul.msk.f32.gmra.mxu2 %vm279_vm1, %v7805_v28  ;;  %416 = vst.msk [vmem:[#allocation2 + $0x129] sm:$0xff] %vm279_vm1, %v384_v43  ;;  %v7859_v44 = vld [vmem:[#allocation2 + $0x31] sm:$0xff]  ;;  %v7867_v47 = vld [vmem:[#allocation2 + $0xf9] sm:$0xff]  ;;  %v7869_v48 = vld [vmem:[#allocation2 + $0x48] sm:$0xff] }
  0x6a   : > { %6954 = vmatmul.msk.f32.gmra.mxu3 %vm279_vm1, %v7807_v29  ;;  %6906 = vmatmul.msk.f32.gmra.mxu0 %vm279_vm1, %v7809_v30  ;;  %401 = vst.msk [vmem:[#allocation2 + $0x79] sm:$0xff] %vm279_vm1, %v369_v45  ;;  %v7865_v46 = vld [vmem:[#allocation2 + $0xf8] sm:$0xff]  ;;  %v447_v52 = vld [vmem:[#allocation2 + $0x108] sm:$0xff] }
  0x6b   : > { %417 = vst.msk [vmem:[#allocation2 + $0x139] sm:$0xff] %vm279_vm1, %v385_v49  ;;  %v7885_v53 = vld [vmem:[#allocation2 + $0x109] sm:$0xff]  ;;  %v7910_v62 = vld [vmem:[#allocation2 + $0x51] sm:$0xff] }
  0x6c   : > { %402 = vst.msk [vmem:[#allocation2 + $0x81] sm:$0xff] %vm279_vm1, %v370_v51  ;;  %v7887_v54 = vld [vmem:[#allocation2 + $0x50] sm:$0xff]  ;;  %v2441_v37 = vld [vmem:[%s10271_s1 + $0x18] sm:$0xf] }
  0x6d   : > { %418 = vst.msk [vmem:[#allocation2 + $0x141] sm:$0xff] %vm279_vm1, %v386_v55  ;;  %v7896_v56 = vld [vmem:[#allocation2 + $0x49] sm:$0xff]  ;;  %v726_v59 = vld [vmem:[#allocation2 + $0x111] sm:$0xff]  ;;  %v7902_v60 = vld [vmem:[#allocation2 + $0x60] sm:$0xff]  ;;  %7100 = vmatpush.msk.msra.mxu2 %vm554_vm0, %v2441_v37 }
  0x6e   : > { %6939 = vmatmul.msk.f32.gmra.mxu1 %vm279_vm1, %v7839_v38  ;;  %403 = vst.msk [vmem:[#allocation2 + $0x91] sm:$0xff] %vm279_vm1, %v371_v57  ;;  %v448_v58 = vld [vmem:[#allocation2 + $0x110] sm:$0xff]  ;;  %v449_v0 = vld [vmem:[#allocation2 + $0x120] sm:$0xff] }
  0x6f   : > { %419 = vst.msk [vmem:[#allocation2 + $0x151] sm:$0xff] %vm279_vm1, %v387_v61  ;;  %v727_v1 = vld [vmem:[#allocation2 + $0x121] sm:$0xff]  ;;  %v7938_v11 = vld [vmem:[#allocation2 + $0x69] sm:$0xff] }
  0x70   : > { %404 = vst.msk [vmem:[#allocation2 + $0x99] sm:$0xff] %vm279_vm1, %v372_v63  ;;  %v7916_v2 = vld [vmem:[#allocation2 + $0x68] sm:$0xff] }
  0x71   : > { %6922 = vmatmul.msk.f32.gmra.mxu2 %vm279_vm1, %v7825_v34  ;;  %420 = vst.msk [vmem:[#allocation2 + $0x159] sm:$0xff] %vm279_vm1, %v388_v3  ;;  %v7924_v4 = vld [vmem:[#allocation2 + $0x61] sm:$0xff]  ;;  %v728_v8 = vld [vmem:[#allocation2 + $0x129] sm:$0xff]  ;;  %v7930_v9 = vld [vmem:[#allocation2 + $0x78] sm:$0xff] }
  0x72   : > { %6955 = vmatmul.msk.f32.gmra.mxu3 %vm279_vm1, %v7827_v35  ;;  %6907 = vmatmul.msk.f32.gmra.mxu0 %vm279_vm1, %v7829_v36  ;;  %405 = vst.msk [vmem:[#allocation2 + $0xa9] sm:$0xff] %vm279_vm1, %v373_v5  ;;  %v450_v6 = vld [vmem:[#allocation2 + $0x128] sm:$0xff]  ;;  %v451_v13 = vld [vmem:[#allocation2 + $0x138] sm:$0xff] }
  0x73   : > { %421 = vst.msk [vmem:[#allocation2 + $0x169] sm:$0xff] %vm279_vm1, %v389_v10  ;;  %v729_v14 = vld [vmem:[#allocation2 + $0x139] sm:$0xff]  ;;  %v7961_v24 = vld [vmem:[#allocation2 + $0x81] sm:$0xff] }
  0x74   : > { %406 = vst.msk [vmem:[#allocation2 + $0xb1] sm:$0xff] %vm279_vm1, %v374_v12  ;;  %v7944_v15 = vld [vmem:[#allocation2 + $0x80] sm:$0xff] }
  0x75   : > { %422 = vst.msk [vmem:[#allocation2 + $0x171] sm:$0xff] %vm279_vm1, %v390_v16  ;;  %v7952_v17 = vld [vmem:[#allocation2 + $0x79] sm:$0xff]  ;;  %v730_v20 = vld [vmem:[#allocation2 + $0x141] sm:$0xff]  ;;  %v7957_v21 = vld [vmem:[#allocation2 + $0x90] sm:$0xff] }
  0x76   : > { %6940 = vmatmul.msk.f32.gmra.mxu1 %vm279_vm1, %v7859_v44  ;;  %v452_v19 = vld [vmem:[#allocation2 + $0x140] sm:$0xff]  ;;  %v453_v27 = vld [vmem:[#allocation2 + $0x150] sm:$0xff] }
  0x77   : > { %v731_v31 = vld [vmem:[#allocation2 + $0x151] sm:$0xff]  ;;  %v3123_v10 = vld [vmem:[%s10271_s1 + $0x20] sm:$0xf] }
  0x78   : > { %v7968_v33 = vld [vmem:[#allocation2 + $0x98] sm:$0xff]  ;;  %7166 = vmatpush.msk.msra.mxu0 %vm554_vm0, %v3123_v10 }
  0x79   : > { %6923 = vmatmul.msk.f32.gmra.mxu2 %vm279_vm1, %v7845_v40  ;;  %v7975_v39 = vld [vmem:[#allocation2 + $0x91] sm:$0xff]  ;;  %v732_v49 = vld [vmem:[#allocation2 + $0x159] sm:$0xff]  ;;  %v7983_v51 = vld [vmem:[#allocation2 + $0xa8] sm:$0xff] }
  0x7a   : > { %6956 = vmatmul.msk.f32.gmra.mxu3 %vm279_vm1, %v7847_v41  ;;  %6908 = vmatmul.msk.f32.gmra.mxu0 %vm279_vm1, %v7849_v42  ;;  %v454_v45 = vld [vmem:[#allocation2 + $0x158] sm:$0xff]  ;;  %v455_v61 = vld [vmem:[#allocation2 + $0x168] sm:$0xff] }
  0x7b   : > { %v733_v63 = vld [vmem:[#allocation2 + $0x169] sm:$0xff]  ;;  %v1046_v16 = vld [vmem:[#allocation2 + $0x1a] sm:$0xff] }
  0x7c   : > { %v456_v3 = vld [vmem:[#allocation2 + $0x170] sm:$0xff] }
  0x7d   : > { %v734_v5 = vld [vmem:[#allocation2 + $0x171] sm:$0xff] }
  0x7e   : > { %6941 = vmatmul.msk.f32.gmra.mxu1 %vm279_vm1, %v7879_v50 }
  0x81   : > { %6924 = vmatmul.msk.f32.gmra.mxu2 %vm279_vm1, %v7865_v46 }
  0x82   : > { %6957 = vmatmul.msk.f32.gmra.mxu3 %vm279_vm1, %v7867_v47  ;;  %6909 = vmatmul.msk.f32.gmra.mxu0 %vm279_vm1, %v7869_v48 }
  0x86   : > { %6942 = vmatmul.msk.f32.gmra.mxu1 %vm279_vm1, %v7896_v56 }
  0x89   : > { %6925 = vmatmul.msk.f32.gmra.mxu2 %vm279_vm1, %v447_v52  ;;  %v7987_v52 = vld [vmem:[#allocation2 + $0x99] sm:$0xff] }
  0x8a   : > { %6958 = vmatmul.msk.f32.gmra.mxu3 %vm279_vm1, %v7885_v53  ;;  %6910 = vmatmul.msk.f32.gmra.mxu0 %vm279_vm1, %v7887_v54 }
  0x8e   : > { %6943 = vmatmul.msk.f32.gmra.mxu1 %vm279_vm1, %v7910_v62 }
  0x91   : > { %6926 = vmatmul.msk.f32.gmra.mxu2 %vm279_vm1, %v448_v58  ;;  %v575_v18 = vpop.f32.mrf.mxu0  ;;  %v2782_v58 = vld [vmem:[%s10271_s1 + $0x1c] sm:$0xf] }
  0x92   : > { %6959 = vmatmul.msk.f32.gmra.mxu3 %vm279_vm1, %v726_v59  ;;  %6911 = vmatmul.msk.f32.gmra.mxu0 %vm279_vm1, %v7902_v60  ;;  %671 = vst.msk [vmem:[#allocation4] sm:$0xff] %vm279_vm1, %v575_v18  ;;  %v1045_v18 = vld [vmem:[#allocation2 + $0xa] sm:$0xff] }
  0x93   : > { %7133 = vmatpush.msk.msra.mxu3 %vm554_vm0, %v2782_v58  ;;  %v852_v12 = vpop.f32.mrf.mxu1 }
  0x96   : > { %6944 = vmatmul.msk.f32.gmra.mxu1 %vm279_vm1, %v7924_v4 }
  0x99   : > { %6927 = vmatmul.msk.f32.gmra.mxu2 %vm279_vm1, %v449_v0  ;;  %v578_v26 = vpop.f32.mrf.mxu0  ;;  %v7998_v0 = vld [vmem:[#allocation2 + $0xb0] sm:$0xff] }
  0x9a   : > { %6960 = vmatmul.msk.f32.gmra.mxu3 %vm279_vm1, %v727_v1  ;;  %6912 = vmatmul.msk.f32.gmra.mxu0 %vm279_vm1, %v7916_v2  ;;  %672 = vst.msk [vmem:[#allocation4 + $0x8] sm:$0xff] %vm279_vm1, %v578_v26  ;;  %v8004_v1 = vld [vmem:[#allocation2 + $0xa9] sm:$0xff] }
  0x9e   : > { %6945 = vmatmul.msk.f32.gmra.mxu1 %vm279_vm1, %v7938_v11 }
  0xa1   : > { %6928 = vmatmul.msk.f32.gmra.mxu2 %vm279_vm1, %v450_v6  ;;  %v8012_v6 = vld [vmem:[#allocation2 + $0xb1] sm:$0xff] }
  0xa2   : > { %6961 = vmatmul.msk.f32.gmra.mxu3 %vm279_vm1, %v728_v8  ;;  %6913 = vmatmul.msk.f32.gmra.mxu0 %vm279_vm1, %v7930_v9  ;;  %v1044_v8 = vld [vmem:[#allocation2 + $0x2] sm:$0xff] }
  0xa4   : > { %v623_v43 = vpop.f32.mrf.mxu2 }
  0xa5   : > { %687 = vst.msk [vmem:[#allocation4 + $0x80] sm:$0xff] %vm279_vm1, %v623_v43  ;;  %v900_v55 = vpop.f32.mrf.mxu3 }
  0xa6   : > { %6946 = vmatmul.msk.f32.gmra.mxu1 %vm279_vm1, %v7952_v17 }
  0xa9   : > { %6929 = vmatmul.msk.f32.gmra.mxu2 %vm279_vm1, %v451_v13  ;;  %v948_v13 = vld [vmem:[#allocation4] sm:$0xff] }
  0xaa   : > { %6962 = vmatmul.msk.f32.gmra.mxu3 %vm279_vm1, %v729_v14  ;;  %6914 = vmatmul.msk.f32.gmra.mxu0 %vm279_vm1, %v7944_v15  ;;  %v2099_v14 = vld [vmem:[%s10271_s1 + $0x14] sm:$0xf] }
  0xab   : > { %7067 = vmatpush.msk.msrb.mxu1 %vm554_vm0, %v2099_v14 }
  0xac   : > { %v964_v57 = vld [vmem:[#allocation4 + $0x80] sm:$0xff] }
  0xad   : > { %v996_v59 = vadd.f32 %v964_v57, %v900_v55  ;;  %v1048_v57 = vld [vmem:[#allocation2 + $0x32] sm:$0xff] }
  0xae   : > { %6947 = vmatmul.msk.f32.gmra.mxu1 %vm279_vm1, %v7961_v24 }
  0xaf   : > { %1028 = vst.msk [vmem:[#allocation4 + $0x80] sm:$0xff] %vm279_vm1, %v996_v59 }
  0xb1   : > { %6930 = vmatmul.msk.f32.gmra.mxu2 %vm279_vm1, %v452_v19 }
  0xb2   : > { %6963 = vmatmul.msk.f32.gmra.mxu3 %vm279_vm1, %v730_v20  ;;  %6915 = vmatmul.msk.f32.gmra.mxu0 %vm279_vm1, %v7957_v21  ;;  %v949_v20 = vld [vmem:[#allocation4 + $0x8] sm:$0xff] }
  0xb6   : > { %6948 = vmatmul.msk.f32.gmra.mxu1 %vm279_vm1, %v7975_v39 }
  0xb9   : > { %6931 = vmatmul.msk.f32.gmra.mxu2 %vm279_vm1, %v453_v27 }
  0xba   : > { %6964 = vmatmul.msk.f32.gmra.mxu3 %vm279_vm1, %v731_v31  ;;  %6916 = vmatmul.msk.f32.gmra.mxu0 %vm279_vm1, %v7968_v33  ;;  %v1047_v31 = vld [vmem:[#allocation2 + $0x22] sm:$0xff] }
  0xbe   : > { %6949 = vmatmul.msk.f32.gmra.mxu1 %vm279_vm1, %v7987_v52 }
  0xc1   : > { %6932 = vmatmul.msk.f32.gmra.mxu2 %vm279_vm1, %v454_v45 }
  0xc2   : > { %6965 = vmatmul.msk.f32.gmra.mxu3 %vm279_vm1, %v732_v49  ;;  %6917 = vmatmul.msk.f32.gmra.mxu0 %vm279_vm1, %v7983_v51 }
  0xc6   : > { %6950 = vmatmul.msk.f32.gmra.mxu1 %vm279_vm1, %v8004_v1 }
  0xc9   : > { %6933 = vmatmul.msk.f32.gmra.mxu2 %vm279_vm1, %v455_v61 }
  0xca   : > { %6966 = vmatmul.msk.f32.gmra.mxu3 %vm279_vm1, %v733_v63  ;;  %6918 = vmatmul.msk.f32.gmra.mxu0 %vm279_vm1, %v7998_v0 }
  0xce   : > { %6951 = vmatmul.msk.f32.gmra.mxu1 %vm279_vm1, %v8012_v6 }
  0xd1   : > { %6934 = vmatmul.msk.f32.gmra.mxu2 %vm279_vm1, %v456_v3 }
  0xd2   : > { %6967 = vmatmul.msk.f32.gmra.mxu3 %vm279_vm1, %v734_v5  ;;  %7035 = vmatmul.msk.f32.vlgmr.msrb.gmra.mxu0 %vm279_vm1, %v7819_v32  ;;  %v980_v32 = vadd.f32 %v948_v13, %v852_v12 }
  0xd4   : > { %1012 = vst.msk [vmem:[#allocation4] sm:$0xff] %vm279_vm1, %v980_v32 }
  0xd6   : > { %7068 = vmatmul.msk.f32.vlgmr.msrb.gmra.mxu1 %vm279_vm1, %v1046_v16 }
  0xd9   : > { %6969 = vmatmul.msk.f32.vlgmr.msrb.gmra.mxu2 %vm279_vm1, %v1044_v8  ;;  %v1049_v8 = vld [vmem:[#allocation2 + $0x3a] sm:$0xff] }
  0xda   : > { %7002 = vmatmul.msk.f32.vlgmr.msrb.gmra.mxu3 %vm279_vm1, %v7795_v25  ;;  %7036 = vmatmul.msk.f32.gmra.mxu0 %vm279_vm1, %v7839_v38  ;;  %v855_v25 = vpop.f32.mrf.mxu1 }
  0xdb   : > { %v981_v38 = vadd.f32 %v949_v20, %v855_v25 }
  0xdd   : > { %1013 = vst.msk [vmem:[#allocation4 + $0x8] sm:$0xff] %vm279_vm1, %v981_v38 }
  0xde   : > { %7069 = vmatmul.msk.f32.gmra.mxu1 %vm279_vm1, %v1047_v31 }
  0xdf   : > { %v581_v19 = vpop.f32.mrf.mxu0 }
  0xe0   : > { %673 = vst.msk [vmem:[#allocation4 + $0x10] sm:$0xff] %vm279_vm1, %v581_v19 }
  0xe1   : > { %6970 = vmatmul.msk.f32.gmra.mxu2 %vm279_vm1, %v1045_v18  ;;  %v1050_v18 = vld [vmem:[#allocation2 + $0x4a] sm:$0xff] }
  0xe2   : > { %7003 = vmatmul.msk.f32.gmra.mxu3 %vm279_vm1, %v7809_v30  ;;  %7037 = vmatmul.msk.f32.gmra.mxu0 %vm279_vm1, %v7859_v44 }
  0xe3   : > { %v858_v43 = vpop.f32.mrf.mxu1 }
  0xe4   : > { %v626_v26 = vpop.f32.mrf.mxu2 }
  0xe5   : > { %v903_v27 = vpop.f32.mrf.mxu3  ;;  %688 = vst.msk [vmem:[#allocation4 + $0x88] sm:$0xff] %vm279_vm1, %v626_v26 }
  0xe6   : > { %7070 = vmatmul.msk.f32.gmra.mxu1 %vm279_vm1, %v1048_v57 }
  0xe7   : > { %v584_v37 = vpop.f32.mrf.mxu0  ;;  %v950_v45 = vld [vmem:[#allocation4 + $0x10] sm:$0xff] }
  0xe8   : > { %674 = vst.msk [vmem:[#allocation4 + $0x18] sm:$0xff] %vm279_vm1, %v584_v37  ;;  %v982_v30 = vadd.f32 %v950_v45, %v858_v43 }
  0xe9   : > { %6971 = vmatmul.msk.f32.gmra.mxu2 %vm279_vm1, %v1046_v16 }
  0xea   : > { %7004 = vmatmul.msk.f32.gmra.mxu3 %vm279_vm1, %v7829_v36  ;;  %7038 = vmatmul.msk.f32.gmra.mxu0 %vm279_vm1, %v7879_v50  ;;  %1014 = vst.msk [vmem:[#allocation4 + $0x10] sm:$0xff] %vm279_vm1, %v982_v30 }
  0xeb   : > { %v861_v36 = vpop.f32.mrf.mxu1 }
  0xec   : > { %v965_v44 = vld [vmem:[#allocation4 + $0x88] sm:$0xff]  ;;  %v629_v49 = vpop.f32.mrf.mxu2 }
  0xed   : > { %v906_v55 = vpop.f32.mrf.mxu3  ;;  %v997_v58 = vadd.f32 %v965_v44, %v903_v27  ;;  %689 = vst.msk [vmem:[#allocation4 + $0x90] sm:$0xff] %vm279_vm1, %v629_v49 }
  0xee   : > { %7071 = vmatmul.msk.f32.gmra.mxu1 %vm279_vm1, %v1049_v8 }
  0xef   : > { %1029 = vst.msk [vmem:[#allocation4 + $0x88] sm:$0xff] %vm279_vm1, %v997_v58  ;;  %v587_v59 = vpop.f32.mrf.mxu0  ;;  %v951_v61 = vld [vmem:[#allocation4 + $0x18] sm:$0xff] }
  0xf0   : > { %675 = vst.msk [vmem:[#allocation4 + $0x20] sm:$0xff] %vm279_vm1, %v587_v59  ;;  %v983_v50 = vadd.f32 %v951_v61, %v861_v36 }
  0xf1   : > { %6972 = vmatmul.msk.f32.gmra.mxu2 %vm279_vm1, %v1047_v31  ;;  %v1051_v31 = vld [vmem:[#allocation2 + $0x52] sm:$0xff] }
  0xf2   : > { %7005 = vmatmul.msk.f32.gmra.mxu3 %vm279_vm1, %v7849_v42  ;;  %7039 = vmatmul.msk.f32.gmra.mxu0 %vm279_vm1, %v7896_v56  ;;  %1015 = vst.msk [vmem:[#allocation4 + $0x18] sm:$0xff] %vm279_vm1, %v983_v50 }
  0xf3   : > { %v864_v42 = vpop.f32.mrf.mxu1 }
  0xf4   : > { %v966_v63 = vld [vmem:[#allocation4 + $0x90] sm:$0xff]  ;;  %v632_v3 = vpop.f32.mrf.mxu2 }
  0xf5   : > { %v909_v5 = vpop.f32.mrf.mxu3  ;;  %v998_v10 = vadd.f32 %v966_v63, %v906_v55  ;;  %690 = vst.msk [vmem:[#allocation4 + $0x98] sm:$0xff] %vm279_vm1, %v632_v3  ;;  %v1052_v55 = vld [vmem:[#allocation2 + $0x62] sm:$0xff]  ;;  %v1053_v63 = vld [vmem:[#allocation2 + $0x6a] sm:$0xff] }
  0xf6   : > { %7072 = vmatmul.msk.f32.gmra.mxu1 %vm279_vm1, %v1050_v18 }
  0xf7   : > { %1030 = vst.msk [vmem:[#allocation4 + $0x90] sm:$0xff] %vm279_vm1, %v998_v10  ;;  %v590_v12 = vpop.f32.mrf.mxu0  ;;  %v952_v13 = vld [vmem:[#allocation4 + $0x20] sm:$0xff] }
  0xf8   : > { %676 = vst.msk [vmem:[#allocation4 + $0x28] sm:$0xff] %vm279_vm1, %v590_v12  ;;  %v984_v56 = vadd.f32 %v952_v13, %v864_v42  ;;  %v1054_v13 = vld [vmem:[#allocation2 + $0x7a] sm:$0xff] }
  0xf9   : > { %6973 = vmatmul.msk.f32.gmra.mxu2 %vm279_vm1, %v1048_v57 }
  0xfa   : > { %7006 = vmatmul.msk.f32.gmra.mxu3 %vm279_vm1, %v7869_v48  ;;  %7040 = vmatmul.msk.f32.gmra.mxu0 %vm279_vm1, %v7910_v62  ;;  %1016 = vst.msk [vmem:[#allocation4 + $0x20] sm:$0xff] %vm279_vm1, %v984_v56 }
  0xfb   : > { %v867_v48 = vpop.f32.mrf.mxu1 }
  0xfc   : > { %v967_v32 = vld [vmem:[#allocation4 + $0x98] sm:$0xff]  ;;  %v635_v14 = vpop.f32.mrf.mxu2 }
  0xfd   : > { %v912_v16 = vpop.f32.mrf.mxu3  ;;  %v999_v19 = vadd.f32 %v967_v32, %v909_v5  ;;  %691 = vst.msk [vmem:[#allocation4 + $0xa0] sm:$0xff] %vm279_vm1, %v635_v14 }
  0xfe   : > { %7073 = vmatmul.msk.f32.gmra.mxu1 %vm279_vm1, %v1051_v31 }
  0xff   : > { %1031 = vst.msk [vmem:[#allocation4 + $0x98] sm:$0xff] %vm279_vm1, %v999_v19  ;;  %v593_v25 = vpop.f32.mrf.mxu0  ;;  %v953_v20 = vld [vmem:[#allocation4 + $0x28] sm:$0xff] }
 0x100   : > { %677 = vst.msk [vmem:[#allocation4 + $0x30] sm:$0xff] %vm279_vm1, %v593_v25  ;;  %v985_v62 = vadd.f32 %v953_v20, %v867_v48  ;;  %v1055_v25 = vld [vmem:[#allocation2 + $0x82] sm:$0xff] }
 0x101   : > { %6974 = vmatmul.msk.f32.gmra.mxu2 %vm279_vm1, %v1049_v8 }
 0x102   : > { %7007 = vmatmul.msk.f32.gmra.mxu3 %vm279_vm1, %v7887_v54  ;;  %7041 = vmatmul.msk.f32.gmra.mxu0 %vm279_vm1, %v7924_v4  ;;  %1017 = vst.msk [vmem:[#allocation4 + $0x28] sm:$0xff] %vm279_vm1, %v985_v62 }
 0x103   : > { %v870_v54 = vpop.f32.mrf.mxu1 }
 0x104   : > { %v968_v38 = vld [vmem:[#allocation4 + $0xa0] sm:$0xff]  ;;  %v638_v26 = vpop.f32.mrf.mxu2 }
 0x105   : > { %v915_v27 = vpop.f32.mrf.mxu3  ;;  %v1000_v37 = vadd.f32 %v968_v38, %v912_v16  ;;  %692 = vst.msk [vmem:[#allocation4 + $0xa8] sm:$0xff] %vm279_vm1, %v638_v26 }
 0x106   : > { %7074 = vmatmul.msk.f32.gmra.mxu1 %vm279_vm1, %v1052_v55 }
 0x107   : > { %1032 = vst.msk [vmem:[#allocation4 + $0xa0] sm:$0xff] %vm279_vm1, %v1000_v37  ;;  %v596_v43 = vpop.f32.mrf.mxu0  ;;  %v954_v45 = vld [vmem:[#allocation4 + $0x30] sm:$0xff] }
 0x108   : > { %678 = vst.msk [vmem:[#allocation4 + $0x38] sm:$0xff] %vm279_vm1, %v596_v43  ;;  %v986_v4 = vadd.f32 %v954_v45, %v870_v54 }
 0x109   : > { %6975 = vmatmul.msk.f32.gmra.mxu2 %vm279_vm1, %v1050_v18 }
 0x10a   : > { %7008 = vmatmul.msk.f32.gmra.mxu3 %vm279_vm1, %v7902_v60  ;;  %7042 = vmatmul.msk.f32.gmra.mxu0 %vm279_vm1, %v7938_v11  ;;  %1018 = vst.msk [vmem:[#allocation4 + $0x30] sm:$0xff] %vm279_vm1, %v986_v4 }
 0x10b   : > { %v873_v60 = vpop.f32.mrf.mxu1 }
 0x10c   : > { %v969_v30 = vld [vmem:[#allocation4 + $0xa8] sm:$0xff]  ;;  %v641_v44 = vpop.f32.mrf.mxu2 }
 0x10d   : > { %v918_v49 = vpop.f32.mrf.mxu3  ;;  %v1001_v57 = vadd.f32 %v969_v30, %v915_v27  ;;  %693 = vst.msk [vmem:[#allocation4 + $0xb0] sm:$0xff] %vm279_vm1, %v641_v44  ;;  %v1057_v44 = vld [vmem:[#allocation2 + $0x9a] sm:$0xff] }
 0x10e   : > { %7075 = vmatmul.msk.f32.gmra.mxu1 %vm279_vm1, %v1053_v63 }
 0x10f   : > { %1033 = vst.msk [vmem:[#allocation4 + $0xa8] sm:$0xff] %vm279_vm1, %v1001_v57  ;;  %v599_v58 = vpop.f32.mrf.mxu0  ;;  %v955_v59 = vld [vmem:[#allocation4 + $0x38] sm:$0xff] }
 0x110   : > { %679 = vst.msk [vmem:[#allocation4 + $0x40] sm:$0xff] %vm279_vm1, %v599_v58  ;;  %v987_v11 = vadd.f32 %v955_v59, %v873_v60 }
 0x111   : > { %6976 = vmatmul.msk.f32.gmra.mxu2 %vm279_vm1, %v1051_v31  ;;  %v1056_v31 = vld [vmem:[#allocation2 + $0x92] sm:$0xff] }
 0x112   : > { %7009 = vmatmul.msk.f32.gmra.mxu3 %vm279_vm1, %v7916_v2  ;;  %7043 = vmatmul.msk.f32.gmra.mxu0 %vm279_vm1, %v7952_v17  ;;  %1019 = vst.msk [vmem:[#allocation4 + $0x38] sm:$0xff] %vm279_vm1, %v987_v11  ;;  %v1058_v11 = vld [vmem:[#allocation2 + $0xaa] sm:$0xff] }
 0x113   : > { %v876_v2 = vpop.f32.mrf.mxu1 }
 0x114   : > { %v970_v36 = vld [vmem:[#allocation4 + $0xb0] sm:$0xff]  ;;  %v644_v61 = vpop.f32.mrf.mxu2 }
 0x115   : > { %v921_v50 = vpop.f32.mrf.mxu3  ;;  %v1002_v3 = vadd.f32 %v970_v36, %v918_v49  ;;  %694 = vst.msk [vmem:[#allocation4 + $0xb8] sm:$0xff] %vm279_vm1, %v644_v61 }
 0x116   : > { %7076 = vmatmul.msk.f32.gmra.mxu1 %vm279_vm1, %v1054_v13 }
 0x117   : > { %1034 = vst.msk [vmem:[#allocation4 + $0xb0] sm:$0xff] %vm279_vm1, %v1002_v3  ;;  %v602_v5 = vpop.f32.mrf.mxu0  ;;  %v956_v8 = vld [vmem:[#allocation4 + $0x40] sm:$0xff] }
 0x118   : > { %680 = vst.msk [vmem:[#allocation4 + $0x48] sm:$0xff] %vm279_vm1, %v602_v5  ;;  %v988_v17 = vadd.f32 %v956_v8, %v876_v2  ;;  %v1059_v2 = vld [vmem:[#allocation2 + $0xb2] sm:$0xff] }
 0x119   : > { %6977 = vmatmul.msk.f32.gmra.mxu2 %vm279_vm1, %v1052_v55 }
 0x11a   : > { %7010 = vmatmul.msk.f32.gmra.mxu3 %vm279_vm1, %v7930_v9  ;;  %7044 = vmatmul.msk.f32.gmra.mxu0 %vm279_vm1, %v7961_v24  ;;  %1020 = vst.msk [vmem:[#allocation4 + $0x40] sm:$0xff] %vm279_vm1, %v988_v17  ;;  %v1399_v17 = vld [vmem:[#allocation2 + $0xc0] sm:$0xff] }
 0x11b   : > { %v879_v9 = vpop.f32.mrf.mxu1 }
 0x11c   : > { %v971_v10 = vld [vmem:[#allocation4 + $0xb8] sm:$0xff]  ;;  %v647_v12 = vpop.f32.mrf.mxu2 }
 0x11d   : > { %v924_v42 = vpop.f32.mrf.mxu3  ;;  %v1003_v56 = vadd.f32 %v971_v10, %v921_v50  ;;  %695 = vst.msk [vmem:[#allocation4 + $0xc0] sm:$0xff] %vm279_vm1, %v647_v12 }
 0x11e   : > { %7077 = vmatmul.msk.f32.gmra.mxu1 %vm279_vm1, %v1055_v25 }
 0x11f   : > { %1035 = vst.msk [vmem:[#allocation4 + $0xb8] sm:$0xff] %vm279_vm1, %v1003_v56  ;;  %v605_v32 = vpop.f32.mrf.mxu0  ;;  %v957_v14 = vld [vmem:[#allocation4 + $0x48] sm:$0xff] }
 0x120   : > { %681 = vst.msk [vmem:[#allocation4 + $0x50] sm:$0xff] %vm279_vm1, %v605_v32  ;;  %v989_v24 = vadd.f32 %v957_v14, %v879_v9  ;;  %v1060_v32 = vld [vmem:[#allocation2 + $0xc2] sm:$0xff] }
 0x121   : > { %6978 = vmatmul.msk.f32.gmra.mxu2 %vm279_vm1, %v1053_v63 }
 0x122   : > { %7011 = vmatmul.msk.f32.gmra.mxu3 %vm279_vm1, %v7944_v15  ;;  %7045 = vmatmul.msk.f32.gmra.mxu0 %vm279_vm1, %v7975_v39  ;;  %1021 = vst.msk [vmem:[#allocation4 + $0x48] sm:$0xff] %vm279_vm1, %v989_v24 }
 0x123   : > { %v882_v15 = vpop.f32.mrf.mxu1 }
 0x124   : > { %v972_v16 = vld [vmem:[#allocation4 + $0xc0] sm:$0xff]  ;;  %v650_v18 = vpop.f32.mrf.mxu2 }
 0x125   : > { %v927_v19 = vpop.f32.mrf.mxu3  ;;  %v1004_v48 = vadd.f32 %v972_v16, %v924_v42  ;;  %696 = vst.msk [vmem:[#allocation4 + $0xc8] sm:$0xff] %vm279_vm1, %v650_v18 }
 0x126   : > { %7078 = vmatmul.msk.f32.gmra.mxu1 %vm279_vm1, %v1056_v31 }
 0x127   : > { %1036 = vst.msk [vmem:[#allocation4 + $0xc0] sm:$0xff] %vm279_vm1, %v1004_v48  ;;  %v608_v20 = vpop.f32.mrf.mxu0  ;;  %v958_v62 = vld [vmem:[#allocation4 + $0x50] sm:$0xff] }
 0x128   : > { %682 = vst.msk [vmem:[#allocation4 + $0x58] sm:$0xff] %vm279_vm1, %v608_v20  ;;  %v990_v39 = vadd.f32 %v958_v62, %v882_v15  ;;  %v1061_v48 = vld [vmem:[#allocation2 + $0xca] sm:$0xff] }
 0x129   : > { %6979 = vmatmul.msk.f32.gmra.mxu2 %vm279_vm1, %v1054_v13 }
 0x12a   : > { %7012 = vmatmul.msk.f32.gmra.mxu3 %vm279_vm1, %v7957_v21  ;;  %7046 = vmatmul.msk.f32.gmra.mxu0 %vm279_vm1, %v7987_v52  ;;  %1022 = vst.msk [vmem:[#allocation4 + $0x50] sm:$0xff] %vm279_vm1, %v990_v39  ;;  %v1289_v39 = vld [vmem:[#allocation4] sm:$0xff] }
 0x12b   : > { %v885_v21 = vpop.f32.mrf.mxu1 }
 0x12c   : > { %v973_v38 = vld [vmem:[#allocation4 + $0xc8] sm:$0xff]  ;;  %v653_v26 = vpop.f32.mrf.mxu2 }
 0x12d   : > { %v930_v27 = vpop.f32.mrf.mxu3  ;;  %v1005_v37 = vadd.f32 %v973_v38, %v927_v19  ;;  %697 = vst.msk [vmem:[#allocation4 + $0xd0] sm:$0xff] %vm279_vm1, %v653_v26  ;;  %v1062_v26 = vld [vmem:[#allocation2 + $0xda] sm:$0xff] }
 0x12e   : > { %7079 = vmatmul.msk.f32.gmra.mxu1 %vm279_vm1, %v1057_v44 }
 0x12f   : > { %1037 = vst.msk [vmem:[#allocation4 + $0xc8] sm:$0xff] %vm279_vm1, %v1005_v37  ;;  %v611_v43 = vpop.f32.mrf.mxu0  ;;  %v959_v54 = vld [vmem:[#allocation4 + $0x58] sm:$0xff] }
 0x130   : > { %683 = vst.msk [vmem:[#allocation4 + $0x60] sm:$0xff] %vm279_vm1, %v611_v43  ;;  %v991_v52 = vadd.f32 %v959_v54, %v885_v21  ;;  %v1290_v21 = vld [vmem:[#allocation4 + $0x8] sm:$0xff] }
 0x131   : > { %6980 = vmatmul.msk.f32.gmra.mxu2 %vm279_vm1, %v1055_v25 }
 0x132   : > { %7013 = vmatmul.msk.f32.gmra.mxu3 %vm279_vm1, %v7968_v33  ;;  %7047 = vmatmul.msk.f32.gmra.mxu0 %vm279_vm1, %v8004_v1  ;;  %1023 = vst.msk [vmem:[#allocation4 + $0x58] sm:$0xff] %vm279_vm1, %v991_v52  ;;  %v1063_v52 = vld [vmem:[#allocation2 + $0xe2] sm:$0xff] }
 0x133   : > { %v888_v33 = vpop.f32.mrf.mxu1 }
 0x134   : > { %v974_v45 = vld [vmem:[#allocation4 + $0xd0] sm:$0xff]  ;;  %v656_v4 = vpop.f32.mrf.mxu2 }
 0x135   : > { %v933_v30 = vpop.f32.mrf.mxu3  ;;  %v1006_v49 = vadd.f32 %v974_v45, %v930_v27  ;;  %698 = vst.msk [vmem:[#allocation4 + $0xd8] sm:$0xff] %vm279_vm1, %v656_v4 }
 0x136   : > { %7080 = vmatmul.msk.f32.gmra.mxu1 %vm279_vm1, %v1058_v11 }
 0x137   : > { %1038 = vst.msk [vmem:[#allocation4 + $0xd0] sm:$0xff] %vm279_vm1, %v1006_v49  ;;  %v614_v55 = vpop.f32.mrf.mxu0  ;;  %v960_v57 = vld [vmem:[#allocation4 + $0x60] sm:$0xff]  ;;  %v1291_v49 = vld [vmem:[#allocation4 + $0x10] sm:$0xff] }
 0x138   : > { %684 = vst.msk [vmem:[#allocation4 + $0x68] sm:$0xff] %vm279_vm1, %v614_v55  ;;  %v992_v1 = vadd.f32 %v960_v57, %v888_v33  ;;  %v1064_v33 = vld [vmem:[#allocation2 + $0xf2] sm:$0xff] }
 0x139   : > { %6981 = vmatmul.msk.f32.gmra.mxu2 %vm279_vm1, %v1056_v31 }
 0x13a   : > { %7014 = vmatmul.msk.f32.gmra.mxu3 %vm279_vm1, %v7983_v51  ;;  %7048 = vmatmul.msk.f32.gmra.mxu0 %vm279_vm1, %v8012_v6  ;;  %1024 = vst.msk [vmem:[#allocation4 + $0x60] sm:$0xff] %vm279_vm1, %v992_v1 }
 0x13b   : > { %v891_v51 = vpop.f32.mrf.mxu1 }
 0x13c   : > { %v975_v58 = vld [vmem:[#allocation4 + $0xd8] sm:$0xff]  ;;  %v659_v60 = vpop.f32.mrf.mxu2 }
 0x13d   : > { %v936_v59 = vpop.f32.mrf.mxu3  ;;  %v1007_v36 = vadd.f32 %v975_v58, %v933_v30  ;;  %699 = vst.msk [vmem:[#allocation4 + $0xe0] sm:$0xff] %vm279_vm1, %v659_v60 }
 0x13e   : > { %7081 = vmatmul.msk.f32.gmra.mxu1 %vm279_vm1, %v1059_v2 }
 0x13f   : > { %1039 = vst.msk [vmem:[#allocation4 + $0xd8] sm:$0xff] %vm279_vm1, %v1007_v36  ;;  %v617_v61 = vpop.f32.mrf.mxu0  ;;  %v961_v6 = vld [vmem:[#allocation4 + $0x68] sm:$0xff]  ;;  %v1292_v36 = vld [vmem:[#allocation4 + $0x18] sm:$0xff] }
 0x140   : > { %685 = vst.msk [vmem:[#allocation4 + $0x70] sm:$0xff] %vm279_vm1, %v617_v61  ;;  %v993_v50 = vadd.f32 %v961_v6, %v891_v51  ;;  %v1065_v51 = vld [vmem:[#allocation2 + $0xfa] sm:$0xff] }
 0x141   : > { %6982 = vmatmul.msk.f32.gmra.mxu2 %vm279_vm1, %v1057_v44 }
 0x142   : > { %7015 = vmatmul.msk.f32.gmra.mxu3 %vm279_vm1, %v7998_v0  ;;  %7049 = vmatmul.msk.f32.gmra.mxu0 %vm279_vm1, %v7638_v7  ;;  %1025 = vst.msk [vmem:[#allocation4 + $0x68] sm:$0xff] %vm279_vm1, %v993_v50 }
 0x143   : > { %v894_v7 = vpop.f32.mrf.mxu1 }
 0x144   : > { %v976_v63 = vld [vmem:[#allocation4 + $0xe0] sm:$0xff]  ;;  %v662_v3 = vpop.f32.mrf.mxu2 }
 0x145   : > { %v939_v5 = vpop.f32.mrf.mxu3  ;;  %v1008_v8 = vadd.f32 %v976_v63, %v936_v59  ;;  %700 = vst.msk [vmem:[#allocation4 + $0xe8] sm:$0xff] %vm279_vm1, %v662_v3  ;;  %v1405_v63 = vld [vmem:[#allocation2 + $0x108] sm:$0xff] }
 0x146   : > { %7082 = vmatmul.msk.f32.gmra.mxu1 %vm279_vm1, %v1060_v32 }
 0x147   : > { %1040 = vst.msk [vmem:[#allocation4 + $0xe0] sm:$0xff] %vm279_vm1, %v1008_v8  ;;  %v620_v0 = vpop.f32.mrf.mxu0  ;;  %v962_v10 = vld [vmem:[#allocation4 + $0x70] sm:$0xff] }
 0x148   : > { %686 = vst.msk [vmem:[#allocation4 + $0x78] sm:$0xff] %vm279_vm1, %v620_v0  ;;  %v994_v12 = vadd.f32 %v962_v10, %v894_v7  ;;  %v1293_v10 = vld [vmem:[#allocation4 + $0x20] sm:$0xff] }
 0x149   : > { %6983 = vmatmul.msk.f32.gmra.mxu2 %vm279_vm1, %v1058_v11 }
 0x14a   : > { %7016 = vmatmul.msk.f32.gmra.mxu3 %vm279_vm1, %v1399_v17  ;;  %7050 = vmatmul.msk.f32.gmra.mxu0 %vm279_vm1, %v7787_v23  ;;  %1026 = vst.msk [vmem:[#allocation4 + $0x70] sm:$0xff] %vm279_vm1, %v994_v12 }
 0x14b   : > { %v897_v23 = vpop.f32.mrf.mxu1 }
 0x14c   : > { %v977_v42 = vld [vmem:[#allocation4 + $0xe8] sm:$0xff]  ;;  %v665_v13 = vpop.f32.mrf.mxu2 }
 0x14d   : > { %v942_v56 = vpop.f32.mrf.mxu3  ;;  %v1009_v9 = vadd.f32 %v977_v42, %v939_v5  ;;  %701 = vst.msk [vmem:[#allocation4 + $0xf0] sm:$0xff] %vm279_vm1, %v665_v13  ;;  %v1066_v42 = vld [vmem:[#allocation2 + $0x10a] sm:$0xff] }
 0x14e   : > { %7083 = vmatmul.msk.f32.gmra.mxu1 %vm279_vm1, %v1061_v48 }
 0x14f   : > { %1041 = vst.msk [vmem:[#allocation4 + $0xe8] sm:$0xff] %vm279_vm1, %v1009_v9  ;;  %v8169_v14 = vpop.f32.mrf.mxu0  ;;  %v963_v24 = vld [vmem:[#allocation4 + $0x78] sm:$0xff] }
 0x150   : > { %v995_v16 = vadd.f32 %v963_v24, %v897_v23  ;;  %v1748_v23 = vld [vmem:[#allocation2 + $0x121] sm:$0xff] }
 0x151   : > { %6984 = vmatmul.msk.f32.gmra.mxu2 %vm279_vm1, %v1059_v2 }
 0x152   : > { %7017 = vmatmul.msk.f32.gmra.mxu3 %vm279_vm1, %v7785_v22  ;;  %7051 = vmatmul.msk.f32.gmra.mxu0 %vm279_vm1, %v7807_v29  ;;  %1027 = vst.msk [vmem:[#allocation4 + $0x78] sm:$0xff] %vm279_vm1, %v995_v16 }
 0x153   : > { %v8187_v29 = vpop.f32.mrf.mxu1 }
 0x154   : > { %v978_v18 = vld [vmem:[#allocation4 + $0xf0] sm:$0xff]  ;;  %v668_v19 = vpop.f32.mrf.mxu2 }
 0x155   : > { %v945_v25 = vpop.f32.mrf.mxu3  ;;  %v1010_v20 = vadd.f32 %v978_v18, %v942_v56  ;;  %702 = vst.msk [vmem:[#allocation4 + $0xf8] sm:$0xff] %vm279_vm1, %v668_v19 }
 0x156   : > { %7084 = vmatmul.msk.f32.gmra.mxu1 %vm279_vm1, %v1062_v26 }
 0x157   : > { %1042 = vst.msk [vmem:[#allocation4 + $0xf0] sm:$0xff] %vm279_vm1, %v1010_v20  ;;  %v8180_v22 = vpop.f32.mrf.mxu0  ;;  %v1294_v20 = vld [vmem:[#allocation4 + $0x28] sm:$0xff] }
 0x159   : > { %6985 = vmatmul.msk.f32.gmra.mxu2 %vm279_vm1, %v1060_v32  ;;  %v1406_v32 = vld [vmem:[#allocation2 + $0x110] sm:$0xff] }
 0x15a   : > { %7018 = vmatmul.msk.f32.gmra.mxu3 %vm279_vm1, %v7805_v28  ;;  %7052 = vmatmul.msk.f32.gmra.mxu0 %vm279_vm1, %v7827_v35  ;;  %v3632_v28 = vld [vmem:[%s10272_s2] sm:$0xf] }
 0x15b   : > { %7199 = vmatpush.msk.msra.mxu1 %vm554_vm0, %v3632_v28  ;;  %v8203_v35 = vpop.f32.mrf.mxu1 }
 0x15c   : > { %v979_v15 = vld [vmem:[#allocation4 + $0xf8] sm:$0xff]  ;;  %v1193_v62 = vpop.f32.mrf.mxu2 }
 0x15d   : > { %v1534_v38 = vpop.f32.mrf.mxu3  ;;  %v1011_v27 = vadd.f32 %v979_v15, %v945_v25  ;;  %v1321_v31 = vadd.f32 %v1289_v39, %v1193_v62  ;;  %v1407_v39 = vld [vmem:[#allocation2 + $0x120] sm:$0xff] }
 0x15e   : > { %7085 = vmatmul.msk.f32.gmra.mxu1 %vm279_vm1, %v1063_v52 }
 0x15f   : > { %1043 = vst.msk [vmem:[#allocation4 + $0xf8] sm:$0xff] %vm279_vm1, %v1011_v27  ;;  %v8191_v37 = vpop.f32.mrf.mxu0  ;;  %v1749_v27 = vld [vmem:[#allocation2 + $0x129] sm:$0xff] }
 0x160   : > { %1353 = vst.msk [vmem:[#allocation4] sm:$0xff] %vm279_vm1, %v1321_v31 }
 0x161   : > { %6986 = vmatmul.msk.f32.gmra.mxu2 %vm279_vm1, %v1061_v48 }
 0x162   : > { %7019 = vmatmul.msk.f32.gmra.mxu3 %vm279_vm1, %v7825_v34  ;;  %7053 = vmatmul.msk.f32.gmra.mxu0 %vm279_vm1, %v7847_v41 }
 0x163   : > { %v8215_v41 = vpop.f32.mrf.mxu1 }
 0x164   : > { %v1196_v43 = vpop.f32.mrf.mxu2 }
 0x165   : > { %v1537_v54 = vpop.f32.mrf.mxu3  ;;  %v1322_v45 = vadd.f32 %v1290_v21, %v1196_v43 }
 0x166   : > { %7086 = vmatmul.msk.f32.gmra.mxu1 %vm279_vm1, %v1064_v33 }
 0x167   : > { %v1630_v4 = vld [vmem:[#allocation4] sm:$0xff]  ;;  %1354 = vst.msk [vmem:[#allocation4 + $0x8] sm:$0xff] %vm279_vm1, %v1322_v45  ;;  %v8207_v34 = vpop.f32.mrf.mxu0 }
 0x168   : > { %v1662_v30 = vadd.f32 %v1630_v4, %v1534_v38  ;;  %v1068_v45 = vld [vmem:[#allocation2 + $0x122] sm:$0xff] }
 0x169   : > { %6987 = vmatmul.msk.f32.gmra.mxu2 %vm279_vm1, %v1062_v26 }
 0x16a   : > { %7020 = vmatmul.msk.f32.gmra.mxu3 %vm279_vm1, %v7845_v40  ;;  %1694 = vst.msk [vmem:[#allocation4] sm:$0xff] %vm279_vm1, %v1662_v30  ;;  %7054 = vmatmul.msk.f32.gmra.mxu0 %vm279_vm1, %v7867_v47 }
 0x16b   : > { %v8228_v59 = vpop.f32.mrf.mxu1 }
 0x16c   : > { %v1199_v44 = vpop.f32.mrf.mxu2 }
 0x16d   : > { %v1540_v55 = vpop.f32.mrf.mxu3  ;;  %v1323_v57 = vadd.f32 %v1291_v49, %v1199_v44 }
 0x16e   : > { %v1631_v1 = vld [vmem:[#allocation4 + $0x8] sm:$0xff]  ;;  %7087 = vmatmul.msk.f32.gmra.mxu1 %vm279_vm1, %v1065_v51 }
 0x16f   : > { %v1663_v58 = vadd.f32 %v1631_v1, %v1537_v54  ;;  %1355 = vst.msk [vmem:[#allocation4 + $0x10] sm:$0xff] %vm279_vm1, %v1323_v57  ;;  %v8219_v60 = vpop.f32.mrf.mxu0  ;;  %v1295_v54 = vld [vmem:[#allocation4 + $0x30] sm:$0xff] }
 0x171   : > { %1695 = vst.msk [vmem:[#allocation4 + $0x8] sm:$0xff] %vm279_vm1, %v1663_v58  ;;  %6988 = vmatmul.msk.f32.gmra.mxu2 %vm279_vm1, %v1063_v52  ;;  %v1971_v40 = vld [vmem:[#allocation4] sm:$0xff] }
 0x172   : > { %7021 = vmatmul.msk.f32.gmra.mxu3 %vm279_vm1, %v7865_v46  ;;  %7055 = vmatmul.msk.f32.gmra.mxu0 %vm279_vm1, %v7885_v53  ;;  %v2003_v47 = vadd.f32 %v1971_v40, %v8169_v14  ;;  %v1747_v53 = vld [vmem:[#allocation2 + $0x111] sm:$0xff] }
 0x173   : > { %v8241_v17 = vpop.f32.mrf.mxu1 }
 0x174   : > { %v1202_v11 = vpop.f32.mrf.mxu2  ;;  %2035 = vst.msk [vmem:[#allocation4] sm:$0xff] %vm279_vm1, %v2003_v47  ;;  %v1296_v47 = vld [vmem:[#allocation4 + $0x38] sm:$0xff] }
 0x175   : > { %v1543_v61 = vpop.f32.mrf.mxu3  ;;  %v1324_v6 = vadd.f32 %v1292_v36, %v1202_v11  ;;  %v1069_v36 = vld [vmem:[#allocation2 + $0x12a] sm:$0xff] }
 0x176   : > { %v1632_v50 = vld [vmem:[#allocation4 + $0x10] sm:$0xff]  ;;  %7088 = vmatmul.msk.f32.gmra.mxu1 %vm279_vm1, %v1066_v42 }
 0x177   : > { %v1664_v46 = vadd.f32 %v1632_v50, %v1540_v55  ;;  %1356 = vst.msk [vmem:[#allocation4 + $0x18] sm:$0xff] %vm279_vm1, %v1324_v6  ;;  %v8233_v3 = vpop.f32.mrf.mxu0  ;;  %v1751_v50 = vld [vmem:[#allocation2 + $0x141] sm:$0xff] }
 0x178   : > { %v1972_v5 = vld [vmem:[#allocation4 + $0x8] sm:$0xff] }
 0x179   : > { %1696 = vst.msk [vmem:[#allocation4 + $0x10] sm:$0xff] %vm279_vm1, %v1664_v46  ;;  %6989 = vmatmul.msk.f32.gmra.mxu2 %vm279_vm1, %v1064_v33  ;;  %v2004_v2 = vadd.f32 %v1972_v5, %v8180_v22 }
 0x17a   : > { %7022 = vmatmul.msk.f32.gmra.mxu3 %vm279_vm1, %v1405_v63  ;;  %7056 = vmatmul.msk.f32.gmra.mxu0 %vm279_vm1, %v1747_v53 }
 0x17b   : > { %v2312_v8 = vld [vmem:[#allocation4] sm:$0xff]  ;;  %2036 = vst.msk [vmem:[#allocation4 + $0x8] sm:$0xff] %vm279_vm1, %v2004_v2  ;;  %v8256_v25 = vpop.f32.mrf.mxu1 }
 0x17c   : > { %v2344_v0 = vadd.f32 %v2312_v8, %v8187_v29  ;;  %v1205_v7 = vpop.f32.mrf.mxu2  ;;  %v1067_v29 = vld [vmem:[#allocation2 + $0x112] sm:$0xff] }
 0x17d   : > { %v1546_v12 = vpop.f32.mrf.mxu3  ;;  %v1325_v13 = vadd.f32 %v1293_v10, %v1205_v7  ;;  %v391_v8 = vld [vmem:[%s7608_s10 + $0xf0] sm:$0xff]  ;;  %v1297_v7 = vld [vmem:[#allocation4 + $0x40] sm:$0xff] }
 0x17e   : > { %v1633_v56 = vld [vmem:[#allocation4 + $0x18] sm:$0xff]  ;;  %2376 = vst.msk [vmem:[#allocation4] sm:$0xff] %vm279_vm1, %v2344_v0  ;;  %7089 = vmatmul.msk.f32.gmra.mxu1 %vm279_vm1, %v1067_v29 }
 0x17f   : > { %v1665_v9 = vadd.f32 %v1633_v56, %v1543_v61  ;;  %1357 = vst.msk [vmem:[#allocation4 + $0x20] sm:$0xff] %vm279_vm1, %v1325_v13  ;;  %v8247_v14 = vpop.f32.mrf.mxu0  ;;  %v1410_v13 = vld [vmem:[#allocation2 + $0x140] sm:$0xff] }
 0x180   : > { %v1973_v24 = vld [vmem:[#allocation4 + $0x10] sm:$0xff]  ;;  %423 = vst.msk [vmem:[#allocation2 + $0x181] sm:$0xff] %vm279_vm1, %v391_v8 }
 0x181   : > { %1697 = vst.msk [vmem:[#allocation4 + $0x18] sm:$0xff] %vm279_vm1, %v1665_v9  ;;  %6990 = vmatmul.msk.f32.gmra.mxu2 %vm279_vm1, %v1065_v51  ;;  %v2005_v16 = vadd.f32 %v1973_v24, %v8191_v37 }
 0x182   : > { %7023 = vmatmul.msk.f32.gmra.mxu3 %vm279_vm1, %v1406_v32  ;;  %v2313_v18 = vld [vmem:[#allocation4 + $0x8] sm:$0xff]  ;;  %7057 = vmatmul.msk.f32.gmra.mxu0 %vm279_vm1, %v1748_v23  ;;  %v1752_v32 = vld [vmem:[#allocation2 + $0x151] sm:$0xff] }
 0x183   : > { %v2345_v19 = vadd.f32 %v2313_v18, %v8203_v35  ;;  %2037 = vst.msk [vmem:[#allocation4 + $0x10] sm:$0xff] %vm279_vm1, %v2005_v16  ;;  %v8270_v43 = vpop.f32.mrf.mxu1 }
 0x184   : > { %v1208_v48 = vpop.f32.mrf.mxu2 }
 0x185   : > { %v1549_v22 = vpop.f32.mrf.mxu3  ;;  %2377 = vst.msk [vmem:[#allocation4 + $0x8] sm:$0xff] %vm279_vm1, %v2345_v19  ;;  %v1326_v15 = vadd.f32 %v1294_v20, %v1208_v48  ;;  %v392_v19 = vld [vmem:[%s7608_s10 + $0xf8] sm:$0xff]  ;;  %v1298_v20 = vld [vmem:[#allocation4 + $0x48] sm:$0xff] }
 0x186   : > { %v1634_v62 = vld [vmem:[#allocation4 + $0x20] sm:$0xff]  ;;  %7090 = vmatmul.msk.f32.gmra.mxu1 %vm279_vm1, %v1068_v45  ;;  %424 = vst.msk [vmem:[#allocation2 + $0x189] sm:$0xff] %vm279_vm1, %v392_v19  ;;  %v1302_v19 = vld [vmem:[#allocation4 + $0x68] sm:$0xff] }
 0x187   : > { %v1666_v38 = vadd.f32 %v1634_v62, %v1546_v12  ;;  %1358 = vst.msk [vmem:[#allocation4 + $0x28] sm:$0xff] %vm279_vm1, %v1326_v15  ;;  %v8261_v26 = vpop.f32.mrf.mxu0  ;;  %v1070_v12 = vld [vmem:[#allocation2 + $0x13a] sm:$0xff]  ;;  %v1411_v62 = vld [vmem:[#allocation2 + $0x150] sm:$0xff] }
 0x188   : > { %v1974_v31 = vld [vmem:[#allocation4 + $0x18] sm:$0xff] }
 0x189   : > { %1698 = vst.msk [vmem:[#allocation4 + $0x20] sm:$0xff] %vm279_vm1, %v1666_v38  ;;  %6991 = vmatmul.msk.f32.gmra.mxu2 %vm279_vm1, %v1066_v42  ;;  %v2006_v37 = vadd.f32 %v1974_v31, %v8207_v34  ;;  %v1408_v34 = vld [vmem:[#allocation2 + $0x128] sm:$0xff]  ;;  %v1753_v38 = vld [vmem:[#allocation2 + $0x159] sm:$0xff] }
 0x18a   : > { %7024 = vmatmul.msk.f32.gmra.mxu3 %vm279_vm1, %v1407_v39  ;;  %v2314_v28 = vld [vmem:[#allocation4 + $0x10] sm:$0xff]  ;;  %7058 = vmatmul.msk.f32.gmra.mxu0 %vm279_vm1, %v1749_v27 }
 0x18b   : > { %v2346_v35 = vadd.f32 %v2314_v28, %v8215_v41  ;;  %2038 = vst.msk [vmem:[#allocation4 + $0x18] sm:$0xff] %vm279_vm1, %v2006_v37  ;;  %v1750_v41 = vld [vmem:[#allocation2 + $0x139] sm:$0xff]  ;;  %v8284_v58 = vpop.f32.mrf.mxu1 }
 0x18c   : > { %v1211_v21 = vpop.f32.mrf.mxu2 }
 0x18d   : > { %v1552_v52 = vpop.f32.mrf.mxu3  ;;  %2378 = vst.msk [vmem:[#allocation4 + $0x10] sm:$0xff] %vm279_vm1, %v2346_v35  ;;  %v1327_v4 = vadd.f32 %v1295_v54, %v1211_v21  ;;  %v1299_v54 = vld [vmem:[#allocation4 + $0x50] sm:$0xff] }
 0x18e   : > { %v1635_v30 = vld [vmem:[#allocation4 + $0x28] sm:$0xff]  ;;  %7091 = vmatmul.msk.f32.gmra.mxu1 %vm279_vm1, %v1069_v36 }
 0x18f   : > { %v1667_v44 = vadd.f32 %v1635_v30, %v1549_v22  ;;  %1359 = vst.msk [vmem:[#allocation4 + $0x30] sm:$0xff] %vm279_vm1, %v1327_v4  ;;  %v8275_v49 = vpop.f32.mrf.mxu0 }
 0x190   : > { %v1975_v55 = vld [vmem:[#allocation4 + $0x20] sm:$0xff] }
 0x191   : > { %1699 = vst.msk [vmem:[#allocation4 + $0x28] sm:$0xff] %vm279_vm1, %v1667_v44  ;;  %6992 = vmatmul.msk.f32.gmra.mxu2 %vm279_vm1, %v1067_v29  ;;  %v2007_v33 = vadd.f32 %v1975_v55, %v8219_v60  ;;  %v1409_v60 = vld [vmem:[#allocation2 + $0x138] sm:$0xff]  ;;  %v1071_v29 = vld [vmem:[#allocation2 + $0x142] sm:$0xff] }
 0x192   : > { %7025 = vmatmul.msk.f32.gmra.mxu3 %vm279_vm1, %v1408_v34  ;;  %v2315_v57 = vld [vmem:[#allocation4 + $0x18] sm:$0xff]  ;;  %7059 = vmatmul.msk.f32.gmra.mxu0 %vm279_vm1, %v1750_v41 }
 0x193   : > { %v2347_v1 = vadd.f32 %v2315_v57, %v8228_v59  ;;  %2039 = vst.msk [vmem:[#allocation4 + $0x20] sm:$0xff] %vm279_vm1, %v2007_v33  ;;  %v8298_v2 = vpop.f32.mrf.mxu1 }
 0x194   : > { %v1214_v40 = vpop.f32.mrf.mxu2 }
 0x195   : > { %v1555_v11 = vpop.f32.mrf.mxu3  ;;  %2379 = vst.msk [vmem:[#allocation4 + $0x18] sm:$0xff] %vm279_vm1, %v2347_v1  ;;  %v1328_v61 = vadd.f32 %v1296_v47, %v1214_v40  ;;  %v1300_v47 = vld [vmem:[#allocation4 + $0x58] sm:$0xff] }
 0x196   : > { %v1636_v51 = vld [vmem:[#allocation4 + $0x30] sm:$0xff]  ;;  %7092 = vmatmul.msk.f32.gmra.mxu1 %vm279_vm1, %v1070_v12 }
 0x197   : > { %v1668_v6 = vadd.f32 %v1636_v51, %v1552_v52  ;;  %1360 = vst.msk [vmem:[#allocation4 + $0x38] sm:$0xff] %vm279_vm1, %v1328_v61  ;;  %v8289_v59 = vpop.f32.mrf.mxu0 }
 0x198   : > { %v1976_v63 = vld [vmem:[#allocation4 + $0x28] sm:$0xff] }
 0x199   : > { %1700 = vst.msk [vmem:[#allocation4 + $0x30] sm:$0xff] %vm279_vm1, %v1668_v6  ;;  %6993 = vmatmul.msk.f32.gmra.mxu2 %vm279_vm1, %v1068_v45  ;;  %v2008_v46 = vadd.f32 %v1976_v63, %v8233_v3  ;;  %v1072_v45 = vld [vmem:[#allocation2 + $0x152] sm:$0xff] }
 0x19a   : > { %7026 = vmatmul.msk.f32.gmra.mxu3 %vm279_vm1, %v1409_v60  ;;  %v2316_v53 = vld [vmem:[#allocation4 + $0x20] sm:$0xff]  ;;  %7060 = vmatmul.msk.f32.gmra.mxu0 %vm279_vm1, %v1751_v50 }
 0x19b   : > { %v2348_v5 = vadd.f32 %v2316_v53, %v8241_v17  ;;  %2040 = vst.msk [vmem:[#allocation4 + $0x28] sm:$0xff] %vm279_vm1, %v2008_v46  ;;  %v8314_v18 = vpop.f32.mrf.mxu1 }
 0x19c   : > { %v1217_v0 = vpop.f32.mrf.mxu2 }
 0x19d   : > { %v1558_v10 = vpop.f32.mrf.mxu3  ;;  %2380 = vst.msk [vmem:[#allocation4 + $0x20] sm:$0xff] %vm279_vm1, %v2348_v5  ;;  %v1329_v42 = vadd.f32 %v1297_v7, %v1217_v0  ;;  %v1301_v0 = vld [vmem:[#allocation4 + $0x60] sm:$0xff] }
 0x19e   : > { %v1637_v3 = vld [vmem:[#allocation4 + $0x38] sm:$0xff]  ;;  %7093 = vmatmul.msk.f32.gmra.mxu1 %vm279_vm1, %v1071_v29 }
 0x19f   : > { %v1669_v17 = vadd.f32 %v1637_v3, %v1555_v11  ;;  %1361 = vst.msk [vmem:[#allocation4 + $0x40] sm:$0xff] %vm279_vm1, %v1329_v42  ;;  %v8305_v56 = vpop.f32.mrf.mxu0 }
 0x1a0   : > { %v1977_v9 = vld [vmem:[#allocation4 + $0x30] sm:$0xff] }
 0x1a1   : > { %1701 = vst.msk [vmem:[#allocation4 + $0x38] sm:$0xff] %vm279_vm1, %v1669_v17  ;;  %6994 = vmatmul.msk.f32.gmra.mxu2 %vm279_vm1, %v1069_v36  ;;  %v2009_v23 = vadd.f32 %v1977_v9, %v8247_v14  ;;  %v1073_v36 = vld [vmem:[#allocation2 + $0x15a] sm:$0xff] }
 0x1a2   : > { %7027 = vmatmul.msk.f32.gmra.mxu3 %vm279_vm1, %v1410_v13  ;;  %v2317_v24 = vld [vmem:[#allocation4 + $0x28] sm:$0xff]  ;;  %7061 = vmatmul.msk.f32.gmra.mxu0 %vm279_vm1, %v1752_v32 }
 0x1a3   : > { %v2349_v16 = vadd.f32 %v2317_v24, %v8256_v25  ;;  %2041 = vst.msk [vmem:[#allocation4 + $0x30] sm:$0xff] %vm279_vm1, %v2009_v23  ;;  %v8330_v35 = vpop.f32.mrf.mxu1 }
 0x1a4   : > { %v1220_v48 = vpop.f32.mrf.mxu2 }
 0x1a5   : > { %v1561_v22 = vpop.f32.mrf.mxu3  ;;  %2381 = vst.msk [vmem:[#allocation4 + $0x28] sm:$0xff] %vm279_vm1, %v2349_v16  ;;  %v1330_v15 = vadd.f32 %v1298_v20, %v1220_v48  ;;  %v1075_v20 = vld [vmem:[#allocation2 + $0x172] sm:$0xff] }
 0x1a6   : > { %v1638_v14 = vld [vmem:[#allocation4 + $0x40] sm:$0xff]  ;;  %7094 = vmatmul.msk.f32.gmra.mxu1 %vm279_vm1, %v1072_v45 }
 0x1a7   : > { %v1670_v39 = vadd.f32 %v1638_v14, %v1558_v10  ;;  %1362 = vst.msk [vmem:[#allocation4 + $0x48] sm:$0xff] %vm279_vm1, %v1330_v15  ;;  %v8321_v25 = vpop.f32.mrf.mxu0  ;;  %v1074_v10 = vld [vmem:[#allocation2 + $0x16a] sm:$0xff] }
 0x1a8   : > { %v1978_v27 = vld [vmem:[#allocation4 + $0x38] sm:$0xff] }
 0x1a9   : > { %1702 = vst.msk [vmem:[#allocation4 + $0x40] sm:$0xff] %vm279_vm1, %v1670_v39  ;;  %6995 = vmatmul.msk.f32.gmra.mxu2 %vm279_vm1, %v1070_v12  ;;  %v2010_v31 = vadd.f32 %v1978_v27, %v8261_v26  ;;  %v1412_v26 = vld [vmem:[#allocation2 + $0x158] sm:$0xff] }
 0x1aa   : > { %7028 = vmatmul.msk.f32.gmra.mxu3 %vm279_vm1, %v1411_v62  ;;  %v2318_v37 = vld [vmem:[#allocation4 + $0x30] sm:$0xff]  ;;  %7062 = vmatmul.msk.f32.gmra.mxu0 %vm279_vm1, %v1753_v38 }
 0x1ab   : > { %v2350_v28 = vadd.f32 %v2318_v37, %v8270_v43  ;;  %2042 = vst.msk [vmem:[#allocation4 + $0x38] sm:$0xff] %vm279_vm1, %v2010_v31  ;;  %v1754_v43 = vld [vmem:[#allocation2 + $0x169] sm:$0xff]  ;;  %v8344_v1 = vpop.f32.mrf.mxu1 }
 0x1ac   : > { %v1223_v21 = vpop.f32.mrf.mxu2 }
 0x1ad   : > { %v1564_v52 = vpop.f32.mrf.mxu3  ;;  %2382 = vst.msk [vmem:[#allocation4 + $0x30] sm:$0xff] %vm279_vm1, %v2350_v28  ;;  %v1331_v4 = vadd.f32 %v1299_v54, %v1223_v21  ;;  %v1303_v28 = vld [vmem:[#allocation4 + $0x70] sm:$0xff] }
 0x1ae   : > { %v1639_v30 = vld [vmem:[#allocation4 + $0x48] sm:$0xff]  ;;  %7095 = vmatmul.msk.f32.gmra.mxu1 %vm279_vm1, %v1073_v36 }
 0x1af   : > { %v1671_v34 = vadd.f32 %v1639_v30, %v1561_v22  ;;  %1363 = vst.msk [vmem:[#allocation4 + $0x50] sm:$0xff] %vm279_vm1, %v1331_v4  ;;  %v8335_v44 = vpop.f32.mrf.mxu0  ;;  %v1416_v4 = vld [vmem:[#allocation2 + $0x188] sm:$0xff] }
 0x1b0   : > { %v1979_v41 = vld [vmem:[#allocation4 + $0x40] sm:$0xff] }
 0x1b1   : > { %1703 = vst.msk [vmem:[#allocation4 + $0x48] sm:$0xff] %vm279_vm1, %v1671_v34  ;;  %6996 = vmatmul.msk.f32.gmra.mxu2 %vm279_vm1, %v1071_v29  ;;  %v2011_v55 = vadd.f32 %v1979_v41, %v8275_v49  ;;  %v1413_v49 = vld [vmem:[#allocation2 + $0x168] sm:$0xff] }
 0x1b2   : > { %7029 = vmatmul.msk.f32.gmra.mxu3 %vm279_vm1, %v1412_v26  ;;  %v2319_v33 = vld [vmem:[#allocation4 + $0x38] sm:$0xff]  ;;  %7063 = vmatmul.msk.f32.gmra.mxu0 %vm279_vm1, %v1754_v43 }
 0x1b3   : > { %v2351_v57 = vadd.f32 %v2319_v33, %v8284_v58  ;;  %2043 = vst.msk [vmem:[#allocation4 + $0x40] sm:$0xff] %vm279_vm1, %v2011_v55  ;;  %v1755_v58 = vld [vmem:[#allocation2 + $0x171] sm:$0xff]  ;;  %v8358_v5 = vpop.f32.mrf.mxu1 }
 0x1b4   : > { %v1226_v40 = vpop.f32.mrf.mxu2 }
 0x1b5   : > { %v1567_v11 = vpop.f32.mrf.mxu3  ;;  %2383 = vst.msk [vmem:[#allocation4 + $0x38] sm:$0xff] %vm279_vm1, %v2351_v57  ;;  %v1332_v61 = vadd.f32 %v1300_v47, %v1226_v40  ;;  %v1304_v57 = vld [vmem:[#allocation4 + $0x78] sm:$0xff] }
 0x1b6   : > { %v1640_v51 = vld [vmem:[#allocation4 + $0x50] sm:$0xff]  ;;  %7096 = vmatmul.msk.f32.gmra.mxu1 %vm279_vm1, %v1074_v10 }
 0x1b7   : > { %v1672_v60 = vadd.f32 %v1640_v51, %v1564_v52  ;;  %1364 = vst.msk [vmem:[#allocation4 + $0x58] sm:$0xff] %vm279_vm1, %v1332_v61  ;;  %v8349_v6 = vpop.f32.mrf.mxu0  ;;  %v2097_v52 = vld [vmem:[#allocation2 + $0x182] sm:$0xff]  ;;  %v2409_v61 = vld [vmem:[#allocation2 + $0x30] sm:$0xff] }
 0x1b8   : > { %v1980_v50 = vld [vmem:[#allocation4 + $0x48] sm:$0xff]  ;;  %v2750_v51 = vld [vmem:[#allocation2 + $0x31] sm:$0xff] }
 0x1b9   : > { %1704 = vst.msk [vmem:[#allocation4 + $0x50] sm:$0xff] %vm279_vm1, %v1672_v60  ;;  %6997 = vmatmul.msk.f32.gmra.mxu2 %vm279_vm1, %v1072_v45  ;;  %v2012_v63 = vadd.f32 %v1980_v50, %v8289_v59  ;;  %v1414_v59 = vld [vmem:[#allocation2 + $0x170] sm:$0xff] }
 0x1ba   : > { %7030 = vmatmul.msk.f32.gmra.mxu3 %vm279_vm1, %v1413_v49  ;;  %v2320_v46 = vld [vmem:[#allocation4 + $0x40] sm:$0xff]  ;;  %7064 = vmatmul.msk.f32.gmra.mxu0 %vm279_vm1, %v1755_v58 }
 0x1bb   : > { %v2352_v53 = vadd.f32 %v2320_v46, %v8298_v2  ;;  %2044 = vst.msk [vmem:[#allocation4 + $0x48] sm:$0xff] %vm279_vm1, %v2012_v63  ;;  %v1756_v2 = vld [vmem:[#allocation2 + $0x181] sm:$0xff]  ;;  %v8372_v24 = vpop.f32.mrf.mxu1 }
 0x1bc   : > { %v1229_v8 = vpop.f32.mrf.mxu2  ;;  %v3092_v49 = vld [vmem:[#allocation2 + $0x3a] sm:$0xff] }
 0x1bd   : > { %v1570_v7 = vpop.f32.mrf.mxu3  ;;  %2384 = vst.msk [vmem:[#allocation4 + $0x40] sm:$0xff] %vm279_vm1, %v2352_v53  ;;  %v1333_v12 = vadd.f32 %v1301_v0, %v1229_v8  ;;  %v1305_v8 = vld [vmem:[#allocation4 + $0x80] sm:$0xff] }
 0x1be   : > { %v1641_v42 = vld [vmem:[#allocation4 + $0x58] sm:$0xff]  ;;  %7097 = vmatmul.msk.f32.gmra.mxu1 %vm279_vm1, %v1075_v20 }
 0x1bf   : > { %v1673_v3 = vadd.f32 %v1641_v42, %v1567_v11  ;;  %1365 = vst.msk [vmem:[#allocation4 + $0x60] sm:$0xff] %vm279_vm1, %v1333_v12  ;;  %v8363_v13 = vpop.f32.mrf.mxu0  ;;  %v2098_v11 = vld [vmem:[#allocation2 + $0x18a] sm:$0xff]  ;;  %v2410_v12 = vld [vmem:[#allocation2 + $0x38] sm:$0xff] }
 0x1c0   : > { %v1981_v17 = vld [vmem:[#allocation4 + $0x50] sm:$0xff]  ;;  %v2751_v42 = vld [vmem:[#allocation2 + $0x39] sm:$0xff] }
 0x1c1   : > { %1705 = vst.msk [vmem:[#allocation4 + $0x58] sm:$0xff] %vm279_vm1, %v1673_v3  ;;  %6998 = vmatmul.msk.f32.gmra.mxu2 %vm279_vm1, %v1073_v36  ;;  %v2013_v32 = vadd.f32 %v1981_v17, %v8305_v56  ;;  %v1415_v56 = vld [vmem:[#allocation2 + $0x180] sm:$0xff]  ;;  %v3093_v3 = vld [vmem:[#allocation2 + $0x4a] sm:$0xff] }
 0x1c2   : > { %7031 = vmatmul.msk.f32.gmra.mxu3 %vm279_vm1, %v1414_v59  ;;  %v2321_v9 = vld [vmem:[#allocation4 + $0x48] sm:$0xff]  ;;  %7065 = vmatmul.msk.f32.gmra.mxu0 %vm279_vm1, %v1756_v2 }
 0x1c3   : > { %v2353_v23 = vadd.f32 %v2321_v9, %v8314_v18  ;;  %2045 = vst.msk [vmem:[#allocation4 + $0x50] sm:$0xff] %vm279_vm1, %v2013_v32  ;;  %v1757_v18 = vld [vmem:[#allocation2 + $0x189] sm:$0xff]  ;;  %v8386_v31 = vpop.f32.mrf.mxu1 }
 0x1c4   : > { %v1232_v16 = vpop.f32.mrf.mxu2 }
 0x1c5   : > { %v1573_v48 = vpop.f32.mrf.mxu3  ;;  %2385 = vst.msk [vmem:[#allocation4 + $0x48] sm:$0xff] %vm279_vm1, %v2353_v23  ;;  %v1334_v22 = vadd.f32 %v1302_v19, %v1232_v16  ;;  %v1306_v16 = vld [vmem:[#allocation4 + $0x88] sm:$0xff] }
 0x1c6   : > { %v1642_v29 = vld [vmem:[#allocation4 + $0x60] sm:$0xff]  ;;  %7098 = vmatmul.msk.f32.gmra.mxu1 %vm279_vm1, %v2097_v52  ;;  %v2412_v52 = vld [vmem:[#allocation2 + $0x50] sm:$0xff] }
 0x1c7   : > { %v1674_v15 = vadd.f32 %v1642_v29, %v1570_v7  ;;  %1366 = vst.msk [vmem:[#allocation4 + $0x68] sm:$0xff] %vm279_vm1, %v1334_v22  ;;  %v8377_v14 = vpop.f32.mrf.mxu0  ;;  %v2411_v22 = vld [vmem:[#allocation2 + $0x48] sm:$0xff] }
 0x1c8   : > { %v1982_v62 = vld [vmem:[#allocation4 + $0x58] sm:$0xff]  ;;  %v2752_v29 = vld [vmem:[#allocation2 + $0x49] sm:$0xff] }
 0x1c9   : > { %1706 = vst.msk [vmem:[#allocation4 + $0x60] sm:$0xff] %vm279_vm1, %v1674_v15  ;;  %6999 = vmatmul.msk.f32.gmra.mxu2 %vm279_vm1, %v1074_v10  ;;  %v2014_v39 = vadd.f32 %v1982_v62, %v8321_v25  ;;  %v3094_v15 = vld [vmem:[#allocation2 + $0x52] sm:$0xff] }
 0x1ca   : > { %7032 = vmatmul.msk.f32.gmra.mxu3 %vm279_vm1, %v1415_v56  ;;  %v2322_v38 = vld [vmem:[#allocation4 + $0x50] sm:$0xff]  ;;  %7066 = vmatmul.msk.f32.gmra.mxu0 %vm279_vm1, %v1757_v18 }
 0x1cb   : > { %v2354_v27 = vadd.f32 %v2322_v38, %v8330_v35  ;;  %2046 = vst.msk [vmem:[#allocation4 + $0x58] sm:$0xff] %vm279_vm1, %v2014_v39  ;;  %v3091_v35 = vld [vmem:[#allocation2 + $0x32] sm:$0xff]  ;;  %v8400_v55 = vpop.f32.mrf.mxu1 }
 0x1cc   : > { %v1235_v37 = vpop.f32.mrf.mxu2 }
 0x1cd   : > { %v1576_v21 = vpop.f32.mrf.mxu3  ;;  %2386 = vst.msk [vmem:[#allocation4 + $0x50] sm:$0xff] %vm279_vm1, %v2354_v27  ;;  %v1335_v54 = vadd.f32 %v1303_v28, %v1235_v37  ;;  %v1307_v27 = vld [vmem:[#allocation4 + $0x90] sm:$0xff] }
 0x1ce   : > { %v1643_v45 = vld [vmem:[#allocation4 + $0x68] sm:$0xff]  ;;  %7099 = vmatmul.msk.f32.gmra.mxu1 %vm279_vm1, %v2098_v11 }
 0x1cf   : > { %v1675_v25 = vadd.f32 %v1643_v45, %v1573_v48  ;;  %1367 = vst.msk [vmem:[#allocation4 + $0x70] sm:$0xff] %vm279_vm1, %v1335_v54  ;;  %v8391_v30 = vpop.f32.mrf.mxu0  ;;  %v2753_v45 = vld [vmem:[#allocation2 + $0x51] sm:$0xff]  ;;  %v2754_v11 = vld [vmem:[#allocation2 + $0x61] sm:$0xff] }
 0x1d0   : > { %v1983_v26 = vld [vmem:[#allocation4 + $0x60] sm:$0xff] }
 0x1d1   : > { %1707 = vst.msk [vmem:[#allocation4 + $0x68] sm:$0xff] %vm279_vm1, %v1675_v25  ;;  %7000 = vmatmul.msk.f32.gmra.mxu2 %vm279_vm1, %v1075_v20  ;;  %v2015_v34 = vadd.f32 %v1983_v26, %v8335_v44  ;;  %v3095_v25 = vld [vmem:[#allocation2 + $0x62] sm:$0xff] }
 0x1d2   : > { %7033 = vmatmul.msk.f32.gmra.mxu3 %vm279_vm1, %v1416_v4  ;;  %v2323_v43 = vld [vmem:[#allocation4 + $0x58] sm:$0xff]  ;;  %7167 = vmatmul.msk.f32.vlgmr.msra.gmra.mxu0 %vm279_vm1, %v3091_v35 }
 0x1d3   : > { %v2355_v41 = vadd.f32 %v2323_v43, %v8344_v1  ;;  %2047 = vst.msk [vmem:[#allocation4 + $0x60] sm:$0xff] %vm279_vm1, %v2015_v34  ;;  %v8414_v46 = vpop.f32.mrf.mxu1 }
 0x1d4   : > { %v1238_v33 = vpop.f32.mrf.mxu2 }
 0x1d5   : > { %v1579_v40 = vpop.f32.mrf.mxu3  ;;  %2387 = vst.msk [vmem:[#allocation4 + $0x58] sm:$0xff] %vm279_vm1, %v2355_v41  ;;  %v1336_v47 = vadd.f32 %v1304_v57, %v1238_v33  ;;  %v1308_v41 = vld [vmem:[#allocation4 + $0x98] sm:$0xff] }
 0x1d6   : > { %v1644_v36 = vld [vmem:[#allocation4 + $0x70] sm:$0xff] }
 0x1d7   : > { %v1676_v44 = vadd.f32 %v1644_v36, %v1576_v21  ;;  %1368 = vst.msk [vmem:[#allocation4 + $0x78] sm:$0xff] %vm279_vm1, %v1336_v47  ;;  %v8405_v1 = vpop.f32.mrf.mxu0  ;;  %v2413_v47 = vld [vmem:[#allocation2 + $0x60] sm:$0xff] }
 0x1d8   : > { %v1984_v60 = vld [vmem:[#allocation4 + $0x68] sm:$0xff] }
 0x1d9   : > { %1708 = vst.msk [vmem:[#allocation4 + $0x70] sm:$0xff] %vm279_vm1, %v1676_v44  ;;  %7101 = vmatmul.msk.f32.vlgmr.msra.gmra.mxu2 %vm279_vm1, %v2409_v61  ;;  %v2016_v58 = vadd.f32 %v1984_v60, %v8349_v6  ;;  %v3096_v61 = vld [vmem:[#allocation2 + $0x6a] sm:$0xff] }
 0x1da   : > { %7134 = vmatmul.msk.f32.vlgmr.msra.gmra.mxu3 %vm279_vm1, %v2750_v51  ;;  %v2324_v50 = vld [vmem:[#allocation4 + $0x60] sm:$0xff]  ;;  %7168 = vmatmul.msk.f32.gmra.mxu0 %vm279_vm1, %v3092_v49 }
 0x1db   : > { %v2356_v63 = vadd.f32 %v2324_v50, %v8358_v5  ;;  %2048 = vst.msk [vmem:[#allocation4 + $0x68] sm:$0xff] %vm279_vm1, %v2016_v58  ;;  %v8427_v9 = vpop.f32.mrf.mxu1  ;;  %v1309_v50 = vld [vmem:[#allocation4 + $0xa0] sm:$0xff] }
 0x1dc   : > { %v1241_v53 = vpop.f32.mrf.mxu2 }
 0x1dd   : > { %v1582_v0 = vpop.f32.mrf.mxu3  ;;  %2388 = vst.msk [vmem:[#allocation4 + $0x60] sm:$0xff] %vm279_vm1, %v2356_v63  ;;  %v1337_v7 = vadd.f32 %v1305_v8, %v1241_v53 }
 0x1de   : > { %v1645_v10 = vld [vmem:[#allocation4 + $0x78] sm:$0xff] }
 0x1df   : > { %v1677_v59 = vadd.f32 %v1645_v10, %v1579_v40  ;;  %1369 = vst.msk [vmem:[#allocation4 + $0x80] sm:$0xff] %vm279_vm1, %v1337_v7  ;;  %v8418_v6 = vpop.f32.mrf.mxu0  ;;  %v2755_v7 = vld [vmem:[#allocation2 + $0x69] sm:$0xff] }
 0x1e0   : > { %v1985_v5 = vld [vmem:[#allocation4 + $0x70] sm:$0xff] }
 0x1e1   : > { %1709 = vst.msk [vmem:[#allocation4 + $0x78] sm:$0xff] %vm279_vm1, %v1677_v59  ;;  %7102 = vmatmul.msk.f32.gmra.mxu2 %vm279_vm1, %v2410_v12  ;;  %v2017_v2 = vadd.f32 %v1985_v5, %v8363_v13  ;;  %v3097_v12 = vld [vmem:[#allocation2 + $0x7a] sm:$0xff] }
 0x1e2   : > { %7135 = vmatmul.msk.f32.gmra.mxu3 %vm279_vm1, %v2751_v42  ;;  %v2325_v17 = vld [vmem:[#allocation4 + $0x68] sm:$0xff]  ;;  %7169 = vmatmul.msk.f32.gmra.mxu0 %vm279_vm1, %v3093_v3 }
 0x1e3   : > { %v2357_v32 = vadd.f32 %v2325_v17, %v8372_v24  ;;  %2049 = vst.msk [vmem:[#allocation4 + $0x70] sm:$0xff] %vm279_vm1, %v2017_v2  ;;  %v8441_v21 = vpop.f32.mrf.mxu1  ;;  %v1310_v17 = vld [vmem:[#allocation4 + $0xa8] sm:$0xff] }
 0x1e4   : > { %v1244_v23 = vpop.f32.mrf.mxu2 }
 0x1e5   : > { %v1585_v19 = vpop.f32.mrf.mxu3  ;;  %2389 = vst.msk [vmem:[#allocation4 + $0x68] sm:$0xff] %vm279_vm1, %v2357_v32  ;;  %v1338_v48 = vadd.f32 %v1306_v16, %v1244_v23 }
 0x1e6   : > { %v1646_v20 = vld [vmem:[#allocation4 + $0x80] sm:$0xff] }
 0x1e7   : > { %v1678_v56 = vadd.f32 %v1646_v20, %v1582_v0  ;;  %1370 = vst.msk [vmem:[#allocation4 + $0x88] sm:$0xff] %vm279_vm1, %v1338_v48  ;;  %v8431_v13 = vpop.f32.mrf.mxu0  ;;  %v2414_v0 = vld [vmem:[#allocation2 + $0x68] sm:$0xff]  ;;  %v2756_v48 = vld [vmem:[#allocation2 + $0x79] sm:$0xff] }
 0x1e8   : > { %v1986_v24 = vld [vmem:[#allocation4 + $0x78] sm:$0xff] }
 0x1e9   : > { %1710 = vst.msk [vmem:[#allocation4 + $0x80] sm:$0xff] %vm279_vm1, %v1678_v56  ;;  %7103 = vmatmul.msk.f32.gmra.mxu2 %vm279_vm1, %v2411_v22  ;;  %v2018_v18 = vadd.f32 %v1986_v24, %v8377_v14  ;;  %v3098_v22 = vld [vmem:[#allocation2 + $0x82] sm:$0xff] }
 0x1ea   : > { %7136 = vmatmul.msk.f32.gmra.mxu3 %vm279_vm1, %v2752_v29  ;;  %v2326_v62 = vld [vmem:[#allocation4 + $0x70] sm:$0xff]  ;;  %7170 = vmatmul.msk.f32.gmra.mxu0 %vm279_vm1, %v3094_v15 }
 0x1eb   : > { %v2358_v39 = vadd.f32 %v2326_v62, %v8386_v31  ;;  %2050 = vst.msk [vmem:[#allocation4 + $0x78] sm:$0xff] %vm279_vm1, %v2018_v18  ;;  %v8457_v51 = vpop.f32.mrf.mxu1  ;;  %v1311_v62 = vld [vmem:[#allocation4 + $0xb0] sm:$0xff] }
 0x1ec   : > { %v1247_v38 = vpop.f32.mrf.mxu2 }
 0x1ed   : > { %v1588_v37 = vpop.f32.mrf.mxu3  ;;  %2390 = vst.msk [vmem:[#allocation4 + $0x70] sm:$0xff] %vm279_vm1, %v2358_v39  ;;  %v1339_v28 = vadd.f32 %v1307_v27, %v1247_v38 }
 0x1ee   : > { %v1647_v54 = vld [vmem:[#allocation4 + $0x88] sm:$0xff] }
 0x1ef   : > { %v1679_v4 = vadd.f32 %v1647_v54, %v1585_v19  ;;  %1371 = vst.msk [vmem:[#allocation4 + $0x90] sm:$0xff] %vm279_vm1, %v1339_v28  ;;  %v8444_v14 = vpop.f32.mrf.mxu0  ;;  %v2415_v19 = vld [vmem:[#allocation2 + $0x78] sm:$0xff]  ;;  %v2757_v28 = vld [vmem:[#allocation2 + $0x81] sm:$0xff] }
 0x1f0   : > { %v1987_v31 = vld [vmem:[#allocation4 + $0x80] sm:$0xff] }
 0x1f1   : > { %1711 = vst.msk [vmem:[#allocation4 + $0x88] sm:$0xff] %vm279_vm1, %v1679_v4  ;;  %7104 = vmatmul.msk.f32.gmra.mxu2 %vm279_vm1, %v2412_v52  ;;  %v2019_v35 = vadd.f32 %v1987_v31, %v8391_v30  ;;  %v3099_v52 = vld [vmem:[#allocation2 + $0x92] sm:$0xff] }
 0x1f2   : > { %7137 = vmatmul.msk.f32.gmra.mxu3 %vm279_vm1, %v2753_v45  ;;  %v2327_v26 = vld [vmem:[#allocation4 + $0x78] sm:$0xff]  ;;  %7171 = vmatmul.msk.f32.gmra.mxu0 %vm279_vm1, %v3095_v25 }
 0x1f3   : > { %v2359_v34 = vadd.f32 %v2327_v26, %v8400_v55  ;;  %2051 = vst.msk [vmem:[#allocation4 + $0x80] sm:$0xff] %vm279_vm1, %v2019_v35  ;;  %v8474_v59 = vpop.f32.mrf.mxu1  ;;  %v1312_v35 = vld [vmem:[#allocation4 + $0xb8] sm:$0xff] }
 0x1f4   : > { %v1250_v43 = vpop.f32.mrf.mxu2 }
 0x1f5   : > { %v1591_v33 = vpop.f32.mrf.mxu3  ;;  %2391 = vst.msk [vmem:[#allocation4 + $0x78] sm:$0xff] %vm279_vm1, %v2359_v34  ;;  %v1340_v57 = vadd.f32 %v1308_v41, %v1250_v43 }
 0x1f6   : > { %v1648_v40 = vld [vmem:[#allocation4 + $0x90] sm:$0xff] }
 0x1f7   : > { %v1680_v36 = vadd.f32 %v1648_v40, %v1588_v37  ;;  %1372 = vst.msk [vmem:[#allocation4 + $0x98] sm:$0xff] %vm279_vm1, %v1340_v57  ;;  %v8455_v30 = vpop.f32.mrf.mxu0  ;;  %v2416_v37 = vld [vmem:[#allocation2 + $0x80] sm:$0xff]  ;;  %v2758_v57 = vld [vmem:[#allocation2 + $0x91] sm:$0xff] }
 0x1f8   : > { %v1988_v55 = vld [vmem:[#allocation4 + $0x88] sm:$0xff] }
 0x1f9   : > { %1712 = vst.msk [vmem:[#allocation4 + $0x90] sm:$0xff] %vm279_vm1, %v1680_v36  ;;  %7105 = vmatmul.msk.f32.gmra.mxu2 %vm279_vm1, %v2413_v47  ;;  %v2020_v44 = vadd.f32 %v1988_v55, %v8405_v1  ;;  %v3100_v47 = vld [vmem:[#allocation2 + $0x9a] sm:$0xff] }
 0x1fa   : > { %7138 = vmatmul.msk.f32.gmra.mxu3 %vm279_vm1, %v2754_v11  ;;  %v2328_v49 = vld [vmem:[#allocation4 + $0x80] sm:$0xff]  ;;  %7172 = vmatmul.msk.f32.gmra.mxu0 %vm279_vm1, %v3096_v61 }
 0x1fb   : > { %v2360_v60 = vadd.f32 %v2328_v49, %v8414_v46  ;;  %2052 = vst.msk [vmem:[#allocation4 + $0x88] sm:$0xff] %vm279_vm1, %v2020_v44  ;;  %v8490_v24 = vpop.f32.mrf.mxu1  ;;  %v1313_v44 = vld [vmem:[#allocation4 + $0xc0] sm:$0xff] }
 0x1fc   : > { %v1253_v58 = vpop.f32.mrf.mxu2 }
 0x1fd   : > { %v1594_v63 = vpop.f32.mrf.mxu3  ;;  %2392 = vst.msk [vmem:[#allocation4 + $0x80] sm:$0xff] %vm279_vm1, %v2360_v60  ;;  %v1341_v53 = vadd.f32 %v1309_v50, %v1253_v58  ;;  %v2418_v50 = vld [vmem:[#allocation2 + $0x98] sm:$0xff] }
 0x1fe   : > { %v1649_v8 = vld [vmem:[#allocation4 + $0x98] sm:$0xff] }
 0x1ff   : > { %v1681_v10 = vadd.f32 %v1649_v8, %v1591_v33  ;;  %1373 = vst.msk [vmem:[#allocation4 + $0xa0] sm:$0xff] %vm279_vm1, %v1341_v53  ;;  %v8468_v1 = vpop.f32.mrf.mxu0  ;;  %v2417_v33 = vld [vmem:[#allocation2 + $0x90] sm:$0xff] }
 0x200   : > { %v1989_v42 = vld [vmem:[#allocation4 + $0x90] sm:$0xff] }
 0x201   : > { %1713 = vst.msk [vmem:[#allocation4 + $0x98] sm:$0xff] %vm279_vm1, %v1681_v10  ;;  %7106 = vmatmul.msk.f32.gmra.mxu2 %vm279_vm1, %v2414_v0  ;;  %v2021_v46 = vadd.f32 %v1989_v42, %v8418_v6  ;;  %v3101_v8 = vld [vmem:[#allocation2 + $0xaa] sm:$0xff] }
 0x202   : > { %7139 = vmatmul.msk.f32.gmra.mxu3 %vm279_vm1, %v2755_v7  ;;  %v2329_v3 = vld [vmem:[#allocation4 + $0x88] sm:$0xff]  ;;  %7173 = vmatmul.msk.f32.gmra.mxu0 %vm279_vm1, %v3097_v12 }
 0x203   : > { %v2361_v5 = vadd.f32 %v2329_v3, %v8427_v9  ;;  %2053 = vst.msk [vmem:[#allocation4 + $0x90] sm:$0xff] %vm279_vm1, %v2021_v46  ;;  %v2282_v43 = vpop.f32.mrf.mxu1 }
 0x204   : > { %v1256_v2 = vpop.f32.mrf.mxu2 }
 0x205   : > { %v1597_v32 = vpop.f32.mrf.mxu3  ;;  %2393 = vst.msk [vmem:[#allocation4 + $0x88] sm:$0xff] %vm279_vm1, %v2361_v5  ;;  %v1342_v23 = vadd.f32 %v1310_v17, %v1256_v2  ;;  %v2419_v17 = vld [vmem:[#allocation2 + $0xa8] sm:$0xff] }
 0x206   : > { %v1650_v16 = vld [vmem:[#allocation4 + $0xa0] sm:$0xff] }
 0x207   : > { %v1682_v20 = vadd.f32 %v1650_v16, %v1594_v63  ;;  %1374 = vst.msk [vmem:[#allocation4 + $0xa8] sm:$0xff] %vm279_vm1, %v1342_v23  ;;  %v8481_v6 = vpop.f32.mrf.mxu0  ;;  %v2759_v63 = vld [vmem:[#allocation2 + $0x99] sm:$0xff] }
 0x208   : > { %v1990_v29 = vld [vmem:[#allocation4 + $0x98] sm:$0xff] }
 0x209   : > { %1714 = vst.msk [vmem:[#allocation4 + $0xa0] sm:$0xff] %vm279_vm1, %v1682_v20  ;;  %7107 = vmatmul.msk.f32.gmra.mxu2 %vm279_vm1, %v2415_v19  ;;  %v2022_v9 = vadd.f32 %v1990_v29, %v8431_v13  ;;  %v3102_v16 = vld [vmem:[#allocation2 + $0xb2] sm:$0xff] }
 0x20a   : > { %7140 = vmatmul.msk.f32.gmra.mxu3 %vm279_vm1, %v2756_v48  ;;  %v2330_v56 = vld [vmem:[#allocation4 + $0x90] sm:$0xff]  ;;  %7174 = vmatmul.msk.f32.gmra.mxu0 %vm279_vm1, %v3098_v22 }
 0x20b   : > { %v2362_v15 = vadd.f32 %v2330_v56, %v8441_v21  ;;  %2054 = vst.msk [vmem:[#allocation4 + $0x98] sm:$0xff] %vm279_vm1, %v2022_v9  ;;  %v2285_v0 = vpop.f32.mrf.mxu1  ;;  %v1315_v56 = vld [vmem:[#allocation4 + $0xd0] sm:$0xff] }
 0x20c   : > { %v1259_v18 = vpop.f32.mrf.mxu2 }
 0x20d   : > { %v1600_v39 = vpop.f32.mrf.mxu3  ;;  %2394 = vst.msk [vmem:[#allocation4 + $0x90] sm:$0xff] %vm279_vm1, %v2362_v15  ;;  %v1343_v38 = vadd.f32 %v1311_v62, %v1259_v18  ;;  %v2420_v62 = vld [vmem:[#allocation2 + $0xb0] sm:$0xff] }
 0x20e   : > { %v1651_v27 = vld [vmem:[#allocation4 + $0xa8] sm:$0xff] }
 0x20f   : > { %v1683_v54 = vadd.f32 %v1651_v27, %v1597_v32  ;;  %1375 = vst.msk [vmem:[#allocation4 + $0xb0] sm:$0xff] %vm279_vm1, %v1343_v38  ;;  %v8494_v13 = vpop.f32.mrf.mxu0  ;;  %v2760_v32 = vld [vmem:[#allocation2 + $0xa9] sm:$0xff] }
 0x210   : > { %v1991_v21 = vld [vmem:[#allocation4 + $0xa0] sm:$0xff] }
 0x211   : > { %1715 = vst.msk [vmem:[#allocation4 + $0xa8] sm:$0xff] %vm279_vm1, %v1683_v54  ;;  %7108 = vmatmul.msk.f32.gmra.mxu2 %vm279_vm1, %v2416_v37  ;;  %v2023_v45 = vadd.f32 %v1991_v21, %v8444_v14  ;;  %v3103_v27 = vld [vmem:[#allocation2 + $0xc2] sm:$0xff] }
 0x212   : > { %7141 = vmatmul.msk.f32.gmra.mxu3 %vm279_vm1, %v2757_v28  ;;  %v2331_v4 = vld [vmem:[#allocation4 + $0x98] sm:$0xff]  ;;  %7175 = vmatmul.msk.f32.gmra.mxu0 %vm279_vm1, %v3099_v52 }
 0x213   : > { %v2363_v25 = vadd.f32 %v2331_v4, %v8457_v51  ;;  %2055 = vst.msk [vmem:[#allocation4 + $0xa0] sm:$0xff] %vm279_vm1, %v2023_v45  ;;  %v2288_v20 = vpop.f32.mrf.mxu1  ;;  %v1316_v4 = vld [vmem:[#allocation4 + $0xd8] sm:$0xff] }
 0x214   : > { %v1262_v31 = vpop.f32.mrf.mxu2 }
 0x215   : > { %v1603_v26 = vpop.f32.mrf.mxu3  ;;  %2395 = vst.msk [vmem:[#allocation4 + $0x98] sm:$0xff] %vm279_vm1, %v2363_v25  ;;  %v1344_v34 = vadd.f32 %v1312_v35, %v1262_v31 }
 0x216   : > { %v1652_v41 = vld [vmem:[#allocation4 + $0xb0] sm:$0xff] }
 0x217   : > { %v1684_v40 = vadd.f32 %v1652_v41, %v1600_v39  ;;  %1376 = vst.msk [vmem:[#allocation4 + $0xb8] sm:$0xff] %vm279_vm1, %v1344_v34  ;;  %v8505_v14 = vpop.f32.mrf.mxu0  ;;  %v2761_v39 = vld [vmem:[#allocation2 + $0xb1] sm:$0xff]  ;;  %v2762_v34 = vld [vmem:[#allocation2 + $0xc1] sm:$0xff] }
 0x218   : > { %v1992_v11 = vld [vmem:[#allocation4 + $0xa8] sm:$0xff] }
 0x219   : > { %1716 = vst.msk [vmem:[#allocation4 + $0xb0] sm:$0xff] %vm279_vm1, %v1684_v40  ;;  %7109 = vmatmul.msk.f32.gmra.mxu2 %vm279_vm1, %v2417_v33  ;;  %v2024_v36 = vadd.f32 %v1992_v11, %v8455_v30  ;;  %v3104_v41 = vld [vmem:[#allocation2 + $0xca] sm:$0xff] }
 0x21a   : > { %7142 = vmatmul.msk.f32.gmra.mxu3 %vm279_vm1, %v2758_v57  ;;  %v2332_v61 = vld [vmem:[#allocation4 + $0xa0] sm:$0xff]  ;;  %7176 = vmatmul.msk.f32.gmra.mxu0 %vm279_vm1, %v3100_v47 }
 0x21b   : > { %v2364_v51 = vadd.f32 %v2332_v61, %v8474_v59  ;;  %2056 = vst.msk [vmem:[#allocation4 + $0xa8] sm:$0xff] %vm279_vm1, %v2024_v36  ;;  %v1314_v59 = vld [vmem:[#allocation4 + $0xc8] sm:$0xff]  ;;  %v2291_v21 = vpop.f32.mrf.mxu1  ;;  %v1317_v36 = vld [vmem:[#allocation4 + $0xe0] sm:$0xff] }
 0x21c   : > { %v1265_v55 = vpop.f32.mrf.mxu2 }
 0x21d   : > { %v1606_v49 = vpop.f32.mrf.mxu3  ;;  %2396 = vst.msk [vmem:[#allocation4 + $0xa0] sm:$0xff] %vm279_vm1, %v2364_v51  ;;  %v1345_v60 = vadd.f32 %v1313_v44, %v1265_v55 }
 0x21e   : > { %v1653_v58 = vld [vmem:[#allocation4 + $0xb8] sm:$0xff] }
 0x21f   : > { %v1685_v53 = vadd.f32 %v1653_v58, %v1603_v26  ;;  %1377 = vst.msk [vmem:[#allocation4 + $0xc0] sm:$0xff] %vm279_vm1, %v1345_v60  ;;  %v8516_v30 = vpop.f32.mrf.mxu0  ;;  %v2421_v26 = vld [vmem:[#allocation2 + $0xc0] sm:$0xff]  ;;  %v2763_v60 = vld [vmem:[#allocation2 + $0xc9] sm:$0xff] }
 0x220   : > { %v1993_v7 = vld [vmem:[#allocation4 + $0xb0] sm:$0xff] }
 0x221   : > { %1717 = vst.msk [vmem:[#allocation4 + $0xb8] sm:$0xff] %vm279_vm1, %v1685_v53  ;;  %7110 = vmatmul.msk.f32.gmra.mxu2 %vm279_vm1, %v2418_v50  ;;  %v2025_v10 = vadd.f32 %v1993_v7, %v8468_v1  ;;  %v3105_v50 = vld [vmem:[#allocation2 + $0xda] sm:$0xff] }
 0x222   : > { %7143 = vmatmul.msk.f32.gmra.mxu3 %vm279_vm1, %v2759_v63  ;;  %v2333_v12 = vld [vmem:[#allocation4 + $0xa8] sm:$0xff]  ;;  %7177 = vmatmul.msk.f32.gmra.mxu0 %vm279_vm1, %v3101_v8  ;;  %v3909_v8 = vld [vmem:[%s10272_s2 + $0x4] sm:$0xf] }
 0x223   : > { %v2365_v42 = vadd.f32 %v2333_v12, %v8490_v24  ;;  %2057 = vst.msk [vmem:[#allocation4 + $0xb0] sm:$0xff] %vm279_vm1, %v2025_v10  ;;  %v2294_v55 = vpop.f32.mrf.mxu1  ;;  %7232 = vmatpush.msk.msrb.mxu2 %vm554_vm0, %v3909_v8  ;;  %v1318_v12 = vld [vmem:[#allocation4 + $0xe8] sm:$0xff] }
 0x224   : > { %v1268_v46 = vpop.f32.mrf.mxu2 }
 0x225   : > { %v1609_v3 = vpop.f32.mrf.mxu3  ;;  %2397 = vst.msk [vmem:[#allocation4 + $0xa8] sm:$0xff] %vm279_vm1, %v2365_v42  ;;  %v1346_v5 = vadd.f32 %v1314_v59, %v1268_v46 }
 0x226   : > { %v1654_v2 = vld [vmem:[#allocation4 + $0xc0] sm:$0xff] }
 0x227   : > { %v1686_v23 = vadd.f32 %v1654_v2, %v1606_v49  ;;  %1378 = vst.msk [vmem:[#allocation4 + $0xc8] sm:$0xff] %vm279_vm1, %v1346_v5  ;;  %v8527_v1 = vpop.f32.mrf.mxu0  ;;  %v2422_v49 = vld [vmem:[#allocation2 + $0xc8] sm:$0xff] }
 0x228   : > { %v1994_v19 = vld [vmem:[#allocation4 + $0xb8] sm:$0xff] }
 0x229   : > { %1718 = vst.msk [vmem:[#allocation4 + $0xc0] sm:$0xff] %vm279_vm1, %v1686_v23  ;;  %7111 = vmatmul.msk.f32.gmra.mxu2 %vm279_vm1, %v2419_v17  ;;  %v2026_v48 = vadd.f32 %v1994_v19, %v8481_v6  ;;  %v3106_v17 = vld [vmem:[#allocation2 + $0xe2] sm:$0xff] }
 0x22a   : > { %7144 = vmatmul.msk.f32.gmra.mxu3 %vm279_vm1, %v2760_v32  ;;  %v2334_v22 = vld [vmem:[#allocation4 + $0xb0] sm:$0xff]  ;;  %7178 = vmatmul.msk.f32.gmra.mxu0 %vm279_vm1, %v3102_v16 }
 0x22b   : > { %v2366_v29 = vadd.f32 %v2334_v22, %v2282_v43  ;;  %2058 = vst.msk [vmem:[#allocation4 + $0xb8] sm:$0xff] %vm279_vm1, %v2026_v48  ;;  %v2297_v32 = vpop.f32.mrf.mxu1  ;;  %v1319_v22 = vld [vmem:[#allocation4 + $0xf0] sm:$0xff] }
 0x22c   : > { %v1271_v9 = vpop.f32.mrf.mxu2 }
 0x22d   : > { %v1612_v15 = vpop.f32.mrf.mxu3  ;;  %2398 = vst.msk [vmem:[#allocation4 + $0xb0] sm:$0xff] %vm279_vm1, %v2366_v29  ;;  %v1347_v24 = vadd.f32 %v1315_v56, %v1271_v9 }
 0x22e   : > { %v1655_v18 = vld [vmem:[#allocation4 + $0xc8] sm:$0xff] }
 0x22f   : > { %v1687_v38 = vadd.f32 %v1655_v18, %v1609_v3  ;;  %1379 = vst.msk [vmem:[#allocation4 + $0xd0] sm:$0xff] %vm279_vm1, %v1347_v24  ;;  %v8537_v6 = vpop.f32.mrf.mxu0  ;;  %v2764_v3 = vld [vmem:[#allocation2 + $0xd9] sm:$0xff]  ;;  %v2765_v24 = vld [vmem:[#allocation2 + $0xe1] sm:$0xff] }
 0x230   : > { %v1995_v37 = vld [vmem:[#allocation4 + $0xc0] sm:$0xff] }
 0x231   : > { %1719 = vst.msk [vmem:[#allocation4 + $0xc8] sm:$0xff] %vm279_vm1, %v1687_v38  ;;  %7112 = vmatmul.msk.f32.gmra.mxu2 %vm279_vm1, %v2420_v62  ;;  %v2027_v28 = vadd.f32 %v1995_v37, %v8494_v13 }
 0x232   : > { %7145 = vmatmul.msk.f32.gmra.mxu3 %vm279_vm1, %v2761_v39  ;;  %v2335_v54 = vld [vmem:[#allocation4 + $0xb8] sm:$0xff]  ;;  %7179 = vmatmul.msk.f32.gmra.mxu0 %vm279_vm1, %v3103_v27 }
 0x233   : > { %v2367_v52 = vadd.f32 %v2335_v54, %v2285_v0  ;;  %2059 = vst.msk [vmem:[#allocation4 + $0xc0] sm:$0xff] %vm279_vm1, %v2027_v28  ;;  %v2300_v27 = vpop.f32.mrf.mxu1  ;;  %v4250_v54 = vld [vmem:[%s10272_s2 + $0x8] sm:$0xf] }
 0x234   : > { %v1274_v45 = vpop.f32.mrf.mxu2  ;;  %7265 = vmatpush.msk.msrb.mxu3 %vm554_vm0, %v4250_v54 }
 0x235   : > { %v1615_v25 = vpop.f32.mrf.mxu3  ;;  %2399 = vst.msk [vmem:[#allocation4 + $0xb8] sm:$0xff] %vm279_vm1, %v2367_v52  ;;  %v1348_v31 = vadd.f32 %v1316_v4, %v1274_v45 }
 0x236   : > { %v1656_v35 = vld [vmem:[#allocation4 + $0xd0] sm:$0xff] }
 0x237   : > { %v1688_v43 = vadd.f32 %v1656_v35, %v1612_v15  ;;  %1380 = vst.msk [vmem:[#allocation4 + $0xd8] sm:$0xff] %vm279_vm1, %v1348_v31  ;;  %v8547_v13 = vpop.f32.mrf.mxu0  ;;  %v2424_v15 = vld [vmem:[#allocation2 + $0xe0] sm:$0xff]  ;;  %v2766_v31 = vld [vmem:[#allocation2 + $0xf1] sm:$0xff] }
 0x238   : > { %v1996_v33 = vld [vmem:[#allocation4 + $0xc8] sm:$0xff] }
 0x239   : > { %1720 = vst.msk [vmem:[#allocation4 + $0xd0] sm:$0xff] %vm279_vm1, %v1688_v43  ;;  %7113 = vmatmul.msk.f32.gmra.mxu2 %vm279_vm1, %v2421_v26  ;;  %v2028_v57 = vadd.f32 %v1996_v33, %v8505_v14  ;;  %v3600_v33 = vld [vmem:[#allocation3] sm:$0xff] }
 0x23a   : > { %7146 = vmatmul.msk.f32.gmra.mxu3 %vm279_vm1, %v2762_v34  ;;  %v2336_v40 = vld [vmem:[#allocation4 + $0xc0] sm:$0xff]  ;;  %7180 = vmatmul.msk.f32.gmra.mxu0 %vm279_vm1, %v3104_v41 }
 0x23b   : > { %v2368_v47 = vadd.f32 %v2336_v40, %v2288_v20  ;;  %2060 = vst.msk [vmem:[#allocation4 + $0xc8] sm:$0xff] %vm279_vm1, %v2028_v57  ;;  %v3108_v34 = vld [vmem:[#allocation2 + $0xfa] sm:$0xff]  ;;  %7200 = vmatmul.msk.f32.vlgmr.msra.gmra.mxu1 %vm279_vm1, %v3600_v33 }
 0x23c   : > { %v1277_v11 = vpop.f32.mrf.mxu2 }
 0x23d   : > { %v1618_v61 = vpop.f32.mrf.mxu3  ;;  %2400 = vst.msk [vmem:[#allocation4 + $0xc0] sm:$0xff] %vm279_vm1, %v2368_v47  ;;  %v1349_v51 = vadd.f32 %v1317_v36, %v1277_v11  ;;  %v2303_v47 = vpop.f32.mrf.mxu1  ;;  %v2654_v36 = vld [vmem:[#allocation4] sm:$0xff] }
 0x23e   : > { %v1657_v44 = vld [vmem:[#allocation4 + $0xd8] sm:$0xff] }
 0x23f   : > { %v1689_v58 = vadd.f32 %v1657_v44, %v1615_v25  ;;  %1381 = vst.msk [vmem:[#allocation4 + $0xe0] sm:$0xff] %vm279_vm1, %v1349_v51  ;;  %v8557_v14 = vpop.f32.mrf.mxu0  ;;  %v2425_v25 = vld [vmem:[#allocation2 + $0xf0] sm:$0xff]  ;;  %v2426_v44 = vld [vmem:[#allocation2 + $0xf8] sm:$0xff] }
 0x240   : > { %v1997_v63 = vld [vmem:[#allocation4 + $0xd0] sm:$0xff] }
 0x241   : > { %1721 = vst.msk [vmem:[#allocation4 + $0xd8] sm:$0xff] %vm279_vm1, %v1689_v58  ;;  %7114 = vmatmul.msk.f32.gmra.mxu2 %vm279_vm1, %v2422_v49  ;;  %v2029_v53 = vadd.f32 %v1997_v63, %v8516_v30  ;;  %v2423_v30 = vld [vmem:[#allocation2 + $0xd8] sm:$0xff]  ;;  %v3109_v58 = vld [vmem:[#allocation2 + $0x10a] sm:$0xff] }
 0x242   : > { %7147 = vmatmul.msk.f32.gmra.mxu3 %vm279_vm1, %v2763_v60  ;;  %v2337_v0 = vld [vmem:[#allocation4 + $0xc8] sm:$0xff]  ;;  %7181 = vmatmul.msk.f32.gmra.mxu0 %vm279_vm1, %v3105_v50  ;;  %v2767_v49 = vld [vmem:[#allocation2 + $0xf9] sm:$0xff] }
 0x243   : > { %v2369_v7 = vadd.f32 %v2337_v0, %v2291_v21  ;;  %2061 = vst.msk [vmem:[#allocation4 + $0xd0] sm:$0xff] %vm279_vm1, %v2029_v53  ;;  %v1320_v21 = vld [vmem:[#allocation4 + $0xf8] sm:$0xff] }
 0x244   : > { %v1280_v10 = vpop.f32.mrf.mxu2  ;;  %v3601_v53 = vld [vmem:[#allocation3 + $0x8] sm:$0xff] }
 0x245   : > { %v1621_v42 = vpop.f32.mrf.mxu3  ;;  %2401 = vst.msk [vmem:[#allocation4 + $0xc8] sm:$0xff] %vm279_vm1, %v2369_v7  ;;  %v1350_v46 = vadd.f32 %v1318_v12, %v1280_v10  ;;  %7201 = vmatmul.msk.f32.gmra.mxu1 %vm279_vm1, %v3601_v53  ;;  %v4591_v7 = vld [vmem:[%s10272_s2 + $0xc] sm:$0xf] }
 0x246   : > { %v1658_v59 = vld [vmem:[#allocation4 + $0xe0] sm:$0xff]  ;;  %v2655_v12 = vld [vmem:[#allocation4 + $0x8] sm:$0xff]  ;;  %7298 = vmatpush.msk.msrb.mxu0 %vm554_vm0, %v4591_v7 }
 0x247   : > { %v1690_v5 = vadd.f32 %v1658_v59, %v1618_v61  ;;  %1382 = vst.msk [vmem:[#allocation4 + $0xe8] sm:$0xff] %vm279_vm1, %v1350_v46  ;;  %v8571_v2 = vpop.f32.mrf.mxu0  ;;  %v2427_v59 = vld [vmem:[#allocation2 + $0x108] sm:$0xff] }
 0x248   : > { %v1998_v23 = vld [vmem:[#allocation4 + $0xd8] sm:$0xff] }
 0x249   : > { %1722 = vst.msk [vmem:[#allocation4 + $0xe0] sm:$0xff] %vm279_vm1, %v1690_v5  ;;  %7115 = vmatmul.msk.f32.gmra.mxu2 %vm279_vm1, %v2423_v30  ;;  %v2030_v16 = vadd.f32 %v1998_v23, %v8527_v1  ;;  %v3107_v1 = vld [vmem:[#allocation2 + $0xf2] sm:$0xff]  ;;  %v2768_v30 = vld [vmem:[#allocation2 + $0x109] sm:$0xff] }
 0x24a   : > { %7148 = vmatmul.msk.f32.gmra.mxu3 %vm279_vm1, %v2764_v3  ;;  %v2338_v19 = vld [vmem:[#allocation4 + $0xd0] sm:$0xff]  ;;  %7182 = vmatmul.msk.f32.gmra.mxu0 %vm279_vm1, %v3106_v17  ;;  %v2306_v3 = vpop.f32.mrf.mxu1 }
 0x24b   : > { %v2370_v48 = vadd.f32 %v2338_v19, %v2294_v55  ;;  %2062 = vst.msk [vmem:[#allocation4 + $0xd8] sm:$0xff] %vm279_vm1, %v2030_v16 }
 0x24c   : > { %v1283_v20 = vpop.f32.mrf.mxu2 }
 0x24d   : > { %v1624_v29 = vpop.f32.mrf.mxu3  ;;  %2402 = vst.msk [vmem:[#allocation4 + $0xd0] sm:$0xff] %vm279_vm1, %v2370_v48  ;;  %v1351_v9 = vadd.f32 %v1319_v22, %v1283_v20  ;;  %v4932_v20 = vld [vmem:[%s10272_s2 + $0x10] sm:$0xf] }
 0x24e   : > { %v1659_v56 = vld [vmem:[#allocation4 + $0xe8] sm:$0xff]  ;;  %7331 = vmatpush.msk.msrb.mxu1 %vm554_vm0, %v4932_v20 }
 0x24f   : > { %v1691_v18 = vadd.f32 %v1659_v56, %v1621_v42  ;;  %1383 = vst.msk [vmem:[#allocation4 + $0xf0] sm:$0xff] %vm279_vm1, %v1351_v9  ;;  %v8581_v62 = vpop.f32.mrf.mxu0 }
 0x250   : > { %v1999_v39 = vld [vmem:[#allocation4 + $0xe0] sm:$0xff] }
 0x251   : > { %1723 = vst.msk [vmem:[#allocation4 + $0xe8] sm:$0xff] %vm279_vm1, %v1691_v18  ;;  %7116 = vmatmul.msk.f32.gmra.mxu2 %vm279_vm1, %v2424_v15  ;;  %v2031_v38 = vadd.f32 %v1999_v39, %v8537_v6  ;;  %v3111_v39 = vld [vmem:[#allocation2 + $0x122] sm:$0xff] }
 0x252   : > { %7149 = vmatmul.msk.f32.gmra.mxu3 %vm279_vm1, %v2765_v24  ;;  %v2339_v37 = vld [vmem:[#allocation4 + $0xd8] sm:$0xff]  ;;  %7183 = vmatmul.msk.f32.gmra.mxu0 %vm279_vm1, %v3107_v1 }
 0x253   : > { %v2371_v28 = vadd.f32 %v2339_v37, %v2297_v32  ;;  %2063 = vst.msk [vmem:[#allocation4 + $0xe0] sm:$0xff] %vm279_vm1, %v2031_v38  ;;  %v3110_v32 = vld [vmem:[#allocation2 + $0x112] sm:$0xff] }
 0x254   : > { %v1286_v52 = vpop.f32.mrf.mxu2  ;;  %v2769_v24 = vld [vmem:[#allocation2 + $0x111] sm:$0xff] }
 0x255   : > { %v1627_v45 = vpop.f32.mrf.mxu3  ;;  %2403 = vst.msk [vmem:[#allocation4 + $0xd8] sm:$0xff] %vm279_vm1, %v2371_v28  ;;  %v1352_v4 = vadd.f32 %v1320_v21, %v1286_v52  ;;  %v2657_v21 = vld [vmem:[#allocation4 + $0x18] sm:$0xff] }
 0x256   : > { %v1660_v6 = vld [vmem:[#allocation4 + $0xf0] sm:$0xff] }
 0x257   : > { %v1692_v35 = vadd.f32 %v1660_v6, %v1624_v29  ;;  %1384 = vst.msk [vmem:[#allocation4 + $0xf8] sm:$0xff] %vm279_vm1, %v1352_v4  ;;  %v8595_v26 = vpop.f32.mrf.mxu0  ;;  %v2656_v29 = vld [vmem:[#allocation4 + $0x10] sm:$0xff] }
 0x258   : > { %v2000_v43 = vld [vmem:[#allocation4 + $0xe8] sm:$0xff] }
 0x259   : > { %1724 = vst.msk [vmem:[#allocation4 + $0xf0] sm:$0xff] %vm279_vm1, %v1692_v35  ;;  %7117 = vmatmul.msk.f32.gmra.mxu2 %vm279_vm1, %v2425_v25  ;;  %v2032_v41 = vadd.f32 %v2000_v43, %v8547_v13  ;;  %v2770_v25 = vld [vmem:[#allocation2 + $0x121] sm:$0xff]  ;;  %v8650_v43 = vld [vmem:[%s10273_s3] ss:$0 sm:$0xff] }
 0x25a   : > { %7150 = vmatmul.msk.f32.gmra.mxu3 %vm279_vm1, %v2766_v31  ;;  %v2340_v57 = vld [vmem:[#allocation4 + $0xe0] sm:$0xff]  ;;  %7184 = vmatmul.msk.f32.gmra.mxu0 %vm279_vm1, %v3108_v34  ;;  %v3112_v34 = vld [vmem:[#allocation2 + $0x12a] sm:$0xff] }
 0x25b   : > { %v2372_v40 = vadd.f32 %v2340_v57, %v2300_v27  ;;  %2064 = vst.msk [vmem:[#allocation4 + $0xe8] sm:$0xff] %vm279_vm1, %v2032_v41  ;;  %v2309_v27 = vpop.f32.mrf.mxu1  ;;  %v8659_v57 = vld [vmem:[%s10274_s4] ss:$0 sm:$0xff] }
 0x25c   : > { %v2558_v11 = vpop.f32.mrf.mxu2 }
 0x25d   : > { %v2899_v61 = vpop.f32.mrf.mxu3  ;;  %2404 = vst.msk [vmem:[#allocation4 + $0xe0] sm:$0xff] %vm279_vm1, %v2372_v40  ;;  %v2686_v51 = vadd.f32 %v2654_v36, %v2558_v11 }
 0x25e   : > { %v1661_v55 = vld [vmem:[#allocation4 + $0xf8] sm:$0xff] }
 0x25f   : > { %v1693_v13 = vadd.f32 %v1661_v55, %v1627_v45  ;;  %2718 = vst.msk [vmem:[#allocation4] sm:$0xff] %vm279_vm1, %v2686_v51  ;;  %v8606_v60 = vpop.f32.mrf.mxu0 }
 0x260   : > { %v2001_v50 = vld [vmem:[#allocation4 + $0xf0] sm:$0xff] }
 0x261   : > { %1725 = vst.msk [vmem:[#allocation4 + $0xf8] sm:$0xff] %vm279_vm1, %v1693_v13  ;;  %7118 = vmatmul.msk.f32.gmra.mxu2 %vm279_vm1, %v2426_v44  ;;  %v2033_v63 = vadd.f32 %v2001_v50, %v8557_v14  ;;  %v2430_v44 = vld [vmem:[#allocation2 + $0x128] sm:$0xff]  ;;  %v3113_v50 = vld [vmem:[#allocation2 + $0x13a] sm:$0xff] }
 0x262   : > { %7151 = vmatmul.msk.f32.gmra.mxu3 %vm279_vm1, %v2767_v49  ;;  %v2341_v8 = vld [vmem:[#allocation4 + $0xe8] sm:$0xff]  ;;  %7185 = vmatmul.msk.f32.gmra.mxu0 %vm279_vm1, %v3109_v58 }
 0x263   : > { %v2373_v0 = vadd.f32 %v2341_v8, %v2303_v47  ;;  %2065 = vst.msk [vmem:[#allocation4 + $0xf0] sm:$0xff] %vm279_vm1, %v2033_v63  ;;  %v2771_v49 = vld [vmem:[#allocation2 + $0x129] sm:$0xff] }
 0x264   : > { %v2561_v10 = vpop.f32.mrf.mxu2 }
 0x265   : > { %v2902_v42 = vpop.f32.mrf.mxu3  ;;  %2405 = vst.msk [vmem:[#allocation4 + $0xe8] sm:$0xff] %vm279_vm1, %v2373_v0  ;;  %v2687_v14 = vadd.f32 %v2655_v12, %v2561_v10  ;;  %v2659_v12 = vld [vmem:[#allocation4 + $0x28] sm:$0xff] }
 0x266   : > { %v2995_v46 = vld [vmem:[#allocation4] sm:$0xff] }
 0x267   : > { %v3027_v5 = vadd.f32 %v2995_v46, %v2899_v61  ;;  %2719 = vst.msk [vmem:[#allocation4 + $0x8] sm:$0xff] %vm279_vm1, %v2687_v14  ;;  %v8621_v17 = vpop.f32.mrf.mxu0 }
 0x268   : > { %v2002_v23 = vld [vmem:[#allocation4 + $0xf8] sm:$0xff] }
 0x269   : > { %3059 = vst.msk [vmem:[#allocation4] sm:$0xff] %vm279_vm1, %v3027_v5  ;;  %7119 = vmatmul.msk.f32.gmra.mxu2 %vm279_vm1, %v2427_v59  ;;  %v2034_v16 = vadd.f32 %v2002_v23, %v8571_v2  ;;  %v2428_v2 = vld [vmem:[#allocation2 + $0x110] sm:$0xff]  ;;  %v2431_v59 = vld [vmem:[#allocation2 + $0x138] sm:$0xff] }
 0x26a   : > { %7152 = vmatmul.msk.f32.gmra.mxu3 %vm279_vm1, %v2768_v30  ;;  %v2342_v19 = vld [vmem:[#allocation4 + $0xf0] sm:$0xff]  ;;  %7186 = vmatmul.msk.f32.gmra.mxu0 %vm279_vm1, %v3110_v32  ;;  %v2772_v30 = vld [vmem:[#allocation2 + $0x139] sm:$0xff]  ;;  %v3114_v32 = vld [vmem:[#allocation2 + $0x142] sm:$0xff] }
 0x26b   : > { %v2374_v48 = vadd.f32 %v2342_v19, %v2306_v3  ;;  %2066 = vst.msk [vmem:[#allocation4 + $0xf8] sm:$0xff] %vm279_vm1, %v2034_v16 }
 0x26c   : > { %v2564_v22 = vpop.f32.mrf.mxu2 }
 0x26d   : > { %v2905_v9 = vpop.f32.mrf.mxu3  ;;  %2406 = vst.msk [vmem:[#allocation4 + $0xf0] sm:$0xff] %vm279_vm1, %v2374_v48  ;;  %v2688_v56 = vadd.f32 %v2656_v29, %v2564_v22  ;;  %v2660_v29 = vld [vmem:[#allocation4 + $0x30] sm:$0xff] }
 0x26e   : > { %v2996_v15 = vld [vmem:[#allocation4 + $0x8] sm:$0xff] }
 0x26f   : > { %v3028_v18 = vadd.f32 %v2996_v15, %v2902_v42  ;;  %2720 = vst.msk [vmem:[#allocation4 + $0x10] sm:$0xff] %vm279_vm1, %v2688_v56  ;;  %v8635_v1 = vpop.f32.mrf.mxu0 }
 0x270   : > { %v3336_v38 = vld [vmem:[#allocation4] sm:$0xff] }
 0x271   : > { %v3368_v37 = vadd.f32 %v3336_v38, %v8581_v62  ;;  %3060 = vst.msk [vmem:[#allocation4 + $0x8] sm:$0xff] %vm279_vm1, %v3028_v18  ;;  %7120 = vmatmul.msk.f32.gmra.mxu2 %vm279_vm1, %v2428_v2  ;;  %v2429_v62 = vld [vmem:[#allocation2 + $0x120] sm:$0xff] }
 0x272   : > { %7153 = vmatmul.msk.f32.gmra.mxu3 %vm279_vm1, %v2769_v24  ;;  %v2343_v28 = vld [vmem:[#allocation4 + $0xf8] sm:$0xff]  ;;  %7187 = vmatmul.msk.f32.gmra.mxu0 %vm279_vm1, %v3111_v39  ;;  %v2432_v24 = vld [vmem:[#allocation2 + $0x140] sm:$0xff] }
 0x273   : > { %3400 = vst.msk [vmem:[#allocation4] sm:$0xff] %vm279_vm1, %v3368_v37  ;;  %v2375_v54 = vadd.f32 %v2343_v28, %v2309_v27  ;;  %v2773_v18 = vld [vmem:[#allocation2 + $0x141] sm:$0xff]  ;;  %v3115_v27 = vld [vmem:[#allocation2 + $0x152] sm:$0xff] }
 0x274   : > { %v2567_v52 = vpop.f32.mrf.mxu2 }
 0x275   : > { %v2908_v45 = vpop.f32.mrf.mxu3  ;;  %2407 = vst.msk [vmem:[#allocation4 + $0xf8] sm:$0xff] %vm279_vm1, %v2375_v54  ;;  %v2689_v4 = vadd.f32 %v2657_v21, %v2567_v52 }
 0x276   : > { %v2997_v6 = vld [vmem:[#allocation4 + $0x10] sm:$0xff] }
 0x277   : > { %v3029_v31 = vadd.f32 %v2997_v6, %v2905_v9  ;;  %2721 = vst.msk [vmem:[#allocation4 + $0x18] sm:$0xff] %vm279_vm1, %v2689_v4  ;;  %v8645_v35 = vpop.f32.mrf.mxu0  ;;  %v2661_v4 = vld [vmem:[#allocation4 + $0x38] sm:$0xff] }
 0x278   : > { %v3337_v41 = vld [vmem:[#allocation4 + $0x8] sm:$0xff] }
 0x279   : > { %v3369_v33 = vadd.f32 %v3337_v41, %v8595_v26  ;;  %3061 = vst.msk [vmem:[#allocation4 + $0x10] sm:$0xff] %vm279_vm1, %v3029_v31  ;;  %7121 = vmatmul.msk.f32.gmra.mxu2 %vm279_vm1, %v2429_v62  ;;  %v2658_v26 = vld [vmem:[#allocation4 + $0x20] sm:$0xff]  ;;  %v2774_v41 = vld [vmem:[#allocation2 + $0x151] sm:$0xff] }
 0x27a   : > { %7154 = vmatmul.msk.f32.gmra.mxu3 %vm279_vm1, %v2770_v25  ;;  %7188 = vmatmul.msk.f32.gmra.mxu0 %vm279_vm1, %v3112_v34  ;;  %v3432_v40 = vld [vmem:[#allocation4] sm:$0xff]  ;;  %v2433_v34 = vld [vmem:[#allocation2 + $0x150] sm:$0xff] }
 0x27b   : > { %3401 = vst.msk [vmem:[#allocation4 + $0x8] sm:$0xff] %vm279_vm1, %v3369_v33  ;;  %v3468_v47 = vmul.f32 %v8650_v43, %v3432_v40 }
 0x27c   : > { %v2570_v11 = vpop.f32.mrf.mxu2 }
 0x27d   : > { %v2911_v36 = vpop.f32.mrf.mxu3  ;;  %v2690_v61 = vadd.f32 %v2658_v26, %v2570_v11  ;;  %v3504_v51 = vadd.f32 %v8659_v57, %v3468_v47  ;;  %v3116_v47 = vld [vmem:[#allocation2 + $0x15a] sm:$0xff] }
 0x27e   : > { %v2998_v55 = vld [vmem:[#allocation4 + $0x18] sm:$0xff] }
 0x27f   : > { %v3030_v13 = vadd.f32 %v2998_v55, %v2908_v45  ;;  %2722 = vst.msk [vmem:[#allocation4 + $0x20] sm:$0xff] %vm279_vm1, %v2690_v61  ;;  %v8666_v58 = vpop.f32.mrf.mxu0  ;;  %v3536_v63 = vmax.f32 %v3504_v51, 0.0 }
 0x280   : > { %v3338_v53 = vld [vmem:[#allocation4 + $0x10] sm:$0xff] }
 0x281   : > { %v3370_v8 = vadd.f32 %v3338_v53, %v8606_v60  ;;  %3062 = vst.msk [vmem:[#allocation4 + $0x18] sm:$0xff] %vm279_vm1, %v3030_v13  ;;  %7122 = vmatmul.msk.f32.gmra.mxu2 %vm279_vm1, %v2430_v44  ;;  %v2662_v44 = vld [vmem:[#allocation4 + $0x40] sm:$0xff]  ;;  %v2434_v53 = vld [vmem:[#allocation2 + $0x158] sm:$0xff] }
 0x282   : > { %7155 = vmatmul.msk.f32.gmra.mxu3 %vm279_vm1, %v2771_v49  ;;  %7189 = vmatmul.msk.f32.gmra.mxu0 %vm279_vm1, %v3113_v50  ;;  %3568 = vst.msk [vmem:[#allocation3 + $0x19] sm:$0xff] %vm279_vm1, %v3536_v63  ;;  %v3433_v0 = vld [vmem:[#allocation4 + $0x8] sm:$0xff] }
 0x283   : > { %3402 = vst.msk [vmem:[#allocation4 + $0x10] sm:$0xff] %vm279_vm1, %v3370_v8  ;;  %v3469_v7 = vmul.f32 %v8650_v43, %v3433_v0  ;;  %v2775_v8 = vld [vmem:[#allocation2 + $0x159] sm:$0xff] }
 0x284   : > { %v2573_v10 = vpop.f32.mrf.mxu2 }
 0x285   : > { %v2914_v42 = vpop.f32.mrf.mxu3  ;;  %v2691_v14 = vadd.f32 %v2659_v12, %v2573_v10  ;;  %v3505_v60 = vadd.f32 %v8659_v57, %v3469_v7  ;;  %v3117_v10 = vld [vmem:[#allocation2 + $0x16a] sm:$0xff] }
 0x286   : > { %v2999_v46 = vld [vmem:[#allocation4 + $0x20] sm:$0xff] }
 0x287   : > { %v3031_v3 = vadd.f32 %v2999_v46, %v2911_v36  ;;  %2723 = vst.msk [vmem:[#allocation4 + $0x28] sm:$0xff] %vm279_vm1, %v2691_v14  ;;  %v8678_v5 = vpop.f32.mrf.mxu0  ;;  %v3537_v23 = vmax.f32 %v3505_v60, 0.0 }
 0x288   : > { %v3339_v16 = vld [vmem:[#allocation4 + $0x18] sm:$0xff] }
 0x289   : > { %v3371_v19 = vadd.f32 %v3339_v16, %v8621_v17  ;;  %3063 = vst.msk [vmem:[#allocation4 + $0x20] sm:$0xff] %vm279_vm1, %v3031_v3  ;;  %7123 = vmatmul.msk.f32.gmra.mxu2 %vm279_vm1, %v2431_v59  ;;  %v8684_v48 = vld [vmem:[#allocation3 + $0x18] sm:$0xff] }
 0x28a   : > { %7156 = vmatmul.msk.f32.gmra.mxu3 %vm279_vm1, %v2772_v30  ;;  %7202 = vmatmul.msk.f32.gmra.mxu1 %vm279_vm1, %v8684_v48  ;;  %3569 = vst.msk [vmem:[#allocation3 + $0x21] sm:$0xff] %vm279_vm1, %v3537_v23  ;;  %v3434_v20 = vld [vmem:[#allocation4 + $0x10] sm:$0xff]  ;;  %v2663_v30 = vld [vmem:[#allocation4 + $0x48] sm:$0xff] }
 0x28b   : > { %7190 = vmatmul.msk.f32.gmra.mxu0 %vm279_vm1, %v3114_v32  ;;  %3403 = vst.msk [vmem:[#allocation4 + $0x18] sm:$0xff] %vm279_vm1, %v3371_v19  ;;  %v3470_v17 = vmul.f32 %v8650_v43, %v3434_v20  ;;  %v2435_v19 = vld [vmem:[#allocation2 + $0x168] sm:$0xff] }
 0x28c   : > { %v2576_v22 = vpop.f32.mrf.mxu2  ;;  %v2776_v20 = vld [vmem:[#allocation2 + $0x169] sm:$0xff] }
 0x28d   : > { %v2917_v9 = vpop.f32.mrf.mxu3  ;;  %v2692_v56 = vadd.f32 %v2660_v29, %v2576_v22  ;;  %v3506_v15 = vadd.f32 %v8659_v57, %v3470_v17  ;;  %v3118_v29 = vld [vmem:[#allocation2 + $0x172] sm:$0xff] }
 0x28e   : > { %v3000_v2 = vld [vmem:[#allocation4 + $0x28] sm:$0xff] }
 0x28f   : > { %v3032_v39 = vadd.f32 %v3000_v2, %v2914_v42  ;;  %2724 = vst.msk [vmem:[#allocation4 + $0x30] sm:$0xff] %vm279_vm1, %v2692_v56  ;;  %v8694_v38 = vpop.f32.mrf.mxu0  ;;  %v3538_v37 = vmax.f32 %v3506_v15, 0.0 }
 0x290   : > { %v3340_v28 = vld [vmem:[#allocation4 + $0x20] sm:$0xff] }
 0x291   : > { %v3372_v54 = vadd.f32 %v3340_v28, %v8635_v1  ;;  %3064 = vst.msk [vmem:[#allocation4 + $0x28] sm:$0xff] %vm279_vm1, %v3032_v39  ;;  %7124 = vmatmul.msk.f32.gmra.mxu2 %vm279_vm1, %v2432_v24  ;;  %v8700_v52 = vld [vmem:[#allocation3 + $0x20] sm:$0xff] }
 0x292   : > { %7157 = vmatmul.msk.f32.gmra.mxu3 %vm279_vm1, %v2773_v18  ;;  %7203 = vmatmul.msk.f32.gmra.mxu1 %vm279_vm1, %v8700_v52  ;;  %3570 = vst.msk [vmem:[#allocation3 + $0x31] sm:$0xff] %vm279_vm1, %v3538_v37  ;;  %v3435_v21 = vld [vmem:[#allocation4 + $0x18] sm:$0xff]  ;;  %v2664_v39 = vld [vmem:[#allocation4 + $0x50] sm:$0xff] }
 0x293   : > { %7191 = vmatmul.msk.f32.gmra.mxu0 %vm279_vm1, %v3115_v27  ;;  %3404 = vst.msk [vmem:[#allocation4 + $0x20] sm:$0xff] %vm279_vm1, %v3372_v54  ;;  %v3471_v1 = vmul.f32 %v8650_v43, %v3435_v21  ;;  %v2436_v21 = vld [vmem:[#allocation2 + $0x170] sm:$0xff] }
 0x294   : > { %v2579_v45 = vpop.f32.mrf.mxu2 }
 0x295   : > { %v2920_v6 = vpop.f32.mrf.mxu3  ;;  %v2693_v62 = vadd.f32 %v2661_v4, %v2579_v45  ;;  %v3507_v25 = vadd.f32 %v8659_v57, %v3471_v1  ;;  %v2777_v1 = vld [vmem:[#allocation2 + $0x171] sm:$0xff] }
 0x296   : > { %v3001_v31 = vld [vmem:[#allocation4 + $0x30] sm:$0xff] }
 0x297   : > { %v3033_v33 = vadd.f32 %v3001_v31, %v2917_v9  ;;  %2725 = vst.msk [vmem:[#allocation4 + $0x38] sm:$0xff] %vm279_vm1, %v2693_v62  ;;  %v8710_v40 = vpop.f32.mrf.mxu0  ;;  %v3539_v11 = vmax.f32 %v3507_v25, 0.0 }
 0x298   : > { %v3341_v26 = vld [vmem:[#allocation4 + $0x28] sm:$0xff] }
 0x299   : > { %v3373_v36 = vadd.f32 %v3341_v26, %v8645_v35  ;;  %3065 = vst.msk [vmem:[#allocation4 + $0x30] sm:$0xff] %vm279_vm1, %v3033_v33  ;;  %7125 = vmatmul.msk.f32.gmra.mxu2 %vm279_vm1, %v2433_v34  ;;  %v8716_v61 = vld [vmem:[#allocation3 + $0x30] sm:$0xff] }
 0x29a   : > { %7158 = vmatmul.msk.f32.gmra.mxu3 %vm279_vm1, %v2774_v41  ;;  %7204 = vmatmul.msk.f32.gmra.mxu1 %vm279_vm1, %v8716_v61  ;;  %3571 = vst.msk [vmem:[#allocation3 + $0x39] sm:$0xff] %vm279_vm1, %v3539_v11  ;;  %v3436_v51 = vld [vmem:[#allocation4 + $0x20] sm:$0xff] }
 0x29b   : > { %7192 = vmatmul.msk.f32.gmra.mxu0 %vm279_vm1, %v3116_v47  ;;  %3405 = vst.msk [vmem:[#allocation4 + $0x28] sm:$0xff] %vm279_vm1, %v3373_v36  ;;  %v3472_v35 = vmul.f32 %v8650_v43, %v3436_v51  ;;  %v2665_v47 = vld [vmem:[#allocation4 + $0x58] sm:$0xff] }
 0x29c   : > { %v2582_v55 = vpop.f32.mrf.mxu2 }
 0x29d   : > { %v2923_v49 = vpop.f32.mrf.mxu3  ;;  %v2694_v13 = vadd.f32 %v2662_v44, %v2582_v55  ;;  %v3508_v50 = vadd.f32 %v8659_v57, %v3472_v35  ;;  %v2437_v35 = vld [vmem:[#allocation2 + $0x180] sm:$0xff] }
 0x29e   : > { %v3002_v63 = vld [vmem:[#allocation4 + $0x38] sm:$0xff]  ;;  %v2778_v55 = vld [vmem:[#allocation2 + $0x181] sm:$0xff] }
 0x29f   : > { %v3034_v0 = vadd.f32 %v3002_v63, %v2920_v6  ;;  %2726 = vst.msk [vmem:[#allocation4 + $0x40] sm:$0xff] %vm279_vm1, %v2694_v13  ;;  %v8726_v7 = vpop.f32.mrf.mxu0  ;;  %v3540_v12 = vmax.f32 %v3508_v50, 0.0  ;;  %v3119_v6 = vld [vmem:[#allocation2 + $0x182] sm:$0xff]  ;;  %v3120_v13 = vld [vmem:[#allocation2 + $0x18a] sm:$0xff] }
 0x2a0   : > { %v3342_v42 = vld [vmem:[#allocation4 + $0x30] sm:$0xff] }
 0x2a1   : > { %v3374_v14 = vadd.f32 %v3342_v42, %v8666_v58  ;;  %3066 = vst.msk [vmem:[#allocation4 + $0x38] sm:$0xff] %vm279_vm1, %v3034_v0  ;;  %7126 = vmatmul.msk.f32.gmra.mxu2 %vm279_vm1, %v2434_v53  ;;  %v8732_v60 = vld [vmem:[#allocation3 + $0x38] sm:$0xff] }
 0x2a2   : > { %7159 = vmatmul.msk.f32.gmra.mxu3 %vm279_vm1, %v2775_v8  ;;  %7205 = vmatmul.msk.f32.gmra.mxu1 %vm279_vm1, %v8732_v60  ;;  %3572 = vst.msk [vmem:[#allocation3 + $0x49] sm:$0xff] %vm279_vm1, %v3540_v12  ;;  %v3437_v46 = vld [vmem:[#allocation4 + $0x28] sm:$0xff]  ;;  %v2666_v12 = vld [vmem:[#allocation4 + $0x60] sm:$0xff] }
 0x2a3   : > { %7193 = vmatmul.msk.f32.gmra.mxu0 %vm279_vm1, %v3117_v10  ;;  %3406 = vst.msk [vmem:[#allocation4 + $0x30] sm:$0xff] %vm279_vm1, %v3374_v14  ;;  %v3473_v58 = vmul.f32 %v8650_v43, %v3437_v46 }
 0x2a4   : > { %v2585_v59 = vpop.f32.mrf.mxu2 }
 0x2a5   : > { %v2926_v3 = vpop.f32.mrf.mxu3  ;;  %v2695_v32 = vadd.f32 %v2663_v30, %v2585_v59  ;;  %v3509_v23 = vadd.f32 %v8659_v57, %v3473_v58  ;;  %v2438_v59 = vld [vmem:[#allocation2 + $0x188] sm:$0xff] }
 0x2a6   : > { %v3003_v16 = vld [vmem:[#allocation4 + $0x40] sm:$0xff]  ;;  %v2779_v30 = vld [vmem:[#allocation2 + $0x189] sm:$0xff] }
 0x2a7   : > { %v3035_v17 = vadd.f32 %v3003_v16, %v2923_v49  ;;  %2727 = vst.msk [vmem:[#allocation4 + $0x48] sm:$0xff] %vm279_vm1, %v2695_v32  ;;  %v8742_v22 = vpop.f32.mrf.mxu0  ;;  %v3541_v9 = vmax.f32 %v3509_v23, 0.0  ;;  %v3121_v23 = vld [vmem:[#allocation2 + $0x19a] sm:$0xff] }
 0x2a8   : > { %v3343_v56 = vld [vmem:[#allocation4 + $0x38] sm:$0xff] }
 0x2a9   : > { %v3375_v15 = vadd.f32 %v3343_v56, %v8678_v5  ;;  %3067 = vst.msk [vmem:[#allocation4 + $0x40] sm:$0xff] %vm279_vm1, %v3035_v17  ;;  %7127 = vmatmul.msk.f32.gmra.mxu2 %vm279_vm1, %v2435_v19  ;;  %v8748_v2 = vld [vmem:[#allocation3 + $0x48] sm:$0xff]  ;;  %v2667_v56 = vld [vmem:[#allocation4 + $0x68] sm:$0xff] }
 0x2aa   : > { %7160 = vmatmul.msk.f32.gmra.mxu3 %vm279_vm1, %v2776_v20  ;;  %7206 = vmatmul.msk.f32.gmra.mxu1 %vm279_vm1, %v8748_v2  ;;  %3573 = vst.msk [vmem:[#allocation3 + $0x51] sm:$0xff] %vm279_vm1, %v3541_v9  ;;  %v3438_v24 = vld [vmem:[#allocation4 + $0x30] sm:$0xff] }
 0x2ab   : > { %7194 = vmatmul.msk.f32.gmra.mxu0 %vm279_vm1, %v3118_v29  ;;  %3407 = vst.msk [vmem:[#allocation4 + $0x38] sm:$0xff] %vm279_vm1, %v3375_v15  ;;  %v3474_v5 = vmul.f32 %v8650_v43, %v3438_v24 }
 0x2ac   : > { %v2588_v18 = vpop.f32.mrf.mxu2 }
 0x2ad   : > { %v2929_v27 = vpop.f32.mrf.mxu3  ;;  %v2696_v37 = vadd.f32 %v2664_v39, %v2588_v18  ;;  %v3510_v28 = vadd.f32 %v8659_v57, %v3474_v5  ;;  %v2439_v39 = vld [vmem:[#allocation2 + $0x198] sm:$0xff] }
 0x2ae   : > { %v3004_v54 = vld [vmem:[#allocation4 + $0x48] sm:$0xff] }
 0x2af   : > { %v3036_v45 = vadd.f32 %v3004_v54, %v2926_v3  ;;  %2728 = vst.msk [vmem:[#allocation4 + $0x50] sm:$0xff] %vm279_vm1, %v2696_v37  ;;  %v8758_v4 = vpop.f32.mrf.mxu0  ;;  %v3542_v62 = vmax.f32 %v3510_v28, 0.0  ;;  %v3122_v54 = vld [vmem:[#allocation2 + $0x1a2] sm:$0xff] }
 0x2b0   : > { %v3344_v25 = vld [vmem:[#allocation4 + $0x40] sm:$0xff] }
 0x2b1   : > { %v3376_v31 = vadd.f32 %v3344_v25, %v8694_v38  ;;  %3068 = vst.msk [vmem:[#allocation4 + $0x48] sm:$0xff] %vm279_vm1, %v3036_v45  ;;  %7128 = vmatmul.msk.f32.gmra.mxu2 %vm279_vm1, %v2436_v21  ;;  %v8764_v34 = vld [vmem:[#allocation3 + $0x50] sm:$0xff] }
 0x2b2   : > { %7161 = vmatmul.msk.f32.gmra.mxu3 %vm279_vm1, %v2777_v1  ;;  %7207 = vmatmul.msk.f32.gmra.mxu1 %vm279_vm1, %v8764_v34  ;;  %3574 = vst.msk [vmem:[#allocation3 + $0x61] sm:$0xff] %vm279_vm1, %v3542_v62  ;;  %v3439_v41 = vld [vmem:[#allocation4 + $0x38] sm:$0xff] }
 0x2b3   : > { %7195 = vmatmul.msk.f32.gmra.mxu0 %vm279_vm1, %v3119_v6  ;;  %3408 = vst.msk [vmem:[#allocation4 + $0x40] sm:$0xff] %vm279_vm1, %v3376_v31  ;;  %v3475_v38 = vmul.f32 %v8650_v43, %v3439_v41  ;;  %v2668_v31 = vld [vmem:[#allocation4 + $0x70] sm:$0xff] }
 0x2b4   : > { %v2591_v33 = vpop.f32.mrf.mxu2 }
 0x2b5   : > { %v2932_v11 = vpop.f32.mrf.mxu3  ;;  %v2697_v26 = vadd.f32 %v2665_v47, %v2591_v33  ;;  %v3511_v36 = vadd.f32 %v8659_v57, %v3475_v38 }
 0x2b6   : > { %v3005_v51 = vld [vmem:[#allocation4 + $0x50] sm:$0xff] }
 0x2b7   : > { %v3037_v44 = vadd.f32 %v3005_v51, %v2929_v27  ;;  %2729 = vst.msk [vmem:[#allocation4 + $0x58] sm:$0xff] %vm279_vm1, %v2697_v26  ;;  %v8774_v49 = vpop.f32.mrf.mxu0  ;;  %v3543_v50 = vmax.f32 %v3511_v36, 0.0  ;;  %v2780_v27 = vld [vmem:[#allocation2 + $0x199] sm:$0xff]  ;;  %v2781_v26 = vld [vmem:[#allocation2 + $0x1a1] sm:$0xff] }
 0x2b8   : > { %v3345_v63 = vld [vmem:[#allocation4 + $0x48] sm:$0xff] }
 0x2b9   : > { %v3377_v53 = vadd.f32 %v3345_v63, %v8710_v40  ;;  %3069 = vst.msk [vmem:[#allocation4 + $0x50] sm:$0xff] %vm279_vm1, %v3037_v44  ;;  %7129 = vmatmul.msk.f32.gmra.mxu2 %vm279_vm1, %v2437_v35  ;;  %v8780_v8 = vld [vmem:[#allocation3 + $0x60] sm:$0xff] }
 0x2ba   : > { %7162 = vmatmul.msk.f32.gmra.mxu3 %vm279_vm1, %v2778_v55  ;;  %7208 = vmatmul.msk.f32.gmra.mxu1 %vm279_vm1, %v8780_v8  ;;  %3575 = vst.msk [vmem:[#allocation3 + $0x69] sm:$0xff] %vm279_vm1, %v3543_v50  ;;  %v3440_v0 = vld [vmem:[#allocation4 + $0x40] sm:$0xff] }
 0x2bb   : > { %7196 = vmatmul.msk.f32.gmra.mxu0 %vm279_vm1, %v3120_v13  ;;  %3409 = vst.msk [vmem:[#allocation4 + $0x48] sm:$0xff] %vm279_vm1, %v3377_v53  ;;  %v3476_v40 = vmul.f32 %v8650_v43, %v3440_v0  ;;  %v2669_v53 = vld [vmem:[#allocation4 + $0x78] sm:$0xff] }
 0x2bc   : > { %v2594_v10 = vpop.f32.mrf.mxu2 }
 0x2bd   : > { %v2935_v42 = vpop.f32.mrf.mxu3  ;;  %v2698_v14 = vadd.f32 %v2666_v12, %v2594_v10  ;;  %v3512_v46 = vadd.f32 %v8659_v57, %v3476_v40 }
 0x2be   : > { %v3006_v58 = vld [vmem:[#allocation4 + $0x58] sm:$0xff] }
 0x2bf   : > { %v3038_v3 = vadd.f32 %v3006_v58, %v2932_v11  ;;  %2730 = vst.msk [vmem:[#allocation4 + $0x60] sm:$0xff] %vm279_vm1, %v2698_v14  ;;  %v8790_v32 = vpop.f32.mrf.mxu0  ;;  %v3544_v16 = vmax.f32 %v3512_v46, 0.0  ;;  %v2440_v11 = vld [vmem:[#allocation2 + $0x1a0] sm:$0xff]  ;;  %v4218_v14 = vld [vmem:[#allocation3 + $0x2] sm:$0xff] }
 0x2c0   : > { %v3346_v19 = vld [vmem:[#allocation4 + $0x50] sm:$0xff] }
 0x2c1   : > { %v3378_v20 = vadd.f32 %v3346_v19, %v8726_v7  ;;  %3070 = vst.msk [vmem:[#allocation4 + $0x58] sm:$0xff] %vm279_vm1, %v3038_v3  ;;  %7130 = vmatmul.msk.f32.gmra.mxu2 %vm279_vm1, %v2438_v59  ;;  %v8796_v17 = vld [vmem:[#allocation3 + $0x68] sm:$0xff] }
 0x2c2   : > { %7163 = vmatmul.msk.f32.gmra.mxu3 %vm279_vm1, %v2779_v30  ;;  %7209 = vmatmul.msk.f32.gmra.mxu1 %vm279_vm1, %v8796_v17  ;;  %3576 = vst.msk [vmem:[#allocation3 + $0x79] sm:$0xff] %vm279_vm1, %v3544_v16  ;;  %v3441_v29 = vld [vmem:[#allocation4 + $0x48] sm:$0xff] }
 0x2c3   : > { %7197 = vmatmul.msk.f32.gmra.mxu0 %vm279_vm1, %v3121_v23  ;;  %3410 = vst.msk [vmem:[#allocation4 + $0x50] sm:$0xff] %vm279_vm1, %v3378_v20  ;;  %v3477_v7 = vmul.f32 %v8650_v43, %v3441_v29  ;;  %v3749_v23 = vpop.f32.mrf.mxu1  ;;  %v2670_v20 = vld [vmem:[#allocation4 + $0x80] sm:$0xff] }
 0x2c4   : > { %v2597_v9 = vpop.f32.mrf.mxu2  ;;  %3845 = vst.msk [vmem:[#allocation4] sm:$0xff] %vm279_vm1, %v3749_v23 }
 0x2c5   : > { %v2938_v15 = vpop.f32.mrf.mxu3  ;;  %v2699_v24 = vadd.f32 %v2667_v56, %v2597_v9  ;;  %v3513_v5 = vadd.f32 %v8659_v57, %v3477_v7 }
 0x2c6   : > { %v3007_v18 = vld [vmem:[#allocation4 + $0x60] sm:$0xff] }
 0x2c7   : > { %v3039_v37 = vadd.f32 %v3007_v18, %v2935_v42  ;;  %2731 = vst.msk [vmem:[#allocation4 + $0x68] sm:$0xff] %vm279_vm1, %v2699_v24  ;;  %v8806_v28 = vpop.f32.mrf.mxu0  ;;  %v3545_v21 = vmax.f32 %v3513_v5, 0.0  ;;  %v3877_v42 = vld [vmem:[#allocation3 + $0x1] sm:$0xff]  ;;  %v4219_v24 = vld [vmem:[#allocation3 + $0xa] sm:$0xff] }
 0x2c8   : > { %v3347_v1 = vld [vmem:[#allocation4 + $0x58] sm:$0xff] }
 0x2c9   : > { %v3379_v45 = vadd.f32 %v3347_v1, %v8742_v22  ;;  %3071 = vst.msk [vmem:[#allocation4 + $0x60] sm:$0xff] %vm279_vm1, %v3039_v37  ;;  %7131 = vmatmul.msk.f32.gmra.mxu2 %vm279_vm1, %v2439_v39  ;;  %v8812_v6 = vld [vmem:[#allocation3 + $0x78] sm:$0xff] }
 0x2ca   : > { %7164 = vmatmul.msk.f32.gmra.mxu3 %vm279_vm1, %v2780_v27  ;;  %7210 = vmatmul.msk.f32.gmra.mxu1 %vm279_vm1, %v8812_v6  ;;  %3577 = vst.msk [vmem:[#allocation3 + $0x81] sm:$0xff] %vm279_vm1, %v3545_v21  ;;  %v3442_v62 = vld [vmem:[#allocation4 + $0x50] sm:$0xff] }
 0x2cb   : > { %7198 = vmatmul.msk.f32.gmra.mxu0 %vm279_vm1, %v3122_v54  ;;  %3411 = vst.msk [vmem:[#allocation4 + $0x58] sm:$0xff] %vm279_vm1, %v3379_v45  ;;  %v3478_v22 = vmul.f32 %v8650_v43, %v3442_v62  ;;  %v3752_v54 = vpop.f32.mrf.mxu1  ;;  %v2671_v45 = vld [vmem:[#allocation4 + $0x88] sm:$0xff] }
 0x2cc   : > { %v2600_v25 = vpop.f32.mrf.mxu2  ;;  %3846 = vst.msk [vmem:[#allocation4 + $0x8] sm:$0xff] %vm279_vm1, %v3752_v54 }
 0x2cd   : > { %v2941_v41 = vpop.f32.mrf.mxu3  ;;  %v2700_v38 = vadd.f32 %v2668_v31, %v2600_v25  ;;  %v3514_v33 = vadd.f32 %v8659_v57, %v3478_v22 }
 0x2ce   : > { %v3008_v47 = vld [vmem:[#allocation4 + $0x68] sm:$0xff] }
 0x2cf   : > { %v3040_v36 = vadd.f32 %v3008_v47, %v2938_v15  ;;  %2732 = vst.msk [vmem:[#allocation4 + $0x70] sm:$0xff] %vm279_vm1, %v2700_v38  ;;  %v8822_v51 = vpop.f32.mrf.mxu0  ;;  %v3546_v35 = vmax.f32 %v3514_v33, 0.0  ;;  %v3878_v15 = vld [vmem:[#allocation3 + $0x9] sm:$0xff]  ;;  %v8877_v47 = vld [vmem:[#allocation3 + $0x19] sm:$0xff] }
 0x2d0   : > { %v3348_v55 = vld [vmem:[#allocation4 + $0x60] sm:$0xff] }
 0x2d1   : > { %v3380_v44 = vadd.f32 %v3348_v55, %v8758_v4  ;;  %3072 = vst.msk [vmem:[#allocation4 + $0x68] sm:$0xff] %vm279_vm1, %v3040_v36  ;;  %7132 = vmatmul.msk.f32.gmra.mxu2 %vm279_vm1, %v2440_v11  ;;  %v8828_v13 = vld [vmem:[#allocation3 + $0x80] sm:$0xff] }
 0x2d2   : > { %7165 = vmatmul.msk.f32.gmra.mxu3 %vm279_vm1, %v2781_v26  ;;  %7211 = vmatmul.msk.f32.gmra.mxu1 %vm279_vm1, %v8828_v13  ;;  %3578 = vst.msk [vmem:[#allocation3 + $0x91] sm:$0xff] %vm279_vm1, %v3546_v35  ;;  %v3443_v50 = vld [vmem:[#allocation4 + $0x58] sm:$0xff]  ;;  %v4220_v11 = vld [vmem:[#allocation3 + $0x1a] sm:$0xff] }
 0x2d3   : > { %7299 = vmatmul.msk.f32.vlgmr.msrb.gmra.mxu0 %vm279_vm1, %v8684_v48  ;;  %3412 = vst.msk [vmem:[#allocation4 + $0x60] sm:$0xff] %vm279_vm1, %v3380_v44  ;;  %v3479_v4 = vmul.f32 %v8650_v43, %v3443_v50  ;;  %v2672_v44 = vld [vmem:[#allocation4 + $0x90] sm:$0xff] }
 0x2d4   : > { %v2603_v63 = vpop.f32.mrf.mxu2 }
 0x2d5   : > { %v2944_v0 = vpop.f32.mrf.mxu3  ;;  %v2701_v40 = vadd.f32 %v2669_v53, %v2603_v63  ;;  %v3515_v10 = vadd.f32 %v8659_v57, %v3479_v4 }
 0x2d6   : > { %v3009_v12 = vld [vmem:[#allocation4 + $0x70] sm:$0xff] }
 0x2d7   : > { %v3041_v46 = vadd.f32 %v3009_v12, %v2941_v41  ;;  %2733 = vst.msk [vmem:[#allocation4 + $0x78] sm:$0xff] %vm279_vm1, %v2701_v40  ;;  %v8839_v48 = vpop.f32.mrf.mxu0  ;;  %v3547_v58 = vmax.f32 %v3515_v10, 0.0  ;;  %v8897_v12 = vld [vmem:[#allocation3 + $0x21] sm:$0xff] }
 0x2d8   : > { %v3349_v59 = vld [vmem:[#allocation4 + $0x68] sm:$0xff] }
 0x2d9   : > { %v3381_v30 = vadd.f32 %v3349_v59, %v8774_v49  ;;  %3073 = vst.msk [vmem:[#allocation4 + $0x70] sm:$0xff] %vm279_vm1, %v3041_v46  ;;  %v8843_v3 = vld [vmem:[#allocation3 + $0x90] sm:$0xff]  ;;  %7233 = vmatmul.msk.f32.vlgmr.msrb.gmra.mxu2 %vm279_vm1, %v3877_v42  ;;  %v4221_v42 = vld [vmem:[#allocation3 + $0x22] sm:$0xff] }
 0x2da   : > { %7266 = vmatmul.msk.f32.vlgmr.msrb.gmra.mxu3 %vm279_vm1, %v4218_v14  ;;  %7212 = vmatmul.msk.f32.gmra.mxu1 %vm279_vm1, %v8843_v3  ;;  %3579 = vst.msk [vmem:[#allocation3 + $0x99] sm:$0xff] %vm279_vm1, %v3547_v58  ;;  %v3444_v16 = vld [vmem:[#allocation4 + $0x60] sm:$0xff] }
 0x2db   : > { %7300 = vmatmul.msk.f32.gmra.mxu0 %vm279_vm1, %v8700_v52  ;;  %3413 = vst.msk [vmem:[#allocation4 + $0x68] sm:$0xff] %vm279_vm1, %v3381_v30  ;;  %v3480_v49 = vmul.f32 %v8650_v43, %v3444_v16  ;;  %v2673_v30 = vld [vmem:[#allocation4 + $0x98] sm:$0xff] }
 0x2dc   : > { %v2606_v19 = vpop.f32.mrf.mxu2 }
 0x2dd   : > { %v2947_v29 = vpop.f32.mrf.mxu3  ;;  %v2702_v7 = vadd.f32 %v2670_v20, %v2606_v19  ;;  %v3516_v9 = vadd.f32 %v8659_v57, %v3480_v49 }
 0x2de   : > { %v3010_v56 = vld [vmem:[#allocation4 + $0x78] sm:$0xff] }
 0x2df   : > { %v3042_v5 = vadd.f32 %v3010_v56, %v2944_v0  ;;  %2734 = vst.msk [vmem:[#allocation4 + $0x80] sm:$0xff] %vm279_vm1, %v2702_v7  ;;  %v8857_v52 = vpop.f32.mrf.mxu0  ;;  %v3548_v18 = vmax.f32 %v3516_v9, 0.0  ;;  %v8917_v9 = vld [vmem:[#allocation3 + $0x31] sm:$0xff] }
 0x2e0   : > { %v3350_v39 = vld [vmem:[#allocation4 + $0x70] sm:$0xff]  ;;  %v4222_v56 = vld [vmem:[#allocation3 + $0x32] sm:$0xff] }
 0x2e1   : > { %v3382_v27 = vadd.f32 %v3350_v39, %v8790_v32  ;;  %3074 = vst.msk [vmem:[#allocation4 + $0x78] sm:$0xff] %vm279_vm1, %v3042_v5  ;;  %v8861_v37 = vld [vmem:[#allocation3 + $0x98] sm:$0xff]  ;;  %7234 = vmatmul.msk.f32.gmra.mxu2 %vm279_vm1, %v3878_v15  ;;  %v2674_v39 = vld [vmem:[#allocation4 + $0xa0] sm:$0xff] }
 0x2e2   : > { %7267 = vmatmul.msk.f32.gmra.mxu3 %vm279_vm1, %v4219_v24  ;;  %7213 = vmatmul.msk.f32.gmra.mxu1 %vm279_vm1, %v8861_v37  ;;  %3580 = vst.msk [vmem:[#allocation3 + $0xa9] sm:$0xff] %vm279_vm1, %v3548_v18  ;;  %v3445_v21 = vld [vmem:[#allocation4 + $0x68] sm:$0xff] }
 0x2e3   : > { %7301 = vmatmul.msk.f32.gmra.mxu0 %vm279_vm1, %v8716_v61  ;;  %3414 = vst.msk [vmem:[#allocation4 + $0x70] sm:$0xff] %vm279_vm1, %v3382_v27  ;;  %v3481_v32 = vmul.f32 %v8650_v43, %v3445_v21 }
 0x2e4   : > { %v2609_v1 = vpop.f32.mrf.mxu2 }
 0x2e5   : > { %v2950_v62 = vpop.f32.mrf.mxu3  ;;  %v2703_v22 = vadd.f32 %v2671_v45, %v2609_v1  ;;  %v3517_v25 = vadd.f32 %v8659_v57, %v3481_v32 }
 0x2e6   : > { %v3011_v31 = vld [vmem:[#allocation4 + $0x80] sm:$0xff] }
 0x2e7   : > { %v3043_v41 = vadd.f32 %v3011_v31, %v2947_v29  ;;  %2735 = vst.msk [vmem:[#allocation4 + $0x88] sm:$0xff] %vm279_vm1, %v2703_v22  ;;  %v8875_v61 = vpop.f32.mrf.mxu0  ;;  %v3549_v38 = vmax.f32 %v3517_v25, 0.0  ;;  %v8937_v22 = vld [vmem:[#allocation3 + $0x39] sm:$0xff] }
 0x2e8   : > { %v3351_v33 = vld [vmem:[#allocation4 + $0x78] sm:$0xff]  ;;  %v4223_v25 = vld [vmem:[#allocation3 + $0x3a] sm:$0xff] }
 0x2e9   : > { %v3383_v26 = vadd.f32 %v3351_v33, %v8806_v28  ;;  %3075 = vst.msk [vmem:[#allocation4 + $0x80] sm:$0xff] %vm279_vm1, %v3043_v41  ;;  %v8881_v36 = vld [vmem:[#allocation3 + $0xa8] sm:$0xff]  ;;  %7235 = vmatmul.msk.f32.gmra.mxu2 %vm279_vm1, %v8877_v47 }
 0x2ea   : > { %7268 = vmatmul.msk.f32.gmra.mxu3 %vm279_vm1, %v4220_v11  ;;  %7214 = vmatmul.msk.f32.gmra.mxu1 %vm279_vm1, %v8881_v36  ;;  %3581 = vst.msk [vmem:[#allocation3 + $0xb1] sm:$0xff] %vm279_vm1, %v3549_v38  ;;  %v3446_v35 = vld [vmem:[#allocation4 + $0x70] sm:$0xff]  ;;  %v2675_v11 = vld [vmem:[#allocation4 + $0xa8] sm:$0xff] }
 0x2eb   : > { %7302 = vmatmul.msk.f32.gmra.mxu0 %vm279_vm1, %v8732_v60  ;;  %3415 = vst.msk [vmem:[#allocation4 + $0x78] sm:$0xff] %vm279_vm1, %v3383_v26  ;;  %v3482_v28 = vmul.f32 %v8650_v43, %v3446_v35 }
 0x2ec   : > { %v2612_v55 = vpop.f32.mrf.mxu2 }
 0x2ed   : > { %v2953_v50 = vpop.f32.mrf.mxu3  ;;  %v2704_v4 = vadd.f32 %v2672_v44, %v2612_v55  ;;  %v3518_v63 = vadd.f32 %v8659_v57, %v3482_v28 }
 0x2ee   : > { %v3012_v53 = vld [vmem:[#allocation4 + $0x88] sm:$0xff] }
 0x2ef   : > { %v3044_v0 = vadd.f32 %v3012_v53, %v2950_v62  ;;  %2736 = vst.msk [vmem:[#allocation4 + $0x90] sm:$0xff] %vm279_vm1, %v2704_v4  ;;  %v8895_v40 = vpop.f32.mrf.mxu0  ;;  %v3550_v60 = vmax.f32 %v3518_v63, 0.0  ;;  %v8958_v53 = vld [vmem:[#allocation3 + $0x49] sm:$0xff] }
 0x2f0   : > { %v3352_v10 = vld [vmem:[#allocation4 + $0x80] sm:$0xff] }
 0x2f1   : > { %v3384_v14 = vadd.f32 %v3352_v10, %v8822_v51  ;;  %3076 = vst.msk [vmem:[#allocation4 + $0x88] sm:$0xff] %vm279_vm1, %v3044_v0  ;;  %v8901_v46 = vld [vmem:[#allocation3 + $0xb0] sm:$0xff]  ;;  %7236 = vmatmul.msk.f32.gmra.mxu2 %vm279_vm1, %v8897_v12 }
 0x2f2   : > { %7269 = vmatmul.msk.f32.gmra.mxu3 %vm279_vm1, %v4221_v42  ;;  %7215 = vmatmul.msk.f32.gmra.mxu1 %vm279_vm1, %v8901_v46  ;;  %3582 = vst.msk [vmem:[#allocation3 + $0xc1] sm:$0xff] %vm279_vm1, %v3550_v60  ;;  %v3447_v58 = vld [vmem:[#allocation4 + $0x78] sm:$0xff] }
 0x2f3   : > { %7303 = vmatmul.msk.f32.gmra.mxu0 %vm279_vm1, %v8748_v2  ;;  %3416 = vst.msk [vmem:[#allocation4 + $0x80] sm:$0xff] %vm279_vm1, %v3384_v14  ;;  %v3483_v51 = vmul.f32 %v8650_v43, %v3447_v58  ;;  %v4224_v0 = vld [vmem:[#allocation3 + $0x4a] sm:$0xff]  ;;  %v2676_v58 = vld [vmem:[#allocation4 + $0xb0] sm:$0xff] }
 0x2f4   : > { %v2615_v59 = vpop.f32.mrf.mxu2 }
 0x2f5   : > { %v2956_v23 = vpop.f32.mrf.mxu3  ;;  %v2705_v16 = vadd.f32 %v2673_v30, %v2615_v59  ;;  %v3519_v49 = vadd.f32 %v8659_v57, %v3483_v51 }
 0x2f6   : > { %v3013_v19 = vld [vmem:[#allocation4 + $0x90] sm:$0xff] }
 0x2f7   : > { %v3045_v20 = vadd.f32 %v3013_v19, %v2953_v50  ;;  %2737 = vst.msk [vmem:[#allocation4 + $0x98] sm:$0xff] %vm279_vm1, %v2705_v16  ;;  %v8915_v29 = vpop.f32.mrf.mxu0  ;;  %v3551_v2 = vmax.f32 %v3519_v49, 0.0 }
 0x2f8   : > { %v3353_v7 = vld [vmem:[#allocation4 + $0x88] sm:$0xff] }
 0x2f9   : > { %v3385_v15 = vadd.f32 %v3353_v7, %v8839_v48  ;;  %3077 = vst.msk [vmem:[#allocation4 + $0x90] sm:$0xff] %vm279_vm1, %v3045_v20  ;;  %v8921_v24 = vld [vmem:[#allocation3 + $0xc0] sm:$0xff]  ;;  %7237 = vmatmul.msk.f32.gmra.mxu2 %vm279_vm1, %v8917_v9  ;;  %v4225_v7 = vld [vmem:[#allocation3 + $0x52] sm:$0xff] }
 0x2fa   : > { %7270 = vmatmul.msk.f32.gmra.mxu3 %vm279_vm1, %v4222_v56  ;;  %7216 = vmatmul.msk.f32.gmra.mxu1 %vm279_vm1, %v8921_v24  ;;  %3583 = vst.msk [vmem:[#allocation3 + $0xc9] sm:$0xff] %vm279_vm1, %v3551_v2  ;;  %v3448_v5 = vld [vmem:[#allocation4 + $0x80] sm:$0xff] }
 0x2fb   : > { %7304 = vmatmul.msk.f32.gmra.mxu0 %vm279_vm1, %v8764_v34  ;;  %3417 = vst.msk [vmem:[#allocation4 + $0x88] sm:$0xff] %vm279_vm1, %v3385_v15  ;;  %v3484_v48 = vmul.f32 %v8650_v43, %v3448_v5  ;;  %v8979_v2 = vld [vmem:[#allocation3 + $0x51] sm:$0xff] }
 0x2fc   : > { %v2618_v18 = vpop.f32.mrf.mxu2 }
 0x2fd   : > { %v2959_v27 = vpop.f32.mrf.mxu3  ;;  %v2706_v54 = vadd.f32 %v2674_v39, %v2618_v18  ;;  %v3520_v21 = vadd.f32 %v8659_v57, %v3484_v48  ;;  %v2677_v18 = vld [vmem:[#allocation4 + $0xb8] sm:$0xff] }
 0x2fe   : > { %v3014_v32 = vld [vmem:[#allocation4 + $0x98] sm:$0xff] }
 0x2ff   : > { %v3046_v1 = vadd.f32 %v3014_v32, %v2956_v23  ;;  %2738 = vst.msk [vmem:[#allocation4 + $0xa0] sm:$0xff] %vm279_vm1, %v2706_v54  ;;  %v8935_v45 = vpop.f32.mrf.mxu0  ;;  %v3552_v34 = vmax.f32 %v3520_v21, 0.0 }
 0x300   : > { %v3354_v62 = vld [vmem:[#allocation4 + $0x90] sm:$0xff] }
 0x301   : > { %v3386_v31 = vadd.f32 %v3354_v62, %v8857_v52  ;;  %3078 = vst.msk [vmem:[#allocation4 + $0x98] sm:$0xff] %vm279_vm1, %v3046_v1  ;;  %v8941_v41 = vld [vmem:[#allocation3 + $0xc8] sm:$0xff]  ;;  %7238 = vmatmul.msk.f32.gmra.mxu2 %vm279_vm1, %v8937_v22 }
 0x302   : > { %7271 = vmatmul.msk.f32.gmra.mxu3 %vm279_vm1, %v4223_v25  ;;  %7217 = vmatmul.msk.f32.gmra.mxu1 %vm279_vm1, %v8941_v41  ;;  %3584 = vst.msk [vmem:[#allocation3 + $0xd9] sm:$0xff] %vm279_vm1, %v3552_v34  ;;  %v3449_v38 = vld [vmem:[#allocation4 + $0x88] sm:$0xff]  ;;  %v9000_v25 = vld [vmem:[#allocation3 + $0x61] sm:$0xff] }
 0x303   : > { %7305 = vmatmul.msk.f32.gmra.mxu0 %vm279_vm1, %v8780_v8  ;;  %3418 = vst.msk [vmem:[#allocation4 + $0x90] sm:$0xff] %vm279_vm1, %v3386_v31  ;;  %v3485_v52 = vmul.f32 %v8650_v43, %v3449_v38  ;;  %v4226_v31 = vld [vmem:[#allocation3 + $0x62] sm:$0xff] }
 0x304   : > { %v2621_v33 = vpop.f32.mrf.mxu2 }
 0x305   : > { %v2962_v26 = vpop.f32.mrf.mxu3  ;;  %v2707_v35 = vadd.f32 %v2675_v11, %v2621_v33  ;;  %v3521_v28 = vadd.f32 %v8659_v57, %v3485_v52 }
 0x306   : > { %v3015_v55 = vld [vmem:[#allocation4 + $0xa0] sm:$0xff] }
 0x307   : > { %v3047_v44 = vadd.f32 %v3015_v55, %v2959_v27  ;;  %2739 = vst.msk [vmem:[#allocation4 + $0xa8] sm:$0xff] %vm279_vm1, %v2707_v35  ;;  %v3755_v50 = vpop.f32.mrf.mxu1  ;;  %v3553_v8 = vmax.f32 %v3521_v28, 0.0 }
 0x308   : > { %v8955_v4 = vpop.f32.mrf.mxu0  ;;  %v3355_v63 = vld [vmem:[#allocation4 + $0x98] sm:$0xff]  ;;  %3847 = vst.msk [vmem:[#allocation4 + $0x10] sm:$0xff] %vm279_vm1, %v3755_v50 }
 0x309   : > { %v3387_v60 = vadd.f32 %v3355_v63, %v8875_v61  ;;  %3079 = vst.msk [vmem:[#allocation4 + $0xa0] sm:$0xff] %vm279_vm1, %v3047_v44  ;;  %v8962_v10 = vld [vmem:[#allocation3 + $0xd8] sm:$0xff]  ;;  %7239 = vmatmul.msk.f32.gmra.mxu2 %vm279_vm1, %v8958_v53 }
 0x30a   : > { %7272 = vmatmul.msk.f32.gmra.mxu3 %vm279_vm1, %v4224_v0  ;;  %7218 = vmatmul.msk.f32.gmra.mxu1 %vm279_vm1, %v8962_v10  ;;  %3585 = vst.msk [vmem:[#allocation3 + $0xe1] sm:$0xff] %vm279_vm1, %v3553_v8  ;;  %v3450_v42 = vld [vmem:[#allocation4 + $0x90] sm:$0xff] }
 0x30b   : > { %7306 = vmatmul.msk.f32.gmra.mxu0 %vm279_vm1, %v8796_v17  ;;  %3419 = vst.msk [vmem:[#allocation4 + $0x98] sm:$0xff] %vm279_vm1, %v3387_v60  ;;  %v3486_v61 = vmul.f32 %v8650_v43, %v3450_v42  ;;  %v9021_v60 = vld [vmem:[#allocation3 + $0x69] sm:$0xff] }
 0x30c   : > { %v2624_v14 = vpop.f32.mrf.mxu2 }
 0x30d   : > { %v2965_v51 = vpop.f32.mrf.mxu3  ;;  %v2708_v59 = vadd.f32 %v2676_v58, %v2624_v14  ;;  %v3522_v30 = vadd.f32 %v8659_v57, %v3486_v61 }
 0x30e   : > { %v3016_v23 = vld [vmem:[#allocation4 + $0xa8] sm:$0xff] }
 0x30f   : > { %v3048_v16 = vadd.f32 %v3016_v23, %v2962_v26  ;;  %2740 = vst.msk [vmem:[#allocation4 + $0xb0] sm:$0xff] %vm279_vm1, %v2708_v59  ;;  %v3758_v49 = vpop.f32.mrf.mxu1  ;;  %v3554_v17 = vmax.f32 %v3522_v30, 0.0  ;;  %v2678_v26 = vld [vmem:[#allocation4 + $0xc0] sm:$0xff] }
 0x310   : > { %v8976_v19 = vpop.f32.mrf.mxu0  ;;  %v3356_v20 = vld [vmem:[#allocation4 + $0xa0] sm:$0xff]  ;;  %3848 = vst.msk [vmem:[#allocation4 + $0x18] sm:$0xff] %vm279_vm1, %v3758_v49 }
 0x311   : > { %v3388_v56 = vadd.f32 %v3356_v20, %v8895_v40  ;;  %3080 = vst.msk [vmem:[#allocation4 + $0xa8] sm:$0xff] %vm279_vm1, %v3048_v16  ;;  %v8983_v15 = vld [vmem:[#allocation3 + $0xe0] sm:$0xff]  ;;  %7240 = vmatmul.msk.f32.gmra.mxu2 %vm279_vm1, %v8979_v2 }
 0x312   : > { %7273 = vmatmul.msk.f32.gmra.mxu3 %vm279_vm1, %v4225_v7  ;;  %7219 = vmatmul.msk.f32.gmra.mxu1 %vm279_vm1, %v8983_v15  ;;  %3586 = vst.msk [vmem:[#allocation3 + $0xf1] sm:$0xff] %vm279_vm1, %v3554_v17  ;;  %v3451_v5 = vld [vmem:[#allocation4 + $0x98] sm:$0xff] }
 0x313   : > { %7307 = vmatmul.msk.f32.gmra.mxu0 %vm279_vm1, %v8812_v6  ;;  %3420 = vst.msk [vmem:[#allocation4 + $0xa0] sm:$0xff] %vm279_vm1, %v3388_v56  ;;  %v3487_v40 = vmul.f32 %v8650_v43, %v3451_v5  ;;  %v9052_v5 = vld [vmem:[#allocation3 + $0x79] sm:$0xff] }
 0x314   : > { %v2627_v48 = vpop.f32.mrf.mxu2 }
 0x315   : > { %v2968_v39 = vpop.f32.mrf.mxu3  ;;  %v2709_v27 = vadd.f32 %v2677_v18, %v2627_v48  ;;  %v3523_v54 = vadd.f32 %v8659_v57, %v3487_v40  ;;  %v4228_v40 = vld [vmem:[#allocation3 + $0x7a] sm:$0xff] }
 0x316   : > { %v3017_v21 = vld [vmem:[#allocation4 + $0xb0] sm:$0xff] }
 0x317   : > { %v3049_v32 = vadd.f32 %v3017_v21, %v2965_v51  ;;  %2741 = vst.msk [vmem:[#allocation4 + $0xb8] sm:$0xff] %vm279_vm1, %v2709_v27  ;;  %v3761_v1 = vpop.f32.mrf.mxu1  ;;  %v3555_v6 = vmax.f32 %v3523_v54, 0.0  ;;  %v2679_v51 = vld [vmem:[#allocation4 + $0xc8] sm:$0xff]  ;;  %v2680_v54 = vld [vmem:[#allocation4 + $0xd0] sm:$0xff] }
 0x318   : > { %v8997_v34 = vpop.f32.mrf.mxu0  ;;  %v3357_v62 = vld [vmem:[#allocation4 + $0xa8] sm:$0xff]  ;;  %3849 = vst.msk [vmem:[#allocation4 + $0x20] sm:$0xff] %vm279_vm1, %v3761_v1 }
 0x319   : > { %v3389_v38 = vadd.f32 %v3357_v62, %v8915_v29  ;;  %3081 = vst.msk [vmem:[#allocation4 + $0xb0] sm:$0xff] %vm279_vm1, %v3049_v32  ;;  %v9004_v52 = vld [vmem:[#allocation3 + $0xf0] sm:$0xff]  ;;  %7241 = vmatmul.msk.f32.gmra.mxu2 %vm279_vm1, %v9000_v25 }
 0x31a   : > { %7274 = vmatmul.msk.f32.gmra.mxu3 %vm279_vm1, %v4226_v31  ;;  %7220 = vmatmul.msk.f32.gmra.mxu1 %vm279_vm1, %v9004_v52  ;;  %3587 = vst.msk [vmem:[#allocation3 + $0xf9] sm:$0xff] %vm279_vm1, %v3555_v6  ;;  %v3452_v33 = vld [vmem:[#allocation4 + $0xa0] sm:$0xff] }
 0x31b   : > { %7308 = vmatmul.msk.f32.gmra.mxu0 %vm279_vm1, %v8828_v13  ;;  %3421 = vst.msk [vmem:[#allocation4 + $0xa8] sm:$0xff] %vm279_vm1, %v3389_v38  ;;  %v3488_v29 = vmul.f32 %v8650_v43, %v3452_v33  ;;  %v4227_v43 = vld [vmem:[#allocation3 + $0x6a] sm:$0xff] }
 0x31c   : > { %v2630_v11 = vpop.f32.mrf.mxu2 }
 0x31d   : > { %v2971_v35 = vpop.f32.mrf.mxu3  ;;  %v2710_v28 = vadd.f32 %v2678_v26, %v2630_v11  ;;  %v3524_v55 = vadd.f32 %v8659_v57, %v3488_v29  ;;  %v9073_v29 = vld [vmem:[#allocation3 + $0x81] sm:$0xff] }
 0x31e   : > { %v3018_v44 = vld [vmem:[#allocation4 + $0xb8] sm:$0xff] }
 0x31f   : > { %v3050_v50 = vadd.f32 %v3018_v44, %v2968_v39  ;;  %2742 = vst.msk [vmem:[#allocation4 + $0xc0] sm:$0xff] %vm279_vm1, %v2710_v28  ;;  %v3764_v8 = vpop.f32.mrf.mxu1  ;;  %v3556_v13 = vmax.f32 %v3524_v55, 0.0  ;;  %v4229_v11 = vld [vmem:[#allocation3 + $0x82] sm:$0xff] }
 0x320   : > { %v9018_v63 = vpop.f32.mrf.mxu0  ;;  %v3358_v0 = vld [vmem:[#allocation4 + $0xb0] sm:$0xff]  ;;  %3850 = vst.msk [vmem:[#allocation4 + $0x28] sm:$0xff] %vm279_vm1, %v3764_v8  ;;  %v2681_v44 = vld [vmem:[#allocation4 + $0xd8] sm:$0xff] }
 0x321   : > { %v3390_v42 = vadd.f32 %v3358_v0, %v8935_v45  ;;  %3082 = vst.msk [vmem:[#allocation4 + $0xb8] sm:$0xff] %vm279_vm1, %v3050_v50  ;;  %v9025_v61 = vld [vmem:[#allocation3 + $0xf8] sm:$0xff]  ;;  %7242 = vmatmul.msk.f32.gmra.mxu2 %vm279_vm1, %v9021_v60  ;;  %v9039_v45 = vld [vmem:[%s10273_s3] ss:$0 sm:$0xff] }
 0x322   : > { %7275 = vmatmul.msk.f32.gmra.mxu3 %vm279_vm1, %v4227_v43  ;;  %7221 = vmatmul.msk.f32.gmra.mxu1 %vm279_vm1, %v9025_v61  ;;  %3588 = vst.msk [vmem:[#allocation3 + $0x109] sm:$0xff] %vm279_vm1, %v3556_v13  ;;  %v3453_v57 = vld [vmem:[#allocation4 + $0xa8] sm:$0xff] }
 0x323   : > { %7309 = vmatmul.msk.f32.gmra.mxu0 %vm279_vm1, %v8843_v3  ;;  %3422 = vst.msk [vmem:[#allocation4 + $0xb0] sm:$0xff] %vm279_vm1, %v3390_v42  ;;  %v3489_v14 = vmul.f32 %v9039_v45, %v3453_v57  ;;  %v9045_v3 = vld [vmem:[%s10274_s4] ss:$0 sm:$0xff] }
 0x324   : > { %v2633_v58 = vpop.f32.mrf.mxu2 }
 0x325   : > { %v2974_v59 = vpop.f32.mrf.mxu3  ;;  %v2711_v30 = vadd.f32 %v2679_v51, %v2633_v58  ;;  %v3525_v23 = vadd.f32 %v9045_v3, %v3489_v14  ;;  %v9094_v58 = vld [vmem:[#allocation3 + $0x91] sm:$0xff] }
 0x326   : > { %v3019_v16 = vld [vmem:[#allocation4 + $0xc0] sm:$0xff] }
 0x327   : > { %v3051_v49 = vadd.f32 %v3019_v16, %v2971_v35  ;;  %2743 = vst.msk [vmem:[#allocation4 + $0xc8] sm:$0xff] %vm279_vm1, %v2711_v30  ;;  %v3767_v17 = vpop.f32.mrf.mxu1  ;;  %v3557_v7 = vmax.f32 %v3525_v23, 0.0  ;;  %v4230_v51 = vld [vmem:[#allocation3 + $0x92] sm:$0xff] }
 0x328   : > { %v9049_v20 = vpop.f32.mrf.mxu0  ;;  %v3359_v56 = vld [vmem:[#allocation4 + $0xb8] sm:$0xff]  ;;  %3851 = vst.msk [vmem:[#allocation4 + $0x30] sm:$0xff] %vm279_vm1, %v3767_v17 }
 0x329   : > { %v3391_v48 = vadd.f32 %v3359_v56, %v8955_v4  ;;  %3083 = vst.msk [vmem:[#allocation4 + $0xc0] sm:$0xff] %vm279_vm1, %v3051_v49  ;;  %v9056_v18 = vld [vmem:[#allocation3 + $0x108] sm:$0xff]  ;;  %7243 = vmatmul.msk.f32.gmra.mxu2 %vm279_vm1, %v9052_v5  ;;  %v2682_v49 = vld [vmem:[#allocation4 + $0xe0] sm:$0xff] }
 0x32a   : > { %7276 = vmatmul.msk.f32.gmra.mxu3 %vm279_vm1, %v4228_v40  ;;  %7222 = vmatmul.msk.f32.gmra.mxu1 %vm279_vm1, %v9056_v18  ;;  %3589 = vst.msk [vmem:[#allocation3 + $0x111] sm:$0xff] %vm279_vm1, %v3557_v7  ;;  %v3454_v39 = vld [vmem:[#allocation4 + $0xb0] sm:$0xff] }
 0x32b   : > { %7310 = vmatmul.msk.f32.gmra.mxu0 %vm279_vm1, %v8861_v37  ;;  %3423 = vst.msk [vmem:[#allocation4 + $0xb8] sm:$0xff] %vm279_vm1, %v3391_v48  ;;  %v3490_v4 = vmul.f32 %v9039_v45, %v3454_v39 }
 0x32c   : > { %v2636_v27 = vpop.f32.mrf.mxu2 }
 0x32d   : > { %v2977_v21 = vpop.f32.mrf.mxu3  ;;  %v2712_v32 = vadd.f32 %v2680_v54, %v2636_v27  ;;  %v3526_v1 = vadd.f32 %v9045_v3, %v3490_v4  ;;  %v9115_v54 = vld [vmem:[#allocation3 + $0x99] sm:$0xff] }
 0x32e   : > { %v3020_v6 = vld [vmem:[#allocation4 + $0xc8] sm:$0xff] }
 0x32f   : > { %v3052_v62 = vadd.f32 %v3020_v6, %v2974_v59  ;;  %2744 = vst.msk [vmem:[#allocation4 + $0xd0] sm:$0xff] %vm279_vm1, %v2712_v32  ;;  %v3770_v31 = vpop.f32.mrf.mxu1  ;;  %v3558_v37 = vmax.f32 %v3526_v1, 0.0 }
 0x330   : > { %v9070_v38 = vpop.f32.mrf.mxu0  ;;  %v3360_v33 = vld [vmem:[#allocation4 + $0xc0] sm:$0xff]  ;;  %3852 = vst.msk [vmem:[#allocation4 + $0x38] sm:$0xff] %vm279_vm1, %v3770_v31  ;;  %v2683_v31 = vld [vmem:[#allocation4 + $0xe8] sm:$0xff] }
 0x331   : > { %v3392_v26 = vadd.f32 %v3360_v33, %v8976_v19  ;;  %3084 = vst.msk [vmem:[#allocation4 + $0xc8] sm:$0xff] %vm279_vm1, %v3052_v62  ;;  %v9077_v35 = vld [vmem:[#allocation3 + $0x110] sm:$0xff]  ;;  %7244 = vmatmul.msk.f32.gmra.mxu2 %vm279_vm1, %v9073_v29 }
 0x332   : > { %7277 = vmatmul.msk.f32.gmra.mxu3 %vm279_vm1, %v4229_v11  ;;  %7223 = vmatmul.msk.f32.gmra.mxu1 %vm279_vm1, %v9077_v35  ;;  %3590 = vst.msk [vmem:[#allocation3 + $0x121] sm:$0xff] %vm279_vm1, %v3558_v37  ;;  %v3455_v28 = vld [vmem:[#allocation4 + $0xb8] sm:$0xff] }
 0x333   : > { %7311 = vmatmul.msk.f32.gmra.mxu0 %vm279_vm1, %v8881_v36  ;;  %3424 = vst.msk [vmem:[#allocation4 + $0xc0] sm:$0xff] %vm279_vm1, %v3392_v26  ;;  %v3491_v19 = vmul.f32 %v9039_v45, %v3455_v28 }
 0x334   : > { %v2639_v55 = vpop.f32.mrf.mxu2 }
 0x335   : > { %v2980_v50 = vpop.f32.mrf.mxu3  ;;  %v2713_v8 = vadd.f32 %v2681_v44, %v2639_v55  ;;  %v3527_v13 = vadd.f32 %v9045_v3, %v3491_v19 }
 0x336   : > { %v3021_v0 = vld [vmem:[#allocation4 + $0xd0] sm:$0xff] }
 0x337   : > { %v3053_v43 = vadd.f32 %v3021_v0, %v2977_v21  ;;  %2745 = vst.msk [vmem:[#allocation4 + $0xd8] sm:$0xff] %vm279_vm1, %v2713_v8  ;;  %v3773_v42 = vpop.f32.mrf.mxu1  ;;  %v3559_v36 = vmax.f32 %v3527_v13, 0.0  ;;  %v4231_v21 = vld [vmem:[#allocation3 + $0x9a] sm:$0xff]  ;;  %v4232_v8 = vld [vmem:[#allocation3 + $0xaa] sm:$0xff] }
 0x338   : > { %v9091_v57 = vpop.f32.mrf.mxu0  ;;  %v3361_v14 = vld [vmem:[#allocation4 + $0xc8] sm:$0xff]  ;;  %3853 = vst.msk [vmem:[#allocation4 + $0x40] sm:$0xff] %vm279_vm1, %v3773_v42 }
 0x339   : > { %v3393_v59 = vadd.f32 %v3361_v14, %v8997_v34  ;;  %3085 = vst.msk [vmem:[#allocation4 + $0xd0] sm:$0xff] %vm279_vm1, %v3053_v43  ;;  %v9098_v30 = vld [vmem:[#allocation3 + $0x120] sm:$0xff]  ;;  %7245 = vmatmul.msk.f32.gmra.mxu2 %vm279_vm1, %v9094_v58 }
 0x33a   : > { %7278 = vmatmul.msk.f32.gmra.mxu3 %vm279_vm1, %v4230_v51  ;;  %7224 = vmatmul.msk.f32.gmra.mxu1 %vm279_vm1, %v9098_v30  ;;  %3591 = vst.msk [vmem:[#allocation3 + $0x129] sm:$0xff] %vm279_vm1, %v3559_v36  ;;  %v3456_v23 = vld [vmem:[#allocation4 + $0xc0] sm:$0xff]  ;;  %v5615_v36 = vld [vmem:[%s10272_s2 + $0x18] sm:$0xf]  ;;  %v2684_v51 = vld [vmem:[#allocation4 + $0xf0] sm:$0xff] }
 0x33b   : > { %7312 = vmatmul.msk.f32.gmra.mxu0 %vm279_vm1, %v8901_v46  ;;  %3425 = vst.msk [vmem:[#allocation4 + $0xc8] sm:$0xff] %vm279_vm1, %v3393_v59  ;;  %v3492_v34 = vmul.f32 %v9039_v45, %v3456_v23  ;;  %7397 = vmatpush.msk.msra.mxu3 %vm554_vm0, %v5615_v36 }
 0x33c   : > { %v2642_v16 = vpop.f32.mrf.mxu2 }
 0x33d   : > { %v2983_v17 = vpop.f32.mrf.mxu3  ;;  %v2714_v7 = vadd.f32 %v2682_v49, %v2642_v16  ;;  %v3528_v56 = vadd.f32 %v9045_v3, %v3492_v34 }
 0x33e   : > { %v3022_v40 = vld [vmem:[#allocation4 + $0xd8] sm:$0xff] }
 0x33f   : > { %v3054_v48 = vadd.f32 %v3022_v40, %v2980_v50  ;;  %2746 = vst.msk [vmem:[#allocation4 + $0xe0] sm:$0xff] %vm279_vm1, %v2714_v7  ;;  %v3776_v39 = vpop.f32.mrf.mxu1  ;;  %v3560_v46 = vmax.f32 %v3528_v56, 0.0  ;;  %v9136_v50 = vld [vmem:[#allocation3 + $0xa9] sm:$0xff]  ;;  %v9165_v40 = vld [vmem:[#allocation3 + $0xb1] sm:$0xff] }
 0x340   : > { %v9112_v4 = vpop.f32.mrf.mxu0  ;;  %v3362_v27 = vld [vmem:[#allocation4 + $0xd0] sm:$0xff]  ;;  %3854 = vst.msk [vmem:[#allocation4 + $0x48] sm:$0xff] %vm279_vm1, %v3776_v39 }
 0x341   : > { %v3394_v32 = vadd.f32 %v3362_v27, %v9018_v63  ;;  %3086 = vst.msk [vmem:[#allocation4 + $0xd8] sm:$0xff] %vm279_vm1, %v3054_v48  ;;  %v9119_v1 = vld [vmem:[#allocation3 + $0x128] sm:$0xff]  ;;  %7246 = vmatmul.msk.f32.gmra.mxu2 %vm279_vm1, %v9115_v54  ;;  %v4233_v48 = vld [vmem:[#allocation3 + $0xb2] sm:$0xff] }
 0x342   : > { %7279 = vmatmul.msk.f32.gmra.mxu3 %vm279_vm1, %v4231_v21  ;;  %7225 = vmatmul.msk.f32.gmra.mxu1 %vm279_vm1, %v9119_v1  ;;  %3592 = vst.msk [vmem:[#allocation3 + $0x139] sm:$0xff] %vm279_vm1, %v3560_v46  ;;  %v3457_v6 = vld [vmem:[#allocation4 + $0xc8] sm:$0xff] }
 0x343   : > { %7313 = vmatmul.msk.f32.gmra.mxu0 %vm279_vm1, %v8921_v24  ;;  %3426 = vst.msk [vmem:[#allocation4 + $0xd0] sm:$0xff] %vm279_vm1, %v3394_v32  ;;  %v3493_v63 = vmul.f32 %v9039_v45, %v3457_v6  ;;  %v2685_v32 = vld [vmem:[#allocation4 + $0xf8] sm:$0xff] }
 0x344   : > { %v2645_v62 = vpop.f32.mrf.mxu2 }
 0x345   : > { %v2986_v37 = vpop.f32.mrf.mxu3  ;;  %v2715_v33 = vadd.f32 %v2683_v31, %v2645_v62  ;;  %v3529_v11 = vadd.f32 %v9045_v3, %v3493_v63 }
 0x346   : > { %v3023_v26 = vld [vmem:[#allocation4 + $0xe0] sm:$0xff] }
 0x347   : > { %v3055_v28 = vadd.f32 %v3023_v26, %v2983_v17  ;;  %2747 = vst.msk [vmem:[#allocation4 + $0xe8] sm:$0xff] %vm279_vm1, %v2715_v33  ;;  %v3779_v19 = vpop.f32.mrf.mxu1  ;;  %v3561_v24 = vmax.f32 %v3529_v11, 0.0 }
 0x348   : > { %v9133_v55 = vpop.f32.mrf.mxu0  ;;  %v3363_v44 = vld [vmem:[#allocation4 + $0xd8] sm:$0xff]  ;;  %3855 = vst.msk [vmem:[#allocation4 + $0x50] sm:$0xff] %vm279_vm1, %v3779_v19 }
 0x349   : > { %v3395_v13 = vadd.f32 %v3363_v44, %v9049_v20  ;;  %3087 = vst.msk [vmem:[#allocation4 + $0xe0] sm:$0xff] %vm279_vm1, %v3055_v28  ;;  %v9140_v0 = vld [vmem:[#allocation3 + $0x138] sm:$0xff]  ;;  %7247 = vmatmul.msk.f32.gmra.mxu2 %vm279_vm1, %v9136_v50  ;;  %v5273_v20 = vld [vmem:[%s10272_s2 + $0x14] sm:$0xf] }
 0x34a   : > { %7280 = vmatmul.msk.f32.gmra.mxu3 %vm279_vm1, %v4232_v8  ;;  %7226 = vmatmul.msk.f32.gmra.mxu1 %vm279_vm1, %v9140_v0  ;;  %3593 = vst.msk [vmem:[#allocation3 + $0x141] sm:$0xff] %vm279_vm1, %v3561_v24  ;;  %v3458_v43 = vld [vmem:[#allocation4 + $0xd0] sm:$0xff]  ;;  %v5956_v8 = vld [vmem:[%s10272_s2 + $0x1c] sm:$0xf] }
 0x34b   : > { %7314 = vmatmul.msk.f32.gmra.mxu0 %vm279_vm1, %v8941_v41  ;;  %3427 = vst.msk [vmem:[#allocation4 + $0xd8] sm:$0xff] %vm279_vm1, %v3395_v13  ;;  %v3494_v42 = vmul.f32 %v9039_v45, %v3458_v43  ;;  %7364 = vmatpush.msk.msra.mxu2 %vm554_vm0, %v5273_v20  ;;  %v9186_v28 = vld [vmem:[#allocation3 + $0xc1] sm:$0xff]  ;;  %v4122_v20 = vld [vmem:[#allocation4] sm:$0xff] }
 0x34c   : > { %v2648_v14 = vpop.f32.mrf.mxu2  ;;  %v4234_v19 = vld [vmem:[#allocation3 + $0xc2] sm:$0xff]  ;;  %7430 = vmatpush.msk.msra.mxu0 %vm554_vm0, %v5956_v8 }
 0x34d   : > { %v2989_v59 = vpop.f32.mrf.mxu3  ;;  %v2716_v41 = vadd.f32 %v2684_v51, %v2648_v14  ;;  %v3530_v23 = vadd.f32 %v9045_v3, %v3494_v42 }
 0x34e   : > { %v3024_v34 = vld [vmem:[#allocation4 + $0xe8] sm:$0xff] }
 0x34f   : > { %v3056_v16 = vadd.f32 %v3024_v34, %v2986_v37  ;;  %2748 = vst.msk [vmem:[#allocation4 + $0xf0] sm:$0xff] %vm279_vm1, %v2716_v41  ;;  %v3782_v49 = vpop.f32.mrf.mxu1  ;;  %v3562_v7 = vmax.f32 %v3530_v23, 0.0 }
 0x350   : > { %v9162_v17 = vpop.f32.mrf.mxu0  ;;  %v3364_v56 = vld [vmem:[#allocation4 + $0xe0] sm:$0xff]  ;;  %3856 = vst.msk [vmem:[#allocation4 + $0x58] sm:$0xff] %vm279_vm1, %v3782_v49 }
 0x351   : > { %v3396_v39 = vadd.f32 %v3364_v56, %v9070_v38  ;;  %3088 = vst.msk [vmem:[#allocation4 + $0xe8] sm:$0xff] %vm279_vm1, %v3056_v16  ;;  %v9169_v46 = vld [vmem:[#allocation3 + $0x140] sm:$0xff]  ;;  %7248 = vmatmul.msk.f32.gmra.mxu2 %vm279_vm1, %v9165_v40  ;;  %v9211_v16 = vld [vmem:[#allocation3 + $0xc9] sm:$0xff] }
 0x352   : > { %7281 = vmatmul.msk.f32.gmra.mxu3 %vm279_vm1, %v4233_v48  ;;  %7227 = vmatmul.msk.f32.gmra.mxu1 %vm279_vm1, %v9169_v46  ;;  %3594 = vst.msk [vmem:[#allocation3 + $0x151] sm:$0xff] %vm279_vm1, %v3562_v7  ;;  %v3459_v27 = vld [vmem:[#allocation4 + $0xd8] sm:$0xff]  ;;  %v6297_v48 = vld [vmem:[%s10272_s2 + $0x20] sm:$0xf] }
 0x353   : > { %7315 = vmatmul.msk.f32.gmra.mxu0 %vm279_vm1, %v8962_v10  ;;  %3428 = vst.msk [vmem:[#allocation4 + $0xe0] sm:$0xff] %vm279_vm1, %v3396_v39  ;;  %v3495_v38 = vmul.f32 %v9039_v45, %v3459_v27  ;;  %v4235_v49 = vld [vmem:[#allocation3 + $0xca] sm:$0xff]  ;;  %7463 = vmatpush.msk.msra.mxu1 %vm554_vm0, %v6297_v48 }
 0x354   : > { %v2651_v21 = vpop.f32.mrf.mxu2 }
 0x355   : > { %v2992_v6 = vpop.f32.mrf.mxu3  ;;  %v2717_v63 = vadd.f32 %v2685_v32, %v2651_v21  ;;  %v3531_v62 = vadd.f32 %v9045_v3, %v3495_v38  ;;  %v4123_v38 = vld [vmem:[#allocation4 + $0x8] sm:$0xff] }
 0x356   : > { %v3025_v31 = vld [vmem:[#allocation4 + $0xf0] sm:$0xff] }
 0x357   : > { %v3057_v37 = vadd.f32 %v3025_v31, %v2989_v59  ;;  %2749 = vst.msk [vmem:[#allocation4 + $0xf8] sm:$0xff] %vm279_vm1, %v2717_v63  ;;  %v3785_v33 = vpop.f32.mrf.mxu1  ;;  %v3563_v10 = vmax.f32 %v3531_v62, 0.0 }
 0x358   : > { %v9183_v11 = vpop.f32.mrf.mxu0  ;;  %v3365_v26 = vld [vmem:[#allocation4 + $0xe8] sm:$0xff]  ;;  %3857 = vst.msk [vmem:[#allocation4 + $0x60] sm:$0xff] %vm279_vm1, %v3785_v33 }
 0x359   : > { %v3397_v24 = vadd.f32 %v3365_v26, %v9091_v57  ;;  %3089 = vst.msk [vmem:[#allocation4 + $0xf0] sm:$0xff] %vm279_vm1, %v3057_v37  ;;  %v9190_v44 = vld [vmem:[#allocation3 + $0x150] sm:$0xff]  ;;  %7249 = vmatmul.msk.f32.gmra.mxu2 %vm279_vm1, %v9186_v28  ;;  %v4236_v26 = vld [vmem:[#allocation3 + $0xda] sm:$0xff] }
 0x35a   : > { %7282 = vmatmul.msk.f32.gmra.mxu3 %vm279_vm1, %v4234_v19  ;;  %7228 = vmatmul.msk.f32.gmra.mxu1 %vm279_vm1, %v9190_v44  ;;  %3595 = vst.msk [vmem:[#allocation3 + $0x159] sm:$0xff] %vm279_vm1, %v3563_v10  ;;  %v3460_v57 = vld [vmem:[#allocation4 + $0xe0] sm:$0xff]  ;;  %v9236_v10 = vld [vmem:[#allocation3 + $0xd9] sm:$0xff] }
 0x35b   : > { %7316 = vmatmul.msk.f32.gmra.mxu0 %vm279_vm1, %v8983_v15  ;;  %3429 = vst.msk [vmem:[#allocation4 + $0xe8] sm:$0xff] %vm279_vm1, %v3397_v24  ;;  %v3496_v13 = vmul.f32 %v9039_v45, %v3460_v57 }
 0x35c   : > { %v4026_v43 = vpop.f32.mrf.mxu2 }
 0x35d   : > { %v4367_v42 = vpop.f32.mrf.mxu3  ;;  %v4154_v36 = vadd.f32 %v4122_v20, %v4026_v43  ;;  %v3532_v14 = vadd.f32 %v9045_v3, %v3496_v13  ;;  %v4124_v13 = vld [vmem:[#allocation4 + $0x10] sm:$0xff] }
 0x35e   : > { %v3026_v51 = vld [vmem:[#allocation4 + $0xf8] sm:$0xff] }
 0x35f   : > { %v3058_v59 = vadd.f32 %v3026_v51, %v2992_v6  ;;  %4186 = vst.msk [vmem:[#allocation4] sm:$0xff] %vm279_vm1, %v4154_v36  ;;  %v3788_v15 = vpop.f32.mrf.mxu1  ;;  %v3564_v23 = vmax.f32 %v3532_v14, 0.0 }
 0x360   : > { %v9208_v41 = vpop.f32.mrf.mxu0  ;;  %v3366_v34 = vld [vmem:[#allocation4 + $0xf0] sm:$0xff]  ;;  %3858 = vst.msk [vmem:[#allocation4 + $0x68] sm:$0xff] %vm279_vm1, %v3788_v15 }
 0x361   : > { %v3398_v7 = vadd.f32 %v3366_v34, %v9112_v4  ;;  %3090 = vst.msk [vmem:[#allocation4 + $0xf8] sm:$0xff] %vm279_vm1, %v3058_v59  ;;  %v9215_v56 = vld [vmem:[#allocation3 + $0x158] sm:$0xff]  ;;  %7250 = vmatmul.msk.f32.gmra.mxu2 %vm279_vm1, %v9211_v16  ;;  %v9257_v15 = vld [vmem:[#allocation3 + $0xe1] sm:$0xff] }
 0x362   : > { %7283 = vmatmul.msk.f32.gmra.mxu3 %vm279_vm1, %v4235_v49  ;;  %7229 = vmatmul.msk.f32.gmra.mxu1 %vm279_vm1, %v9215_v56  ;;  %3596 = vst.msk [vmem:[#allocation3 + $0x169] sm:$0xff] %vm279_vm1, %v3564_v23  ;;  %v3461_v4 = vld [vmem:[#allocation4 + $0xe8] sm:$0xff]  ;;  %v4237_v23 = vld [vmem:[#allocation3 + $0xe2] sm:$0xff] }
 0x363   : > { %7317 = vmatmul.msk.f32.gmra.mxu0 %vm279_vm1, %v9004_v52  ;;  %3430 = vst.msk [vmem:[#allocation4 + $0xf0] sm:$0xff] %vm279_vm1, %v3398_v7  ;;  %v3497_v39 = vmul.f32 %v9039_v45, %v3461_v4 }
 0x364   : > { %v4029_v27 = vpop.f32.mrf.mxu2 }
 0x365   : > { %v4370_v21 = vpop.f32.mrf.mxu3  ;;  %v4155_v32 = vadd.f32 %v4123_v38, %v4029_v27  ;;  %v3533_v6 = vadd.f32 %v9045_v3, %v3497_v39  ;;  %v4125_v27 = vld [vmem:[#allocation4 + $0x18] sm:$0xff] }
 0x366   : > { %v4463_v63 = vld [vmem:[#allocation4] sm:$0xff] }
 0x367   : > { %v4495_v62 = vadd.f32 %v4463_v63, %v4367_v42  ;;  %4187 = vst.msk [vmem:[#allocation4 + $0x8] sm:$0xff] %vm279_vm1, %v4155_v32  ;;  %v3791_v52 = vpop.f32.mrf.mxu1  ;;  %v3565_v37 = vmax.f32 %v3533_v6, 0.0 }
 0x368   : > { %v9233_v31 = vpop.f32.mrf.mxu0  ;;  %v3367_v33 = vld [vmem:[#allocation4 + $0xf8] sm:$0xff]  ;;  %3859 = vst.msk [vmem:[#allocation4 + $0x70] sm:$0xff] %vm279_vm1, %v3791_v52  ;;  %v9278_v52 = vld [vmem:[#allocation3 + $0xf1] sm:$0xff] }
 0x369   : > { %v3399_v19 = vadd.f32 %v3367_v33, %v9133_v55  ;;  %4527 = vst.msk [vmem:[#allocation4] sm:$0xff] %vm279_vm1, %v4495_v62  ;;  %v9240_v24 = vld [vmem:[#allocation3 + $0x168] sm:$0xff]  ;;  %7251 = vmatmul.msk.f32.gmra.mxu2 %vm279_vm1, %v9236_v10 }
 0x36a   : > { %7284 = vmatmul.msk.f32.gmra.mxu3 %vm279_vm1, %v4236_v26  ;;  %7230 = vmatmul.msk.f32.gmra.mxu1 %vm279_vm1, %v9240_v24  ;;  %3597 = vst.msk [vmem:[#allocation3 + $0x171] sm:$0xff] %vm279_vm1, %v3565_v37  ;;  %v3462_v8 = vld [vmem:[#allocation4 + $0xf0] sm:$0xff]  ;;  %v4126_v26 = vld [vmem:[#allocation4 + $0x20] sm:$0xff] }
 0x36b   : > { %7318 = vmatmul.msk.f32.gmra.mxu0 %vm279_vm1, %v9025_v61  ;;  %3431 = vst.msk [vmem:[#allocation4 + $0xf8] sm:$0xff] %vm279_vm1, %v3399_v19  ;;  %v3498_v55 = vmul.f32 %v9039_v45, %v3462_v8 }
 0x36c   : > { %v4032_v57 = vpop.f32.mrf.mxu2 }
 0x36d   : > { %v4373_v43 = vpop.f32.mrf.mxu3  ;;  %v4156_v20 = vadd.f32 %v4124_v13, %v4032_v57  ;;  %v3534_v42 = vadd.f32 %v9045_v3, %v3498_v55 }
 0x36e   : > { %v4464_v36 = vld [vmem:[#allocation4 + $0x8] sm:$0xff] }
 0x36f   : > { %v4496_v14 = vadd.f32 %v4464_v36, %v4370_v21  ;;  %4188 = vst.msk [vmem:[#allocation4 + $0x10] sm:$0xff] %vm279_vm1, %v4156_v20  ;;  %v3794_v51 = vpop.f32.mrf.mxu1  ;;  %v3566_v61 = vmax.f32 %v3534_v42, 0.0  ;;  %v4127_v36 = vld [vmem:[#allocation4 + $0x28] sm:$0xff] }
 0x370   : > { %v9254_v59 = vpop.f32.mrf.mxu0  ;;  %3860 = vst.msk [vmem:[#allocation4 + $0x78] sm:$0xff] %vm279_vm1, %v3794_v51  ;;  %v4804_v34 = vld [vmem:[#allocation4] sm:$0xff] }
 0x371   : > { %4528 = vst.msk [vmem:[#allocation4 + $0x8] sm:$0xff] %vm279_vm1, %v4496_v14  ;;  %v9260_v49 = vld [vmem:[#allocation3 + $0x170] sm:$0xff]  ;;  %7252 = vmatmul.msk.f32.gmra.mxu2 %vm279_vm1, %v9257_v15  ;;  %v4836_v7 = vadd.f32 %v4804_v34, %v9162_v17 }
 0x372   : > { %7285 = vmatmul.msk.f32.gmra.mxu3 %vm279_vm1, %v4237_v23  ;;  %7231 = vmatmul.msk.f32.gmra.mxu1 %vm279_vm1, %v9260_v49  ;;  %3598 = vst.msk [vmem:[#allocation3 + $0x181] sm:$0xff] %vm279_vm1, %v3566_v61  ;;  %v3463_v48 = vld [vmem:[#allocation4 + $0xf8] sm:$0xff] }
 0x373   : > { %7319 = vmatmul.msk.f32.gmra.mxu0 %vm279_vm1, %v9056_v18  ;;  %v3499_v4 = vmul.f32 %v9039_v45, %v3463_v48  ;;  %4868 = vst.msk [vmem:[#allocation4] sm:$0xff] %vm279_vm1, %v4836_v7  ;;  %v4238_v45 = vld [vmem:[#allocation3 + $0xf2] sm:$0xff] }
 0x374   : > { %v4035_v39 = vpop.f32.mrf.mxu2 }
 0x375   : > { %v4376_v38 = vpop.f32.mrf.mxu3  ;;  %v4157_v21 = vadd.f32 %v4125_v27, %v4035_v39  ;;  %v3535_v32 = vadd.f32 %v9045_v3, %v3499_v4  ;;  %v4128_v39 = vld [vmem:[#allocation4 + $0x30] sm:$0xff] }
 0x376   : > { %v4465_v17 = vld [vmem:[#allocation4 + $0x10] sm:$0xff] }
 0x377   : > { %v4497_v6 = vadd.f32 %v4465_v17, %v4373_v43  ;;  %4189 = vst.msk [vmem:[#allocation4 + $0x18] sm:$0xff] %vm279_vm1, %v4157_v21  ;;  %v3797_v63 = vpop.f32.mrf.mxu1  ;;  %v3567_v18 = vmax.f32 %v3535_v32, 0.0 }
 0x378   : > { %v9275_v62 = vpop.f32.mrf.mxu0  ;;  %3861 = vst.msk [vmem:[#allocation4 + $0x80] sm:$0xff] %vm279_vm1, %v3797_v63  ;;  %v4805_v37 = vld [vmem:[#allocation4 + $0x8] sm:$0xff] }
 0x379   : > { %4529 = vst.msk [vmem:[#allocation4 + $0x10] sm:$0xff] %vm279_vm1, %v4497_v6  ;;  %7253 = vmatmul.msk.f32.gmra.mxu2 %vm279_vm1, %v9278_v52  ;;  %v4837_v3 = vadd.f32 %v4805_v37, %v9183_v11 }
 0x37a   : > { %7286 = vmatmul.msk.f32.gmra.mxu3 %vm279_vm1, %v4238_v45  ;;  %7332 = vmatmul.msk.f32.vlgmr.msrb.gmra.mxu1 %vm279_vm1, %v8877_v47  ;;  %3599 = vst.msk [vmem:[#allocation3 + $0x189] sm:$0xff] %vm279_vm1, %v3567_v18  ;;  %v9295_v47 = vld [vmem:[#allocation3 + $0xf9] sm:$0xff]  ;;  %v4129_v45 = vld [vmem:[#allocation4 + $0x38] sm:$0xff] }
 0x37b   : > { %7320 = vmatmul.msk.f32.gmra.mxu0 %vm279_vm1, %v9077_v35  ;;  %4869 = vst.msk [vmem:[#allocation4 + $0x8] sm:$0xff] %vm279_vm1, %v4837_v3  ;;  %v4239_v35 = vld [vmem:[#allocation3 + $0xfa] sm:$0xff] }
 0x37c   : > { %v4038_v33 = vpop.f32.mrf.mxu2 }
 0x37d   : > { %v4379_v19 = vpop.f32.mrf.mxu3  ;;  %v4158_v8 = vadd.f32 %v4126_v26, %v4038_v33 }
 0x37e   : > { %v4466_v55 = vld [vmem:[#allocation4 + $0x18] sm:$0xff] }
 0x37f   : > { %v4498_v57 = vadd.f32 %v4466_v55, %v4376_v38  ;;  %4190 = vst.msk [vmem:[#allocation4 + $0x20] sm:$0xff] %vm279_vm1, %v4158_v8  ;;  %v3800_v13 = vpop.f32.mrf.mxu1 }
 0x380   : > { %v9292_v11 = vpop.f32.mrf.mxu0  ;;  %3862 = vst.msk [vmem:[#allocation4 + $0x88] sm:$0xff] %vm279_vm1, %v3800_v13  ;;  %v4806_v43 = vld [vmem:[#allocation4 + $0x10] sm:$0xff]  ;;  %v4130_v13 = vld [vmem:[#allocation4 + $0x40] sm:$0xff] }
 0x381   : > { %4530 = vst.msk [vmem:[#allocation4 + $0x18] sm:$0xff] %vm279_vm1, %v4498_v57  ;;  %7254 = vmatmul.msk.f32.gmra.mxu2 %vm279_vm1, %v9295_v47  ;;  %v4838_v20 = vadd.f32 %v4806_v43, %v9208_v41  ;;  %v9311_v41 = vld [vmem:[#allocation3 + $0x109] sm:$0xff] }
 0x382   : > { %7287 = vmatmul.msk.f32.gmra.mxu3 %vm279_vm1, %v4239_v35  ;;  %7333 = vmatmul.msk.f32.gmra.mxu1 %vm279_vm1, %v8897_v12  ;;  %v4240_v12 = vld [vmem:[#allocation3 + $0x10a] sm:$0xff] }
 0x383   : > { %7321 = vmatmul.msk.f32.gmra.mxu0 %vm279_vm1, %v9098_v30  ;;  %4870 = vst.msk [vmem:[#allocation4 + $0x10] sm:$0xff] %vm279_vm1, %v4838_v20 }
 0x384   : > { %v4041_v42 = vpop.f32.mrf.mxu2 }
 0x385   : > { %v4382_v14 = vpop.f32.mrf.mxu3  ;;  %v4159_v51 = vadd.f32 %v4127_v36, %v4041_v42 }
 0x386   : > { %v4467_v61 = vld [vmem:[#allocation4 + $0x20] sm:$0xff] }
 0x387   : > { %v4499_v23 = vadd.f32 %v4467_v61, %v4379_v19  ;;  %4191 = vst.msk [vmem:[#allocation4 + $0x28] sm:$0xff] %vm279_vm1, %v4159_v51  ;;  %v3803_v34 = vpop.f32.mrf.mxu1 }
 0x388   : > { %v9308_v7 = vpop.f32.mrf.mxu0  ;;  %3863 = vst.msk [vmem:[#allocation4 + $0x90] sm:$0xff] %vm279_vm1, %v3803_v34  ;;  %v4807_v48 = vld [vmem:[#allocation4 + $0x18] sm:$0xff] }
 0x389   : > { %4531 = vst.msk [vmem:[#allocation4 + $0x20] sm:$0xff] %vm279_vm1, %v4499_v23  ;;  %7255 = vmatmul.msk.f32.gmra.mxu2 %vm279_vm1, %v9311_v41  ;;  %v4839_v30 = vadd.f32 %v4807_v48, %v9233_v31  ;;  %v9327_v31 = vld [vmem:[#allocation3 + $0x111] sm:$0xff] }
 0x38a   : > { %7288 = vmatmul.msk.f32.gmra.mxu3 %vm279_vm1, %v4240_v12  ;;  %7334 = vmatmul.msk.f32.gmra.mxu1 %vm279_vm1, %v8917_v9  ;;  %v4241_v9 = vld [vmem:[#allocation3 + $0x112] sm:$0xff] }
 0x38b   : > { %7322 = vmatmul.msk.f32.gmra.mxu0 %vm279_vm1, %v9119_v1  ;;  %4871 = vst.msk [vmem:[#allocation4 + $0x18] sm:$0xff] %vm279_vm1, %v4839_v30  ;;  %v4131_v23 = vld [vmem:[#allocation4 + $0x48] sm:$0xff] }
 0x38c   : > { %v4044_v4 = vpop.f32.mrf.mxu2 }
 0x38d   : > { %v4385_v27 = vpop.f32.mrf.mxu3  ;;  %v4160_v38 = vadd.f32 %v4128_v39, %v4044_v4 }
 0x38e   : > { %v4468_v21 = vld [vmem:[#allocation4 + $0x28] sm:$0xff] }
 0x38f   : > { %v4500_v32 = vadd.f32 %v4468_v21, %v4382_v14  ;;  %4192 = vst.msk [vmem:[#allocation4 + $0x30] sm:$0xff] %vm279_vm1, %v4160_v38  ;;  %v3806_v17 = vpop.f32.mrf.mxu1  ;;  %v4132_v21 = vld [vmem:[#allocation4 + $0x50] sm:$0xff] }
 0x390   : > { %v9324_v6 = vpop.f32.mrf.mxu0  ;;  %3864 = vst.msk [vmem:[#allocation4 + $0x98] sm:$0xff] %vm279_vm1, %v3806_v17  ;;  %v4808_v63 = vld [vmem:[#allocation4 + $0x20] sm:$0xff] }
 0x391   : > { %4532 = vst.msk [vmem:[#allocation4 + $0x28] sm:$0xff] %vm279_vm1, %v4500_v32  ;;  %7256 = vmatmul.msk.f32.gmra.mxu2 %vm279_vm1, %v9327_v31  ;;  %v4840_v1 = vadd.f32 %v4808_v63, %v9254_v59  ;;  %v9343_v59 = vld [vmem:[#allocation3 + $0x121] sm:$0xff] }
 0x392   : > { %7289 = vmatmul.msk.f32.gmra.mxu3 %vm279_vm1, %v4241_v9  ;;  %7335 = vmatmul.msk.f32.gmra.mxu1 %vm279_vm1, %v8937_v22  ;;  %v4242_v22 = vld [vmem:[#allocation3 + $0x122] sm:$0xff] }
 0x393   : > { %7323 = vmatmul.msk.f32.gmra.mxu0 %vm279_vm1, %v9140_v0  ;;  %4872 = vst.msk [vmem:[#allocation4 + $0x20] sm:$0xff] %vm279_vm1, %v4840_v1 }
 0x394   : > { %v4047_v18 = vpop.f32.mrf.mxu2 }
 0x395   : > { %v4388_v37 = vpop.f32.mrf.mxu3  ;;  %v4161_v3 = vadd.f32 %v4129_v45, %v4047_v18 }
 0x396   : > { %v4469_v33 = vld [vmem:[#allocation4 + $0x30] sm:$0xff] }
 0x397   : > { %v4501_v26 = vadd.f32 %v4469_v33, %v4385_v27  ;;  %4193 = vst.msk [vmem:[#allocation4 + $0x38] sm:$0xff] %vm279_vm1, %v4161_v3  ;;  %v3809_v19 = vpop.f32.mrf.mxu1  ;;  %v4133_v3 = vld [vmem:[#allocation4 + $0x58] sm:$0xff] }
 0x398   : > { %v9340_v8 = vpop.f32.mrf.mxu0  ;;  %3865 = vst.msk [vmem:[#allocation4 + $0xa0] sm:$0xff] %vm279_vm1, %v3809_v19  ;;  %v4809_v55 = vld [vmem:[#allocation4 + $0x28] sm:$0xff] }
 0x399   : > { %4533 = vst.msk [vmem:[#allocation4 + $0x30] sm:$0xff] %vm279_vm1, %v4501_v26  ;;  %7257 = vmatmul.msk.f32.gmra.mxu2 %vm279_vm1, %v9343_v59  ;;  %v4841_v0 = vadd.f32 %v4809_v55, %v9275_v62  ;;  %v9359_v62 = vld [vmem:[#allocation3 + $0x129] sm:$0xff] }
 0x39a   : > { %7290 = vmatmul.msk.f32.gmra.mxu3 %vm279_vm1, %v4242_v22  ;;  %7336 = vmatmul.msk.f32.gmra.mxu1 %vm279_vm1, %v8958_v53  ;;  %v4243_v53 = vld [vmem:[#allocation3 + $0x12a] sm:$0xff] }
 0x39b   : > { %7324 = vmatmul.msk.f32.gmra.mxu0 %vm279_vm1, %v9169_v46  ;;  %4873 = vst.msk [vmem:[#allocation4 + $0x28] sm:$0xff] %vm279_vm1, %v4841_v0 }
 0x39c   : > { %v4050_v57 = vpop.f32.mrf.mxu2 }
 0x39d   : > { %v4391_v35 = vpop.f32.mrf.mxu3  ;;  %v4162_v43 = vadd.f32 %v4130_v13, %v4050_v57 }
 0x39e   : > { %v4470_v20 = vld [vmem:[#allocation4 + $0x38] sm:$0xff] }
 0x39f   : > { %v4502_v42 = vadd.f32 %v4470_v20, %v4388_v37  ;;  %4194 = vst.msk [vmem:[#allocation4 + $0x40] sm:$0xff] %vm279_vm1, %v4162_v43  ;;  %v3812_v36 = vpop.f32.mrf.mxu1 }
 0x3a0   : > { %v9356_v14 = vpop.f32.mrf.mxu0  ;;  %3866 = vst.msk [vmem:[#allocation4 + $0xa8] sm:$0xff] %vm279_vm1, %v3812_v36  ;;  %v4810_v51 = vld [vmem:[#allocation4 + $0x30] sm:$0xff] }
 0x3a1   : > { %4534 = vst.msk [vmem:[#allocation4 + $0x38] sm:$0xff] %vm279_vm1, %v4502_v42  ;;  %7258 = vmatmul.msk.f32.gmra.mxu2 %vm279_vm1, %v9359_v62  ;;  %v4842_v46 = vadd.f32 %v4810_v51, %v9292_v11  ;;  %v9375_v11 = vld [vmem:[#allocation3 + $0x139] sm:$0xff] }
 0x3a2   : > { %7291 = vmatmul.msk.f32.gmra.mxu3 %vm279_vm1, %v4243_v53  ;;  %7337 = vmatmul.msk.f32.gmra.mxu1 %vm279_vm1, %v8979_v2  ;;  %v4244_v2 = vld [vmem:[#allocation3 + $0x13a] sm:$0xff] }
 0x3a3   : > { %7325 = vmatmul.msk.f32.gmra.mxu0 %vm279_vm1, %v9190_v44  ;;  %4874 = vst.msk [vmem:[#allocation4 + $0x30] sm:$0xff] %vm279_vm1, %v4842_v46 }
 0x3a4   : > { %v4053_v61 = vpop.f32.mrf.mxu2 }
 0x3a5   : > { %v4394_v34 = vpop.f32.mrf.mxu3  ;;  %v4163_v12 = vadd.f32 %v4131_v23, %v4053_v61 }
 0x3a6   : > { %v4471_v48 = vld [vmem:[#allocation4 + $0x40] sm:$0xff] }
 0x3a7   : > { %v4503_v30 = vadd.f32 %v4471_v48, %v4391_v35  ;;  %4195 = vst.msk [vmem:[#allocation4 + $0x48] sm:$0xff] %vm279_vm1, %v4163_v12  ;;  %v3815_v4 = vpop.f32.mrf.mxu1  ;;  %v4134_v35 = vld [vmem:[#allocation4 + $0x60] sm:$0xff] }
 0x3a8   : > { %v9372_v39 = vpop.f32.mrf.mxu0  ;;  %3867 = vst.msk [vmem:[#allocation4 + $0xb0] sm:$0xff] %vm279_vm1, %v3815_v4  ;;  %v4811_v27 = vld [vmem:[#allocation4 + $0x38] sm:$0xff] }
 0x3a9   : > { %4535 = vst.msk [vmem:[#allocation4 + $0x40] sm:$0xff] %vm279_vm1, %v4503_v30  ;;  %7259 = vmatmul.msk.f32.gmra.mxu2 %vm279_vm1, %v9375_v11  ;;  %v4843_v44 = vadd.f32 %v4811_v27, %v9308_v7  ;;  %v9391_v7 = vld [vmem:[#allocation3 + $0x141] sm:$0xff] }
 0x3aa   : > { %7292 = vmatmul.msk.f32.gmra.mxu3 %vm279_vm1, %v4244_v2  ;;  %7338 = vmatmul.msk.f32.gmra.mxu1 %vm279_vm1, %v9000_v25  ;;  %v4245_v25 = vld [vmem:[#allocation3 + $0x142] sm:$0xff] }
 0x3ab   : > { %7326 = vmatmul.msk.f32.gmra.mxu0 %vm279_vm1, %v9215_v56  ;;  %4875 = vst.msk [vmem:[#allocation4 + $0x38] sm:$0xff] %vm279_vm1, %v4843_v44 }
 0x3ac   : > { %v4056_v38 = vpop.f32.mrf.mxu2 }
 0x3ad   : > { %v4397_v32 = vpop.f32.mrf.mxu3  ;;  %v4164_v17 = vadd.f32 %v4132_v21, %v4056_v38  ;;  %v4590_v38 = vld [vmem:[#allocation3 + $0x188] sm:$0xff] }
 0x3ae   : > { %v4472_v9 = vld [vmem:[#allocation4 + $0x48] sm:$0xff] }
 0x3af   : > { %v4504_v63 = vadd.f32 %v4472_v9, %v4394_v34  ;;  %4196 = vst.msk [vmem:[#allocation4 + $0x50] sm:$0xff] %vm279_vm1, %v4164_v17  ;;  %v3818_v1 = vpop.f32.mrf.mxu1  ;;  %v4135_v34 = vld [vmem:[#allocation4 + $0x68] sm:$0xff]  ;;  %v4136_v17 = vld [vmem:[#allocation4 + $0x70] sm:$0xff] }
 0x3b0   : > { %v9388_v18 = vpop.f32.mrf.mxu0  ;;  %3868 = vst.msk [vmem:[#allocation4 + $0xb8] sm:$0xff] %vm279_vm1, %v3818_v1  ;;  %v4812_v45 = vld [vmem:[#allocation4 + $0x40] sm:$0xff] }
 0x3b1   : > { %4536 = vst.msk [vmem:[#allocation4 + $0x48] sm:$0xff] %vm279_vm1, %v4504_v63  ;;  %7260 = vmatmul.msk.f32.gmra.mxu2 %vm279_vm1, %v9391_v7  ;;  %v4844_v56 = vadd.f32 %v4812_v45, %v9324_v6  ;;  %v9407_v6 = vld [vmem:[#allocation3 + $0x151] sm:$0xff] }
 0x3b2   : > { %7293 = vmatmul.msk.f32.gmra.mxu3 %vm279_vm1, %v4245_v25  ;;  %7339 = vmatmul.msk.f32.gmra.mxu1 %vm279_vm1, %v9021_v60  ;;  %v4246_v60 = vld [vmem:[#allocation3 + $0x152] sm:$0xff] }
 0x3b3   : > { %7327 = vmatmul.msk.f32.gmra.mxu0 %vm279_vm1, %v9240_v24  ;;  %4876 = vst.msk [vmem:[#allocation4 + $0x40] sm:$0xff] %vm279_vm1, %v4844_v56 }
 0x3b4   : > { %v4059_v37 = vpop.f32.mrf.mxu2 }
 0x3b5   : > { %v4400_v33 = vpop.f32.mrf.mxu3  ;;  %v4165_v26 = vadd.f32 %v4133_v3, %v4059_v37  ;;  %v5924_v3 = vld [vmem:[#allocation3 + $0x31] sm:$0xff] }
 0x3b6   : > { %v4473_v19 = vld [vmem:[#allocation4 + $0x50] sm:$0xff] }
 0x3b7   : > { %v4505_v22 = vadd.f32 %v4473_v19, %v4397_v32  ;;  %4197 = vst.msk [vmem:[#allocation4 + $0x58] sm:$0xff] %vm279_vm1, %v4165_v26  ;;  %v3821_v55 = vpop.f32.mrf.mxu1  ;;  %v4137_v19 = vld [vmem:[#allocation4 + $0x78] sm:$0xff] }
 0x3b8   : > { %v9404_v0 = vpop.f32.mrf.mxu0  ;;  %3869 = vst.msk [vmem:[#allocation4 + $0xc0] sm:$0xff] %vm279_vm1, %v3821_v55  ;;  %v4813_v57 = vld [vmem:[#allocation4 + $0x48] sm:$0xff] }
 0x3b9   : > { %4537 = vst.msk [vmem:[#allocation4 + $0x50] sm:$0xff] %vm279_vm1, %v4505_v22  ;;  %7261 = vmatmul.msk.f32.gmra.mxu2 %vm279_vm1, %v9407_v6  ;;  %v4845_v24 = vadd.f32 %v4813_v57, %v9340_v8  ;;  %v9423_v8 = vld [vmem:[#allocation3 + $0x159] sm:$0xff] }
 0x3ba   : > { %7294 = vmatmul.msk.f32.gmra.mxu3 %vm279_vm1, %v4246_v60  ;;  %7340 = vmatmul.msk.f32.gmra.mxu1 %vm279_vm1, %v9052_v5  ;;  %v4247_v5 = vld [vmem:[#allocation3 + $0x15a] sm:$0xff] }
 0x3bb   : > { %7328 = vmatmul.msk.f32.gmra.mxu0 %vm279_vm1, %v9260_v49  ;;  %4877 = vst.msk [vmem:[#allocation4 + $0x48] sm:$0xff] %vm279_vm1, %v4845_v24  ;;  %v4589_v49 = vld [vmem:[#allocation3 + $0x180] sm:$0xff] }
 0x3bc   : > { %v4062_v13 = vpop.f32.mrf.mxu2 }
 0x3bd   : > { %v4403_v43 = vpop.f32.mrf.mxu3  ;;  %v4166_v20 = vadd.f32 %v4134_v35, %v4062_v13  ;;  %v5583_v35 = vld [vmem:[#allocation3 + $0x30] sm:$0xff] }
 0x3be   : > { %v4474_v42 = vld [vmem:[#allocation4 + $0x58] sm:$0xff] }
 0x3bf   : > { %v4506_v36 = vadd.f32 %v4474_v42, %v4400_v33  ;;  %4198 = vst.msk [vmem:[#allocation4 + $0x60] sm:$0xff] %vm279_vm1, %v4166_v20  ;;  %v3824_v53 = vpop.f32.mrf.mxu1 }
 0x3c0   : > { %v9420_v51 = vpop.f32.mrf.mxu0  ;;  %3870 = vst.msk [vmem:[#allocation4 + $0xc8] sm:$0xff] %vm279_vm1, %v3824_v53  ;;  %v4814_v46 = vld [vmem:[#allocation4 + $0x50] sm:$0xff] }
 0x3c1   : > { %4538 = vst.msk [vmem:[#allocation4 + $0x58] sm:$0xff] %vm279_vm1, %v4506_v36  ;;  %7262 = vmatmul.msk.f32.gmra.mxu2 %vm279_vm1, %v9423_v8  ;;  %v4846_v61 = vadd.f32 %v4814_v46, %v9356_v14  ;;  %v9438_v14 = vld [vmem:[#allocation3 + $0x169] sm:$0xff] }
 0x3c2   : > { %7295 = vmatmul.msk.f32.gmra.mxu3 %vm279_vm1, %v4247_v5  ;;  %7341 = vmatmul.msk.f32.gmra.mxu1 %vm279_vm1, %v9073_v29  ;;  %v4248_v29 = vld [vmem:[#allocation3 + $0x16a] sm:$0xff] }
 0x3c3   : > { %7329 = vmatmul.msk.f32.gmra.mxu0 %vm279_vm1, %v4589_v49  ;;  %4878 = vst.msk [vmem:[#allocation4 + $0x50] sm:$0xff] %vm279_vm1, %v4846_v61  ;;  %v4138_v36 = vld [vmem:[#allocation4 + $0x80] sm:$0xff] }
 0x3c4   : > { %v4065_v23 = vpop.f32.mrf.mxu2 }
 0x3c5   : > { %v4406_v12 = vpop.f32.mrf.mxu3  ;;  %v4167_v48 = vadd.f32 %v4135_v34, %v4065_v23  ;;  %v5584_v34 = vld [vmem:[#allocation3 + $0x38] sm:$0xff] }
 0x3c6   : > { %v4475_v30 = vld [vmem:[#allocation4 + $0x60] sm:$0xff] }
 0x3c7   : > { %v4507_v4 = vadd.f32 %v4475_v30, %v4403_v43  ;;  %4199 = vst.msk [vmem:[#allocation4 + $0x68] sm:$0xff] %vm279_vm1, %v4167_v48  ;;  %v3827_v2 = vpop.f32.mrf.mxu1  ;;  %v5925_v43 = vld [vmem:[#allocation3 + $0x39] sm:$0xff] }
 0x3c8   : > { %v9435_v27 = vpop.f32.mrf.mxu0  ;;  %3871 = vst.msk [vmem:[#allocation4 + $0xd0] sm:$0xff] %vm279_vm1, %v3827_v2  ;;  %v4815_v44 = vld [vmem:[#allocation4 + $0x58] sm:$0xff] }
 0x3c9   : > { %4539 = vst.msk [vmem:[#allocation4 + $0x60] sm:$0xff] %vm279_vm1, %v4507_v4  ;;  %7263 = vmatmul.msk.f32.gmra.mxu2 %vm279_vm1, %v9438_v14  ;;  %v4847_v21 = vadd.f32 %v4815_v44, %v9372_v39  ;;  %v9453_v39 = vld [vmem:[#allocation3 + $0x171] sm:$0xff] }
 0x3ca   : > { %7296 = vmatmul.msk.f32.gmra.mxu3 %vm279_vm1, %v4248_v29  ;;  %7342 = vmatmul.msk.f32.gmra.mxu1 %vm279_vm1, %v9094_v58  ;;  %v4249_v58 = vld [vmem:[#allocation3 + $0x172] sm:$0xff] }
 0x3cb   : > { %7330 = vmatmul.msk.f32.gmra.mxu0 %vm279_vm1, %v4590_v38  ;;  %4879 = vst.msk [vmem:[#allocation4 + $0x58] sm:$0xff] %vm279_vm1, %v4847_v21  ;;  %v4139_v4 = vld [vmem:[#allocation4 + $0x88] sm:$0xff] }
 0x3cc   : > { %v4068_v32 = vpop.f32.mrf.mxu2 }
 0x3cd   : > { %v4409_v9 = vpop.f32.mrf.mxu3  ;;  %v4168_v63 = vadd.f32 %v4136_v17, %v4068_v32 }
 0x3ce   : > { %v4476_v1 = vld [vmem:[#allocation4 + $0x68] sm:$0xff] }
 0x3cf   : > { %v4508_v25 = vadd.f32 %v4476_v1, %v4406_v12  ;;  %4200 = vst.msk [vmem:[#allocation4 + $0x70] sm:$0xff] %vm279_vm1, %v4168_v63  ;;  %v3830_v45 = vpop.f32.mrf.mxu1  ;;  %v5926_v12 = vld [vmem:[#allocation3 + $0x49] sm:$0xff] }
 0x3d0   : > { %v9450_v56 = vpop.f32.mrf.mxu0  ;;  %3872 = vst.msk [vmem:[#allocation4 + $0xd8] sm:$0xff] %vm279_vm1, %v3830_v45  ;;  %v4816_v37 = vld [vmem:[#allocation4 + $0x60] sm:$0xff] }
 0x3d1   : > { %4540 = vst.msk [vmem:[#allocation4 + $0x68] sm:$0xff] %vm279_vm1, %v4508_v25  ;;  %7264 = vmatmul.msk.f32.gmra.mxu2 %vm279_vm1, %v9453_v39  ;;  %v4848_v33 = vadd.f32 %v4816_v37, %v9388_v18  ;;  %v5241_v18 = vld [vmem:[#allocation3 + $0x1a] sm:$0xff] }
 0x3d2   : > { %7297 = vmatmul.msk.f32.gmra.mxu3 %vm279_vm1, %v4249_v58  ;;  %7343 = vmatmul.msk.f32.gmra.mxu1 %vm279_vm1, %v9115_v54  ;;  %v4140_v25 = vld [vmem:[#allocation4 + $0x90] sm:$0xff] }
 0x3d3   : > { %7431 = vmatmul.msk.f32.vlgmr.msra.gmra.mxu0 %vm279_vm1, %v5924_v3  ;;  %4880 = vst.msk [vmem:[#allocation4 + $0x60] sm:$0xff] %vm279_vm1, %v4848_v33 }
 0x3d4   : > { %v4071_v26 = vpop.f32.mrf.mxu2 }
 0x3d5   : > { %v4412_v22 = vpop.f32.mrf.mxu3  ;;  %v4169_v55 = vadd.f32 %v4137_v19, %v4071_v26 }
 0x3d6   : > { %v4477_v60 = vld [vmem:[#allocation4 + $0x70] sm:$0xff] }
 0x3d7   : > { %v4509_v57 = vadd.f32 %v4477_v60, %v4409_v9  ;;  %4201 = vst.msk [vmem:[#allocation4 + $0x78] sm:$0xff] %vm279_vm1, %v4169_v55  ;;  %v3833_v24 = vpop.f32.mrf.mxu1  ;;  %v5927_v9 = vld [vmem:[#allocation3 + $0x51] sm:$0xff] }
 0x3d8   : > { %v9465_v13 = vpop.f32.mrf.mxu0  ;;  %3873 = vst.msk [vmem:[#allocation4 + $0xe0] sm:$0xff] %vm279_vm1, %v3833_v24  ;;  %v4817_v54 = vld [vmem:[#allocation4 + $0x68] sm:$0xff] }
 0x3d9   : > { %4541 = vst.msk [vmem:[#allocation4 + $0x70] sm:$0xff] %vm279_vm1, %v4509_v57  ;;  %7365 = vmatmul.msk.f32.vlgmr.msra.gmra.mxu2 %vm279_vm1, %v5241_v18  ;;  %v4849_v20 = vadd.f32 %v4817_v54, %v9404_v0  ;;  %v5242_v0 = vld [vmem:[#allocation3 + $0x22] sm:$0xff] }
 0x3da   : > { %7398 = vmatmul.msk.f32.vlgmr.msra.gmra.mxu3 %vm279_vm1, %v5583_v35  ;;  %7344 = vmatmul.msk.f32.gmra.mxu1 %vm279_vm1, %v9136_v50  ;;  %v4141_v57 = vld [vmem:[#allocation4 + $0x98] sm:$0xff] }
 0x3db   : > { %7432 = vmatmul.msk.f32.gmra.mxu0 %vm279_vm1, %v5925_v43  ;;  %4881 = vst.msk [vmem:[#allocation4 + $0x68] sm:$0xff] %vm279_vm1, %v4849_v20  ;;  %v5145_v20 = vld [vmem:[#allocation4] sm:$0xff] }
 0x3dc   : > { %v4074_v42 = vpop.f32.mrf.mxu2 }
 0x3dd   : > { %v4415_v53 = vpop.f32.mrf.mxu3  ;;  %v4170_v5 = vadd.f32 %v4138_v36, %v4074_v42  ;;  %v9521_v36 = vld [vmem:[#allocation3 + $0x4a] sm:$0xff] }
 0x3de   : > { %v4478_v46 = vld [vmem:[#allocation4 + $0x78] sm:$0xff] }
 0x3df   : > { %v4510_v49 = vadd.f32 %v4478_v46, %v4412_v22  ;;  %4202 = vst.msk [vmem:[#allocation4 + $0x80] sm:$0xff] %vm279_vm1, %v4170_v5  ;;  %v3836_v61 = vpop.f32.mrf.mxu1  ;;  %v5928_v22 = vld [vmem:[#allocation3 + $0x61] sm:$0xff]  ;;  %v5929_v5 = vld [vmem:[#allocation3 + $0x69] sm:$0xff] }
 0x3e0   : > { %v9477_v23 = vpop.f32.mrf.mxu0  ;;  %3874 = vst.msk [vmem:[#allocation4 + $0xe8] sm:$0xff] %vm279_vm1, %v3836_v61  ;;  %v4818_v50 = vld [vmem:[#allocation4 + $0x70] sm:$0xff]  ;;  %v4142_v61 = vld [vmem:[#allocation4 + $0xa0] sm:$0xff] }
 0x3e1   : > { %4542 = vst.msk [vmem:[#allocation4 + $0x78] sm:$0xff] %vm279_vm1, %v4510_v49  ;;  %7366 = vmatmul.msk.f32.gmra.mxu2 %vm279_vm1, %v5242_v0  ;;  %v4850_v48 = vadd.f32 %v4818_v50, %v9420_v51  ;;  %v9492_v51 = vld [vmem:[#allocation3 + $0x32] sm:$0xff] }
 0x3e2   : > { %7399 = vmatmul.msk.f32.gmra.mxu3 %vm279_vm1, %v5584_v34  ;;  %7345 = vmatmul.msk.f32.gmra.mxu1 %vm279_vm1, %v9165_v40  ;;  %v5585_v40 = vld [vmem:[#allocation3 + $0x48] sm:$0xff] }
 0x3e3   : > { %7433 = vmatmul.msk.f32.gmra.mxu0 %vm279_vm1, %v5926_v12  ;;  %4882 = vst.msk [vmem:[#allocation4 + $0x70] sm:$0xff] %vm279_vm1, %v4850_v48 }
 0x3e4   : > { %v4077_v30 = vpop.f32.mrf.mxu2 }
 0x3e5   : > { %v4418_v2 = vpop.f32.mrf.mxu3  ;;  %v4171_v29 = vadd.f32 %v4139_v4, %v4077_v30  ;;  %v5146_v30 = vld [vmem:[#allocation4 + $0x8] sm:$0xff] }
 0x3e6   : > { %v4479_v44 = vld [vmem:[#allocation4 + $0x80] sm:$0xff] }
 0x3e7   : > { %v4511_v38 = vadd.f32 %v4479_v44, %v4415_v53  ;;  %4203 = vst.msk [vmem:[#allocation4 + $0x88] sm:$0xff] %vm279_vm1, %v4171_v29  ;;  %v3839_v21 = vpop.f32.mrf.mxu1  ;;  %v5930_v44 = vld [vmem:[#allocation3 + $0x79] sm:$0xff] }
 0x3e8   : > { %v9489_v32 = vpop.f32.mrf.mxu0  ;;  %3875 = vst.msk [vmem:[#allocation4 + $0xf0] sm:$0xff] %vm279_vm1, %v3839_v21  ;;  %v4819_v17 = vld [vmem:[#allocation4 + $0x78] sm:$0xff] }
 0x3e9   : > { %4543 = vst.msk [vmem:[#allocation4 + $0x80] sm:$0xff] %vm279_vm1, %v4511_v38  ;;  %7367 = vmatmul.msk.f32.gmra.mxu2 %vm279_vm1, %v9492_v51  ;;  %v4851_v63 = vadd.f32 %v4819_v17, %v9435_v27  ;;  %v9507_v27 = vld [vmem:[#allocation3 + $0x3a] sm:$0xff] }
 0x3ea   : > { %7400 = vmatmul.msk.f32.gmra.mxu3 %vm279_vm1, %v5585_v40  ;;  %7346 = vmatmul.msk.f32.gmra.mxu1 %vm279_vm1, %v9186_v28  ;;  %v5586_v28 = vld [vmem:[#allocation3 + $0x50] sm:$0xff]  ;;  %v4143_v40 = vld [vmem:[#allocation4 + $0xa8] sm:$0xff] }
 0x3eb   : > { %7434 = vmatmul.msk.f32.gmra.mxu0 %vm279_vm1, %v5927_v9  ;;  %4883 = vst.msk [vmem:[#allocation4 + $0x78] sm:$0xff] %vm279_vm1, %v4851_v63 }
 0x3ec   : > { %v4080_v1 = vpop.f32.mrf.mxu2 }
 0x3ed   : > { %v4421_v45 = vpop.f32.mrf.mxu3  ;;  %v4172_v58 = vadd.f32 %v4140_v25, %v4080_v1 }
 0x3ee   : > { %v4480_v37 = vld [vmem:[#allocation4 + $0x88] sm:$0xff] }
 0x3ef   : > { %v4512_v3 = vadd.f32 %v4480_v37, %v4418_v2  ;;  %4204 = vst.msk [vmem:[#allocation4 + $0x90] sm:$0xff] %vm279_vm1, %v4172_v58  ;;  %v3842_v33 = vpop.f32.mrf.mxu1  ;;  %v9536_v2 = vld [vmem:[#allocation3 + $0x52] sm:$0xff]  ;;  %v9551_v37 = vld [vmem:[#allocation3 + $0x62] sm:$0xff] }
 0x3f0   : > { %v9504_v26 = vpop.f32.mrf.mxu0  ;;  %3876 = vst.msk [vmem:[#allocation4 + $0xf8] sm:$0xff] %vm279_vm1, %v3842_v33  ;;  %v4820_v19 = vld [vmem:[#allocation4 + $0x80] sm:$0xff]  ;;  %v5931_v33 = vld [vmem:[#allocation3 + $0x81] sm:$0xff] }
 0x3f1   : > { %4544 = vst.msk [vmem:[#allocation4 + $0x88] sm:$0xff] %vm279_vm1, %v4512_v3  ;;  %7368 = vmatmul.msk.f32.gmra.mxu2 %vm279_vm1, %v9507_v27  ;;  %v4852_v55 = vadd.f32 %v4820_v19, %v9450_v56 }
 0x3f2   : > { %7401 = vmatmul.msk.f32.gmra.mxu3 %vm279_vm1, %v5586_v28  ;;  %7347 = vmatmul.msk.f32.gmra.mxu1 %vm279_vm1, %v9211_v16  ;;  %v5587_v16 = vld [vmem:[#allocation3 + $0x60] sm:$0xff] }
 0x3f3   : > { %7435 = vmatmul.msk.f32.gmra.mxu0 %vm279_vm1, %v5928_v22  ;;  %4884 = vst.msk [vmem:[#allocation4 + $0x80] sm:$0xff] %vm279_vm1, %v4852_v55  ;;  %v4144_v22 = vld [vmem:[#allocation4 + $0xb0] sm:$0xff] }
 0x3f4   : > { %v4083_v60 = vpop.f32.mrf.mxu2 }
 0x3f5   : > { %v4424_v24 = vpop.f32.mrf.mxu3  ;;  %v4173_v18 = vadd.f32 %v4141_v57, %v4083_v60 }
 0x3f6   : > { %v4481_v35 = vld [vmem:[#allocation4 + $0x90] sm:$0xff] }
 0x3f7   : > { %v4513_v54 = vadd.f32 %v4481_v35, %v4421_v45  ;;  %4205 = vst.msk [vmem:[#allocation4 + $0x98] sm:$0xff] %vm279_vm1, %v4173_v18  ;;  %v5049_v43 = vpop.f32.mrf.mxu1  ;;  %v5147_v45 = vld [vmem:[#allocation4 + $0x10] sm:$0xff]  ;;  %v5148_v35 = vld [vmem:[#allocation4 + $0x18] sm:$0xff] }
 0x3f8   : > { %v9519_v42 = vpop.f32.mrf.mxu0  ;;  %v5177_v56 = vadd.f32 %v5145_v20, %v5049_v43  ;;  %v4821_v53 = vld [vmem:[#allocation4 + $0x88] sm:$0xff]  ;;  %v9566_v43 = vld [vmem:[#allocation3 + $0x6a] sm:$0xff] }
 0x3f9   : > { %4545 = vst.msk [vmem:[#allocation4 + $0x90] sm:$0xff] %vm279_vm1, %v4513_v54  ;;  %7369 = vmatmul.msk.f32.gmra.mxu2 %vm279_vm1, %v9521_v36  ;;  %v4853_v46 = vadd.f32 %v4821_v53, %v9465_v13 }
 0x3fa   : > { %7402 = vmatmul.msk.f32.gmra.mxu3 %vm279_vm1, %v5587_v16  ;;  %5209 = vst.msk [vmem:[#allocation4] sm:$0xff] %vm279_vm1, %v5177_v56  ;;  %7348 = vmatmul.msk.f32.gmra.mxu1 %vm279_vm1, %v9236_v10  ;;  %v5588_v10 = vld [vmem:[#allocation3 + $0x68] sm:$0xff]  ;;  %v5932_v56 = vld [vmem:[#allocation3 + $0x91] sm:$0xff] }
 0x3fb   : > { %7436 = vmatmul.msk.f32.gmra.mxu0 %vm279_vm1, %v5929_v5  ;;  %4885 = vst.msk [vmem:[#allocation4 + $0x88] sm:$0xff] %vm279_vm1, %v4853_v46  ;;  %v4145_v5 = vld [vmem:[#allocation4 + $0xb8] sm:$0xff] }
 0x3fc   : > { %v4086_v49 = vpop.f32.mrf.mxu2 }
 0x3fd   : > { %v4427_v0 = vpop.f32.mrf.mxu3  ;;  %v4174_v34 = vadd.f32 %v4142_v61, %v4086_v49 }
 0x3fe   : > { %v4482_v50 = vld [vmem:[#allocation4 + $0x98] sm:$0xff] }
 0x3ff   : > { %v4514_v12 = vadd.f32 %v4482_v50, %v4424_v24  ;;  %4206 = vst.msk [vmem:[#allocation4 + $0xa0] sm:$0xff] %vm279_vm1, %v4174_v34  ;;  %v5052_v48 = vpop.f32.mrf.mxu1  ;;  %v5149_v50 = vld [vmem:[#allocation4 + $0x20] sm:$0xff] }
 0x400   : > { %v9534_v13 = vpop.f32.mrf.mxu0  ;;  %v5178_v4 = vadd.f32 %v5146_v30, %v5052_v48  ;;  %v4822_v29 = vld [vmem:[#allocation4 + $0x90] sm:$0xff] }
 0x401   : > { %4546 = vst.msk [vmem:[#allocation4 + $0x98] sm:$0xff] %vm279_vm1, %v4514_v12  ;;  %7370 = vmatmul.msk.f32.gmra.mxu2 %vm279_vm1, %v9536_v2  ;;  %v4854_v38 = vadd.f32 %v4822_v29, %v9477_v23  ;;  %v9581_v48 = vld [vmem:[#allocation3 + $0x7a] sm:$0xff] }
 0x402   : > { %7403 = vmatmul.msk.f32.gmra.mxu3 %vm279_vm1, %v5588_v10  ;;  %5210 = vst.msk [vmem:[#allocation4 + $0x8] sm:$0xff] %vm279_vm1, %v5178_v4  ;;  %7349 = vmatmul.msk.f32.gmra.mxu1 %vm279_vm1, %v9257_v15  ;;  %v5589_v15 = vld [vmem:[#allocation3 + $0x78] sm:$0xff] }
 0x403   : > { %7437 = vmatmul.msk.f32.gmra.mxu0 %vm279_vm1, %v5930_v44  ;;  %4886 = vst.msk [vmem:[#allocation4 + $0x90] sm:$0xff] %vm279_vm1, %v4854_v38  ;;  %v5933_v4 = vld [vmem:[#allocation3 + $0x99] sm:$0xff]  ;;  %v4146_v44 = vld [vmem:[#allocation4 + $0xc0] sm:$0xff] }
 0x404   : > { %v4089_v21 = vpop.f32.mrf.mxu2 }
 0x405   : > { %v4430_v17 = vpop.f32.mrf.mxu3  ;;  %v4175_v9 = vadd.f32 %v4143_v40, %v4089_v21 }
 0x406   : > { %v4483_v63 = vld [vmem:[#allocation4 + $0xa0] sm:$0xff] }
 0x407   : > { %v4515_v1 = vadd.f32 %v4483_v63, %v4427_v0  ;;  %4207 = vst.msk [vmem:[#allocation4 + $0xa8] sm:$0xff] %vm279_vm1, %v4175_v9  ;;  %v5055_v25 = vpop.f32.mrf.mxu1  ;;  %v5150_v63 = vld [vmem:[#allocation4 + $0x28] sm:$0xff] }
 0x408   : > { %v9549_v23 = vpop.f32.mrf.mxu0  ;;  %v5179_v58 = vadd.f32 %v5147_v45, %v5055_v25  ;;  %v4823_v3 = vld [vmem:[#allocation4 + $0x98] sm:$0xff] }
 0x409   : > { %4547 = vst.msk [vmem:[#allocation4 + $0xa0] sm:$0xff] %vm279_vm1, %v4515_v1  ;;  %7371 = vmatmul.msk.f32.gmra.mxu2 %vm279_vm1, %v9551_v37  ;;  %v4855_v28 = vadd.f32 %v4823_v3, %v9489_v32  ;;  %v9596_v25 = vld [vmem:[#allocation3 + $0x82] sm:$0xff] }
 0x40a   : > { %7404 = vmatmul.msk.f32.gmra.mxu3 %vm279_vm1, %v5589_v15  ;;  %5211 = vst.msk [vmem:[#allocation4 + $0x10] sm:$0xff] %vm279_vm1, %v5179_v58  ;;  %7350 = vmatmul.msk.f32.gmra.mxu1 %vm279_vm1, %v9278_v52  ;;  %v5590_v52 = vld [vmem:[#allocation3 + $0x80] sm:$0xff]  ;;  %v5934_v58 = vld [vmem:[#allocation3 + $0xa9] sm:$0xff] }
 0x40b   : > { %7438 = vmatmul.msk.f32.gmra.mxu0 %vm279_vm1, %v5931_v33  ;;  %4887 = vst.msk [vmem:[#allocation4 + $0x98] sm:$0xff] %vm279_vm1, %v4855_v28  ;;  %v4147_v33 = vld [vmem:[#allocation4 + $0xc8] sm:$0xff] }
 0x40c   : > { %v4092_v19 = vpop.f32.mrf.mxu2 }
 0x40d   : > { %v4433_v55 = vpop.f32.mrf.mxu3  ;;  %v4176_v60 = vadd.f32 %v4144_v22, %v4092_v19 }
 0x40e   : > { %v4484_v57 = vld [vmem:[#allocation4 + $0xa8] sm:$0xff] }
 0x40f   : > { %v4516_v24 = vadd.f32 %v4484_v57, %v4430_v17  ;;  %4208 = vst.msk [vmem:[#allocation4 + $0xb0] sm:$0xff] %vm279_vm1, %v4176_v60  ;;  %v5058_v18 = vpop.f32.mrf.mxu1  ;;  %v5151_v57 = vld [vmem:[#allocation4 + $0x30] sm:$0xff] }
 0x410   : > { %v9564_v32 = vpop.f32.mrf.mxu0  ;;  %v5180_v54 = vadd.f32 %v5148_v35, %v5058_v18  ;;  %v4824_v20 = vld [vmem:[#allocation4 + $0xa0] sm:$0xff] }
 0x411   : > { %4548 = vst.msk [vmem:[#allocation4 + $0xa8] sm:$0xff] %vm279_vm1, %v4516_v24  ;;  %7372 = vmatmul.msk.f32.gmra.mxu2 %vm279_vm1, %v9566_v43  ;;  %v4856_v16 = vadd.f32 %v4824_v20, %v9504_v26  ;;  %v9611_v18 = vld [vmem:[#allocation3 + $0x92] sm:$0xff] }
 0x412   : > { %7405 = vmatmul.msk.f32.gmra.mxu3 %vm279_vm1, %v5590_v52  ;;  %5212 = vst.msk [vmem:[#allocation4 + $0x18] sm:$0xff] %vm279_vm1, %v5180_v54  ;;  %7351 = vmatmul.msk.f32.gmra.mxu1 %vm279_vm1, %v9295_v47  ;;  %v5591_v47 = vld [vmem:[#allocation3 + $0x90] sm:$0xff] }
 0x413   : > { %7439 = vmatmul.msk.f32.gmra.mxu0 %vm279_vm1, %v5932_v56  ;;  %4888 = vst.msk [vmem:[#allocation4 + $0xa0] sm:$0xff] %vm279_vm1, %v4856_v16  ;;  %v5935_v54 = vld [vmem:[#allocation3 + $0xb1] sm:$0xff]  ;;  %v4148_v56 = vld [vmem:[#allocation4 + $0xd0] sm:$0xff] }
 0x414   : > { %v4095_v53 = vpop.f32.mrf.mxu2 }
 0x415   : > { %v4436_v46 = vpop.f32.mrf.mxu3  ;;  %v4177_v49 = vadd.f32 %v4145_v5, %v4095_v53 }
 0x416   : > { %v4485_v61 = vld [vmem:[#allocation4 + $0xb0] sm:$0xff] }
 0x417   : > { %v4517_v0 = vadd.f32 %v4485_v61, %v4433_v55  ;;  %4209 = vst.msk [vmem:[#allocation4 + $0xb8] sm:$0xff] %vm279_vm1, %v4177_v49  ;;  %v5061_v34 = vpop.f32.mrf.mxu1  ;;  %v5152_v61 = vld [vmem:[#allocation4 + $0x38] sm:$0xff] }
 0x418   : > { %v9579_v26 = vpop.f32.mrf.mxu0  ;;  %v5181_v12 = vadd.f32 %v5149_v50, %v5061_v34  ;;  %v4825_v30 = vld [vmem:[#allocation4 + $0xa8] sm:$0xff] }
 0x419   : > { %4549 = vst.msk [vmem:[#allocation4 + $0xb0] sm:$0xff] %vm279_vm1, %v4517_v0  ;;  %7373 = vmatmul.msk.f32.gmra.mxu2 %vm279_vm1, %v9581_v48  ;;  %v4857_v10 = vadd.f32 %v4825_v30, %v9519_v42  ;;  %v9626_v34 = vld [vmem:[#allocation3 + $0x9a] sm:$0xff] }
 0x41a   : > { %7406 = vmatmul.msk.f32.gmra.mxu3 %vm279_vm1, %v5591_v47  ;;  %5213 = vst.msk [vmem:[#allocation4 + $0x20] sm:$0xff] %vm279_vm1, %v5181_v12  ;;  %7352 = vmatmul.msk.f32.gmra.mxu1 %vm279_vm1, %v9311_v41  ;;  %v5592_v41 = vld [vmem:[#allocation3 + $0x98] sm:$0xff]  ;;  %v5936_v12 = vld [vmem:[#allocation3 + $0xc1] sm:$0xff] }
 0x41b   : > { %7440 = vmatmul.msk.f32.gmra.mxu0 %vm279_vm1, %v5933_v4  ;;  %4889 = vst.msk [vmem:[#allocation4 + $0xa8] sm:$0xff] %vm279_vm1, %v4857_v10  ;;  %v4149_v4 = vld [vmem:[#allocation4 + $0xd8] sm:$0xff] }
 0x41c   : > { %v4098_v29 = vpop.f32.mrf.mxu2 }
 0x41d   : > { %v4439_v38 = vpop.f32.mrf.mxu3  ;;  %v4178_v21 = vadd.f32 %v4146_v44, %v4098_v29 }
 0x41e   : > { %v4486_v40 = vld [vmem:[#allocation4 + $0xb8] sm:$0xff] }
 0x41f   : > { %v4518_v17 = vadd.f32 %v4486_v40, %v4436_v46  ;;  %4210 = vst.msk [vmem:[#allocation4 + $0xc0] sm:$0xff] %vm279_vm1, %v4178_v21  ;;  %v5064_v9 = vpop.f32.mrf.mxu1  ;;  %v5153_v40 = vld [vmem:[#allocation4 + $0x40] sm:$0xff] }
 0x420   : > { %v9594_v42 = vpop.f32.mrf.mxu0  ;;  %v5182_v1 = vadd.f32 %v5150_v63, %v5064_v9  ;;  %v4826_v45 = vld [vmem:[#allocation4 + $0xb0] sm:$0xff]  ;;  %v9641_v9 = vld [vmem:[#allocation3 + $0xaa] sm:$0xff] }
 0x421   : > { %4550 = vst.msk [vmem:[#allocation4 + $0xb8] sm:$0xff] %vm279_vm1, %v4518_v17  ;;  %7374 = vmatmul.msk.f32.gmra.mxu2 %vm279_vm1, %v9596_v25  ;;  %v4858_v15 = vadd.f32 %v4826_v45, %v9534_v13 }
 0x422   : > { %7407 = vmatmul.msk.f32.gmra.mxu3 %vm279_vm1, %v5592_v41  ;;  %5214 = vst.msk [vmem:[#allocation4 + $0x28] sm:$0xff] %vm279_vm1, %v5182_v1  ;;  %7353 = vmatmul.msk.f32.gmra.mxu1 %vm279_vm1, %v9327_v31  ;;  %v5593_v31 = vld [vmem:[#allocation3 + $0xa8] sm:$0xff] }
 0x423   : > { %7441 = vmatmul.msk.f32.gmra.mxu0 %vm279_vm1, %v5934_v58  ;;  %4890 = vst.msk [vmem:[#allocation4 + $0xb0] sm:$0xff] %vm279_vm1, %v4858_v15  ;;  %v5937_v1 = vld [vmem:[#allocation3 + $0xc9] sm:$0xff] }
 0x424   : > { %v4101_v3 = vpop.f32.mrf.mxu2  ;;  %v4150_v58 = vld [vmem:[#allocation4 + $0xe0] sm:$0xff] }
 0x425   : > { %v4442_v28 = vpop.f32.mrf.mxu3  ;;  %v4179_v19 = vadd.f32 %v4147_v33, %v4101_v3 }
 0x426   : > { %v4487_v22 = vld [vmem:[#allocation4 + $0xc0] sm:$0xff] }
 0x427   : > { %v4519_v55 = vadd.f32 %v4487_v22, %v4439_v38  ;;  %4211 = vst.msk [vmem:[#allocation4 + $0xc8] sm:$0xff] %vm279_vm1, %v4179_v19  ;;  %v5067_v60 = vpop.f32.mrf.mxu1  ;;  %v5154_v22 = vld [vmem:[#allocation4 + $0x48] sm:$0xff] }
 0x428   : > { %v9609_v13 = vpop.f32.mrf.mxu0  ;;  %v5183_v24 = vadd.f32 %v5151_v57, %v5067_v60  ;;  %v4827_v35 = vld [vmem:[#allocation4 + $0xb8] sm:$0xff]  ;;  %v9656_v60 = vld [vmem:[#allocation3 + $0xb2] sm:$0xff] }
 0x429   : > { %4551 = vst.msk [vmem:[#allocation4 + $0xc0] sm:$0xff] %vm279_vm1, %v4519_v55  ;;  %7375 = vmatmul.msk.f32.gmra.mxu2 %vm279_vm1, %v9611_v18  ;;  %v4859_v52 = vadd.f32 %v4827_v35, %v9549_v23 }
 0x42a   : > { %7408 = vmatmul.msk.f32.gmra.mxu3 %vm279_vm1, %v5593_v31  ;;  %5215 = vst.msk [vmem:[#allocation4 + $0x30] sm:$0xff] %vm279_vm1, %v5183_v24  ;;  %7354 = vmatmul.msk.f32.gmra.mxu1 %vm279_vm1, %v9343_v59  ;;  %v5594_v59 = vld [vmem:[#allocation3 + $0xb0] sm:$0xff]  ;;  %v5938_v24 = vld [vmem:[#allocation3 + $0xd9] sm:$0xff] }
 0x42b   : > { %7442 = vmatmul.msk.f32.gmra.mxu0 %vm279_vm1, %v5935_v54  ;;  %4891 = vst.msk [vmem:[#allocation4 + $0xb8] sm:$0xff] %vm279_vm1, %v4859_v52  ;;  %v4151_v54 = vld [vmem:[#allocation4 + $0xe8] sm:$0xff] }
 0x42c   : > { %v4104_v20 = vpop.f32.mrf.mxu2 }
 0x42d   : > { %v4445_v16 = vpop.f32.mrf.mxu3  ;;  %v4180_v53 = vadd.f32 %v4148_v56, %v4104_v20 }
 0x42e   : > { %v4488_v5 = vld [vmem:[#allocation4 + $0xc8] sm:$0xff] }
 0x42f   : > { %v4520_v46 = vadd.f32 %v4488_v5, %v4442_v28  ;;  %4212 = vst.msk [vmem:[#allocation4 + $0xd0] sm:$0xff] %vm279_vm1, %v4180_v53  ;;  %v5070_v49 = vpop.f32.mrf.mxu1  ;;  %v5155_v5 = vld [vmem:[#allocation4 + $0x50] sm:$0xff] }
 0x430   : > { %v9624_v23 = vpop.f32.mrf.mxu0  ;;  %v5184_v0 = vadd.f32 %v5152_v61, %v5070_v49  ;;  %v4828_v50 = vld [vmem:[#allocation4 + $0xc0] sm:$0xff]  ;;  %v9671_v49 = vld [vmem:[#allocation3 + $0xc2] sm:$0xff] }
 0x431   : > { %4552 = vst.msk [vmem:[#allocation4 + $0xc8] sm:$0xff] %vm279_vm1, %v4520_v46  ;;  %7376 = vmatmul.msk.f32.gmra.mxu2 %vm279_vm1, %v9626_v34  ;;  %v4860_v47 = vadd.f32 %v4828_v50, %v9564_v32 }
 0x432   : > { %7409 = vmatmul.msk.f32.gmra.mxu3 %vm279_vm1, %v5594_v59  ;;  %5216 = vst.msk [vmem:[#allocation4 + $0x38] sm:$0xff] %vm279_vm1, %v5184_v0  ;;  %7355 = vmatmul.msk.f32.gmra.mxu1 %vm279_vm1, %v9359_v62  ;;  %v5595_v62 = vld [vmem:[#allocation3 + $0xc0] sm:$0xff] }
 0x433   : > { %7443 = vmatmul.msk.f32.gmra.mxu0 %vm279_vm1, %v5936_v12  ;;  %4892 = vst.msk [vmem:[#allocation4 + $0xc0] sm:$0xff] %vm279_vm1, %v4860_v47  ;;  %v5939_v0 = vld [vmem:[#allocation3 + $0xe1] sm:$0xff] }
 0x434   : > { %v4107_v30 = vpop.f32.mrf.mxu2  ;;  %v4152_v12 = vld [vmem:[#allocation4 + $0xf0] sm:$0xff] }
 0x435   : > { %v4448_v10 = vpop.f32.mrf.mxu3  ;;  %v4181_v29 = vadd.f32 %v4149_v4, %v4107_v30 }
 0x436   : > { %v4489_v44 = vld [vmem:[#allocation4 + $0xd0] sm:$0xff] }
 0x437   : > { %v4521_v38 = vadd.f32 %v4489_v44, %v4445_v16  ;;  %4213 = vst.msk [vmem:[#allocation4 + $0xd8] sm:$0xff] %vm279_vm1, %v4181_v29  ;;  %v5073_v21 = vpop.f32.mrf.mxu1  ;;  %v5156_v44 = vld [vmem:[#allocation4 + $0x58] sm:$0xff] }
 0x438   : > { %v9639_v32 = vpop.f32.mrf.mxu0  ;;  %v5185_v17 = vadd.f32 %v5153_v40, %v5073_v21  ;;  %v4829_v63 = vld [vmem:[#allocation4 + $0xc8] sm:$0xff]  ;;  %v9686_v21 = vld [vmem:[#allocation3 + $0xca] sm:$0xff] }
 0x439   : > { %4553 = vst.msk [vmem:[#allocation4 + $0xd0] sm:$0xff] %vm279_vm1, %v4521_v38  ;;  %7377 = vmatmul.msk.f32.gmra.mxu2 %vm279_vm1, %v9641_v9  ;;  %v4861_v41 = vadd.f32 %v4829_v63, %v9579_v26 }
 0x43a   : > { %7410 = vmatmul.msk.f32.gmra.mxu3 %vm279_vm1, %v5595_v62  ;;  %5217 = vst.msk [vmem:[#allocation4 + $0x40] sm:$0xff] %vm279_vm1, %v5185_v17  ;;  %7356 = vmatmul.msk.f32.gmra.mxu1 %vm279_vm1, %v9375_v11  ;;  %v5596_v11 = vld [vmem:[#allocation3 + $0xc8] sm:$0xff]  ;;  %v5940_v17 = vld [vmem:[#allocation3 + $0xf1] sm:$0xff] }
 0x43b   : > { %7444 = vmatmul.msk.f32.gmra.mxu0 %vm279_vm1, %v5937_v1  ;;  %4893 = vst.msk [vmem:[#allocation4 + $0xc8] sm:$0xff] %vm279_vm1, %v4861_v41  ;;  %v4153_v1 = vld [vmem:[#allocation4 + $0xf8] sm:$0xff] }
 0x43c   : > { %v4110_v45 = vpop.f32.mrf.mxu2 }
 0x43d   : > { %v4451_v15 = vpop.f32.mrf.mxu3  ;;  %v4182_v3 = vadd.f32 %v4150_v58, %v4110_v45 }
 0x43e   : > { %v4490_v33 = vld [vmem:[#allocation4 + $0xd8] sm:$0xff] }
 0x43f   : > { %v4522_v28 = vadd.f32 %v4490_v33, %v4448_v10  ;;  %4214 = vst.msk [vmem:[#allocation4 + $0xe0] sm:$0xff] %vm279_vm1, %v4182_v3  ;;  %v5076_v19 = vpop.f32.mrf.mxu1  ;;  %v5157_v33 = vld [vmem:[#allocation4 + $0x60] sm:$0xff] }
 0x440   : > { %v9654_v26 = vpop.f32.mrf.mxu0  ;;  %v5186_v55 = vadd.f32 %v5154_v22, %v5076_v19  ;;  %v4830_v57 = vld [vmem:[#allocation4 + $0xd0] sm:$0xff] }
 0x441   : > { %4554 = vst.msk [vmem:[#allocation4 + $0xd8] sm:$0xff] %vm279_vm1, %v4522_v28  ;;  %7378 = vmatmul.msk.f32.gmra.mxu2 %vm279_vm1, %v9656_v60  ;;  %v4862_v31 = vadd.f32 %v4830_v57, %v9594_v42  ;;  %v9701_v19 = vld [vmem:[#allocation3 + $0xda] sm:$0xff] }
 0x442   : > { %7411 = vmatmul.msk.f32.gmra.mxu3 %vm279_vm1, %v5596_v11  ;;  %5218 = vst.msk [vmem:[#allocation4 + $0x48] sm:$0xff] %vm279_vm1, %v5186_v55  ;;  %7357 = vmatmul.msk.f32.gmra.mxu1 %vm279_vm1, %v9391_v7  ;;  %v5597_v7 = vld [vmem:[#allocation3 + $0xd8] sm:$0xff] }
 0x443   : > { %7445 = vmatmul.msk.f32.gmra.mxu0 %vm279_vm1, %v5938_v24  ;;  %4894 = vst.msk [vmem:[#allocation4 + $0xd0] sm:$0xff] %vm279_vm1, %v4862_v31  ;;  %v5941_v55 = vld [vmem:[#allocation3 + $0xf9] sm:$0xff]  ;;  %v5486_v24 = vld [vmem:[#allocation4] sm:$0xff] }
 0x444   : > { %v4113_v35 = vpop.f32.mrf.mxu2 }
 0x445   : > { %v4454_v52 = vpop.f32.mrf.mxu3  ;;  %v4183_v20 = vadd.f32 %v4151_v54, %v4113_v35 }
 0x446   : > { %v4491_v56 = vld [vmem:[#allocation4 + $0xe0] sm:$0xff] }
 0x447   : > { %v4523_v16 = vadd.f32 %v4491_v56, %v4451_v15  ;;  %4215 = vst.msk [vmem:[#allocation4 + $0xe8] sm:$0xff] %vm279_vm1, %v4183_v20  ;;  %v5079_v53 = vpop.f32.mrf.mxu1  ;;  %v5158_v56 = vld [vmem:[#allocation4 + $0x68] sm:$0xff] }
 0x448   : > { %v9669_v42 = vpop.f32.mrf.mxu0  ;;  %v5187_v46 = vadd.f32 %v5155_v5, %v5079_v53  ;;  %v4831_v61 = vld [vmem:[#allocation4 + $0xd8] sm:$0xff] }
 0x449   : > { %4555 = vst.msk [vmem:[#allocation4 + $0xe0] sm:$0xff] %vm279_vm1, %v4523_v16  ;;  %7379 = vmatmul.msk.f32.gmra.mxu2 %vm279_vm1, %v9671_v49  ;;  %v4863_v59 = vadd.f32 %v4831_v61, %v9609_v13  ;;  %v9716_v53 = vld [vmem:[#allocation3 + $0xe2] sm:$0xff] }
 0x44a   : > { %7412 = vmatmul.msk.f32.gmra.mxu3 %vm279_vm1, %v5597_v7  ;;  %5219 = vst.msk [vmem:[#allocation4 + $0x50] sm:$0xff] %vm279_vm1, %v5187_v46  ;;  %7358 = vmatmul.msk.f32.gmra.mxu1 %vm279_vm1, %v9407_v6  ;;  %v5598_v6 = vld [vmem:[#allocation3 + $0xe0] sm:$0xff]  ;;  %v5942_v46 = vld [vmem:[#allocation3 + $0x109] sm:$0xff] }
 0x44b   : > { %7446 = vmatmul.msk.f32.gmra.mxu0 %vm279_vm1, %v5939_v0  ;;  %4895 = vst.msk [vmem:[#allocation4 + $0xd8] sm:$0xff] %vm279_vm1, %v4863_v59  ;;  %v5487_v0 = vld [vmem:[#allocation4 + $0x8] sm:$0xff] }
 0x44c   : > { %v4116_v50 = vpop.f32.mrf.mxu2 }
 0x44d   : > { %v4457_v47 = vpop.f32.mrf.mxu3  ;;  %v4184_v30 = vadd.f32 %v4152_v12, %v4116_v50 }
 0x44e   : > { %v4492_v4 = vld [vmem:[#allocation4 + $0xe8] sm:$0xff] }
 0x44f   : > { %v4524_v10 = vadd.f32 %v4492_v4, %v4454_v52  ;;  %4216 = vst.msk [vmem:[#allocation4 + $0xf0] sm:$0xff] %vm279_vm1, %v4184_v30  ;;  %v5082_v29 = vpop.f32.mrf.mxu1  ;;  %v5159_v4 = vld [vmem:[#allocation4 + $0x70] sm:$0xff] }
 0x450   : > { %v9684_v13 = vpop.f32.mrf.mxu0  ;;  %v5188_v38 = vadd.f32 %v5156_v44, %v5082_v29  ;;  %v4832_v40 = vld [vmem:[#allocation4 + $0xe0] sm:$0xff] }
 0x451   : > { %4556 = vst.msk [vmem:[#allocation4 + $0xe8] sm:$0xff] %vm279_vm1, %v4524_v10  ;;  %7380 = vmatmul.msk.f32.gmra.mxu2 %vm279_vm1, %v9686_v21  ;;  %v4864_v62 = vadd.f32 %v4832_v40, %v9624_v23  ;;  %v9731_v29 = vld [vmem:[#allocation3 + $0xf2] sm:$0xff] }
 0x452   : > { %7413 = vmatmul.msk.f32.gmra.mxu3 %vm279_vm1, %v5598_v6  ;;  %5220 = vst.msk [vmem:[#allocation4 + $0x58] sm:$0xff] %vm279_vm1, %v5188_v38  ;;  %7359 = vmatmul.msk.f32.gmra.mxu1 %vm279_vm1, %v9423_v8  ;;  %v5599_v8 = vld [vmem:[#allocation3 + $0xf0] sm:$0xff]  ;;  %v9734_v38 = vld [vmem:[#allocation3 + $0x181] sm:$0xff] }
 0x453   : > { %7447 = vmatmul.msk.f32.gmra.mxu0 %vm279_vm1, %v5940_v17  ;;  %4896 = vst.msk [vmem:[#allocation4 + $0xe0] sm:$0xff] %vm279_vm1, %v4864_v62  ;;  %v5943_v6 = vld [vmem:[#allocation3 + $0x111] sm:$0xff]  ;;  %v5488_v62 = vld [vmem:[#allocation4 + $0x10] sm:$0xff] }
 0x454   : > { %v4119_v63 = vpop.f32.mrf.mxu2 }
 0x455   : > { %v4460_v41 = vpop.f32.mrf.mxu3  ;;  %v4185_v45 = vadd.f32 %v4153_v1, %v4119_v63 }
 0x456   : > { %v4493_v58 = vld [vmem:[#allocation4 + $0xf0] sm:$0xff] }
 0x457   : > { %v4525_v15 = vadd.f32 %v4493_v58, %v4457_v47  ;;  %4217 = vst.msk [vmem:[#allocation4 + $0xf8] sm:$0xff] %vm279_vm1, %v4185_v45  ;;  %v5085_v3 = vpop.f32.mrf.mxu1 }
 0x458   : > { %v9699_v23 = vpop.f32.mrf.mxu0  ;;  %v5189_v28 = vadd.f32 %v5157_v33, %v5085_v3  ;;  %v4833_v22 = vld [vmem:[#allocation4 + $0xe8] sm:$0xff] }
 0x459   : > { %4557 = vst.msk [vmem:[#allocation4 + $0xf0] sm:$0xff] %vm279_vm1, %v4525_v15  ;;  %7381 = vmatmul.msk.f32.gmra.mxu2 %vm279_vm1, %v9701_v19  ;;  %v4865_v11 = vadd.f32 %v4833_v22, %v9639_v32  ;;  %v5160_v15 = vld [vmem:[#allocation4 + $0x78] sm:$0xff]  ;;  %v9748_v33 = vld [vmem:[#allocation3 + $0xfa] sm:$0xff] }
 0x45a   : > { %7414 = vmatmul.msk.f32.gmra.mxu3 %vm279_vm1, %v5599_v8  ;;  %5221 = vst.msk [vmem:[#allocation4 + $0x60] sm:$0xff] %vm279_vm1, %v5189_v28  ;;  %7360 = vmatmul.msk.f32.gmra.mxu1 %vm279_vm1, %v9438_v14  ;;  %v5600_v14 = vld [vmem:[#allocation3 + $0xf8] sm:$0xff]  ;;  %v5602_v28 = vld [vmem:[#allocation3 + $0x110] sm:$0xff] }
 0x45b   : > { %7448 = vmatmul.msk.f32.gmra.mxu0 %vm279_vm1, %v5941_v55  ;;  %4897 = vst.msk [vmem:[#allocation4 + $0xe8] sm:$0xff] %vm279_vm1, %v4865_v11  ;;  %v9751_v22 = vld [vmem:[#allocation3 + $0x189] sm:$0xff]  ;;  %v5944_v55 = vld [vmem:[#allocation3 + $0x121] sm:$0xff] }
 0x45c   : > { %v5390_v57 = vpop.f32.mrf.mxu2 }
 0x45d   : > { %v5732_v31 = vpop.f32.mrf.mxu3  ;;  %v5518_v35 = vadd.f32 %v5486_v24, %v5390_v57  ;;  %v5489_v24 = vld [vmem:[#allocation4 + $0x18] sm:$0xff] }
 0x45e   : > { %v4494_v54 = vld [vmem:[#allocation4 + $0xf8] sm:$0xff] }
 0x45f   : > { %v4526_v52 = vadd.f32 %v4494_v54, %v4460_v41  ;;  %5550 = vst.msk [vmem:[#allocation4] sm:$0xff] %vm279_vm1, %v5518_v35  ;;  %v5088_v20 = vpop.f32.mrf.mxu1 }
 0x460   : > { %v9714_v32 = vpop.f32.mrf.mxu0  ;;  %v5190_v16 = vadd.f32 %v5158_v56, %v5088_v20  ;;  %v4834_v5 = vld [vmem:[#allocation4 + $0xf0] sm:$0xff]  ;;  %v5161_v56 = vld [vmem:[#allocation4 + $0x80] sm:$0xff] }
 0x461   : > { %4558 = vst.msk [vmem:[#allocation4 + $0xf8] sm:$0xff] %vm279_vm1, %v4526_v52  ;;  %7382 = vmatmul.msk.f32.gmra.mxu2 %vm279_vm1, %v9716_v53  ;;  %v4866_v7 = vadd.f32 %v4834_v5, %v9654_v26  ;;  %v5603_v5 = vld [vmem:[#allocation3 + $0x120] sm:$0xff] }
 0x462   : > { %7415 = vmatmul.msk.f32.gmra.mxu3 %vm279_vm1, %v5600_v14  ;;  %5222 = vst.msk [vmem:[#allocation4 + $0x68] sm:$0xff] %vm279_vm1, %v5190_v16  ;;  %7361 = vmatmul.msk.f32.gmra.mxu1 %vm279_vm1, %v9453_v39  ;;  %v5601_v39 = vld [vmem:[#allocation3 + $0x108] sm:$0xff] }
 0x463   : > { %7449 = vmatmul.msk.f32.gmra.mxu0 %vm279_vm1, %v5942_v46  ;;  %4898 = vst.msk [vmem:[#allocation4 + $0xf0] sm:$0xff] %vm279_vm1, %v4866_v7  ;;  %v9765_v14 = vld [vmem:[#allocation3 + $0x10a] sm:$0xff] }
 0x464   : > { %v5393_v61 = vpop.f32.mrf.mxu2  ;;  %v5945_v7 = vld [vmem:[#allocation3 + $0x129] sm:$0xff] }
 0x465   : > { %v5735_v59 = vpop.f32.mrf.mxu3  ;;  %v5519_v50 = vadd.f32 %v5487_v0, %v5393_v61 }
 0x466   : > { %v5828_v12 = vld [vmem:[#allocation4] sm:$0xff] }
 0x467   : > { %v5860_v47 = vadd.f32 %v5828_v12, %v5732_v31  ;;  %5551 = vst.msk [vmem:[#allocation4 + $0x8] sm:$0xff] %vm279_vm1, %v5519_v50  ;;  %v5091_v30 = vpop.f32.mrf.mxu1 }
 0x468   : > { %v9729_v26 = vpop.f32.mrf.mxu0  ;;  %v5191_v10 = vadd.f32 %v5159_v4, %v5091_v30  ;;  %v4835_v44 = vld [vmem:[#allocation4 + $0xf8] sm:$0xff] }
 0x469   : > { %5892 = vst.msk [vmem:[#allocation4] sm:$0xff] %vm279_vm1, %v5860_v47  ;;  %7383 = vmatmul.msk.f32.gmra.mxu2 %vm279_vm1, %v9731_v29  ;;  %v4867_v40 = vadd.f32 %v4835_v44, %v9669_v42  ;;  %v9780_v44 = vld [vmem:[#allocation3 + $0x112] sm:$0xff] }
 0x46a   : > { %7416 = vmatmul.msk.f32.gmra.mxu3 %vm279_vm1, %v5601_v39  ;;  %5223 = vst.msk [vmem:[#allocation4 + $0x70] sm:$0xff] %vm279_vm1, %v5191_v10  ;;  %7362 = vmatmul.msk.f32.gmra.mxu1 %vm279_vm1, %v9734_v38  ;;  %v5162_v10 = vld [vmem:[#allocation4 + $0x88] sm:$0xff] }
 0x46b   : > { %7450 = vmatmul.msk.f32.gmra.mxu0 %vm279_vm1, %v5943_v6  ;;  %4899 = vst.msk [vmem:[#allocation4 + $0xf8] sm:$0xff] %vm279_vm1, %v4867_v40  ;;  %v5946_v40 = vld [vmem:[#allocation3 + $0x139] sm:$0xff] }
 0x46c   : > { %v5396_v17 = vpop.f32.mrf.mxu2 }
 0x46d   : > { %v5738_v63 = vpop.f32.mrf.mxu3  ;;  %v5520_v1 = vadd.f32 %v5488_v62, %v5396_v17 }
 0x46e   : > { %v5829_v41 = vld [vmem:[#allocation4 + $0x8] sm:$0xff] }
 0x46f   : > { %v5861_v45 = vadd.f32 %v5829_v41, %v5735_v59  ;;  %5552 = vst.msk [vmem:[#allocation4 + $0x10] sm:$0xff] %vm279_vm1, %v5520_v1  ;;  %v5094_v58 = vpop.f32.mrf.mxu1  ;;  %v5490_v59 = vld [vmem:[#allocation4 + $0x20] sm:$0xff] }
 0x470   : > { %v9746_v42 = vpop.f32.mrf.mxu0  ;;  %v5192_v3 = vadd.f32 %v5160_v15, %v5094_v58  ;;  %v6169_v8 = vld [vmem:[#allocation4] sm:$0xff] }
 0x471   : > { %5893 = vst.msk [vmem:[#allocation4 + $0x8] sm:$0xff] %vm279_vm1, %v5861_v45  ;;  %7384 = vmatmul.msk.f32.gmra.mxu2 %vm279_vm1, %v9748_v33  ;;  %v6201_v11 = vadd.f32 %v6169_v8, %v9684_v13  ;;  %v9795_v8 = vld [vmem:[#allocation3 + $0x122] sm:$0xff] }
 0x472   : > { %7417 = vmatmul.msk.f32.gmra.mxu3 %vm279_vm1, %v5602_v28  ;;  %5224 = vst.msk [vmem:[#allocation4 + $0x78] sm:$0xff] %vm279_vm1, %v5192_v3  ;;  %7363 = vmatmul.msk.f32.gmra.mxu1 %vm279_vm1, %v9751_v22  ;;  %v5163_v3 = vld [vmem:[#allocation4 + $0x90] sm:$0xff] }
 0x473   : > { %7451 = vmatmul.msk.f32.gmra.mxu0 %vm279_vm1, %v5944_v55  ;;  %6233 = vst.msk [vmem:[#allocation4] sm:$0xff] %vm279_vm1, %v6201_v11  ;;  %v5947_v11 = vld [vmem:[#allocation3 + $0x141] sm:$0xff] }
 0x474   : > { %v5399_v57 = vpop.f32.mrf.mxu2 }
 0x475   : > { %v5741_v31 = vpop.f32.mrf.mxu3  ;;  %v5521_v35 = vadd.f32 %v5489_v24, %v5399_v57 }
 0x476   : > { %v5830_v54 = vld [vmem:[#allocation4 + $0x10] sm:$0xff] }
 0x477   : > { %v5862_v52 = vadd.f32 %v5830_v54, %v5738_v63  ;;  %5553 = vst.msk [vmem:[#allocation4 + $0x18] sm:$0xff] %vm279_vm1, %v5521_v35  ;;  %v5097_v20 = vpop.f32.mrf.mxu1  ;;  %v5491_v63 = vld [vmem:[#allocation4 + $0x28] sm:$0xff] }
 0x478   : > { %v9763_v13 = vpop.f32.mrf.mxu0  ;;  %v5193_v16 = vadd.f32 %v5161_v56, %v5097_v20  ;;  %v6170_v46 = vld [vmem:[#allocation4 + $0x8] sm:$0xff] }
 0x479   : > { %5894 = vst.msk [vmem:[#allocation4 + $0x10] sm:$0xff] %vm279_vm1, %v5862_v52  ;;  %7385 = vmatmul.msk.f32.gmra.mxu2 %vm279_vm1, %v9765_v14  ;;  %v6202_v61 = vadd.f32 %v6170_v46, %v9699_v23  ;;  %v9810_v46 = vld [vmem:[#allocation3 + $0x12a] sm:$0xff] }
 0x47a   : > { %7418 = vmatmul.msk.f32.gmra.mxu3 %vm279_vm1, %v5603_v5  ;;  %5225 = vst.msk [vmem:[#allocation4 + $0x80] sm:$0xff] %vm279_vm1, %v5193_v16  ;;  %7464 = vmatmul.msk.f32.vlgmr.msra.gmra.mxu1 %vm279_vm1, %v9492_v51  ;;  %v5604_v51 = vld [vmem:[#allocation3 + $0x128] sm:$0xff] }
 0x47b   : > { %7452 = vmatmul.msk.f32.gmra.mxu0 %vm279_vm1, %v5945_v7  ;;  %6234 = vst.msk [vmem:[#allocation4 + $0x8] sm:$0xff] %vm279_vm1, %v6202_v61  ;;  %v5164_v16 = vld [vmem:[#allocation4 + $0x98] sm:$0xff]  ;;  %v5948_v61 = vld [vmem:[#allocation3 + $0x151] sm:$0xff] }
 0x47c   : > { %v5402_v0 = vpop.f32.mrf.mxu2 }
 0x47d   : > { %v5744_v50 = vpop.f32.mrf.mxu3  ;;  %v5522_v12 = vadd.f32 %v5490_v59, %v5402_v0 }
 0x47e   : > { %v5831_v47 = vld [vmem:[#allocation4 + $0x18] sm:$0xff] }
 0x47f   : > { %v5863_v30 = vadd.f32 %v5831_v47, %v5741_v31  ;;  %5554 = vst.msk [vmem:[#allocation4 + $0x20] sm:$0xff] %vm279_vm1, %v5522_v12  ;;  %v5100_v4 = vpop.f32.mrf.mxu1  ;;  %v5492_v31 = vld [vmem:[#allocation4 + $0x30] sm:$0xff] }
 0x480   : > { %v9778_v23 = vpop.f32.mrf.mxu0  ;;  %v5194_v39 = vadd.f32 %v5162_v10, %v5100_v4  ;;  %v6171_v6 = vld [vmem:[#allocation4 + $0x10] sm:$0xff] }
 0x481   : > { %5895 = vst.msk [vmem:[#allocation4 + $0x18] sm:$0xff] %vm279_vm1, %v5863_v30  ;;  %7386 = vmatmul.msk.f32.gmra.mxu2 %vm279_vm1, %v9780_v44  ;;  %v6203_v17 = vadd.f32 %v6171_v6, %v9714_v32  ;;  %v9825_v6 = vld [vmem:[#allocation3 + $0x13a] sm:$0xff] }
 0x482   : > { %7419 = vmatmul.msk.f32.gmra.mxu3 %vm279_vm1, %v5604_v51  ;;  %5226 = vst.msk [vmem:[#allocation4 + $0x88] sm:$0xff] %vm279_vm1, %v5194_v39  ;;  %7465 = vmatmul.msk.f32.gmra.mxu1 %vm279_vm1, %v9507_v27  ;;  %v5605_v27 = vld [vmem:[#allocation3 + $0x138] sm:$0xff]  ;;  %v5165_v39 = vld [vmem:[#allocation4 + $0xa0] sm:$0xff] }
 0x483   : > { %7453 = vmatmul.msk.f32.gmra.mxu0 %vm279_vm1, %v5946_v40  ;;  %6235 = vst.msk [vmem:[#allocation4 + $0x10] sm:$0xff] %vm279_vm1, %v6203_v17  ;;  %v5949_v17 = vld [vmem:[#allocation3 + $0x159] sm:$0xff] }
 0x484   : > { %v5405_v62 = vpop.f32.mrf.mxu2 }
 0x485   : > { %v5747_v1 = vpop.f32.mrf.mxu3  ;;  %v5523_v41 = vadd.f32 %v5491_v63, %v5405_v62 }
 0x486   : > { %v5832_v45 = vld [vmem:[#allocation4 + $0x20] sm:$0xff] }
 0x487   : > { %v5864_v58 = vadd.f32 %v5832_v45, %v5744_v50  ;;  %5555 = vst.msk [vmem:[#allocation4 + $0x28] sm:$0xff] %vm279_vm1, %v5523_v41  ;;  %v5103_v15 = vpop.f32.mrf.mxu1  ;;  %v5493_v50 = vld [vmem:[#allocation4 + $0x38] sm:$0xff] }
 0x488   : > { %v9793_v32 = vpop.f32.mrf.mxu0  ;;  %v5195_v28 = vadd.f32 %v5163_v3, %v5103_v15  ;;  %v6172_v55 = vld [vmem:[#allocation4 + $0x18] sm:$0xff] }
 0x489   : > { %5896 = vst.msk [vmem:[#allocation4 + $0x20] sm:$0xff] %vm279_vm1, %v5864_v58  ;;  %7387 = vmatmul.msk.f32.gmra.mxu2 %vm279_vm1, %v9795_v8  ;;  %v6204_v57 = vadd.f32 %v6172_v55, %v9729_v26  ;;  %v9840_v55 = vld [vmem:[#allocation3 + $0x142] sm:$0xff] }
 0x48a   : > { %7420 = vmatmul.msk.f32.gmra.mxu3 %vm279_vm1, %v5605_v27  ;;  %5227 = vst.msk [vmem:[#allocation4 + $0x90] sm:$0xff] %vm279_vm1, %v5195_v28  ;;  %7466 = vmatmul.msk.f32.gmra.mxu1 %vm279_vm1, %v9521_v36  ;;  %v5606_v36 = vld [vmem:[#allocation3 + $0x140] sm:$0xff]  ;;  %v5166_v28 = vld [vmem:[#allocation4 + $0xa8] sm:$0xff] }
 0x48b   : > { %7454 = vmatmul.msk.f32.gmra.mxu0 %vm279_vm1, %v5947_v11  ;;  %6236 = vst.msk [vmem:[#allocation4 + $0x18] sm:$0xff] %vm279_vm1, %v6204_v57  ;;  %v5950_v57 = vld [vmem:[#allocation3 + $0x169] sm:$0xff] }
 0x48c   : > { %v5408_v24 = vpop.f32.mrf.mxu2 }
 0x48d   : > { %v5750_v35 = vpop.f32.mrf.mxu3  ;;  %v5524_v54 = vadd.f32 %v5492_v31, %v5408_v24 }
 0x48e   : > { %v5833_v52 = vld [vmem:[#allocation4 + $0x28] sm:$0xff] }
 0x48f   : > { %v5865_v20 = vadd.f32 %v5833_v52, %v5747_v1  ;;  %5556 = vst.msk [vmem:[#allocation4 + $0x30] sm:$0xff] %vm279_vm1, %v5524_v54  ;;  %v5106_v56 = vpop.f32.mrf.mxu1  ;;  %v5494_v1 = vld [vmem:[#allocation4 + $0x40] sm:$0xff] }
 0x490   : > { %v9808_v26 = vpop.f32.mrf.mxu0  ;;  %v5196_v5 = vadd.f32 %v5164_v16, %v5106_v56  ;;  %v6173_v7 = vld [vmem:[#allocation4 + $0x20] sm:$0xff] }
 0x491   : > { %5897 = vst.msk [vmem:[#allocation4 + $0x28] sm:$0xff] %vm279_vm1, %v5865_v20  ;;  %7388 = vmatmul.msk.f32.gmra.mxu2 %vm279_vm1, %v9810_v46  ;;  %v6205_v0 = vadd.f32 %v6173_v7, %v9746_v42  ;;  %v9855_v7 = vld [vmem:[#allocation3 + $0x152] sm:$0xff] }
 0x492   : > { %7421 = vmatmul.msk.f32.gmra.mxu3 %vm279_vm1, %v5606_v36  ;;  %5228 = vst.msk [vmem:[#allocation4 + $0x98] sm:$0xff] %vm279_vm1, %v5196_v5  ;;  %7467 = vmatmul.msk.f32.gmra.mxu1 %vm279_vm1, %v9536_v2  ;;  %v5607_v2 = vld [vmem:[#allocation3 + $0x150] sm:$0xff]  ;;  %v5167_v5 = vld [vmem:[#allocation4 + $0xb0] sm:$0xff] }
 0x493   : > { %7455 = vmatmul.msk.f32.gmra.mxu0 %vm279_vm1, %v5948_v61  ;;  %6237 = vst.msk [vmem:[#allocation4 + $0x20] sm:$0xff] %vm279_vm1, %v6205_v0  ;;  %v5951_v0 = vld [vmem:[#allocation3 + $0x171] sm:$0xff] }
 0x494   : > { %v5411_v59 = vpop.f32.mrf.mxu2 }
 0x495   : > { %v5753_v12 = vpop.f32.mrf.mxu3  ;;  %v5525_v47 = vadd.f32 %v5493_v50, %v5411_v59 }
 0x496   : > { %v5834_v30 = vld [vmem:[#allocation4 + $0x30] sm:$0xff] }
 0x497   : > { %v5866_v4 = vadd.f32 %v5834_v30, %v5750_v35  ;;  %5557 = vst.msk [vmem:[#allocation4 + $0x38] sm:$0xff] %vm279_vm1, %v5525_v47  ;;  %v5109_v10 = vpop.f32.mrf.mxu1  ;;  %v5495_v35 = vld [vmem:[#allocation4 + $0x48] sm:$0xff] }
 0x498   : > { %v9823_v42 = vpop.f32.mrf.mxu0  ;;  %v5197_v51 = vadd.f32 %v5165_v39, %v5109_v10  ;;  %v6174_v40 = vld [vmem:[#allocation4 + $0x28] sm:$0xff] }
 0x499   : > { %5898 = vst.msk [vmem:[#allocation4 + $0x30] sm:$0xff] %vm279_vm1, %v5866_v4  ;;  %7389 = vmatmul.msk.f32.gmra.mxu2 %vm279_vm1, %v9825_v6  ;;  %v6206_v62 = vadd.f32 %v6174_v40, %v9763_v13  ;;  %v9870_v40 = vld [vmem:[#allocation3 + $0x15a] sm:$0xff] }
 0x49a   : > { %7422 = vmatmul.msk.f32.gmra.mxu3 %vm279_vm1, %v5607_v2  ;;  %5229 = vst.msk [vmem:[#allocation4 + $0xa0] sm:$0xff] %vm279_vm1, %v5197_v51  ;;  %7468 = vmatmul.msk.f32.gmra.mxu1 %vm279_vm1, %v9551_v37  ;;  %v5608_v37 = vld [vmem:[#allocation3 + $0x158] sm:$0xff]  ;;  %v5168_v51 = vld [vmem:[#allocation4 + $0xb8] sm:$0xff] }
 0x49b   : > { %7456 = vmatmul.msk.f32.gmra.mxu0 %vm279_vm1, %v5949_v17  ;;  %6238 = vst.msk [vmem:[#allocation4 + $0x28] sm:$0xff] %vm279_vm1, %v6206_v62 }
 0x49c   : > { %v5414_v63 = vpop.f32.mrf.mxu2 }
 0x49d   : > { %v5756_v41 = vpop.f32.mrf.mxu3  ;;  %v5526_v45 = vadd.f32 %v5494_v1, %v5414_v63  ;;  %v5497_v1 = vld [vmem:[#allocation4 + $0x58] sm:$0xff] }
 0x49e   : > { %v5835_v58 = vld [vmem:[#allocation4 + $0x38] sm:$0xff] }
 0x49f   : > { %v5867_v15 = vadd.f32 %v5835_v58, %v5753_v12  ;;  %5558 = vst.msk [vmem:[#allocation4 + $0x40] sm:$0xff] %vm279_vm1, %v5526_v45  ;;  %v5112_v3 = vpop.f32.mrf.mxu1  ;;  %v5496_v12 = vld [vmem:[#allocation4 + $0x50] sm:$0xff] }
 0x4a0   : > { %v9838_v13 = vpop.f32.mrf.mxu0  ;;  %v5198_v27 = vadd.f32 %v5166_v28, %v5112_v3  ;;  %v6175_v11 = vld [vmem:[#allocation4 + $0x30] sm:$0xff] }
 0x4a1   : > { %5899 = vst.msk [vmem:[#allocation4 + $0x38] sm:$0xff] %vm279_vm1, %v5867_v15  ;;  %7390 = vmatmul.msk.f32.gmra.mxu2 %vm279_vm1, %v9840_v55  ;;  %v6207_v24 = vadd.f32 %v6175_v11, %v9778_v23 }
 0x4a2   : > { %7423 = vmatmul.msk.f32.gmra.mxu3 %vm279_vm1, %v5608_v37  ;;  %5230 = vst.msk [vmem:[#allocation4 + $0xa8] sm:$0xff] %vm279_vm1, %v5198_v27  ;;  %7469 = vmatmul.msk.f32.gmra.mxu1 %vm279_vm1, %v9566_v43  ;;  %v5609_v43 = vld [vmem:[#allocation3 + $0x168] sm:$0xff] }
 0x4a3   : > { %7457 = vmatmul.msk.f32.gmra.mxu0 %vm279_vm1, %v5950_v57  ;;  %6239 = vst.msk [vmem:[#allocation4 + $0x30] sm:$0xff] %vm279_vm1, %v6207_v24  ;;  %v9886_v37 = vld [vmem:[#allocation3 + $0x16a] sm:$0xff] }
 0x4a4   : > { %v5417_v31 = vpop.f32.mrf.mxu2  ;;  %v5498_v24 = vld [vmem:[#allocation4 + $0x60] sm:$0xff] }
 0x4a5   : > { %v5759_v54 = vpop.f32.mrf.mxu3  ;;  %v5527_v52 = vadd.f32 %v5495_v35, %v5417_v31 }
 0x4a6   : > { %v5836_v20 = vld [vmem:[#allocation4 + $0x40] sm:$0xff] }
 0x4a7   : > { %v5868_v56 = vadd.f32 %v5836_v20, %v5756_v41  ;;  %5559 = vst.msk [vmem:[#allocation4 + $0x48] sm:$0xff] %vm279_vm1, %v5527_v52  ;;  %v5115_v16 = vpop.f32.mrf.mxu1 }
 0x4a8   : > { %v9853_v23 = vpop.f32.mrf.mxu0  ;;  %v5199_v36 = vadd.f32 %v5167_v5, %v5115_v16  ;;  %v6176_v61 = vld [vmem:[#allocation4 + $0x38] sm:$0xff]  ;;  %v9902_v5 = vld [vmem:[#allocation3 + $0x172] sm:$0xff] }
 0x4a9   : > { %5900 = vst.msk [vmem:[#allocation4 + $0x40] sm:$0xff] %vm279_vm1, %v5868_v56  ;;  %7391 = vmatmul.msk.f32.gmra.mxu2 %vm279_vm1, %v9855_v7  ;;  %v6208_v59 = vadd.f32 %v6176_v61, %v9793_v32  ;;  %v5499_v61 = vld [vmem:[#allocation4 + $0x68] sm:$0xff] }
 0x4aa   : > { %7424 = vmatmul.msk.f32.gmra.mxu3 %vm279_vm1, %v5609_v43  ;;  %5231 = vst.msk [vmem:[#allocation4 + $0xb0] sm:$0xff] %vm279_vm1, %v5199_v36  ;;  %7470 = vmatmul.msk.f32.gmra.mxu1 %vm279_vm1, %v9581_v48  ;;  %v5610_v48 = vld [vmem:[#allocation3 + $0x170] sm:$0xff] }
 0x4ab   : > { %7458 = vmatmul.msk.f32.gmra.mxu0 %vm279_vm1, %v5951_v0  ;;  %6240 = vst.msk [vmem:[#allocation4 + $0x38] sm:$0xff] %vm279_vm1, %v6208_v59 }
 0x4ac   : > { %v5420_v50 = vpop.f32.mrf.mxu2 }
 0x4ad   : > { %v5762_v47 = vpop.f32.mrf.mxu3  ;;  %v5528_v30 = vadd.f32 %v5496_v12, %v5420_v50  ;;  %v5613_v12 = vld [vmem:[#allocation3 + $0x198] sm:$0xff] }
 0x4ae   : > { %v5837_v4 = vld [vmem:[#allocation4 + $0x48] sm:$0xff] }
 0x4af   : > { %v5869_v10 = vadd.f32 %v5837_v4, %v5759_v54  ;;  %5560 = vst.msk [vmem:[#allocation4 + $0x50] sm:$0xff] %vm279_vm1, %v5528_v30  ;;  %v5118_v39 = vpop.f32.mrf.mxu1 }
 0x4b0   : > { %v9868_v32 = vpop.f32.mrf.mxu0  ;;  %v5200_v2 = vadd.f32 %v5168_v51, %v5118_v39  ;;  %v6177_v17 = vld [vmem:[#allocation4 + $0x40] sm:$0xff] }
 0x4b1   : > { %5901 = vst.msk [vmem:[#allocation4 + $0x48] sm:$0xff] %vm279_vm1, %v5869_v10  ;;  %7392 = vmatmul.msk.f32.gmra.mxu2 %vm279_vm1, %v9870_v40  ;;  %v6209_v62 = vadd.f32 %v6177_v17, %v9808_v26  ;;  %v5169_v26 = vld [vmem:[#allocation4 + $0xc0] sm:$0xff]  ;;  %v5171_v10 = vld [vmem:[#allocation4 + $0xd0] sm:$0xff] }
 0x4b2   : > { %7425 = vmatmul.msk.f32.gmra.mxu3 %vm279_vm1, %v5610_v48  ;;  %5232 = vst.msk [vmem:[#allocation4 + $0xb8] sm:$0xff] %vm279_vm1, %v5200_v2  ;;  %7471 = vmatmul.msk.f32.gmra.mxu1 %vm279_vm1, %v9596_v25  ;;  %v5611_v25 = vld [vmem:[#allocation3 + $0x180] sm:$0xff] }
 0x4b3   : > { %7459 = vmatmul.msk.f32.gmra.mxu0 %vm279_vm1, %v9734_v38  ;;  %6241 = vst.msk [vmem:[#allocation4 + $0x40] sm:$0xff] %vm279_vm1, %v6209_v62  ;;  %v5500_v17 = vld [vmem:[#allocation4 + $0x70] sm:$0xff] }
 0x4b4   : > { %v5423_v63 = vpop.f32.mrf.mxu2 }
 0x4b5   : > { %v5765_v41 = vpop.f32.mrf.mxu3  ;;  %v5529_v45 = vadd.f32 %v5497_v1, %v5423_v63 }
 0x4b6   : > { %v5838_v58 = vld [vmem:[#allocation4 + $0x50] sm:$0xff] }
 0x4b7   : > { %v5870_v15 = vadd.f32 %v5838_v58, %v5762_v47  ;;  %5561 = vst.msk [vmem:[#allocation4 + $0x58] sm:$0xff] %vm279_vm1, %v5529_v45  ;;  %v5121_v3 = vpop.f32.mrf.mxu1  ;;  %v5954_v47 = vld [vmem:[#allocation3 + $0x199] sm:$0xff]  ;;  %v5955_v45 = vld [vmem:[#allocation3 + $0x1a1] sm:$0xff] }
 0x4b8   : > { %v9884_v28 = vpop.f32.mrf.mxu0  ;;  %v5201_v27 = vadd.f32 %v5169_v26, %v5121_v3  ;;  %v6178_v11 = vld [vmem:[#allocation4 + $0x48] sm:$0xff]  ;;  %v5172_v3 = vld [vmem:[#allocation4 + $0xd8] sm:$0xff] }
 0x4b9   : > { %5902 = vst.msk [vmem:[#allocation4 + $0x50] sm:$0xff] %vm279_vm1, %v5870_v15  ;;  %7393 = vmatmul.msk.f32.gmra.mxu2 %vm279_vm1, %v9886_v37  ;;  %v6210_v38 = vadd.f32 %v6178_v11, %v9823_v42  ;;  %v5170_v42 = vld [vmem:[#allocation4 + $0xc8] sm:$0xff]  ;;  %v9930_v26 = vld [vmem:[#allocation3 + $0x18a] sm:$0xff] }
 0x4ba   : > { %7426 = vmatmul.msk.f32.gmra.mxu3 %vm279_vm1, %v5611_v25  ;;  %5233 = vst.msk [vmem:[#allocation4 + $0xc0] sm:$0xff] %vm279_vm1, %v5201_v27  ;;  %7472 = vmatmul.msk.f32.gmra.mxu1 %vm279_vm1, %v9611_v18  ;;  %v5612_v18 = vld [vmem:[#allocation3 + $0x188] sm:$0xff] }
 0x4bb   : > { %7460 = vmatmul.msk.f32.gmra.mxu0 %vm279_vm1, %v9751_v22  ;;  %6242 = vst.msk [vmem:[#allocation4 + $0x48] sm:$0xff] %vm279_vm1, %v6210_v38  ;;  %v5501_v38 = vld [vmem:[#allocation4 + $0x78] sm:$0xff] }
 0x4bc   : > { %v5426_v57 = vpop.f32.mrf.mxu2 }
 0x4bd   : > { %v5768_v31 = vpop.f32.mrf.mxu3  ;;  %v5530_v35 = vadd.f32 %v5498_v24, %v5426_v57 }
 0x4be   : > { %v5839_v54 = vld [vmem:[#allocation4 + $0x58] sm:$0xff] }
 0x4bf   : > { %v5871_v52 = vadd.f32 %v5839_v54, %v5765_v41  ;;  %5562 = vst.msk [vmem:[#allocation4 + $0x60] sm:$0xff] %vm279_vm1, %v5530_v35  ;;  %v5124_v20 = vpop.f32.mrf.mxu1  ;;  %v5614_v41 = vld [vmem:[#allocation3 + $0x1a0] sm:$0xff] }
 0x4c0   : > { %v9900_v56 = vpop.f32.mrf.mxu0  ;;  %v5202_v16 = vadd.f32 %v5170_v42, %v5124_v20  ;;  %v6179_v36 = vld [vmem:[#allocation4 + $0x50] sm:$0xff] }
 0x4c1   : > { %5903 = vst.msk [vmem:[#allocation4 + $0x58] sm:$0xff] %vm279_vm1, %v5871_v52  ;;  %7394 = vmatmul.msk.f32.gmra.mxu2 %vm279_vm1, %v9902_v5  ;;  %v6211_v22 = vadd.f32 %v6179_v36, %v9838_v13  ;;  %v5173_v52 = vld [vmem:[#allocation4 + $0xe0] sm:$0xff] }
 0x4c2   : > { %7427 = vmatmul.msk.f32.gmra.mxu3 %vm279_vm1, %v5612_v18  ;;  %5234 = vst.msk [vmem:[#allocation4 + $0xc8] sm:$0xff] %vm279_vm1, %v5202_v16  ;;  %7473 = vmatmul.msk.f32.gmra.mxu1 %vm279_vm1, %v9626_v34  ;;  %v9917_v34 = vld [vmem:[#allocation3 + $0x182] sm:$0xff]  ;;  %v5502_v18 = vld [vmem:[#allocation4 + $0x80] sm:$0xff] }
 0x4c3   : > { %6243 = vst.msk [vmem:[#allocation4 + $0x50] sm:$0xff] %vm279_vm1, %v6211_v22  ;;  %7461 = vmatmul.msk.f32.gmra.mxu0 %vm279_vm1, %v5954_v47  ;;  %v5503_v47 = vld [vmem:[#allocation4 + $0x88] sm:$0xff] }
 0x4c4   : > { %v5429_v43 = vpop.f32.mrf.mxu2 }
 0x4c5   : > { %v5771_v0 = vpop.f32.mrf.mxu3  ;;  %v5531_v59 = vadd.f32 %v5499_v61, %v5429_v43 }
 0x4c6   : > { %v5840_v50 = vld [vmem:[#allocation4 + $0x60] sm:$0xff] }
 0x4c7   : > { %v5872_v30 = vadd.f32 %v5840_v50, %v5768_v31  ;;  %5563 = vst.msk [vmem:[#allocation4 + $0x68] sm:$0xff] %vm279_vm1, %v5531_v59  ;;  %v5127_v4 = vpop.f32.mrf.mxu1  ;;  %v5174_v59 = vld [vmem:[#allocation4 + $0xe8] sm:$0xff] }
 0x4c8   : > { %v9914_v13 = vpop.f32.mrf.mxu0  ;;  %v5203_v39 = vadd.f32 %v5171_v10, %v5127_v4  ;;  %v6180_v51 = vld [vmem:[#allocation4 + $0x58] sm:$0xff] }
 0x4c9   : > { %5904 = vst.msk [vmem:[#allocation4 + $0x60] sm:$0xff] %vm279_vm1, %v5872_v30  ;;  %7395 = vmatmul.msk.f32.gmra.mxu2 %vm279_vm1, %v9917_v34  ;;  %v6212_v2 = vadd.f32 %v6180_v51, %v9853_v23 }
 0x4ca   : > { %7428 = vmatmul.msk.f32.gmra.mxu3 %vm279_vm1, %v5613_v12  ;;  %5235 = vst.msk [vmem:[#allocation4 + $0xd0] sm:$0xff] %vm279_vm1, %v5203_v39  ;;  %7474 = vmatmul.msk.f32.gmra.mxu1 %vm279_vm1, %v9641_v9 }
 0x4cb   : > { %6244 = vst.msk [vmem:[#allocation4 + $0x58] sm:$0xff] %vm279_vm1, %v6212_v2  ;;  %7462 = vmatmul.msk.f32.gmra.mxu0 %vm279_vm1, %v5955_v45 }
 0x4cc   : > { %v5432_v48 = vpop.f32.mrf.mxu2 }
 0x4cd   : > { %v5774_v62 = vpop.f32.mrf.mxu3  ;;  %v5532_v63 = vadd.f32 %v5500_v17, %v5432_v48  ;;  %v5175_v48 = vld [vmem:[#allocation4 + $0xf0] sm:$0xff] }
 0x4ce   : > { %v5841_v1 = vld [vmem:[#allocation4 + $0x68] sm:$0xff] }
 0x4cf   : > { %v5873_v58 = vadd.f32 %v5841_v1, %v5771_v0  ;;  %5564 = vst.msk [vmem:[#allocation4 + $0x70] sm:$0xff] %vm279_vm1, %v5532_v63  ;;  %v5130_v15 = vpop.f32.mrf.mxu1  ;;  %v5504_v63 = vld [vmem:[#allocation4 + $0x90] sm:$0xff] }
 0x4d0   : > { %v5204_v23 = vadd.f32 %v5172_v3, %v5130_v15  ;;  %v6181_v9 = vld [vmem:[#allocation4 + $0x60] sm:$0xff]  ;;  %v9933_v27 = vpop.f32.mrf.mxu0 }
 0x4d1   : > { %5905 = vst.msk [vmem:[#allocation4 + $0x68] sm:$0xff] %vm279_vm1, %v5873_v58  ;;  %7396 = vmatmul.msk.f32.gmra.mxu2 %vm279_vm1, %v9930_v26  ;;  %v6213_v25 = vadd.f32 %v6181_v9, %v9868_v32 }
 0x4d2   : > { %7429 = vmatmul.msk.f32.gmra.mxu3 %vm279_vm1, %v5614_v41  ;;  %5236 = vst.msk [vmem:[#allocation4 + $0xd8] sm:$0xff] %vm279_vm1, %v5204_v23  ;;  %7475 = vmatmul.msk.f32.gmra.mxu1 %vm279_vm1, %v9656_v60  ;;  %v5176_v23 = vld [vmem:[#allocation4 + $0xf8] sm:$0xff] }
 0x4d3   : > { %6245 = vst.msk [vmem:[#allocation4 + $0x60] sm:$0xff] %vm279_vm1, %v6213_v25 }
 0x4d4   : > { %v5435_v11 = vpop.f32.mrf.mxu2 }
 0x4d5   : > { %v5777_v57 = vpop.f32.mrf.mxu3  ;;  %v5533_v24 = vadd.f32 %v5501_v38, %v5435_v11  ;;  %v5505_v11 = vld [vmem:[#allocation4 + $0x98] sm:$0xff] }
 0x4d6   : > { %v5842_v31 = vld [vmem:[#allocation4 + $0x70] sm:$0xff] }
 0x4d7   : > { %v5874_v35 = vadd.f32 %v5842_v31, %v5774_v62  ;;  %5565 = vst.msk [vmem:[#allocation4 + $0x78] sm:$0xff] %vm279_vm1, %v5533_v24  ;;  %v5133_v54 = vpop.f32.mrf.mxu1 }
 0x4d8   : > { %v5205_v20 = vadd.f32 %v5173_v52, %v5133_v54  ;;  %v6182_v42 = vld [vmem:[#allocation4 + $0x68] sm:$0xff]  ;;  %v9949_v60 = vpop.f32.mrf.mxu0  ;;  %v6510_v54 = vld [vmem:[#allocation4] sm:$0xff] }
 0x4d9   : > { %5906 = vst.msk [vmem:[#allocation4 + $0x70] sm:$0xff] %vm279_vm1, %v5874_v35  ;;  %v6214_v32 = vadd.f32 %v6182_v42, %v9884_v28 }
 0x4da   : > { %5237 = vst.msk [vmem:[#allocation4 + $0xe0] sm:$0xff] %vm279_vm1, %v5205_v20  ;;  %7476 = vmatmul.msk.f32.gmra.mxu1 %vm279_vm1, %v9671_v49 }
 0x4db   : > { %6246 = vst.msk [vmem:[#allocation4 + $0x68] sm:$0xff] %vm279_vm1, %v6214_v32  ;;  %v5506_v32 = vld [vmem:[#allocation4 + $0xa0] sm:$0xff] }
 0x4dc   : > { %v5438_v16 = vpop.f32.mrf.mxu2 }
 0x4dd   : > { %v5780_v36 = vpop.f32.mrf.mxu3  ;;  %v5534_v22 = vadd.f32 %v5502_v18, %v5438_v16 }
 0x4de   : > { %v5843_v43 = vld [vmem:[#allocation4 + $0x78] sm:$0xff] }
 0x4df   : > { %v5875_v61 = vadd.f32 %v5843_v43, %v5777_v57  ;;  %5566 = vst.msk [vmem:[#allocation4 + $0x80] sm:$0xff] %vm279_vm1, %v5534_v22  ;;  %v5136_v0 = vpop.f32.mrf.mxu1  ;;  %v9989_v22 = vld [vmem:[%s10275_s5] ss:$0 sm:$0xff] }
 0x4e0   : > { %v5206_v28 = vadd.f32 %v5174_v59, %v5136_v0  ;;  %v6183_v50 = vld [vmem:[#allocation4 + $0x70] sm:$0xff]  ;;  %v9959_v4 = vpop.f32.mrf.mxu0 }
 0x4e1   : > { %5907 = vst.msk [vmem:[#allocation4 + $0x78] sm:$0xff] %vm279_vm1, %v5875_v61  ;;  %v6215_v49 = vadd.f32 %v6183_v50, %v9900_v56  ;;  %v6511_v61 = vld [vmem:[#allocation4 + $0x8] sm:$0xff] }
 0x4e2   : > { %5238 = vst.msk [vmem:[#allocation4 + $0xe8] sm:$0xff] %vm279_vm1, %v5206_v28  ;;  %7477 = vmatmul.msk.f32.gmra.mxu1 %vm279_vm1, %v9686_v21 }
 0x4e3   : > { %6247 = vst.msk [vmem:[#allocation4 + $0x70] sm:$0xff] %vm279_vm1, %v6215_v49 }
 0x4e4   : > { %v5441_v12 = vpop.f32.mrf.mxu2 }
 0x4e5   : > { %v5783_v30 = vpop.f32.mrf.mxu3  ;;  %v5535_v10 = vadd.f32 %v5503_v47, %v5441_v12  ;;  %v6710_v12 = vld [vmem:[%s7608_s10] sm:$0xff] }
 0x4e6   : > { %v5844_v39 = vld [vmem:[#allocation4 + $0x80] sm:$0xff] }
 0x4e7   : > { %v5876_v51 = vadd.f32 %v5844_v39, %v5780_v36  ;;  %5567 = vst.msk [vmem:[#allocation4 + $0x88] sm:$0xff] %vm279_vm1, %v5535_v10  ;;  %v5139_v2 = vpop.f32.mrf.mxu1  ;;  %v5507_v39 = vld [vmem:[#allocation4 + $0xa8] sm:$0xff] }
 0x4e8   : > { %v5207_v56 = vadd.f32 %v5175_v48, %v5139_v2  ;;  %v6184_v17 = vld [vmem:[#allocation4 + $0x78] sm:$0xff]  ;;  %v9968_v15 = vpop.f32.mrf.mxu0 }
 0x4e9   : > { %5908 = vst.msk [vmem:[#allocation4 + $0x80] sm:$0xff] %vm279_vm1, %v5876_v51  ;;  %v6216_v21 = vadd.f32 %v6184_v17, %v9914_v13  ;;  %v6512_v17 = vld [vmem:[#allocation4 + $0x10] sm:$0xff] }
 0x4ea   : > { %5239 = vst.msk [vmem:[#allocation4 + $0xf0] sm:$0xff] %vm279_vm1, %v5207_v56  ;;  %7478 = vmatmul.msk.f32.gmra.mxu1 %vm279_vm1, %v9701_v19 }
 0x4eb   : > { %6248 = vst.msk [vmem:[#allocation4 + $0x78] sm:$0xff] %vm279_vm1, %v6216_v21 }
 0x4ec   : > { %v5444_v62 = vpop.f32.mrf.mxu2 }
 0x4ed   : > { %v5786_v1 = vpop.f32.mrf.mxu3  ;;  %v5536_v41 = vadd.f32 %v5504_v63, %v5444_v62 }
 0x4ee   : > { %v5845_v45 = vld [vmem:[#allocation4 + $0x88] sm:$0xff] }
 0x4ef   : > { %v5877_v58 = vadd.f32 %v5845_v45, %v5783_v30  ;;  %5568 = vst.msk [vmem:[#allocation4 + $0x90] sm:$0xff] %vm279_vm1, %v5536_v41  ;;  %v5142_v3 = vpop.f32.mrf.mxu1 }
 0x4f0   : > { %v5208_v13 = vadd.f32 %v5176_v23, %v5142_v3  ;;  %v6185_v9 = vld [vmem:[#allocation4 + $0x80] sm:$0xff] }
 0x4f1   : > { %5909 = vst.msk [vmem:[#allocation4 + $0x88] sm:$0xff] %vm279_vm1, %v5877_v58  ;;  %v6217_v19 = vadd.f32 %v6185_v9, %v9933_v27  ;;  %v9979_v27 = vpop.f32.mrf.mxu0  ;;  %v6711_v58 = vld [vmem:[%s7608_s10 + $0x8] sm:$0xff] }
 0x4f2   : > { %5240 = vst.msk [vmem:[#allocation4 + $0xf8] sm:$0xff] %vm279_vm1, %v5208_v13  ;;  %7479 = vmatmul.msk.f32.gmra.mxu1 %vm279_vm1, %v9716_v53  ;;  %v5508_v13 = vld [vmem:[#allocation4 + $0xb0] sm:$0xff] }
 0x4f3   : > { %6249 = vst.msk [vmem:[#allocation4 + $0x80] sm:$0xff] %vm279_vm1, %v6217_v19 }
 0x4f4   : > { %v5447_v25 = vpop.f32.mrf.mxu2 }
 0x4f5   : > { %v5789_v38 = vpop.f32.mrf.mxu3  ;;  %v5537_v57 = vadd.f32 %v5505_v11, %v5447_v25 }
 0x4f6   : > { %v5846_v24 = vld [vmem:[#allocation4 + $0x90] sm:$0xff] }
 0x4f7   : > { %v5878_v31 = vadd.f32 %v5846_v24, %v5786_v1  ;;  %5569 = vst.msk [vmem:[#allocation4 + $0x98] sm:$0xff] %vm279_vm1, %v5537_v57  ;;  %v6414_v35 = vpop.f32.mrf.mxu1  ;;  %v6513_v57 = vld [vmem:[#allocation4 + $0x18] sm:$0xff] }
 0x4f8   : > { %v6542_v52 = vadd.f32 %v6510_v54, %v6414_v35  ;;  %v6186_v20 = vld [vmem:[#allocation4 + $0x88] sm:$0xff] }
 0x4f9   : > { %5910 = vst.msk [vmem:[#allocation4 + $0x90] sm:$0xff] %vm279_vm1, %v5878_v31  ;;  %v6218_v53 = vadd.f32 %v6186_v20, %v9949_v60  ;;  %v10004_v47 = vpop.f32.mrf.mxu0 }
 0x4fa   : > { %6574 = vst.msk [vmem:[#allocation4] sm:$0xff] %vm279_vm1, %v6542_v52  ;;  %7480 = vmatmul.msk.f32.gmra.mxu1 %vm279_vm1, %v9731_v29  ;;  %v9995_v29 = vld [vmem:[%s10276_s6] ss:$0 sm:$0xff] }
 0x4fb   : > { %6250 = vst.msk [vmem:[#allocation4 + $0x88] sm:$0xff] %vm279_vm1, %v6218_v53  ;;  %v6712_v53 = vld [vmem:[%s7608_s10 + $0x10] sm:$0xff] }
 0x4fc   : > { %v5450_v42 = vpop.f32.mrf.mxu2 }
 0x4fd   : > { %v5792_v16 = vpop.f32.mrf.mxu3  ;;  %v5538_v18 = vadd.f32 %v5506_v32, %v5450_v42  ;;  %v5509_v32 = vld [vmem:[#allocation4 + $0xb8] sm:$0xff] }
 0x4fe   : > { %v5847_v36 = vld [vmem:[#allocation4 + $0x98] sm:$0xff] }
 0x4ff   : > { %v5879_v43 = vadd.f32 %v5847_v36, %v5789_v38  ;;  %5570 = vst.msk [vmem:[#allocation4 + $0xa0] sm:$0xff] %vm279_vm1, %v5538_v18  ;;  %v6417_v60 = vpop.f32.mrf.mxu1 }
 0x500   : > { %v6543_v0 = vadd.f32 %v6511_v61, %v6417_v60  ;;  %v6187_v59 = vld [vmem:[#allocation4 + $0x90] sm:$0xff] }
 0x501   : > { %5911 = vst.msk [vmem:[#allocation4 + $0x98] sm:$0xff] %vm279_vm1, %v5879_v43  ;;  %v6606_v28 = vld [vmem:[#allocation4] sm:$0xff]  ;;  %v6219_v50 = vadd.f32 %v6187_v59, %v9959_v4  ;;  %v6139_v19 = vpop.f32.mrf.mxu0 }
 0x502   : > { %v6642_v49 = vmul.f32 %v9989_v22, %v6606_v28  ;;  %6575 = vst.msk [vmem:[#allocation4 + $0x8] sm:$0xff] %vm279_vm1, %v6543_v0  ;;  %7481 = vmatmul.msk.f32.gmra.mxu1 %vm279_vm1, %v9748_v33  ;;  %v6514_v0 = vld [vmem:[#allocation4 + $0x20] sm:$0xff] }
 0x503   : > { %6251 = vst.msk [vmem:[#allocation4 + $0x90] sm:$0xff] %vm279_vm1, %v6219_v50 }
 0x504   : > { %v6678_v30 = vadd.f32 %v9995_v29, %v6642_v49  ;;  %v5453_v10 = vpop.f32.mrf.mxu2 }
 0x505   : > { %v5795_v51 = vpop.f32.mrf.mxu3  ;;  %v5539_v2 = vadd.f32 %v5507_v39, %v5453_v10  ;;  %v6713_v10 = vld [vmem:[%s7608_s10 + $0x18] sm:$0xff] }
 0x506   : > { %v6742_v48 = vadd.f32 %v6710_v12, %v6678_v30  ;;  %v5848_v4 = vld [vmem:[#allocation4 + $0xa0] sm:$0xff] }
 0x507   : > { %v5880_v33 = vadd.f32 %v5848_v4, %v5792_v16  ;;  %5571 = vst.msk [vmem:[#allocation4 + $0xa8] sm:$0xff] %vm279_vm1, %v5539_v2  ;;  %v6420_v56 = vpop.f32.mrf.mxu1 }
 0x508   : > { %v6774_v21 = vmax.f32 %v6742_v48, 0.0  ;;  %v6544_v62 = vadd.f32 %v6512_v17, %v6420_v56  ;;  %v6188_v63 = vld [vmem:[#allocation4 + $0x98] sm:$0xff]  ;;  %v6515_v17 = vld [vmem:[#allocation4 + $0x28] sm:$0xff] }
 0x509   : > { %5912 = vst.msk [vmem:[#allocation4 + $0xa0] sm:$0xff] %vm279_vm1, %v5880_v33  ;;  %v6607_v1 = vld [vmem:[#allocation4 + $0x8] sm:$0xff]  ;;  %v6220_v41 = vadd.f32 %v6188_v63, %v9968_v15  ;;  %v6142_v60 = vpop.f32.mrf.mxu0 }
 0x50a   : > { %6806 = vst.msk [vmem:[%s10013_s19] sm:$0xff] %vm279_vm1, %v6774_v21  ;;  %v6643_v45 = vmul.f32 %v9989_v22, %v6607_v1  ;;  %7482 = vmatmul.msk.f32.gmra.mxu1 %vm279_vm1, %v9765_v14 }
 0x50b   : > { %6576 = vst.msk [vmem:[#allocation4 + $0x10] sm:$0xff] %vm279_vm1, %v6544_v62 }
 0x50c   : > { %v6679_v3 = vadd.f32 %v9995_v29, %v6643_v45  ;;  %v5456_v23 = vpop.f32.mrf.mxu2  ;;  %6252 = vst.msk [vmem:[#allocation4 + $0x98] sm:$0xff] %vm279_vm1, %v6220_v41 }
 0x50d   : > { %v5798_v9 = vpop.f32.mrf.mxu3  ;;  %v5540_v15 = vadd.f32 %v5508_v13, %v5456_v23 }
 0x50e   : > { %v6743_v25 = vadd.f32 %v6711_v58, %v6679_v3  ;;  %v5849_v11 = vld [vmem:[#allocation4 + $0xa8] sm:$0xff]  ;;  %v6714_v3 = vld [vmem:[%s7608_s10 + $0x20] sm:$0xff] }
 0x50f   : > { %v5881_v38 = vadd.f32 %v5849_v11, %v5795_v51  ;;  %5572 = vst.msk [vmem:[#allocation4 + $0xb0] sm:$0xff] %vm279_vm1, %v5540_v15  ;;  %v6423_v14 = vpop.f32.mrf.mxu1  ;;  %v5510_v51 = vld [vmem:[#allocation4 + $0xc0] sm:$0xff] }
 0x510   : > { %v6775_v24 = vmax.f32 %v6743_v25, 0.0  ;;  %v6545_v31 = vadd.f32 %v6513_v57, %v6423_v14  ;;  %v6189_v35 = vld [vmem:[#allocation4 + $0xa0] sm:$0xff] }
 0x511   : > { %5913 = vst.msk [vmem:[#allocation4 + $0xa8] sm:$0xff] %vm279_vm1, %v5881_v38  ;;  %v6221_v54 = vadd.f32 %v6189_v35, %v9979_v27  ;;  %v6145_v1 = vpop.f32.mrf.mxu0 }
 0x512   : > { %6807 = vst.msk [vmem:[%s10013_s19 + $0x8] sm:$0xff] %vm279_vm1, %v6775_v24  ;;  %v6608_v52 = vld [vmem:[#allocation4 + $0x10] sm:$0xff]  ;;  %7483 = vmatmul.msk.f32.gmra.mxu1 %vm279_vm1, %v9780_v44 }
 0x513   : > { %v6644_v20 = vmul.f32 %v9989_v22, %v6608_v52  ;;  %6577 = vst.msk [vmem:[#allocation4 + $0x18] sm:$0xff] %vm279_vm1, %v6545_v31 }
 0x514   : > { %v5459_v42 = vpop.f32.mrf.mxu2  ;;  %6253 = vst.msk [vmem:[#allocation4 + $0xa0] sm:$0xff] %vm279_vm1, %v6221_v54 }
 0x515   : > { %v5801_v16 = vpop.f32.mrf.mxu3  ;;  %v6680_v18 = vadd.f32 %v9995_v29, %v6644_v20  ;;  %v5541_v36 = vadd.f32 %v5509_v32, %v5459_v42 }
 0x516   : > { %v5850_v27 = vld [vmem:[#allocation4 + $0xb0] sm:$0xff] }
 0x517   : > { %v6744_v43 = vadd.f32 %v6712_v53, %v6680_v18  ;;  %v5882_v61 = vadd.f32 %v5850_v27, %v5798_v9  ;;  %5573 = vst.msk [vmem:[#allocation4 + $0xb8] sm:$0xff] %vm279_vm1, %v5541_v36  ;;  %v6426_v44 = vpop.f32.mrf.mxu1  ;;  %v5511_v9 = vld [vmem:[#allocation4 + $0xc8] sm:$0xff] }
 0x518   : > { %v6546_v59 = vadd.f32 %v6514_v0, %v6426_v44  ;;  %v6190_v28 = vld [vmem:[#allocation4 + $0xa8] sm:$0xff] }
 0x519   : > { %v6776_v50 = vmax.f32 %v6744_v43, 0.0  ;;  %5914 = vst.msk [vmem:[#allocation4 + $0xb0] sm:$0xff] %vm279_vm1, %v5882_v61  ;;  %v6222_v49 = vadd.f32 %v6190_v28, %v10004_v47  ;;  %v6148_v20 = vpop.f32.mrf.mxu0  ;;  %v6715_v53 = vld [vmem:[%s7608_s10 + $0x28] sm:$0xff]  ;;  %v6517_v61 = vld [vmem:[#allocation4 + $0x38] sm:$0xff] }
 0x51a   : > { %v6609_v12 = vld [vmem:[#allocation4 + $0x18] sm:$0xff]  ;;  %6578 = vst.msk [vmem:[#allocation4 + $0x20] sm:$0xff] %vm279_vm1, %v6546_v59  ;;  %7484 = vmatmul.msk.f32.gmra.mxu1 %vm279_vm1, %v9795_v8 }
 0x51b   : > { %6808 = vst.msk [vmem:[%s10013_s19 + $0x10] sm:$0xff] %vm279_vm1, %v6776_v50  ;;  %v6645_v30 = vmul.f32 %v9989_v22, %v6609_v12  ;;  %v6716_v12 = vld [vmem:[%s7608_s10 + $0x30] sm:$0xff] }
 0x51c   : > { %v5462_v39 = vpop.f32.mrf.mxu2  ;;  %6254 = vst.msk [vmem:[#allocation4 + $0xa8] sm:$0xff] %vm279_vm1, %v6222_v49 }
 0x51d   : > { %v5804_v2 = vpop.f32.mrf.mxu3  ;;  %v6681_v48 = vadd.f32 %v9995_v29, %v6645_v30  ;;  %v5542_v4 = vadd.f32 %v5510_v51, %v5462_v39 }
 0x51e   : > { %v5851_v47 = vld [vmem:[#allocation4 + $0xb8] sm:$0xff] }
 0x51f   : > { %v6745_v33 = vadd.f32 %v6713_v10, %v6681_v48  ;;  %v5883_v56 = vadd.f32 %v5851_v47, %v5801_v16  ;;  %5574 = vst.msk [vmem:[#allocation4 + $0xc0] sm:$0xff] %vm279_vm1, %v5542_v4  ;;  %v6429_v8 = vpop.f32.mrf.mxu1  ;;  %v5512_v16 = vld [vmem:[#allocation4 + $0xd0] sm:$0xff]  ;;  %v5513_v10 = vld [vmem:[#allocation4 + $0xd8] sm:$0xff] }
 0x520   : > { %v6547_v21 = vadd.f32 %v6515_v17, %v6429_v8  ;;  %v6191_v62 = vld [vmem:[#allocation4 + $0xb0] sm:$0xff] }
 0x521   : > { %v6777_v63 = vmax.f32 %v6745_v33, 0.0  ;;  %5915 = vst.msk [vmem:[#allocation4 + $0xb8] sm:$0xff] %vm279_vm1, %v5883_v56  ;;  %v6610_v41 = vld [vmem:[#allocation4 + $0x20] sm:$0xff]  ;;  %v6223_v45 = vadd.f32 %v6191_v62, %v6139_v19 }
 0x522   : > { %v6646_v58 = vmul.f32 %v9989_v22, %v6610_v41  ;;  %6579 = vst.msk [vmem:[#allocation4 + $0x28] sm:$0xff] %vm279_vm1, %v6547_v21  ;;  %7485 = vmatmul.msk.f32.gmra.mxu1 %vm279_vm1, %v9810_v46  ;;  %v6516_v46 = vld [vmem:[#allocation4 + $0x30] sm:$0xff]  ;;  %v6518_v56 = vld [vmem:[#allocation4 + $0x40] sm:$0xff]  ;;  %v6717_v41 = vld [vmem:[%s7608_s10 + $0x38] sm:$0xff] }
 0x523   : > { %6809 = vst.msk [vmem:[%s10013_s19 + $0x18] sm:$0xff] %vm279_vm1, %v6777_v63 }
 0x524   : > { %v6682_v23 = vadd.f32 %v9995_v29, %v6646_v58  ;;  %v5465_v13 = vpop.f32.mrf.mxu2  ;;  %6255 = vst.msk [vmem:[#allocation4 + $0xb0] sm:$0xff] %vm279_vm1, %v6223_v45  ;;  %v5514_v58 = vld [vmem:[#allocation4 + $0xe0] sm:$0xff] }
 0x525   : > { %v5807_v15 = vpop.f32.mrf.mxu3  ;;  %v5543_v25 = vadd.f32 %v5511_v9, %v5465_v13 }
 0x526   : > { %v6746_v19 = vadd.f32 %v6714_v3, %v6682_v23  ;;  %v5852_v11 = vld [vmem:[#allocation4 + $0xc0] sm:$0xff] }
 0x527   : > { %v5884_v38 = vadd.f32 %v5852_v11, %v5804_v2  ;;  %5575 = vst.msk [vmem:[#allocation4 + $0xc8] sm:$0xff] %vm279_vm1, %v5543_v25  ;;  %v6432_v14 = vpop.f32.mrf.mxu1  ;;  %v6151_v2 = vpop.f32.mrf.mxu0  ;;  %v6519_v25 = vld [vmem:[#allocation4 + $0x48] sm:$0xff] }
 0x528   : > { %v6778_v57 = vmax.f32 %v6746_v19, 0.0  ;;  %v6548_v24 = vadd.f32 %v6516_v46, %v6432_v14  ;;  %v6192_v31 = vld [vmem:[#allocation4 + $0xb8] sm:$0xff] }
 0x529   : > { %5916 = vst.msk [vmem:[#allocation4 + $0xc0] sm:$0xff] %vm279_vm1, %v5884_v38  ;;  %v6611_v35 = vld [vmem:[#allocation4 + $0x28] sm:$0xff]  ;;  %v6224_v54 = vadd.f32 %v6192_v31, %v6142_v60 }
 0x52a   : > { %6810 = vst.msk [vmem:[%s10013_s19 + $0x20] sm:$0xff] %vm279_vm1, %v6778_v57  ;;  %v6647_v52 = vmul.f32 %v9989_v22, %v6611_v35  ;;  %7486 = vmatmul.msk.f32.gmra.mxu1 %vm279_vm1, %v9825_v6  ;;  %v6718_v35 = vld [vmem:[%s7608_s10 + $0x40] sm:$0xff] }
 0x52b   : > { %6580 = vst.msk [vmem:[#allocation4 + $0x30] sm:$0xff] %vm279_vm1, %v6548_v24 }
 0x52c   : > { %v6683_v42 = vadd.f32 %v9995_v29, %v6647_v52  ;;  %v5468_v32 = vpop.f32.mrf.mxu2  ;;  %6256 = vst.msk [vmem:[#allocation4 + $0xb8] sm:$0xff] %vm279_vm1, %v6224_v54 }
 0x52d   : > { %v5810_v18 = vpop.f32.mrf.mxu3  ;;  %v5544_v36 = vadd.f32 %v5512_v16, %v5468_v32 }
 0x52e   : > { %v6747_v27 = vadd.f32 %v6715_v53, %v6683_v42  ;;  %v5853_v43 = vld [vmem:[#allocation4 + $0xc8] sm:$0xff] }
 0x52f   : > { %v5885_v60 = vadd.f32 %v5853_v43, %v5807_v15  ;;  %5576 = vst.msk [vmem:[#allocation4 + $0xd0] sm:$0xff] %vm279_vm1, %v5544_v36  ;;  %v6435_v6 = vpop.f32.mrf.mxu1  ;;  %v6154_v19 = vpop.f32.mrf.mxu0  ;;  %v6520_v36 = vld [vmem:[#allocation4 + $0x50] sm:$0xff] }
 0x530   : > { %v6779_v44 = vmax.f32 %v6747_v27, 0.0  ;;  %v6549_v0 = vadd.f32 %v6517_v61, %v6435_v6  ;;  %v6193_v59 = vld [vmem:[#allocation4 + $0xc0] sm:$0xff] }
 0x531   : > { %5917 = vst.msk [vmem:[#allocation4 + $0xc8] sm:$0xff] %vm279_vm1, %v5885_v60  ;;  %v6225_v28 = vadd.f32 %v6193_v59, %v6145_v1  ;;  %v6719_v59 = vld [vmem:[%s7608_s10 + $0x48] sm:$0xff] }
 0x532   : > { %6811 = vst.msk [vmem:[%s10013_s19 + $0x28] sm:$0xff] %vm279_vm1, %v6779_v44  ;;  %v6612_v50 = vld [vmem:[#allocation4 + $0x30] sm:$0xff]  ;;  %7487 = vmatmul.msk.f32.gmra.mxu1 %vm279_vm1, %v9840_v55 }
 0x533   : > { %v6648_v49 = vmul.f32 %v9989_v22, %v6612_v50  ;;  %6581 = vst.msk [vmem:[#allocation4 + $0x38] sm:$0xff] %vm279_vm1, %v6549_v0 }
 0x534   : > { %v5471_v30 = vpop.f32.mrf.mxu2  ;;  %6257 = vst.msk [vmem:[#allocation4 + $0xc0] sm:$0xff] %vm279_vm1, %v6225_v28 }
 0x535   : > { %v6684_v39 = vadd.f32 %v9995_v29, %v6648_v49  ;;  %v5545_v51 = vadd.f32 %v5513_v10, %v5471_v30  ;;  %v5813_v4 = vpop.f32.mrf.mxu3  ;;  %v5516_v49 = vld [vmem:[#allocation4 + $0xf0] sm:$0xff] }
 0x536   : > { %v5854_v48 = vld [vmem:[#allocation4 + $0xd0] sm:$0xff] }
 0x537   : > { %v6748_v47 = vadd.f32 %v6716_v12, %v6684_v39  ;;  %v5886_v33 = vadd.f32 %v5854_v48, %v5810_v18  ;;  %5577 = vst.msk [vmem:[#allocation4 + $0xd8] sm:$0xff] %vm279_vm1, %v5545_v51  ;;  %v6438_v55 = vpop.f32.mrf.mxu1  ;;  %v6157_v61 = vpop.f32.mrf.mxu0 }
 0x538   : > { %v6550_v8 = vadd.f32 %v6518_v56, %v6438_v55  ;;  %v6194_v17 = vld [vmem:[#allocation4 + $0xc8] sm:$0xff] }
 0x539   : > { %v6780_v21 = vmax.f32 %v6748_v47, 0.0  ;;  %5918 = vst.msk [vmem:[#allocation4 + $0xd0] sm:$0xff] %vm279_vm1, %v5886_v33  ;;  %v6226_v62 = vadd.f32 %v6194_v17, %v6148_v20  ;;  %v5515_v20 = vld [vmem:[#allocation4 + $0xe8] sm:$0xff]  ;;  %v6720_v17 = vld [vmem:[%s7608_s10 + $0x50] sm:$0xff] }
 0x53a   : > { %v6613_v63 = vld [vmem:[#allocation4 + $0x38] sm:$0xff]  ;;  %6582 = vst.msk [vmem:[#allocation4 + $0x40] sm:$0xff] %vm279_vm1, %v6550_v8  ;;  %7488 = vmatmul.msk.f32.gmra.mxu1 %vm279_vm1, %v9855_v7 }
 0x53b   : > { %6812 = vst.msk [vmem:[%s10013_s19 + $0x30] sm:$0xff] %vm279_vm1, %v6780_v21  ;;  %v6649_v1 = vmul.f32 %v9989_v22, %v6613_v63 }
 0x53c   : > { %v5474_v45 = vpop.f32.mrf.mxu2  ;;  %6258 = vst.msk [vmem:[#allocation4 + $0xc8] sm:$0xff] %vm279_vm1, %v6226_v62  ;;  %v5517_v62 = vld [vmem:[#allocation4 + $0xf8] sm:$0xff] }
 0x53d   : > { %v6685_v3 = vadd.f32 %v9995_v29, %v6649_v1  ;;  %v5546_v23 = vadd.f32 %v5514_v58, %v5474_v45  ;;  %v5816_v11 = vpop.f32.mrf.mxu3 }
 0x53e   : > { %v5855_v13 = vld [vmem:[#allocation4 + $0xd8] sm:$0xff] }
 0x53f   : > { %v6749_v9 = vadd.f32 %v6717_v41, %v6685_v3  ;;  %v5887_v15 = vadd.f32 %v5855_v13, %v5813_v4  ;;  %5578 = vst.msk [vmem:[#allocation4 + $0xe0] sm:$0xff] %vm279_vm1, %v5546_v23  ;;  %v6441_v7 = vpop.f32.mrf.mxu1  ;;  %v6160_v8 = vpop.f32.mrf.mxu0  ;;  %v6522_v3 = vld [vmem:[#allocation4 + $0x60] sm:$0xff] }
 0x540   : > { %v6551_v38 = vadd.f32 %v6519_v25, %v6441_v7  ;;  %v6195_v14 = vld [vmem:[#allocation4 + $0xd0] sm:$0xff] }
 0x541   : > { %v6781_v46 = vmax.f32 %v6749_v9, 0.0  ;;  %5919 = vst.msk [vmem:[#allocation4 + $0xd8] sm:$0xff] %vm279_vm1, %v5887_v15  ;;  %v6614_v57 = vld [vmem:[#allocation4 + $0x40] sm:$0xff]  ;;  %v6227_v24 = vadd.f32 %v6195_v14, %v6151_v2  ;;  %v6521_v2 = vld [vmem:[#allocation4 + $0x58] sm:$0xff] }
 0x542   : > { %v6650_v31 = vmul.f32 %v9989_v22, %v6614_v57  ;;  %6583 = vst.msk [vmem:[#allocation4 + $0x48] sm:$0xff] %vm279_vm1, %v6551_v38  ;;  %7489 = vmatmul.msk.f32.gmra.mxu1 %vm279_vm1, %v9870_v40 }
 0x543   : > { %6813 = vst.msk [vmem:[%s10013_s19 + $0x38] sm:$0xff] %vm279_vm1, %v6781_v46 }
 0x544   : > { %v6686_v54 = vadd.f32 %v9995_v29, %v6650_v31  ;;  %v5477_v52 = vpop.f32.mrf.mxu2  ;;  %6259 = vst.msk [vmem:[#allocation4 + $0xd0] sm:$0xff] %vm279_vm1, %v6227_v24 }
 0x545   : > { %v5547_v53 = vadd.f32 %v5515_v20, %v5477_v52  ;;  %v5819_v0 = vpop.f32.mrf.mxu3 }
 0x546   : > { %v6750_v42 = vadd.f32 %v6718_v35, %v6686_v54  ;;  %v5856_v32 = vld [vmem:[#allocation4 + $0xe0] sm:$0xff]  ;;  %v6523_v35 = vld [vmem:[#allocation4 + $0x68] sm:$0xff] }
 0x547   : > { %v5888_v16 = vadd.f32 %v5856_v32, %v5816_v11  ;;  %5579 = vst.msk [vmem:[#allocation4 + $0xe8] sm:$0xff] %vm279_vm1, %v5547_v53  ;;  %v6444_v18 = vpop.f32.mrf.mxu1  ;;  %v6163_v38 = vpop.f32.mrf.mxu0  ;;  %v6722_v32 = vld [vmem:[%s7608_s10 + $0x60] sm:$0xff] }
 0x548   : > { %v6782_v40 = vmax.f32 %v6750_v42, 0.0  ;;  %v6552_v27 = vadd.f32 %v6520_v36, %v6444_v18  ;;  %v6196_v43 = vld [vmem:[#allocation4 + $0xd8] sm:$0xff] }
 0x549   : > { %5920 = vst.msk [vmem:[#allocation4 + $0xe0] sm:$0xff] %vm279_vm1, %v5888_v16  ;;  %v6615_v60 = vld [vmem:[#allocation4 + $0x48] sm:$0xff]  ;;  %v6228_v6 = vadd.f32 %v6196_v43, %v6154_v19  ;;  %v6721_v19 = vld [vmem:[%s7608_s10 + $0x58] sm:$0xff] }
 0x54a   : > { %6814 = vst.msk [vmem:[%s10013_s19 + $0x40] sm:$0xff] %vm279_vm1, %v6782_v40  ;;  %v6651_v44 = vmul.f32 %v9989_v22, %v6615_v60  ;;  %7490 = vmatmul.msk.f32.gmra.mxu1 %vm279_vm1, %v9886_v37  ;;  %v6295_v43 = vld [vmem:[#allocation3 + $0x19a] sm:$0xff] }
 0x54b   : > { %6584 = vst.msk [vmem:[#allocation4 + $0x50] sm:$0xff] %vm279_vm1, %v6552_v27  ;;  %v6524_v27 = vld [vmem:[#allocation4 + $0x70] sm:$0xff] }
 0x54c   : > { %v6687_v28 = vadd.f32 %v9995_v29, %v6651_v44  ;;  %v5480_v50 = vpop.f32.mrf.mxu2  ;;  %6260 = vst.msk [vmem:[#allocation4 + $0xd8] sm:$0xff] %vm279_vm1, %v6228_v6 }
 0x54d   : > { %v5548_v12 = vadd.f32 %v5516_v49, %v5480_v50  ;;  %v5822_v55 = vpop.f32.mrf.mxu3 }
 0x54e   : > { %v6751_v30 = vadd.f32 %v6719_v59, %v6687_v28  ;;  %v5857_v10 = vld [vmem:[#allocation4 + $0xe8] sm:$0xff] }
 0x54f   : > { %v5889_v39 = vadd.f32 %v5857_v10, %v5819_v0  ;;  %5580 = vst.msk [vmem:[#allocation4 + $0xf0] sm:$0xff] %vm279_vm1, %v5548_v12  ;;  %v6447_v51 = vpop.f32.mrf.mxu1  ;;  %v6166_v36 = vpop.f32.mrf.mxu0  ;;  %v6723_v59 = vld [vmem:[%s7608_s10 + $0x68] sm:$0xff]  ;;  %v6525_v12 = vld [vmem:[#allocation4 + $0x78] sm:$0xff] }
 0x550   : > { %v6783_v37 = vmax.f32 %v6751_v30, 0.0  ;;  %v6553_v48 = vadd.f32 %v6521_v2, %v6447_v51  ;;  %v6197_v4 = vld [vmem:[#allocation4 + $0xe0] sm:$0xff]  ;;  %v6296_v30 = vld [vmem:[#allocation3 + $0x1a2] sm:$0xff] }
 0x551   : > { %5921 = vst.msk [vmem:[#allocation4 + $0xe8] sm:$0xff] %vm279_vm1, %v5889_v39  ;;  %v6229_v47 = vadd.f32 %v6197_v4, %v6157_v61 }
 0x552   : > { %6815 = vst.msk [vmem:[%s10013_s19 + $0x48] sm:$0xff] %vm279_vm1, %v6783_v37  ;;  %v6616_v33 = vld [vmem:[#allocation4 + $0x50] sm:$0xff]  ;;  %7491 = vmatmul.msk.f32.gmra.mxu1 %vm279_vm1, %v9902_v5 }
 0x553   : > { %v6652_v56 = vmul.f32 %v9989_v22, %v6616_v33  ;;  %6585 = vst.msk [vmem:[#allocation4 + $0x58] sm:$0xff] %vm279_vm1, %v6553_v48  ;;  %v6724_v37 = vld [vmem:[%s7608_s10 + $0x70] sm:$0xff]  ;;  %v6526_v33 = vld [vmem:[#allocation4 + $0x80] sm:$0xff] }
 0x554   : > { %v5483_v21 = vpop.f32.mrf.mxu2  ;;  %6261 = vst.msk [vmem:[#allocation4 + $0xe0] sm:$0xff] %vm279_vm1, %v6229_v47 }
 0x555   : > { %v6688_v63 = vadd.f32 %v9995_v29, %v6652_v56  ;;  %v5549_v1 = vadd.f32 %v5517_v62, %v5483_v21  ;;  %v5825_v11 = vpop.f32.mrf.mxu3  ;;  %v6725_v21 = vld [vmem:[%s7608_s10 + $0x78] sm:$0xff] }
 0x556   : > { %v5858_v41 = vld [vmem:[#allocation4 + $0xf0] sm:$0xff] }
 0x557   : > { %v6752_v45 = vadd.f32 %v6720_v17, %v6688_v63  ;;  %5581 = vst.msk [vmem:[#allocation4 + $0xf8] sm:$0xff] %vm279_vm1, %v5549_v1  ;;  %v5890_v5 = vadd.f32 %v5858_v41, %v5822_v55  ;;  %v6450_v58 = vpop.f32.mrf.mxu1  ;;  %v6527_v41 = vld [vmem:[#allocation4 + $0x88] sm:$0xff] }
 0x558   : > { %v6554_v23 = vadd.f32 %v6522_v3, %v6450_v58  ;;  %v6198_v13 = vld [vmem:[#allocation4 + $0xe8] sm:$0xff] }
 0x559   : > { %v6784_v9 = vmax.f32 %v6752_v45, 0.0  ;;  %5922 = vst.msk [vmem:[#allocation4 + $0xf0] sm:$0xff] %vm279_vm1, %v5890_v5  ;;  %v6230_v15 = vadd.f32 %v6198_v13, %v6160_v8 }
 0x55a   : > { %v6617_v7 = vld [vmem:[#allocation4 + $0x58] sm:$0xff]  ;;  %6586 = vst.msk [vmem:[#allocation4 + $0x60] sm:$0xff] %vm279_vm1, %v6554_v23  ;;  %7492 = vmatmul.msk.f32.gmra.mxu1 %vm279_vm1, %v9917_v34  ;;  %v6726_v23 = vld [vmem:[%s7608_s10 + $0x80] sm:$0xff] }
 0x55b   : > { %6816 = vst.msk [vmem:[%s10013_s19 + $0x50] sm:$0xff] %vm279_vm1, %v6784_v9  ;;  %v6653_v25 = vmul.f32 %v9989_v22, %v6617_v7  ;;  %v6528_v7 = vld [vmem:[#allocation4 + $0x90] sm:$0xff] }
 0x55c   : > { %6262 = vst.msk [vmem:[#allocation4 + $0xe8] sm:$0xff] %vm279_vm1, %v6230_v15 }
 0x55d   : > { %v6689_v14 = vadd.f32 %v9995_v29, %v6653_v25 }
 0x55e   : > { %v5859_v46 = vld [vmem:[#allocation4 + $0xf8] sm:$0xff] }
 0x55f   : > { %v6753_v57 = vadd.f32 %v6721_v19, %v6689_v14  ;;  %v5891_v24 = vadd.f32 %v5859_v46, %v5825_v11  ;;  %v6453_v31 = vpop.f32.mrf.mxu1  ;;  %v6727_v14 = vld [vmem:[%s7608_s10 + $0x88] sm:$0xff] }
 0x560   : > { %v6555_v54 = vadd.f32 %v6523_v35, %v6453_v31  ;;  %v6199_v34 = vld [vmem:[#allocation4 + $0xf0] sm:$0xff]  ;;  %v6529_v31 = vld [vmem:[#allocation4 + $0x98] sm:$0xff] }
 0x561   : > { %v6785_v52 = vmax.f32 %v6753_v57, 0.0  ;;  %v6618_v20 = vld [vmem:[#allocation4 + $0x60] sm:$0xff]  ;;  %5923 = vst.msk [vmem:[#allocation4 + $0xf8] sm:$0xff] %vm279_vm1, %v5891_v24  ;;  %v6231_v53 = vadd.f32 %v6199_v34, %v6163_v38 }
 0x562   : > { %v6654_v42 = vmul.f32 %v9989_v22, %v6618_v20  ;;  %6587 = vst.msk [vmem:[#allocation4 + $0x68] sm:$0xff] %vm279_vm1, %v6555_v54  ;;  %7493 = vmatmul.msk.f32.gmra.mxu1 %vm279_vm1, %v9930_v26  ;;  %v6728_v20 = vld [vmem:[%s7608_s10 + $0x90] sm:$0xff] }
 0x563   : > { %6817 = vst.msk [vmem:[%s10013_s19 + $0x58] sm:$0xff] %vm279_vm1, %v6785_v52 }
 0x564   : > { %v6690_v16 = vadd.f32 %v9995_v29, %v6654_v42  ;;  %6263 = vst.msk [vmem:[#allocation4 + $0xf0] sm:$0xff] %vm279_vm1, %v6231_v53 }
 0x566   : > { %v6754_v18 = vadd.f32 %v6722_v32, %v6690_v16  ;;  %v6530_v16 = vld [vmem:[#allocation4 + $0xa0] sm:$0xff] }
 0x567   : > { %v6456_v40 = vpop.f32.mrf.mxu1 }
 0x568   : > { %v6786_v60 = vmax.f32 %v6754_v18, 0.0  ;;  %v6556_v6 = vadd.f32 %v6524_v27, %v6456_v40  ;;  %v6200_v61 = vld [vmem:[#allocation4 + $0xf8] sm:$0xff] }
 0x569   : > { %v6619_v44 = vld [vmem:[#allocation4 + $0x68] sm:$0xff]  ;;  %v6232_v0 = vadd.f32 %v6200_v61, %v6166_v36 }
 0x56a   : > { %6818 = vst.msk [vmem:[%s10013_s19 + $0x60] sm:$0xff] %vm279_vm1, %v6786_v60  ;;  %v6655_v26 = vmul.f32 %v9989_v22, %v6619_v44  ;;  %7494 = vmatmul.msk.f32.gmra.mxu1 %vm279_vm1, %v6295_v43  ;;  %v6729_v43 = vld [vmem:[%s7608_s10 + $0x98] sm:$0xff]  ;;  %v6531_v44 = vld [vmem:[#allocation4 + $0xa8] sm:$0xff] }
 0x56b   : > { %6588 = vst.msk [vmem:[#allocation4 + $0x70] sm:$0xff] %vm279_vm1, %v6556_v6 }
 0x56c   : > { %v6691_v28 = vadd.f32 %v9995_v29, %v6655_v26  ;;  %6264 = vst.msk [vmem:[#allocation4 + $0xf8] sm:$0xff] %vm279_vm1, %v6232_v0 }
 0x56e   : > { %v6755_v50 = vadd.f32 %v6723_v59, %v6691_v28 }
 0x56f   : > { %v6459_v49 = vpop.f32.mrf.mxu1 }
 0x570   : > { %v6787_v10 = vmax.f32 %v6755_v50, 0.0  ;;  %v6557_v39 = vadd.f32 %v6525_v12, %v6459_v49  ;;  %v6730_v50 = vld [vmem:[%s7608_s10 + $0xa0] sm:$0xff] }
 0x572   : > { %6819 = vst.msk [vmem:[%s10013_s19 + $0x68] sm:$0xff] %vm279_vm1, %v6787_v10  ;;  %v6620_v51 = vld [vmem:[#allocation4 + $0x70] sm:$0xff]  ;;  %7495 = vmatmul.msk.f32.gmra.mxu1 %vm279_vm1, %v6296_v30 }
 0x573   : > { %v6656_v2 = vmul.f32 %v9989_v22, %v6620_v51  ;;  %6589 = vst.msk [vmem:[#allocation4 + $0x78] sm:$0xff] %vm279_vm1, %v6557_v39  ;;  %v6532_v10 = vld [vmem:[#allocation4 + $0xb0] sm:$0xff] }
 0x575   : > { %v6692_v48 = vadd.f32 %v9995_v29, %v6656_v2 }
 0x577   : > { %v6756_v4 = vadd.f32 %v6724_v37, %v6692_v48  ;;  %v6462_v47 = vpop.f32.mrf.mxu1  ;;  %v6731_v48 = vld [vmem:[%s7608_s10 + $0xa8] sm:$0xff] }
 0x578   : > { %v6558_v55 = vadd.f32 %v6526_v33, %v6462_v47 }
 0x579   : > { %v6788_v56 = vmax.f32 %v6756_v4, 0.0 }
 0x57a   : > { %v6621_v8 = vld [vmem:[#allocation4 + $0x78] sm:$0xff]  ;;  %6590 = vst.msk [vmem:[#allocation4 + $0x80] sm:$0xff] %vm279_vm1, %v6558_v55 }
 0x57b   : > { %6820 = vst.msk [vmem:[%s10013_s19 + $0x70] sm:$0xff] %vm279_vm1, %v6788_v56  ;;  %v6657_v17 = vmul.f32 %v9989_v22, %v6621_v8  ;;  %v6533_v55 = vld [vmem:[#allocation4 + $0xb8] sm:$0xff] }
 0x57d   : > { %v6693_v62 = vadd.f32 %v9995_v29, %v6657_v17 }
 0x57f   : > { %v6757_v63 = vadd.f32 %v6725_v21, %v6693_v62  ;;  %v6465_v1 = vpop.f32.mrf.mxu1  ;;  %v6732_v62 = vld [vmem:[%s7608_s10 + $0xb0] sm:$0xff] }
 0x580   : > { %v6559_v45 = vadd.f32 %v6527_v41, %v6465_v1 }
 0x581   : > { %v6789_v5 = vmax.f32 %v6757_v63, 0.0  ;;  %v6622_v58 = vld [vmem:[#allocation4 + $0x80] sm:$0xff] }
 0x582   : > { %v6658_v3 = vmul.f32 %v9989_v22, %v6622_v58  ;;  %6591 = vst.msk [vmem:[#allocation4 + $0x88] sm:$0xff] %vm279_vm1, %v6559_v45  ;;  %v6534_v45 = vld [vmem:[#allocation4 + $0xc0] sm:$0xff] }
 0x583   : > { %6821 = vst.msk [vmem:[%s10013_s19 + $0x78] sm:$0xff] %vm279_vm1, %v6789_v5 }
 0x584   : > { %v6694_v13 = vadd.f32 %v9995_v29, %v6658_v3 }
 0x586   : > { %v6758_v9 = vadd.f32 %v6726_v23, %v6694_v13  ;;  %v6733_v13 = vld [vmem:[%s7608_s10 + $0xb8] sm:$0xff] }
 0x587   : > { %v6468_v15 = vpop.f32.mrf.mxu1 }
 0x588   : > { %v6790_v25 = vmax.f32 %v6758_v9, 0.0  ;;  %v6560_v19 = vadd.f32 %v6528_v7, %v6468_v15 }
 0x589   : > { %v6623_v11 = vld [vmem:[#allocation4 + $0x88] sm:$0xff] }
 0x58a   : > { %6822 = vst.msk [vmem:[%s10013_s19 + $0x80] sm:$0xff] %vm279_vm1, %v6790_v25  ;;  %v6659_v38 = vmul.f32 %v9989_v22, %v6623_v11  ;;  %v6535_v25 = vld [vmem:[#allocation4 + $0xc8] sm:$0xff] }
 0x58b   : > { %6592 = vst.msk [vmem:[#allocation4 + $0x90] sm:$0xff] %vm279_vm1, %v6560_v19 }
 0x58c   : > { %v6695_v46 = vadd.f32 %v9995_v29, %v6659_v38 }
 0x58e   : > { %v6759_v57 = vadd.f32 %v6727_v14, %v6695_v46  ;;  %v6734_v46 = vld [vmem:[%s7608_s10 + $0xc0] sm:$0xff] }
 0x58f   : > { %v6471_v24 = vpop.f32.mrf.mxu1 }
 0x590   : > { %v6791_v35 = vmax.f32 %v6759_v57, 0.0  ;;  %v6561_v54 = vadd.f32 %v6529_v31, %v6471_v24 }
 0x592   : > { %6823 = vst.msk [vmem:[%s10013_s19 + $0x88] sm:$0xff] %vm279_vm1, %v6791_v35  ;;  %v6624_v34 = vld [vmem:[#allocation4 + $0x90] sm:$0xff] }
 0x593   : > { %v6660_v52 = vmul.f32 %v9989_v22, %v6624_v34  ;;  %6593 = vst.msk [vmem:[#allocation4 + $0x98] sm:$0xff] %vm279_vm1, %v6561_v54  ;;  %v6536_v35 = vld [vmem:[#allocation4 + $0xd0] sm:$0xff] }
 0x595   : > { %v6696_v53 = vadd.f32 %v9995_v29, %v6660_v52 }
 0x597   : > { %v6760_v42 = vadd.f32 %v6728_v20, %v6696_v53  ;;  %v6474_v32 = vpop.f32.mrf.mxu1  ;;  %v6735_v53 = vld [vmem:[%s7608_s10 + $0xc8] sm:$0xff] }
 0x598   : > { %v6562_v18 = vadd.f32 %v6530_v16, %v6474_v32 }
 0x599   : > { %v6792_v36 = vmax.f32 %v6760_v42, 0.0 }
 0x59a   : > { %v6625_v40 = vld [vmem:[#allocation4 + $0x98] sm:$0xff]  ;;  %6594 = vst.msk [vmem:[#allocation4 + $0xa0] sm:$0xff] %vm279_vm1, %v6562_v18 }
 0x59b   : > { %6824 = vst.msk [vmem:[%s10013_s19 + $0x90] sm:$0xff] %vm279_vm1, %v6792_v36  ;;  %v6661_v27 = vmul.f32 %v9989_v22, %v6625_v40  ;;  %v6537_v18 = vld [vmem:[#allocation4 + $0xd8] sm:$0xff] }
 0x59d   : > { %v6697_v60 = vadd.f32 %v9995_v29, %v6661_v27 }
 0x59f   : > { %v6761_v6 = vadd.f32 %v6729_v43, %v6697_v60  ;;  %v6477_v61 = vpop.f32.mrf.mxu1  ;;  %v6736_v60 = vld [vmem:[%s7608_s10 + $0xd0] sm:$0xff] }
 0x5a0   : > { %v6563_v0 = vadd.f32 %v6531_v44, %v6477_v61 }
 0x5a1   : > { %v6793_v26 = vmax.f32 %v6761_v6, 0.0  ;;  %v6626_v59 = vld [vmem:[#allocation4 + $0xa0] sm:$0xff] }
 0x5a2   : > { %v6662_v28 = vmul.f32 %v9989_v22, %v6626_v59  ;;  %6595 = vst.msk [vmem:[#allocation4 + $0xa8] sm:$0xff] %vm279_vm1, %v6563_v0  ;;  %v6538_v0 = vld [vmem:[#allocation4 + $0xe0] sm:$0xff] }
 0x5a3   : > { %6825 = vst.msk [vmem:[%s10013_s19 + $0x98] sm:$0xff] %vm279_vm1, %v6793_v26 }
 0x5a4   : > { %v6698_v49 = vadd.f32 %v9995_v29, %v6662_v28 }
 0x5a6   : > { %v6762_v12 = vadd.f32 %v6730_v50, %v6698_v49  ;;  %v6737_v49 = vld [vmem:[%s7608_s10 + $0xd8] sm:$0xff] }
 0x5a7   : > { %v6480_v30 = vpop.f32.mrf.mxu1 }
 0x5a8   : > { %v6794_v39 = vmax.f32 %v6762_v12, 0.0  ;;  %v6564_v51 = vadd.f32 %v6532_v10, %v6480_v30 }
 0x5a9   : > { %v6627_v2 = vld [vmem:[#allocation4 + $0xa8] sm:$0xff] }
 0x5aa   : > { %6826 = vst.msk [vmem:[%s10013_s19 + $0xa0] sm:$0xff] %vm279_vm1, %v6794_v39  ;;  %v6663_v37 = vmul.f32 %v9989_v22, %v6627_v2  ;;  %v6539_v39 = vld [vmem:[#allocation4 + $0xe8] sm:$0xff] }
 0x5ab   : > { %6596 = vst.msk [vmem:[#allocation4 + $0xb0] sm:$0xff] %vm279_vm1, %v6564_v51 }
 0x5ac   : > { %v6699_v4 = vadd.f32 %v9995_v29, %v6663_v37 }
 0x5ae   : > { %v6763_v47 = vadd.f32 %v6731_v48, %v6699_v4  ;;  %v6738_v4 = vld [vmem:[%s7608_s10 + $0xe0] sm:$0xff] }
 0x5af   : > { %v6483_v33 = vpop.f32.mrf.mxu1 }
 0x5b0   : > { %v6795_v56 = vmax.f32 %v6763_v47, 0.0  ;;  %v6565_v8 = vadd.f32 %v6533_v55, %v6483_v33 }
 0x5b2   : > { %6827 = vst.msk [vmem:[%s10013_s19 + $0xa8] sm:$0xff] %vm279_vm1, %v6795_v56  ;;  %v6628_v17 = vld [vmem:[#allocation4 + $0xb0] sm:$0xff] }
 0x5b3   : > { %v6664_v21 = vmul.f32 %v9989_v22, %v6628_v17  ;;  %6597 = vst.msk [vmem:[#allocation4 + $0xb8] sm:$0xff] %vm279_vm1, %v6565_v8  ;;  %v6540_v56 = vld [vmem:[#allocation4 + $0xf0] sm:$0xff] }
 0x5b5   : > { %v6700_v63 = vadd.f32 %v9995_v29, %v6664_v21 }
 0x5b7   : > { %v6764_v1 = vadd.f32 %v6732_v62, %v6700_v63  ;;  %v6486_v41 = vpop.f32.mrf.mxu1  ;;  %v6739_v63 = vld [vmem:[%s7608_s10 + $0xe8] sm:$0xff] }
 0x5b8   : > { %v6566_v5 = vadd.f32 %v6534_v45, %v6486_v41 }
 0x5b9   : > { %v6796_v58 = vmax.f32 %v6764_v1, 0.0 }
 0x5ba   : > { %v6629_v3 = vld [vmem:[#allocation4 + $0xb8] sm:$0xff]  ;;  %6598 = vst.msk [vmem:[#allocation4 + $0xc0] sm:$0xff] %vm279_vm1, %v6566_v5 }
 0x5bb   : > { %6828 = vst.msk [vmem:[%s10013_s19 + $0xb0] sm:$0xff] %vm279_vm1, %v6796_v58  ;;  %v6665_v23 = vmul.f32 %v9989_v22, %v6629_v3  ;;  %v6541_v5 = vld [vmem:[#allocation4 + $0xf8] sm:$0xff] }
 0x5bd   : > { %v6701_v9 = vadd.f32 %v9995_v29, %v6665_v23 }
 0x5bf   : > { %v6765_v15 = vadd.f32 %v6733_v13, %v6701_v9  ;;  %v6489_v7 = vpop.f32.mrf.mxu1  ;;  %v6740_v9 = vld [vmem:[%s7608_s10 + $0xf0] sm:$0xff] }
 0x5c0   : > { %v6567_v19 = vadd.f32 %v6535_v25, %v6489_v7 }
 0x5c1   : > { %v6797_v11 = vmax.f32 %v6765_v15, 0.0  ;;  %v6630_v38 = vld [vmem:[#allocation4 + $0xc0] sm:$0xff] }
 0x5c2   : > { %v6666_v14 = vmul.f32 %v9989_v22, %v6630_v38  ;;  %6599 = vst.msk [vmem:[#allocation4 + $0xc8] sm:$0xff] %vm279_vm1, %v6567_v19  ;;  %v6741_v38 = vld [vmem:[%s7608_s10 + $0xf8] sm:$0xff] }
 0x5c3   : > { %6829 = vst.msk [vmem:[%s10013_s19 + $0xb8] sm:$0xff] %vm279_vm1, %v6797_v11 }
 0x5c4   : > { %v6702_v57 = vadd.f32 %v9995_v29, %v6666_v14 }
 0x5c6   : > { %v6766_v24 = vadd.f32 %v6734_v46, %v6702_v57 }
 0x5c7   : > { %v6492_v31 = vpop.f32.mrf.mxu1 }
 0x5c8   : > { %v6798_v54 = vmax.f32 %v6766_v24, 0.0  ;;  %v6568_v34 = vadd.f32 %v6536_v35, %v6492_v31 }
 0x5c9   : > { %v6631_v52 = vld [vmem:[#allocation4 + $0xc8] sm:$0xff] }
 0x5ca   : > { %6830 = vst.msk [vmem:[%s10013_s19 + $0xc0] sm:$0xff] %vm279_vm1, %v6798_v54  ;;  %v6667_v20 = vmul.f32 %v9989_v22, %v6631_v52 }
 0x5cb   : > { %6600 = vst.msk [vmem:[#allocation4 + $0xd0] sm:$0xff] %vm279_vm1, %v6568_v34 }
 0x5cc   : > { %v6703_v42 = vadd.f32 %v9995_v29, %v6667_v20 }
 0x5ce   : > { %v6767_v32 = vadd.f32 %v6735_v53, %v6703_v42 }
 0x5cf   : > { %v6495_v16 = vpop.f32.mrf.mxu1 }
 0x5d0   : > { %v6799_v36 = vmax.f32 %v6767_v32, 0.0  ;;  %v6569_v40 = vadd.f32 %v6537_v18, %v6495_v16 }
 0x5d2   : > { %6831 = vst.msk [vmem:[%s10013_s19 + $0xc8] sm:$0xff] %vm279_vm1, %v6799_v36  ;;  %v6632_v27 = vld [vmem:[#allocation4 + $0xd0] sm:$0xff] }
 0x5d3   : > { %v6668_v43 = vmul.f32 %v9989_v22, %v6632_v27  ;;  %6601 = vst.msk [vmem:[#allocation4 + $0xd8] sm:$0xff] %vm279_vm1, %v6569_v40 }
 0x5d5   : > { %v6704_v6 = vadd.f32 %v9995_v29, %v6668_v43 }
 0x5d7   : > { %v6768_v61 = vadd.f32 %v6736_v60, %v6704_v6  ;;  %v6498_v44 = vpop.f32.mrf.mxu1 }
 0x5d8   : > { %v6570_v26 = vadd.f32 %v6538_v0, %v6498_v44 }
 0x5d9   : > { %v6800_v59 = vmax.f32 %v6768_v61, 0.0 }
 0x5da   : > { %v6633_v28 = vld [vmem:[#allocation4 + $0xd8] sm:$0xff]  ;;  %6602 = vst.msk [vmem:[#allocation4 + $0xe0] sm:$0xff] %vm279_vm1, %v6570_v26 }
 0x5db   : > { %6832 = vst.msk [vmem:[%s10013_s19 + $0xd0] sm:$0xff] %vm279_vm1, %v6800_v59  ;;  %v6669_v50 = vmul.f32 %v9989_v22, %v6633_v28 }
 0x5dd   : > { %v6705_v12 = vadd.f32 %v9995_v29, %v6669_v50 }
 0x5df   : > { %v6769_v30 = vadd.f32 %v6737_v49, %v6705_v12  ;;  %v6501_v10 = vpop.f32.mrf.mxu1 }
 0x5e0   : > { %v6571_v51 = vadd.f32 %v6539_v39, %v6501_v10 }
 0x5e1   : > { %v6801_v2 = vmax.f32 %v6769_v30, 0.0  ;;  %v6634_v37 = vld [vmem:[#allocation4 + $0xe0] sm:$0xff] }
 0x5e2   : > { %v6670_v48 = vmul.f32 %v9989_v22, %v6634_v37  ;;  %6603 = vst.msk [vmem:[#allocation4 + $0xe8] sm:$0xff] %vm279_vm1, %v6571_v51 }
 0x5e3   : > { %6833 = vst.msk [vmem:[%s10013_s19 + $0xd8] sm:$0xff] %vm279_vm1, %v6801_v2 }
 0x5e4   : > { %v6706_v47 = vadd.f32 %v9995_v29, %v6670_v48 }
 0x5e6   : > { %v6770_v33 = vadd.f32 %v6738_v4, %v6706_v47 }
 0x5e7   : > { %v6504_v55 = vpop.f32.mrf.mxu1 }
 0x5e8   : > { %v6802_v8 = vmax.f32 %v6770_v33, 0.0  ;;  %v6572_v17 = vadd.f32 %v6540_v56, %v6504_v55 }
 0x5e9   : > { %v6635_v21 = vld [vmem:[#allocation4 + $0xe8] sm:$0xff] }
 0x5ea   : > { %6834 = vst.msk [vmem:[%s10013_s19 + $0xe0] sm:$0xff] %vm279_vm1, %v6802_v8  ;;  %v6671_v62 = vmul.f32 %v9989_v22, %v6635_v21 }
 0x5eb   : > { %6604 = vst.msk [vmem:[#allocation4 + $0xf0] sm:$0xff] %vm279_vm1, %v6572_v17 }
 0x5ec   : > { %v6707_v1 = vadd.f32 %v9995_v29, %v6671_v62 }
 0x5ee   : > { %v6771_v41 = vadd.f32 %v6739_v63, %v6707_v1 }
 0x5ef   : > { %v6507_v45 = vpop.f32.mrf.mxu1 }
 0x5f0   : > { %v6803_v58 = vmax.f32 %v6771_v41, 0.0  ;;  %v6573_v3 = vadd.f32 %v6541_v5, %v6507_v45 }
 0x5f2   : > { %6835 = vst.msk [vmem:[%s10013_s19 + $0xe8] sm:$0xff] %vm279_vm1, %v6803_v58  ;;  %v6636_v23 = vld [vmem:[#allocation4 + $0xf0] sm:$0xff] }
 0x5f3   : > { %v6672_v13 = vmul.f32 %v9989_v22, %v6636_v23  ;;  %6605 = vst.msk [vmem:[#allocation4 + $0xf8] sm:$0xff] %vm279_vm1, %v6573_v3 }
 0x5f5   : > { %v6708_v15 = vadd.f32 %v9995_v29, %v6672_v13 }
 0x5f7   : > { %v6772_v7 = vadd.f32 %v6740_v9, %v6708_v15 }
 0x5f9   : > { %v6804_v25 = vmax.f32 %v6772_v7, 0.0 }
 0x5fa   : > { %v6637_v19 = vld [vmem:[#allocation4 + $0xf8] sm:$0xff] }
 0x5fb   : > { %6836 = vst.msk [vmem:[%s10013_s19 + $0xf0] sm:$0xff] %vm279_vm1, %v6804_v25  ;;  %v6673_v11 = vmul.f32 %v9989_v22, %v6637_v19 }
 0x5fd   : > { %v6709_v14 = vadd.f32 %v9995_v29, %v6673_v11 }
 0x5ff   : > { %v6773_v46 = vadd.f32 %v6741_v38, %v6709_v14 }
 0x601   : > { %v6805_v57 = vmax.f32 %v6773_v46, 0.0 }
 0x603   : > { %6837 = vst.msk [vmem:[%s10013_s19 + $0xf8] sm:$0xff] %vm279_vm1, %v6805_v57 }
 0x604 PF: > { %s17_s24 = sadd.s32 1, %s7523_s24  }
 0x605   : > { %p14_p4 = scmp.ge.s32.totalorder %s17_s24, 4  }
 0x607   :  { %16 = sbr.rel (!%p14_p4) target bundleno = 1 (0x1), region = 84 }

</bundles_post_ra>
